<compile_context>
chip_gen: v7x
topology: tpu7x:2x2x1
jax: 0.10.0
libtpu: 0.0.40
codegen_flags: <defaults>
</compile_context>

<pallas_src>
import functools

import jax
import jax.numpy as jnp
from jax.experimental import pallas as pl
from jax.experimental.pallas import tpu as pltpu

PCRC_MID = 512 * 3  # hard-coded inside the PyTorch PCRC module


# ----------------------------- Pallas 3x3 conv ------------------------------

def _conv3x3_kernel(x_ref, w_ref, b_ref, o_ref, *, n_rows, row_off, tk, relu):
    """One (n, k) grid step of a 3x3 conv expressed as 3 row-shifted matmuls.

    x_ref: (n_rows + 2*row_off, 3*Cin) bf16  resident dx-im2col'd activation
    w_ref: (3, tk, tn)                 bf16  contiguous (dy, k, n) weight slab
    b_ref: (1, tn)                     f32
    o_ref: (n_rows, tn)                f32   resident accumulator across k
    """
    k = pl.program_id(1)
    koff = pl.multiple_of(k * tk, 128)

    # 3 vertical taps: 16-aligned row-shifted windows of the resident block,
    # accumulated locally so o_ref sees exactly one read-modify-write per step.
    acc = None
    for dy in range(3):  # static unroll
        a = x_ref[pl.ds(dy * row_off, n_rows), pl.ds(koff, tk)]
        part = jnp.dot(a, w_ref[dy], preferred_element_type=jnp.float32)
        acc = part if acc is None else acc + part

    @pl.when(k == 0)
    def _():
        o_ref[...] = acc + b_ref[...]          # bias folded into the init write

    @pl.when(k > 0)
    def _():
        o_ref[...] += acc

    if relu:
        @pl.when(k == pl.num_programs(1) - 1)
        def _():
            o_ref[...] = jnp.maximum(o_ref[...], 0.0)


def _pick_tile(dim, cap, align=128):
    """Largest multiple of `align` that divides `dim` and is <= cap (else full dim)."""
    best = 0
    t = align
    while t <= min(dim, cap):
        if dim % t == 0:
            best = t
        t += align
    return best if best else dim


def _vmem_budget_bytes():
    """Per-chip scoped-VMEM budget for tile selection (conservative)."""
    try:
        kind = jax.devices()[0].device_kind.lower()
    except Exception:  # pragma: no cover - no device info
        kind = ""
    if ("v6" in kind) or ("v7" in kind):
        return 28 << 20   # v6e / v7x: 32 MiB default scoped VMEM
    return 14 << 20       # v5e (and unknown / older): 16 MiB default scoped VMEM


def _select_tk(k3, tn, n_rows, n_rows_pad, budget_bytes):
    """Largest tk (multiple of 128 dividing k3) whose footprint fits the budget."""
    if k3 % 128 != 0:
        return k3
    # Conservative: count double buffers on everything.
    fixed = 2 * (n_rows_pad * k3 * 2) + 2 * (n_rows * tn * 4) + 2 * (tn * 4)
    best = 0
    t = 128
    while t <= k3:
        if k3 % t == 0 and fixed + 2 * (3 * t * tn * 2) <= budget_bytes:
            best = t
        t += 128
    return best if best else 128


def _conv3x3_pallas(xf, w4, b2, *, n_rows, row_off, relu):
    n_rows_pad, k3 = xf.shape               # k3 = 3*Cin
    nt, three, k3w, tn = w4.shape           # (Cout/tn, 3, 3*Cin, tn)
    assert three == 3 and k3w == k3
    n_out = nt * tn

    tk = _select_tk(k3, tn, n_rows, n_rows_pad, _vmem_budget_bytes())

    kernel = functools.partial(_conv3x3_kernel, n_rows=n_rows, row_off=row_off,
                               tk=tk, relu=relu)

    flops = 2 * n_rows * (3 * k3) * n_out
    bytes_accessed = (3 * k3 * n_out * 2) + (n_rows_pad * k3 * 2) + (n_rows * n_out * 4)

    return pl.pallas_call(
        kernel,
        out_shape=jax.ShapeDtypeStruct((n_rows, n_out), jnp.float32),
        grid_spec=pltpu.PrefetchScalarGridSpec(
            num_scalar_prefetch=0,
            grid=(nt, k3 // tk),             # reduction axis last
            in_specs=[
                # resident bf16 activation: constant block index -> DMA'd once
                pl.BlockSpec((n_rows_pad, k3), lambda j, k: (0, 0)),
                # contiguous bf16 weight slab (dy, tk, tn) for this (j, k)
                pl.BlockSpec((None, 3, tk, tn), lambda j, k: (j, 0, k, 0)),
                pl.BlockSpec((1, tn), lambda j, k: (0, j)),            # bias
            ],
            out_specs=pl.BlockSpec((n_rows, tn), lambda j, k: (0, j)),
        ),
        compiler_params=pltpu.CompilerParams(
            dimension_semantics=("parallel", "arbitrary")),
        cost_estimate=pl.CostEstimate(flops=flops, transcendentals=0,
                                      bytes_accessed=bytes_accessed),
    )(xf, w4, b2)


def conv3x3_same(x, w4, b, *, relu=False):
    """3x3 conv, stride 1, padding 1, NHWC.

    w4: (Cout/tn, 3, 3*Cin, tn) bf16 packed as (cout_tile, dy, dx*Cin + cin, cout_in_tile);
    b: (Cout,) f32.
    """
    B, H, W, Cin = x.shape
    nt, _, k3, tn = w4.shape
    Cout = nt * tn
    assert k3 == 3 * Cin
    Hp = H + 2
    Wp = ((W + 15) // 16) * 16   # multiple of 16 -> dy shifts stay aligned for packed bf16
    xb = x.astype(jnp.bfloat16)  # single cast; kernel consumes bf16 directly
    # spatial zero pad: 1 top/bottom, 1 left, (1 + Wp - W) right  -> width = Wp + 2
    xp = jnp.pad(xb, ((0, 0), (1, 1), (1, 1 + (Wp - W)), (0, 0)))
    # horizontal (dx) taps as a 3x channel im2col: (B, Hp, Wp, 3*Cin)
    xw = jnp.concatenate([xp[:, :, dx:dx + Wp, :] for dx in range(3)], axis=-1)
    n_rows = B * Hp * Wp
    xf = xw.reshape(n_rows, 3 * Cin)
    # lead/trail rows so the dy = 0 / 2 shifted windows stay in bounds
    xf = jnp.pad(xf, ((Wp, Wp), (0, 0)))
    y = _conv3x3_pallas(xf, w4, b.reshape(1, Cout),
                        n_rows=n_rows, row_off=Wp, relu=relu)
    # rows index (b, y in [0,Hp), x in [0,Wp)); valid output: y in [1,H+1), x in [0,W)
    return y.reshape(B, Hp, Wp, Cout)[:, 1:1 + H, :W, :]


# ------------------------------- JAX glue -----------------------------------
# Tiny / lane-sparse ops stay in XLA (launch overhead + <3% MXU utilisation for
# K<=3 contractions + masked partial stores for 8/16-wide lanes).

def nchw_to_nhwc(x):
    return jnp.transpose(x, (0, 2, 3, 1))


def nhwc_to_nchw(x):
    return jnp.transpose(x, (0, 3, 1, 2))


def upsample2x(x):  # nn.Upsample(scale_factor=2, mode='nearest'), NHWC
    return jnp.repeat(jnp.repeat(x, 2, axis=1), 2, axis=2)


def maxpool2x2(x):  # nn.MaxPool2d(2, 2), NHWC (H, W even)
    B, H, W, C = x.shape
    return jnp.max(x.reshape(B, H // 2, 2, W // 2, 2, C), axis=(2, 4))


def avgpool2x2(x):  # nn.AvgPool2d(2, 2), NHWC (H, W even)
    B, H, W, C = x.shape
    return jnp.mean(x.reshape(B, H // 2, 2, W // 2, 2, C), axis=(2, 4))


def conv1x1(x, w, b):
    """Tiny 1x1 conv (K<=3 or N<=16 in this model): plain jnp, XLA fuses it."""
    return jnp.einsum("bhwc,cd->bhwd", x, w) + b


# ----------------------------- parameter init -------------------------------

def init_params(key, ch):
    c1, c2, c3 = ch

    def p1x1(k, cin, cout):
        kw, kb = jax.random.split(k)
        w = 0.05 * jax.random.normal(kw, (cin, cout), jnp.float32)
        b = 0.05 * jax.random.normal(kb, (cout,), jnp.float32)
        return w, b

    def p3x3(k, cin, cout):
        kw, kb = jax.random.split(k)
        # PyTorch layout (cout, cin, 3, 3) -> (dy, dx*cin + c, cout)
        wt = 0.05 * jax.random.normal(kw, (cout, cin, 3, 3), jnp.float32)
        w3 = jnp.transpose(wt, (2, 3, 1, 0)).reshape(3, 3 * cin, cout)
        # Repack so every (j, k) weight block is contiguous in HBM:
        # (Cout/tn, dy, 3*cin, tn), bf16.
        tn = _pick_tile(cout, 768)
        w4 = jnp.transpose(w3.reshape(3, 3 * cin, cout // tn, tn),
                           (2, 0, 1, 3)).astype(jnp.bfloat16)
        b = 0.05 * jax.random.normal(kb, (cout,), jnp.float32)
        return w4, b

    keys = jax.random.split(key, 11)
    p = {}
    p["C1"] = p1x1(keys[0], c1 + c2 + c3, 3)
    p["C2"] = p1x1(keys[1], c2, c3)
    p["C3"] = p1x1(keys[2], c2, c1)
    p["C4"] = p1x1(keys[3], 1, c1)
    p["C5"] = p1x1(keys[4], 1, c2)
    p["C6"] = p1x1(keys[5], 1, c3)
    p["pcrc_C1"] = p1x1(keys[6], 3, PCRC_MID)
    p["mcrc_a"] = p3x3(keys[7], PCRC_MID, PCRC_MID)
    p["mcrc_b"] = p3x3(keys[8], PCRC_MID, PCRC_MID)
    p["acrc_a"] = p3x3(keys[9], PCRC_MID, PCRC_MID)
    p["acrc_b"] = p3x3(keys[10], PCRC_MID, PCRC_MID)
    return p


# ------------------------------ forward pass --------------------------------

def pcrc_forward(p, x1):  # x1: NHWC (B, H, W, 3)
    z = conv1x1(x1, *p["pcrc_C1"])                        # (B,H,W,1536)
    m = maxpool2x2(z)
    m = conv3x3_same(m, *p["mcrc_a"], relu=True)
    m = conv3x3_same(m, *p["mcrc_b"])
    a = avgpool2x2(z)
    a = conv3x3_same(a, *p["acrc_a"], relu=True)
    a = conv3x3_same(a, *p["acrc_b"])
    return upsample2x(m) + upsample2x(a)                  # (B,H,W,1536)


def frm_forward(params, xs, *, ch):
    c1, c2, c3 = ch
    x0_in, x1_in, x2_in = (nchw_to_nhwc(x) for x in xs)

    x0 = upsample2x(x0_in)                                # (B,H,W,c1)
    x2 = maxpool2x2(x2_in)                                # (B,H,W,c3)
    inp = jnp.concatenate([x0, x1_in, x2], axis=-1)       # (B,H,W,c1+c2+c3)
    x1 = conv1x1(inp, *params["C1"])                      # (B,H,W,3)

    sm = jax.nn.softmax(x1, axis=0)                       # torch.softmax(x1, dim=0)
    s0, s1, s2 = sm[..., 0:1], sm[..., 1:2], sm[..., 2:3]

    pc = pcrc_forward(params, x1)                         # (B,H,W,1536)
    p0 = pc[..., 0 * c2:1 * c2]
    p1 = pc[..., 1 * c2:2 * c2]
    p2 = pc[..., 2 * c2:3 * c2]

    # y0 = C2(p0) * x0 + x0 * C6(s0)
    y0 = conv1x1(p0, *params["C2"]) * x0 + x0 * conv1x1(s0, *params["C6"])
    # y1 = x[1] * C5(s1) + p1 * x[1]
    y1 = x1_in * conv1x1(s1, *params["C5"]) + p1 * x1_in
    # y2 = x2 * C4(s2) + C3(p2) * x2
    y2 = x2 * conv1x1(s2, *params["C4"]) + conv1x1(p2, *params["C3"]) * x2

    y0 = maxpool2x2(y0)
    y2 = upsample2x(y2)
    return [nhwc_to_nchw(y2), nhwc_to_nchw(y1), nhwc_to_nchw(y0)]


# ---------------------------------- main -------------------------------------

if __name__ == "__main__":
    # Broadcasting inside FRM.forward (e.g. C2(...)*x0) requires channel1 == channel3.
    ch = (16, 8, 16)
    B = 2
    key = jax.random.PRNGKey(0)
    k0, k1, k2, kp = jax.random.split(key, 4)

    x0 = jax.random.normal(k0, (B, ch[0], 4, 4), jnp.float32)    # coarsest level
    x1 = jax.random.normal(k1, (B, ch[1], 8, 8), jnp.float32)    # middle level
    x2 = jax.random.normal(k2, (B, ch[2], 16, 16), jnp.float32)  # finest level

    params = init_params(kp, ch)

    # Light self-check of the Pallas 3x3 conv against lax.conv on the same
    # bf16-rounded operands (differences should only come from summation order).
    xchk = jax.random.normal(jax.random.PRNGKey(1), (2, 4, 4, PCRC_MID), jnp.float32)
    w4c, bbc = params["mcrc_a"]
    got = conv3x3_same(xchk, w4c, bbc, relu=True)
    ntc, _, k3c, tnc = w4c.shape
    coutc = ntc * tnc
    wd = jnp.transpose(w4c.astype(jnp.float32), (1, 2, 0, 3)).reshape(3, k3c, coutc)
    wd = wd.reshape(3, 3, PCRC_MID, coutc)   # (dy, dx, cin, cout) == HWIO
    ref = jax.lax.conv_general_dilated(
        xchk.astype(jnp.bfloat16).astype(jnp.float32), wd,
        window_strides=(1, 1), padding=((1, 1), (1, 1)),
        dimension_numbers=("NHWC", "HWIO", "NHWC"),
        precision=jax.lax.Precision.HIGHEST) + bbc
    ref = jnp.maximum(ref, 0.0)
    err = float(jnp.max(jnp.abs(got - ref)))
    tol = 1e-2 * float(jnp.max(jnp.abs(ref))) + 1e-3
    assert err < tol, f"conv3x3 mismatch: {err} >= {tol}"

    fwd = jax.jit(functools.partial(frm_forward, ch=ch))
    outs = jax.block_until_ready(fwd(params, [x0, x1, x2]))

    assert outs[0].shape == (B, ch[0], 16, 16)
    assert outs[1].shape == (B, ch[1], 8, 8)
    assert outs[2].shape == (B, ch[2], 4, 4)
    assert all(bool(jnp.all(jnp.isfinite(o))) for o in outs)
    print("KERNEL_OK")
</pallas_src>

<mosaic_0001>
module attributes {stable_mosaic.version = 11 : i64} {
  func.func @_conv3x3_kernel(%arg0: i32, %arg1: i32, %arg2: memref<224x4608xbf16, #tpu.memory_space<vmem>>, %arg3: memref<1x3x768x768xbf16, #tpu.memory_space<vmem>>, %arg4: memref<1x768xf32, #tpu.memory_space<vmem>>, %arg5: memref<192x768xf32, #tpu.memory_space<vmem>>) attributes {dimension_semantics = [#tpu.dimension_semantics<parallel>, #tpu.dimension_semantics<arbitrary>], iteration_bounds = array<i64: 2, 6>, scalar_prefetch = 0 : i64, scratch_operands = 0 : i64, tpu.core_type = #tpu.core_type<tc>, window_params = [{pipeline_mode = #tpu.pipeline_mode<synchronous>, transform_indices = @transform_0, window_bounds = array<i64: 224, 4608>}, {transform_indices = @transform_1, window_bounds = array<i64: 1, 3, 768, 768>}, {transform_indices = @transform_2, window_bounds = array<i64: 1, 768>}, {transform_indices = @transform_3, window_bounds = array<i64: 192, 768>}]} {
    %c768_i32 = arith.constant 768 : i32
    %0 = arith.muli %arg1, %c768_i32 : i32
    %1 = tpu.assume_multiple %0, 128 : i32
    %c0 = arith.constant 0 : index
    %2 = arith.index_cast %1 : i32 to index
    %3 = vector.load %arg2[%c0, %2] : memref<224x4608xbf16, #tpu.memory_space<vmem>>, vector<192x768xbf16>
    %c0_0 = arith.constant 0 : index
    %c0_1 = arith.constant 0 : index
    %c0_2 = arith.constant 0 : index
    %c0_3 = arith.constant 0 : index
    %4 = vector.load %arg3[%c0_0, %c0_1, %c0_2, %c0_3] : memref<1x3x768x768xbf16, #tpu.memory_space<vmem>>, vector<1x1x768x768xbf16>
    %5 = vector.shape_cast %4 : vector<1x1x768x768xbf16> to vector<768x768xbf16>
    %cst = arith.constant dense<0.000000e+00> : vector<192x768xf32>
    %6 = tpu.matmul %3, %5, %cst {dimension_numbers = #tpu.dot_dimension_numbers<[1], [0], [0], [1], [0, 0, 1, 1], [], []>} : vector<192x768xbf16>, vector<768x768xbf16>, vector<192x768xf32> -> vector<192x768xf32>
    %c16 = arith.constant 16 : index
    %7 = arith.index_cast %1 : i32 to index
    %8 = vector.load %arg2[%c16, %7] : memref<224x4608xbf16, #tpu.memory_space<vmem>>, vector<192x768xbf16>
    %c0_4 = arith.constant 0 : index
    %c1 = arith.constant 1 : index
    %c0_5 = arith.constant 0 : index
    %c0_6 = arith.constant 0 : index
    %9 = vector.load %arg3[%c0_4, %c1, %c0_5, %c0_6] : memref<1x3x768x768xbf16, #tpu.memory_space<vmem>>, vector<1x1x768x768xbf16>
    %10 = vector.shape_cast %9 : vector<1x1x768x768xbf16> to vector<768x768xbf16>
    %cst_7 = arith.constant dense<0.000000e+00> : vector<192x768xf32>
    %11 = tpu.matmul %8, %10, %cst_7 {dimension_numbers = #tpu.dot_dimension_numbers<[1], [0], [0], [1], [0, 0, 1, 1], [], []>} : vector<192x768xbf16>, vector<768x768xbf16>, vector<192x768xf32> -> vector<192x768xf32>
    %12 = arith.addf %6, %11 : vector<192x768xf32>
    %c32 = arith.constant 32 : index
    %13 = arith.index_cast %1 : i32 to index
    %14 = vector.load %arg2[%c32, %13] : memref<224x4608xbf16, #tpu.memory_space<vmem>>, vector<192x768xbf16>
    %c0_8 = arith.constant 0 : index
    %c2 = arith.constant 2 : index
    %c0_9 = arith.constant 0 : index
    %c0_10 = arith.constant 0 : index
    %15 = vector.load %arg3[%c0_8, %c2, %c0_9, %c0_10] : memref<1x3x768x768xbf16, #tpu.memory_space<vmem>>, vector<1x1x768x768xbf16>
    %16 = vector.shape_cast %15 : vector<1x1x768x768xbf16> to vector<768x768xbf16>
    %cst_11 = arith.constant dense<0.000000e+00> : vector<192x768xf32>
    %17 = tpu.matmul %14, %16, %cst_11 {dimension_numbers = #tpu.dot_dimension_numbers<[1], [0], [0], [1], [0, 0, 1, 1], [], []>} : vector<192x768xbf16>, vector<768x768xbf16>, vector<192x768xf32> -> vector<192x768xf32>
    %18 = arith.addf %12, %17 : vector<192x768xf32>
    %c0_i32 = arith.constant 0 : i32
    %19 = arith.cmpi eq, %arg1, %c0_i32 : i32
    %20 = arith.extui %19 : i1 to i32
    %c0_i32_12 = arith.constant 0 : i32
    %21 = arith.cmpi ne, %20, %c0_i32_12 : i32
    scf.if %21 {
      %c0_16 = arith.constant 0 : index
      %c0_17 = arith.constant 0 : index
      %28 = vector.load %arg4[%c0_16, %c0_17] : memref<1x768xf32, #tpu.memory_space<vmem>>, vector<1x768xf32>
      %29 = vector.broadcast %28 : vector<1x768xf32> to vector<192x768xf32>
      %30 = arith.addf %18, %29 : vector<192x768xf32>
      %c0_18 = arith.constant 0 : index
      %c0_19 = arith.constant 0 : index
      %31 = vector.load %arg5[%c0_18, %c0_19] : memref<192x768xf32, #tpu.memory_space<vmem>>, vector<192x768xf32>
      tpu.vector_store %arg5[%c0_18, %c0_19], %30 {strides = array<i32>} : memref<192x768xf32, #tpu.memory_space<vmem>>, vector<192x768xf32>,
    } else {
    }
    %c0_i32_13 = arith.constant 0 : i32
    %22 = arith.cmpi sgt, %arg1, %c0_i32_13 : i32
    %23 = arith.extui %22 : i1 to i32
    %c0_i32_14 = arith.constant 0 : i32
    %24 = arith.cmpi ne, %23, %c0_i32_14 : i32
    scf.if %24 {
      %c0_16 = arith.constant 0 : index
      %c0_17 = arith.constant 0 : index
      %28 = vector.load %arg5[%c0_16, %c0_17] : memref<192x768xf32, #tpu.memory_space<vmem>>, vector<192x768xf32>
      %29 = arith.addf %28, %18 : vector<192x768xf32>
      %c0_18 = arith.constant 0 : index
      %c0_19 = arith.constant 0 : index
      %30 = vector.load %arg5[%c0_18, %c0_19] : memref<192x768xf32, #tpu.memory_space<vmem>>, vector<192x768xf32>
      tpu.vector_store %arg5[%c0_18, %c0_19], %29 {strides = array<i32>} : memref<192x768xf32, #tpu.memory_space<vmem>>, vector<192x768xf32>,
    } else {
    }
    %c5_i32 = arith.constant 5 : i32
    %25 = arith.cmpi eq, %arg1, %c5_i32 : i32
    %26 = arith.extui %25 : i1 to i32
    %c0_i32_15 = arith.constant 0 : i32
    %27 = arith.cmpi ne, %26, %c0_i32_15 : i32
    scf.if %27 {
      %c0_16 = arith.constant 0 : index
      %c0_17 = arith.constant 0 : index
      %28 = vector.load %arg5[%c0_16, %c0_17] : memref<192x768xf32, #tpu.memory_space<vmem>>, vector<192x768xf32>
      %cst_18 = arith.constant 0.000000e+00 : f32
      %29 = vector.broadcast %cst_18 : f32 to vector<192x768xf32>
      %30 = arith.maximumf %28, %29 : vector<192x768xf32>
      %c0_19 = arith.constant 0 : index
      %c0_20 = arith.constant 0 : index
      %31 = vector.load %arg5[%c0_19, %c0_20] : memref<192x768xf32, #tpu.memory_space<vmem>>, vector<192x768xf32>
      tpu.vector_store %arg5[%c0_19, %c0_20], %30 {strides = array<i32>} : memref<192x768xf32, #tpu.memory_space<vmem>>, vector<192x768xf32>,
    } else {
    }
    return
  }
  func.func @transform_0(%arg0: i32, %arg1: i32) -> (i32, i32) {
    %c0_i32 = arith.constant 0 : i32
    %c0_i32_0 = arith.constant 0 : i32
    %c0_i32_1 = arith.constant 0 : i32
    return %c0_i32, %c0_i32_0 : i32, i32
  }
  func.func @transform_1(%arg0: i32, %arg1: i32) -> (i32, i32, i32, i32) {
    %c0_i32 = arith.constant 0 : i32
    %c0_i32_0 = arith.constant 0 : i32
    %c0_i32_1 = arith.constant 0 : i32
    return %arg0, %c0_i32, %arg1, %c0_i32_0 : i32, i32, i32, i32
  }
  func.func @transform_2(%arg0: i32, %arg1: i32) -> (i32, i32) {
    %c0_i32 = arith.constant 0 : i32
    %c0_i32_0 = arith.constant 0 : i32
    return %c0_i32, %arg0 : i32, i32
  }
  func.func @transform_3(%arg0: i32, %arg1: i32) -> (i32, i32) {
    %c0_i32 = arith.constant 0 : i32
    %c0_i32_0 = arith.constant 0 : i32
    return %c0_i32, %arg0 : i32, i32
  }
}

</mosaic_0001>

<bundles_post_ra>
// kernel: tpu_custom_call.1
= control target key start
LH: loop header
LB: loop body
LE: loop exit
PB: predicated region body
PF: predicated region fallthrough
CT: control target
= control target key end

     0   :  { %s21276_s0 = inlined_call_operand.hbm [shape: bf16[224,4608], index: 0, kind: input, shape index: {}]   ;;  %s21277_s1 = inlined_call_operand.hbm [shape: bf16[2,3,4608,768], index: 1, kind: input, shape index: {}]   ;;  %s21278_s2 = inlined_call_operand.hbm [shape: f32[1,1536], index: 2, kind: input, shape index: {}]   ;;  %s21279_s3 = inlined_call_operand.hbm [shape: f32[192,1536], index: 3, kind: output, shape index: {}]  }
   0x1   :  { %21302 = sst [smem:[#allocation126_spill]] %s21276_s0 }
   0x2   :  { %21303 = sst [smem:[#allocation127_spill]] %s21279_s3 }
   0x3   :  { %8 = vsyncpa [#allocation3], 0 }
   0x4   :  { %9 = vsyncpa [#allocation6], 0 }
   0x5   :  { %11 = vsyncpa [#allocation6 + $0x1], 0 }
   0x6   :  { %12 = vsyncpa [#allocation4], 0 }
   0x7   :  { %14 = vsyncpa [#allocation4 + $0x1], 0  ;;  %s16860_s12 = smov 0   ;;  %s16862_s13 = smov 0  }
   0x8   :  { %s16864_s14 = smov 0   ;;  %s16866_s15 = smov 0  }
   0x9   :  { %s16868_s16 = smov 0   ;;  %s16870_s17 = smov 0  }
   0xa   :  { %s16872_s18 = smov 0   ;;  %s16874_s19 = smov 0  }
   0xb   :  { %s16876_s20 = smov 0   ;;  %s16878_s21 = smov 0  }
   0xc   :  { %s16880_s22 = smov 0  }
   0xd LB: > { %21304 = sst [smem:[#allocation16_spill]] %s16784_s12  ;;  %s16914_s23 = sadd.s32 4294967295, %s16824_s22   ;;  %s16824_s22 = sphi %s16880_s22, %s20_s22   ;;  %s16820_s21 = sphi %s16878_s21, %s21830_s21   ;;  %s16816_s20 = sphi %s16876_s20, %s21821_s20   ;;  %s16812_s19 = sphi %s16874_s19, %s21829_s19   ;;  %s16808_s18 = sphi %s16872_s18, %s21820_s18   ;;  %s16804_s17 = sphi %s16870_s17, %s21828_s17   ;;  %s16800_s16 = sphi %s16868_s16, %s21827_s16   ;;  %s16796_s15 = sphi %s16866_s15, %s21826_s15   ;;  %s16792_s14 = sphi %s16864_s14, %s21825_s14   ;;  %s16788_s13 = sphi %s16862_s13, %s21824_s13   ;;  %s16784_s12 = sphi %s16860_s12, %s21823_s12  }
   0xe   : > { %21305 = sst [smem:[#allocation17_spill]] %s16816_s20  ;;  %s11982_s24 = sadd.s32 4294967294, %s16824_s22  }
   0xf   : > { %21306 = sst [smem:[#allocation18_spill]] %s16824_s22  ;;  %s29_s25 = sadd.s32 1, %s16816_s20 }
  0x10   : > { %s32_s26 = sadd.s32 1, %s16820_s21  ;;  %p30_p0 = scmp.ge.s32.totalorder %s29_s25, 6 }
  0x11   : > { %s62_s27 = sadd.s32 1, %s16804_s17  ;;  %p69_p1 = scmp.ne.s32.totalorder %s16804_s17, %s16800_s16 }
  0x12   : > { %p70_p2 = scmp.eq.s32.totalorder %s16824_s22, 0  ;;  %s21832_s25 = smov (%p30_p0, %s29_s25), 0 }
  0x13   : > { %21307 = sst [smem:[#allocation19_spill]] %s21832_s25  ;;  %s21834_s26 = smov (!%p30_p0, %s32_s26), %s16820_s21 }
  0x14   : > { %s58_s28 = ssub.s32 %s16816_s20, %s21832_s25  ;;  %p16930_p3 = por %p70_p2, %p69_p1 }
  0x15   : > { %p34_p4 = scmp.ge.s32.totalorder %s21834_s26, 2  ;;  %p75_p5 = scmp.ne.s32.totalorder %s16800_s16, %s16796_s15 }
  0x16   : > { %s21308_s29 = scalar_select %p16930_p3, 1, 0 }
  0x17   : > { %p21280_p6 = scmp.eq.s32.totalorder %s16914_s23, 0  ;;  %s88_s30 = sadd.s32 1, %s16792_s14 }
  0x18   : > { %s21836_s26 = smov (%p34_p4, %s21834_s26), 0  ;;  %p95_p8 = scmp.ne.s32.totalorder %s16792_s14, %s16788_s13 }
  0x19   : > { %21309 = sst [smem:[#allocation20_spill]] %s21836_s26  ;;  %p16941_p7 = por %p21280_p6, %p75_p5 }
  0x1a   : > { %s57_s5 = ssub.s32 %s16820_s21, %s21836_s26  ;;  %p101_p9 = scmp.ne.s32.totalorder %s16788_s13, %s16784_s12 }
  0x1b   : > { %s21310_s4 = scalar_select %p16941_p7, 1, 0 }
  0x1c   : > { %s59_s6 = sor.u32 %s58_s28, %s57_s5  ;;  %p86_p10 = scmp.eq.s32.totalorder %s57_s5, 0 }
  0x1d   : > { %p60_p11 = scmp.eq.s32.totalorder %s59_s6, 0  ;;  %p16956_p12 = por %p95_p8, %p70_p2 }
  0x1e   : > { %s16961_s8 = scalar_select %p86_p10, %s16792_s14, %s88_s30  }
  0x1f   : > { %s21311_s7 = scalar_select %p16956_p12, 1, 0 }
  0x20   : > { %21312 = sst [smem:[#allocation21_spill]] %s16961_s8  ;;  %p16971_p13 = por %p101_p9, %p21280_p6 }
  0x21   : > { %s16964_s9 = scalar_select %p60_p11, %s16804_s17, %s62_s27  }
  0x22   : > { %s21314_s10 = scalar_select %p16971_p13, 1, 0 }
  0x23   : > { %21313 = sst [smem:[#allocation22_spill]] %s16964_s9  ;;  %p125_p0 = scmp.eq.s32.totalorder %s16914_s23, 11 }
  0x24   : > { %p131_p1 = scmp.eq.s32.totalorder %s11982_s24, 11  ;;  %p11983_p4 = scmp.ge.s32.totalorder %s16824_s22, 1 }
  0x25   : > { %p16980_p5 = por %p125_p0, %p95_p8  ;;  %p138_p2 = scmp.lt.s32.totalorder %s16824_s22, 13 }
  0x26   : > { %p16988_p10 = por %p131_p1, %p101_p9  ;;  %s16826_s28 = smov [#allocation2]  }
  0x27   : > { %s21315_s11 = scalar_select %p16980_p5, 1, 0 }
  0x28   : > { %s21316_s15 = scalar_select %p16988_p10, 1, 0 }
  0x29   : > { %p16992_p11 = pnand %p11983_p4, %p138_p2  ;;  %s150_s30 = sshll.u32 %s16826_s28, 4  ;;  %s151_s30 = int_to_ptr.vmem [resolvable:$true] %s150_s30 }
  0x2a   : > { %21317 = sst [smem:[#allocation23_spill]] %s21316_s15  ;;  %p21319_p8 = scmp.eq.s32.totalorder %s16914_s23, 0 }
  0x2b   : > { %s21318_s27 = scalar_select %p16992_p11, 1, 0 }
  0x2c   : > { %p14799_p6 = pneg %p16992_p11  ;;  %s21321_s0 = sld [smem:[#allocation126_spill]] }
  0x2e   : > { %p17000_p0 = pnand %p14799_p6, %p21319_p8 }
  0x30   : > { %p16640_p1 = pneg %p17000_p0 }
  0x32   : > { %s16638_s26 = scalar_lea.hbm %s21321_s0, 64512 }
  0x33   : > { %p16639_p9 = scmp.ne.s32.totalorder %s21321_s0, %s16638_s26  ;;  %p16645_p6 = scmp.lt.u32.totalorder %s16638_s26, %s21321_s0 }
  0x35   : > { %p16641_p4 = pnand %p16640_p1, %p16639_p9 }
  0x37   : > { %p16642_p2 = pneg %p16641_p4 }
  0x39   : > { %p16647_p8 = pnand %p16645_p6, %p16642_p2 }
  0x3b   : > { %16650 = shalt.err (!%p16647_p8)
}
  0x3c   : > { %s16651_s15 = scalar_lea.vmem %s151_s30, 64512  ;;  %p16659_p7 = scmp.lt.s32.totalorder %s151_s30, %s151_s30 }
  0x3d   : > { %p16652_p10 = scmp.ne.s32.totalorder %s151_s30, %s16651_s15  ;;  %p16660_p11 = scmp.lt.s32.totalorder %s16651_s15, %s16651_s15 }
  0x3f   : > { %p16654_p5 = pnand %p16652_p10, %p16640_p1  ;;  %p16661_p12 = por %p16660_p11, %p16659_p7 }
  0x41   : > { %p16655_p13 = pneg %p16654_p5 }
  0x43   : > { %p16662_p3 = pnand %p16661_p12, %p16655_p13 }
  0x45   : > { %16665 = shalt.err (!%p16662_p3)
}
  0x46   : > { %s16827_s25 = smov 2304   ;;  %s16828_s9 = smov 144  }
  0x47   : > { %14802 = dma.hbm_to_vmem [thread:$0]  (!%p17000_p0), %s21321_s0, 64512, %s151_s30, [#allocation3], %s16827_s25, %s16827_s25, %s16828_s9  }
  0x48   : > { %p11985_p9 = scmp.ge.s32.totalorder %s16824_s22, 12 }
  0x4a   : > { %160 = sbr.rel (%p11985_p9) target bundleno = 122 (0x7a), region = 20 }
  0x51   : > { %s164_s26 = sand.u32 1, %s16824_s22   ;;  %s166_s8 = sand.u32 1, %s16804_s17  }
  0x52   : > { %s14775_s15 = smul.u32 6912, %s166_s8  ;;  %p21322_p3 = scmp.ne.s32.totalorder %s21308_s29, 0 }
  0x53   : > { %s14808_s28 = smul.u32 576, %s16816_s20  ;;  %s16829_s8 = smov 221184  }
  0x54   : > { %s14777_s24 = smul.u32 10368, %s16820_s21  ;;  %s168_s12 = scalar_lea.vmem [#allocation5], %s14775_s15 }
  0x55   : > { %s190_s5 = sshll.u32 %s168_s12, 4  ;;  %14785 = sst [smem:[#allocation10]] (%p21322_p3), %s16829_s8  ;;  %s191_s5 = int_to_ptr.vmem [resolvable:$true] %s190_s5 }
  0x56   : > { %s14784_s30 = scalar_select %p21322_p3, [#allocation0], [#allocation11] }
  0x57   : > { %s175_s25 = sadd.s32 %s14808_s28, %s14777_s24  ;;  %s16830_s20 = smov 36864  }
  0x58   : > { %s11986_s9 = sshll.u32 %s175_s25, 6  ;;  %s182_s6 = sld [smem:[%s14784_s30]]  }
  0x59   : > { %s177_s22 = scalar_lea.hbm %s21277_s1, %s11986_s9  ;;  %14786 = sst [smem:[#allocation10 + $0x1]] (%p21322_p3), %s16830_s20 }
  0x5a   : > { %s16831_s12 = smov 96   ;;  %s16832_s15 = smov 384  }
  0x5b   : > { %14787 = sst [smem:[#allocation10 + $0x2]] (%p21322_p3), %s16831_s12  ;;  %s16833_s30 = smov 24  }
  0x5c   : > { %14788 = sst [smem:[#allocation10 + $0x3]] (%p21322_p3), %s16832_s15  ;;  %s17042_s0 = scalar_lea.sflag [#allocation6], %s164_s26 }
  0x5d   : > { %14789 = sst [smem:[#allocation10 + $0x4]] (%p21322_p3), %s16832_s15  ;;  %s16834_s3 = smov [#allocation9]  }
  0x5e   : > { %s11987_s28 = sshll.u32 %s182_s6, 26  ;;  %14790 = sst [smem:[#allocation10 + $0x5]] (%p21322_p3), %s16833_s30 }
  0x5f   : > { %s11988_s24 = sadd.s32 134217728, %s11987_s28  ;;  %s215_s20 = sand.u32 1, %s16792_s14  }
  0x60   : > { %14791 = dma.general (%p21322_p3), %s177_s22, 110592, %s191_s5, %s17042_s0, %s16834_s3, [#allocation10], %s11988_s24, 0  }
  0x61   : > { %s13589_s25 = smul.u32 96, %s16820_s21  ;;  %p21323_p12 = scmp.ne.s32.totalorder %s21311_s7, 0 }
  0x62   : > { %s14778_s9 = smul.u32 6, %s215_s20  ;;  %s16670_s28 = scalar_lea.hbm %s21278_s2, 192 }
  0x63   : > { %s17052_s12 = scalar_lea.hbm %s21278_s2, %s13589_s25 }
  0x64   : > { %s217_s26 = scalar_lea.vmem [#allocation7], %s14778_s9  ;;  %s16666_s29 = scalar_lea.hbm %s17052_s12, 96 }
  0x65   : > { %s225_s15 = sshll.u32 %s217_s26, 4  ;;  %p16667_p7 = scmp.ne.s32.totalorder %s17052_s12, %s16666_s29  ;;  %s226_s15 = int_to_ptr.vmem [resolvable:$true] %s225_s15 }
  0x66   : > { %p16671_p10 = scmp.lt.u32.totalorder %s17052_s12, %s21278_s2  ;;  %p16672_p11 = scmp.lt.u32.totalorder %s16670_s28, %s16666_s29 }
  0x67   : > { %p16668_p13 = pnand %p16667_p7, %p21323_p12  ;;  %p16674_p1 = scmp.lt.u32.totalorder %s16666_s29, %s17052_s12 }
  0x68   : > { %p16673_p0 = por %p16672_p11, %p16671_p10 }
  0x69   : > { %p16669_p5 = pneg %p16668_p13 }
  0x6a   : > { %p16675_p4 = por %p16674_p1, %p16673_p0 }
  0x6c   : > { %p16676_p2 = pnand %p16675_p4, %p16669_p5 }
  0x6e   : > { %16679 = shalt.err (!%p16676_p2)
}
  0x6f   : > { %s16680_s3 = scalar_lea.vmem %s226_s15, 96  ;;  %s16835_s20 = smov [#allocation7]  }
  0x70   : > { %p16681_p6 = scmp.ne.s32.totalorder %s226_s15, %s16680_s3  ;;  %s16684_s25 = sshll.u32 %s16835_s20, 4  ;;  %s16685_s25 = int_to_ptr.vmem [resolvable:$false] %s16684_s25 }
  0x71   : > { %s16686_s9 = scalar_lea.vmem %s16685_s25, 192  ;;  %p16687_p3 = scmp.lt.s32.totalorder %s226_s15, %s16685_s25 }
  0x72   : > { %p16682_p8 = pnand %p16681_p6, %p21323_p12  ;;  %p16688_p7 = scmp.lt.s32.totalorder %s16686_s9, %s16680_s3 }
  0x74   : > { %p16683_p9 = pneg %p16682_p8  ;;  %p16689_p13 = por %p16688_p7, %p16687_p3 }
  0x76   : > { %p16690_p10 = pnand %p16689_p13, %p16683_p9 }
  0x78   : > { %16693 = shalt.err (!%p16690_p10)
}
  0x79   : > { %14792 = dma.hbm_to_vmem [thread:$0]  (%p21323_p12), %s17052_s12, 96, %s226_s15, %s17042_s0  }
  0x7a PF: > { %p21324_p5 = scmp.ne.s32.totalorder %s21318_s27, 0 }
  0x7c   : > { %234 = sbr.rel (%p21324_p5) target bundleno = 1998 (0x7ce), region = 32 }
  0x83   : > { %p21325_p11 = scmp.eq.s32.totalorder %s16914_s23, 0 }
  0x85   : > { %16767 = dma.done.wait (%p21325_p11), [#allocation3], 64512   ;;  %p21326_p0 = pmov %p21325_p11 }
  0x86   : > { %s240_s8 = sand.u32 1, %s16914_s23   ;;  %s242_s6 = sand.u32 1, %s16800_s16  }
  0x87   : > { %16769 = vsyncadd (%p21326_p0), [#allocation3], 4294902784  ;;  %s14779_s26 = smul.u32 6912, %s242_s6  ;;  %s241_s7 = scalar_lea.sflag [#allocation6], %s240_s8 }
  0x88   : > { %p21327_p12 = scmp.ne.s32.totalorder %s21310_s4, 0 }
  0x89   : > { %s17080_s29 = scalar_lea.vmem [#allocation5], %s14779_s26 }
  0x8a   : > { %16771 = dma.done.wait (%p21327_p12), %s241_s7, 110592  }
  0x8b   : > { %16773 = vsyncadd (%p21327_p12), %s241_s7, 4294856704  ;;  %s17087_s27 = sand.u32 1, %s16788_s13   ;;  %p21328_p1 = scmp.ne.s32.totalorder %s21314_s10, 0 }
  0x8c   : > { %s14780_s0 = smul.u32 6, %s17087_s27 }
  0x8e   : > { %s17090_s12 = scalar_lea.vmem [#allocation7], %s14780_s0 }
  0x8f   : > { %16775 = dma.done.wait (%p21328_p1), %s241_s7, 96  }
  0x90   : > { %16777 = vsyncadd (%p21328_p1), %s241_s7, 4294967200  ;;  %s14781_s23 = smul.u32 1152, %s17087_s27  ;;  %v14911_v0 = vld [vmem:[%s17080_s29 + $0x904] ss:$24 sps:$4 sm:$0xff]   ;;  %v14913_v1 = vld [vmem:[%s17080_s29 + $0xc14] ss:$24 sps:$4 sm:$0xff]  }
  0x91   : > { %2744 = vmatprep.subr.bf16.mxu1 %v14911_v0  ;;  %v14915_v2 = vld [vmem:[%s17080_s29 + $0x900] ss:$24 sps:$4 sm:$0xff]   ;;  %v14916_v3 = vld [vmem:[%s17080_s29 + $0xc10] ss:$24 sps:$4 sm:$0xff]   ;;  %3815 = vmatprep.subr.bf16.mxu0 %v14913_v1  ;;  %v14917_v4 = vld [vmem:[%s17080_s29 + $0x934] ss:$24 sps:$4 sm:$0xff]  }
  0x92   : > { %2745 = vmatpush1.bf16.msra.mxu1 %v14915_v2  ;;  %3816 = vmatpush1.bf16.msra.mxu0 %v14916_v3  ;;  %v14919_v5 = vld [vmem:[%s17080_s29 + $0xc44] ss:$24 sps:$4 sm:$0xff]   ;;  %v14921_v6 = vld [vmem:[%s17080_s29 + $0x930] ss:$24 sps:$4 sm:$0xff]   ;;  %v14922_v7 = vld [vmem:[%s17080_s29 + $0xc40] ss:$24 sps:$4 sm:$0xff]  }
  0x93   : > { %2746 = vmatprep.subr.bf16.mxu1 %v14917_v4  ;;  %3817 = vmatprep.subr.bf16.mxu0 %v14919_v5  ;;  %v14923_v8 = vld [vmem:[%s17080_s29 + $0x964] ss:$24 sps:$4 sm:$0xff]   ;;  %v14925_v9 = vld [vmem:[%s17080_s29 + $0xc74] ss:$24 sps:$4 sm:$0xff]   ;;  %v14927_v10 = vld [vmem:[%s17080_s29 + $0x960] ss:$24 sps:$4 sm:$0xff]  }
  0x94   : > { %v14928_v11 = vld [vmem:[%s17080_s29 + $0xc70] ss:$24 sps:$4 sm:$0xff]   ;;  %v14929_v12 = vld [vmem:[%s17080_s29 + $0x994] ss:$24 sps:$4 sm:$0xff]   ;;  %v14931_v13 = vld [vmem:[%s17080_s29 + $0xca4] ss:$24 sps:$4 sm:$0xff]  }
  0x95   : > { %v14933_v14 = vld [vmem:[%s17080_s29 + $0x990] ss:$24 sps:$4 sm:$0xff]   ;;  %v14934_v15 = vld [vmem:[%s17080_s29 + $0xca0] ss:$24 sps:$4 sm:$0xff]   ;;  %v14935_v16 = vld [vmem:[%s17080_s29 + $0x9c4] ss:$24 sps:$4 sm:$0xff]  }
  0x96   : > { %2747 = vmatpush1.bf16.msra.mxu1 %v14921_v6  ;;  %3818 = vmatpush1.bf16.msra.mxu0 %v14922_v7  ;;  %v14937_v17 = vld [vmem:[%s17080_s29 + $0xcd4] ss:$24 sps:$4 sm:$0xff]   ;;  %v14939_v18 = vld [vmem:[%s17080_s29 + $0x9c0] ss:$24 sps:$4 sm:$0xff]   ;;  %v14940_v19 = vld [vmem:[%s17080_s29 + $0xcd0] ss:$24 sps:$4 sm:$0xff]  }
  0x97   : > { %2748 = vmatprep.subr.bf16.mxu1 %v14923_v8  ;;  %3819 = vmatprep.subr.bf16.mxu0 %v14925_v9  ;;  %v14941_v20 = vld [vmem:[%s17080_s29 + $0x9f4] ss:$24 sps:$4 sm:$0xff]   ;;  %v14943_v21 = vld [vmem:[%s17080_s29 + $0xd04] ss:$24 sps:$4 sm:$0xff]   ;;  %v14945_v22 = vld [vmem:[%s17080_s29 + $0x9f0] ss:$24 sps:$4 sm:$0xff]  }
  0x98   : > { %v14946_v23 = vld [vmem:[%s17080_s29 + $0xd00] ss:$24 sps:$4 sm:$0xff]   ;;  %v14947_v24 = vld [vmem:[%s17080_s29 + $0xa24] ss:$24 sps:$4 sm:$0xff]   ;;  %v14949_v25 = vld [vmem:[%s17080_s29 + $0xd34] ss:$24 sps:$4 sm:$0xff]  }
  0x99   : > { %v14951_v26 = vld [vmem:[%s17080_s29 + $0xa20] ss:$24 sps:$4 sm:$0xff]   ;;  %v14952_v27 = vld [vmem:[%s17080_s29 + $0xd30] ss:$24 sps:$4 sm:$0xff]   ;;  %v14953_v28 = vld [vmem:[%s17080_s29 + $0xa54] ss:$24 sps:$4 sm:$0xff]  }
  0x9a   : > { %2749 = vmatpush1.bf16.msra.mxu1 %v14927_v10  ;;  %3820 = vmatpush1.bf16.msra.mxu0 %v14928_v11  ;;  %v14955_v29 = vld [vmem:[%s17080_s29 + $0xd64] ss:$24 sps:$4 sm:$0xff]   ;;  %v14957_v30 = vld [vmem:[%s17080_s29 + $0xa50] ss:$24 sps:$4 sm:$0xff]   ;;  %v14958_v31 = vld [vmem:[%s17080_s29 + $0xd60] ss:$24 sps:$4 sm:$0xff]  }
  0x9b   : > { %2750 = vmatprep.subr.bf16.mxu1 %v14929_v12  ;;  %3821 = vmatprep.subr.bf16.mxu0 %v14931_v13  ;;  %v14959_v32 = vld [vmem:[%s17080_s29 + $0xa84] ss:$24 sps:$4 sm:$0xff]   ;;  %v14961_v33 = vld [vmem:[%s17080_s29 + $0xd94] ss:$24 sps:$4 sm:$0xff]   ;;  %s284_s4 = smul.u32 768, %s16808_s18  ;;  %s20036_s5 = scalar_lea.vmem [#allocation8], %s14781_s23 }
  0x9c   : > { %v14963_v34 = vld [vmem:[%s17080_s29 + $0xa80] ss:$24 sps:$4 sm:$0xff]   ;;  %v14964_v35 = vld [vmem:[%s17080_s29 + $0xd90] ss:$24 sps:$4 sm:$0xff]   ;;  %v14965_v36 = vld [vmem:[%s17080_s29 + $0xab4] ss:$24 sps:$4 sm:$0xff]  }
  0x9d   : > { %v14967_v37 = vld [vmem:[%s17080_s29 + $0xdc4] ss:$24 sps:$4 sm:$0xff]   ;;  %s285_s10 = sshra.s32 %s284_s4, 7  ;;  %v14969_v38 = vld [vmem:[%s17080_s29 + $0xab0] ss:$24 sps:$4 sm:$0xff]   ;;  %p13583_p4 = scmp.ne.s32.totalorder %s16808_s18, 0 }
  0x9e   : > { %2751 = vmatpush1.bf16.msra.mxu1 %v14933_v14  ;;  %3822 = vmatpush1.bf16.msra.mxu0 %v14934_v15  ;;  %v14970_v39 = vld [vmem:[%s17080_s29 + $0xdc0] ss:$24 sps:$4 sm:$0xff]   ;;  %v14971_v40 = vld [vmem:[%s17080_s29 + $0xae4] ss:$24 sps:$4 sm:$0xff]   ;;  %v14973_v41 = vld [vmem:[%s17080_s29 + $0xdf4] ss:$24 sps:$4 sm:$0xff]  }
  0x9f   : > { %2752 = vmatprep.subr.bf16.mxu1 %v14935_v16  ;;  %3823 = vmatprep.subr.bf16.mxu0 %v14937_v17  ;;  %s11992_s15 = sshll.u32 %s285_s10, 2  ;;  %v14975_v42 = vld [vmem:[%s17080_s29 + $0xae0] ss:$24 sps:$4 sm:$0xff]   ;;  %v14976_v43 = vld [vmem:[%s17080_s29 + $0xdf0] ss:$24 sps:$4 sm:$0xff]  }
  0xa0   : > { %v14977_v44 = vld [vmem:[%s17080_s29 + $0xb14] ss:$24 sps:$4 sm:$0xff]   ;;  %v14979_v45 = vld [vmem:[%s17080_s29 + $0xe24] ss:$24 sps:$4 sm:$0xff]   ;;  %v14981_v46 = vld [vmem:[%s17080_s29 + $0xb10] ss:$24 sps:$4 sm:$0xff]  }
  0xa1   : > { %v14982_v47 = vld [vmem:[%s17080_s29 + $0xe20] ss:$24 sps:$4 sm:$0xff]   ;;  %s17146_s22 = scalar_lea.vmem [#allocation2], %s11992_s15  ;;  %v14983_v49 = vld [vmem:[%s17080_s29 + $0xb44] ss:$24 sps:$4 sm:$0xff]  }
  0xa2   : > { %2753 = vmatpush1.bf16.msra.mxu1 %v14939_v18  ;;  %3824 = vmatpush1.bf16.msra.mxu0 %v14940_v19  ;;  %v15007_v48 = vld [vmem:[%s17146_s22 + $0x124] ss:$144 sps:$4 sm:$0xff]   ;;  %v17151_v50 = vld [vmem:[%s17146_s22 + $0x12c] ss:$144 sps:$4 sm:$0xff]   ;;  %v14987_v52 = vld [vmem:[%s17080_s29 + $0xb40] ss:$24 sps:$4 sm:$0xff]  }
  0xa3   : > { %2754 = vmatprep.subr.bf16.mxu1 %v14941_v20  ;;  %3825 = vmatprep.subr.bf16.mxu0 %v14943_v21  ;;  %v14985_v51 = vld [vmem:[%s17080_s29 + $0xe54] ss:$24 sps:$4 sm:$0xff]   ;;  %v14988_v53 = vld [vmem:[%s17080_s29 + $0xe50] ss:$24 sps:$4 sm:$0xff]   ;;  %v14991_v55 = vld [vmem:[%s17080_s29 + $0xe84] ss:$24 sps:$4 sm:$0xff]  }
  0xa4   : > { %2776 = vmatprep.mubr.bf16.mxu1 %v15007_v48  ;;  %3847 = vmatprep.mubr.bf16.mxu0 %v17151_v50  ;;  %v14989_v54 = vld [vmem:[%s17080_s29 + $0xb74] ss:$24 sps:$4 sm:$0xff]   ;;  %v14993_v56 = vld [vmem:[%s17080_s29 + $0xb70] ss:$24 sps:$4 sm:$0xff]   ;;  %v14994_v57 = vld [vmem:[%s17080_s29 + $0xe80] ss:$24 sps:$4 sm:$0xff]  }
  0xa5   : > { %v14995_v58 = vld [vmem:[%s17080_s29 + $0xba4] ss:$24 sps:$4 sm:$0xff]   ;;  %v14997_v59 = vld [vmem:[%s17080_s29 + $0xeb4] ss:$24 sps:$4 sm:$0xff]   ;;  %v14999_v60 = vld [vmem:[%s17080_s29 + $0xba0] ss:$24 sps:$4 sm:$0xff]  }
  0xa6   : > { %2755 = vmatpush1.bf16.msra.mxu1 %v14945_v22  ;;  %3826 = vmatpush1.bf16.msra.mxu0 %v14946_v23  ;;  %v15000_v61 = vld [vmem:[%s17080_s29 + $0xeb0] ss:$24 sps:$4 sm:$0xff]   ;;  %v15001_v62 = vld [vmem:[%s17080_s29 + $0xbd4] ss:$24 sps:$4 sm:$0xff]   ;;  %v15003_v63 = vld [vmem:[%s17080_s29 + $0xee4] ss:$24 sps:$4 sm:$0xff]  }
  0xa7   : > { %2756 = vmatprep.subr.bf16.mxu1 %v14947_v24  ;;  %3827 = vmatprep.subr.bf16.mxu0 %v14949_v25  ;;  %v15005_v0 = vld [vmem:[%s17080_s29 + $0xbd0] ss:$24 sps:$4 sm:$0xff]   ;;  %v15006_v1 = vld [vmem:[%s17080_s29 + $0xee0] ss:$24 sps:$4 sm:$0xff]   ;;  %v15014_v2 = vld [vmem:[%s17080_s29 + $0xc04] ss:$24 sps:$4 sm:$0xff]  }
  0xa8   : > { %v15018_v3 = vld [vmem:[%s17080_s29 + $0xf14] ss:$24 sps:$4 sm:$0xff]   ;;  %v15011_v4 = vld [vmem:[%s17146_s22 + $0x120] ss:$144 sps:$4 sm:$0xff]   ;;  %v17174_v6 = vld [vmem:[%s17146_s22 + $0x128] ss:$144 sps:$4 sm:$0xff]  }
  0xa9   : > { %v15012_v5 = vld [vmem:[%s17080_s29 + $0xc00] ss:$24 sps:$4 sm:$0xff]   ;;  %v15016_v7 = vld [vmem:[%s17080_s29 + $0xf10] ss:$24 sps:$4 sm:$0xff]   ;;  %v15021_v8 = vld [vmem:[%s17080_s29 + $0xc34] ss:$24 sps:$4 sm:$0xff]  }
  0xaa   : > { %2757 = vmatpush1.bf16.msra.mxu1 %v14951_v26  ;;  %3828 = vmatpush1.bf16.msra.mxu0 %v14952_v27  ;;  %v15024_v9 = vld [vmem:[%s17080_s29 + $0xf44] ss:$24 sps:$4 sm:$0xff]   ;;  %v15019_v12 = vld [vmem:[%s17080_s29 + $0xc30] ss:$24 sps:$4 sm:$0xff]   ;;  %v15022_v13 = vld [vmem:[%s17080_s29 + $0xf40] ss:$24 sps:$4 sm:$0xff]  }
  0xab   : > { %2758 = vmatprep.subr.bf16.mxu1 %v14953_v28  ;;  %3829 = vmatprep.subr.bf16.mxu0 %v14955_v29  ;;  %v15025_v10 = vld [vmem:[%s17146_s22 + $0x244] ss:$144 sps:$4 sm:$0xff]   ;;  %v17181_v11 = vld [vmem:[%s17146_s22 + $0x24c] ss:$144 sps:$4 sm:$0xff]   ;;  %v15029_v16 = vld [vmem:[%s17146_s22 + $0x240] ss:$144 sps:$4 sm:$0xff]  }
  0xac   : > { %v15033_v14 = vld [vmem:[%s17080_s29 + $0xc64] ss:$24 sps:$4 sm:$0xff]   ;;  %v15036_v15 = vld [vmem:[%s17080_s29 + $0xf74] ss:$24 sps:$4 sm:$0xff]   ;;  %v17191_v17 = vld [vmem:[%s17146_s22 + $0x248] ss:$144 sps:$4 sm:$0xff]  }
  0xad   : > { %v15031_v18 = vld [vmem:[%s17080_s29 + $0xc60] ss:$24 sps:$4 sm:$0xff]   ;;  %v15034_v19 = vld [vmem:[%s17080_s29 + $0xf70] ss:$24 sps:$4 sm:$0xff]   ;;  %v15037_v20 = vld [vmem:[%s17146_s22 + $0x364] ss:$144 sps:$4 sm:$0xff]  }
  0xae   : > { %2759 = vmatpush1.bf16.msra.mxu1 %v14957_v30  ;;  %3830 = vmatpush1.bf16.msra.mxu0 %v14958_v31  ;;  %v17197_v21 = vld [vmem:[%s17146_s22 + $0x36c] ss:$144 sps:$4 sm:$0xff]   ;;  %v15043_v24 = vld [vmem:[%s17080_s29 + $0xc90] ss:$24 sps:$4 sm:$0xff]   ;;  %v15046_v25 = vld [vmem:[%s17080_s29 + $0xfa0] ss:$24 sps:$4 sm:$0xff]  }
  0xaf   : > { %2760 = vmatprep.subr.bf16.mxu1 %v14959_v32  ;;  %3831 = vmatprep.subr.bf16.mxu0 %v14961_v33  ;;  %v15045_v22 = vld [vmem:[%s17080_s29 + $0xc94] ss:$24 sps:$4 sm:$0xff]   ;;  %v15048_v23 = vld [vmem:[%s17080_s29 + $0xfa4] ss:$24 sps:$4 sm:$0xff]   ;;  %v15041_v27 = vld [vmem:[%s17146_s22 + $0x360] ss:$144 sps:$4 sm:$0xff]  }
  0xb0   : > { %v15056_v26 = vld [vmem:[%s17080_s29 + $0xcc4] ss:$24 sps:$4 sm:$0xff]   ;;  %v15060_v28 = vld [vmem:[%s17080_s29 + $0xfd4] ss:$24 sps:$4 sm:$0xff]   ;;  %v17209_v29 = vld [vmem:[%s17146_s22 + $0x368] ss:$144 sps:$4 sm:$0xff]  }
  0xb1   : > { %v15049_v30 = vld [vmem:[%s17146_s22 + $0x484] ss:$144 sps:$4 sm:$0xff]   ;;  %v17213_v31 = vld [vmem:[%s17146_s22 + $0x48c] ss:$144 sps:$4 sm:$0xff]   ;;  %v15054_v32 = vld [vmem:[%s17080_s29 + $0xcc0] ss:$24 sps:$4 sm:$0xff]  }
  0xb2   : > { %2761 = vmatpush1.bf16.msra.mxu1 %v14963_v34  ;;  %3832 = vmatpush1.bf16.msra.mxu0 %v14964_v35  ;;  %v15058_v33 = vld [vmem:[%s17080_s29 + $0xfd0] ss:$24 sps:$4 sm:$0xff]   ;;  %v15063_v34 = vld [vmem:[%s17080_s29 + $0xcf4] ss:$24 sps:$4 sm:$0xff]   ;;  %v15066_v35 = vld [vmem:[%s17080_s29 + $0x1004] ss:$24 sps:$4 sm:$0xff]  }
  0xb3   : > { %2762 = vmatprep.subr.bf16.mxu1 %v14965_v36  ;;  %3833 = vmatprep.subr.bf16.mxu0 %v14967_v37  ;;  %v15061_v36 = vld [vmem:[%s17080_s29 + $0xcf0] ss:$24 sps:$4 sm:$0xff]  }
  0xb4   : > { %v15053_v37 = vld [vmem:[%s17146_s22 + $0x480] ss:$144 sps:$4 sm:$0xff]  }
  0xb5   : > { %v15085_v48 = vld [vmem:[%s17080_s29 + $0xd50] ss:$24 sps:$4 sm:$0xff]  }
  0xb6   : > { %2763 = vmatpush1.bf16.msra.mxu1 %v14969_v38  ;;  %3834 = vmatpush1.bf16.msra.mxu0 %v14970_v39  ;;  %v17224_v38 = vld [vmem:[%s17146_s22 + $0x488] ss:$144 sps:$4 sm:$0xff]  }
  0xb7   : > { %2764 = vmatprep.subr.bf16.mxu1 %v14971_v40  ;;  %3835 = vmatprep.subr.bf16.mxu0 %v14973_v41  ;;  %v15064_v39 = vld [vmem:[%s17080_s29 + $0x1000] ss:$24 sps:$4 sm:$0xff]   ;;  %v15075_v40 = vld [vmem:[%s17080_s29 + $0xd24] ss:$24 sps:$4 sm:$0xff]   ;;  %v15078_v41 = vld [vmem:[%s17080_s29 + $0x1034] ss:$24 sps:$4 sm:$0xff]  }
  0xba   : > { %2765 = vmatpush1.bf16.msra.mxu1 %v14975_v42  ;;  %3836 = vmatpush1.bf16.msra.mxu0 %v14976_v43  ;;  %v15067_v42 = vld [vmem:[%s17146_s22 + $0x5a4] ss:$144 sps:$4 sm:$0xff]   ;;  %v17231_v43 = vld [vmem:[%s17146_s22 + $0x5ac] ss:$144 sps:$4 sm:$0xff]  }
  0xbb   : > { %2766 = vmatprep.subr.bf16.mxu1 %v14977_v44  ;;  %3837 = vmatprep.subr.bf16.mxu0 %v14979_v45  ;;  %v15073_v44 = vld [vmem:[%s17080_s29 + $0xd20] ss:$24 sps:$4 sm:$0xff]   ;;  %v15076_v45 = vld [vmem:[%s17080_s29 + $0x1030] ss:$24 sps:$4 sm:$0xff]  }
  0xbe   : > { %2767 = vmatpush1.bf16.msra.mxu1 %v14981_v46  ;;  %3838 = vmatpush1.bf16.msra.mxu0 %v14982_v47  ;;  %v15087_v46 = vld [vmem:[%s17080_s29 + $0xd54] ss:$24 sps:$4 sm:$0xff]   ;;  %v15090_v47 = vld [vmem:[%s17080_s29 + $0x1064] ss:$24 sps:$4 sm:$0xff]  }
  0xbf   : > { %2768 = vmatprep.subr.bf16.mxu1 %v14983_v49  ;;  %3839 = vmatprep.subr.bf16.mxu0 %v14985_v51  ;;  %v15088_v49 = vld [vmem:[%s17080_s29 + $0x1060] ss:$24 sps:$4 sm:$0xff]  }
  0xc0   : > { %v15071_v51 = vld [vmem:[%s17146_s22 + $0x5a0] ss:$144 sps:$4 sm:$0xff]  }
  0xc2   : > { %2769 = vmatpush1.bf16.msra.mxu1 %v14987_v52  ;;  %3840 = vmatpush1.bf16.msra.mxu0 %v14988_v53  ;;  %v15098_v52 = vld [vmem:[%s17080_s29 + $0xd84] ss:$24 sps:$4 sm:$0xff]   ;;  %v15102_v53 = vld [vmem:[%s17080_s29 + $0x1094] ss:$24 sps:$4 sm:$0xff]  }
  0xc3   : > { %2770 = vmatprep.subr.bf16.mxu1 %v14989_v54  ;;  %3841 = vmatprep.subr.bf16.mxu0 %v14991_v55  ;;  %v17245_v54 = vld [vmem:[%s17146_s22 + $0x5a8] ss:$144 sps:$4 sm:$0xff]   ;;  %v15079_v55 = vld [vmem:[%s17146_s22 + $0x6c4] ss:$144 sps:$4 sm:$0xff]  }
  0xc6   : > { %2771 = vmatpush1.bf16.msra.mxu1 %v14993_v56  ;;  %3842 = vmatpush1.bf16.msra.mxu0 %v14994_v57  ;;  %v17249_v56 = vld [vmem:[%s17146_s22 + $0x6cc] ss:$144 sps:$4 sm:$0xff]   ;;  %v15096_v57 = vld [vmem:[%s17080_s29 + $0xd80] ss:$24 sps:$4 sm:$0xff]  }
  0xc7   : > { %2772 = vmatprep.subr.bf16.mxu1 %v14995_v58  ;;  %3843 = vmatprep.subr.bf16.mxu0 %v14997_v59  ;;  %v15100_v58 = vld [vmem:[%s17080_s29 + $0x1090] ss:$24 sps:$4 sm:$0xff]   ;;  %v15105_v59 = vld [vmem:[%s17080_s29 + $0xdb4] ss:$24 sps:$4 sm:$0xff]  }
  0xca   : > { %2773 = vmatpush1.bf16.msra.mxu1 %v14999_v60  ;;  %3844 = vmatpush1.bf16.msra.mxu0 %v15000_v61  ;;  %v15108_v60 = vld [vmem:[%s17080_s29 + $0x10c4] ss:$24 sps:$4 sm:$0xff]   ;;  %v15103_v61 = vld [vmem:[%s17080_s29 + $0xdb0] ss:$24 sps:$4 sm:$0xff]  }
  0xcb   : > { %2774 = vmatprep.subr.bf16.mxu1 %v15001_v62  ;;  %3845 = vmatprep.subr.bf16.mxu0 %v15003_v63  ;;  %v15083_v62 = vld [vmem:[%s17146_s22 + $0x6c0] ss:$144 sps:$4 sm:$0xff]   ;;  %v17260_v63 = vld [vmem:[%s17146_s22 + $0x6c8] ss:$144 sps:$4 sm:$0xff]  }
  0xce   : > { %2775 = vmatpush1.bf16.msra.mxu1 %v15005_v0  ;;  %3846 = vmatpush1.bf16.msra.mxu0 %v15006_v1  ;;  %v15106_v0 = vld [vmem:[%s17080_s29 + $0x10c0] ss:$24 sps:$4 sm:$0xff]   ;;  %v15117_v1 = vld [vmem:[%s17080_s29 + $0xde4] ss:$24 sps:$4 sm:$0xff]  }
  0xcf   : > { %2897 = vmatprep.subr.bf16.mxu1 %v15014_v2  ;;  %3968 = vmatprep.subr.bf16.mxu0 %v15018_v3  ;;  %v15120_v2 = vld [vmem:[%s17080_s29 + $0x10f4] ss:$24 sps:$4 sm:$0xff]  }
  0xd0   : > { %v15091_v3 = vld [vmem:[%s17146_s22 + $0x7e4] ss:$144 sps:$4 sm:$0xff]  }
  0xd1   : > { %2777 = vmatmul.mubr.bf16.vlgmr.msra.gmra.mrb[0].mxu1 %v15011_v4  ;;  %3848 = vmatmul.mubr.bf16.vlgmr.msra.gmra.mrb[0].mxu0 %v17174_v6  ;;  %v17267_v4 = vld [vmem:[%s17146_s22 + $0x7ec] ss:$144 sps:$4 sm:$0xff]  }
  0xd2   : > { %2898 = vmatpush1.bf16.msra.mxu1 %v15012_v5  ;;  %3969 = vmatpush1.bf16.msra.mxu0 %v15016_v7  ;;  %v15115_v5 = vld [vmem:[%s17080_s29 + $0xde0] ss:$24 sps:$4 sm:$0xff]   ;;  %v15118_v7 = vld [vmem:[%s17080_s29 + $0x10f0] ss:$24 sps:$4 sm:$0xff]  }
  0xd3   : > { %2899 = vmatprep.subr.bf16.mxu1 %v15021_v8  ;;  %3970 = vmatprep.subr.bf16.mxu0 %v15024_v9  ;;  %v15129_v8 = vld [vmem:[%s17080_s29 + $0xe14] ss:$24 sps:$4 sm:$0xff]   ;;  %v15132_v9 = vld [vmem:[%s17080_s29 + $0x1124] ss:$24 sps:$4 sm:$0xff]  }
  0xd4   : > { %2786 = vmatprep.mubr.bf16.mxu1 %v15025_v10  ;;  %3857 = vmatprep.mubr.bf16.mxu0 %v17181_v11  ;;  %v15127_v10 = vld [vmem:[%s17080_s29 + $0xe10] ss:$24 sps:$4 sm:$0xff]  }
  0xd6   : > { %2900 = vmatpush1.bf16.msra.mxu1 %v15019_v12  ;;  %3971 = vmatpush1.bf16.msra.mxu0 %v15022_v13  ;;  %v15095_v12 = vld [vmem:[%s17146_s22 + $0x7e0] ss:$144 sps:$4 sm:$0xff]   ;;  %v17278_v13 = vld [vmem:[%s17146_s22 + $0x7e8] ss:$144 sps:$4 sm:$0xff]  }
  0xd7   : > { %2901 = vmatprep.subr.bf16.mxu1 %v15033_v14  ;;  %3972 = vmatprep.subr.bf16.mxu0 %v15036_v15  ;;  %v15130_v14 = vld [vmem:[%s17080_s29 + $0x1120] ss:$24 sps:$4 sm:$0xff]   ;;  %v15140_v15 = vld [vmem:[%s17080_s29 + $0xe44] ss:$24 sps:$4 sm:$0xff]  }
  0xd9   : > { %2787 = vmatmul.mubr.bf16.gmra.mrb[4].mxu1 %v15029_v16  ;;  %3858 = vmatmul.mubr.bf16.gmra.mrb[4].mxu0 %v17191_v17  ;;  %v15144_v16 = vld [vmem:[%s17080_s29 + $0x1154] ss:$24 sps:$4 sm:$0xff]  }
  0xda   : > { %2902 = vmatpush1.bf16.msra.mxu1 %v15031_v18  ;;  %3973 = vmatpush1.bf16.msra.mxu0 %v15034_v19  ;;  %v15109_v18 = vld [vmem:[%s17146_s22 + $0x904] ss:$144 sps:$4 sm:$0xff]   ;;  %v17285_v19 = vld [vmem:[%s17146_s22 + $0x90c] ss:$144 sps:$4 sm:$0xff]  }
  0xdb   : > { %2796 = vmatprep.mubr.bf16.mxu1 %v15037_v20  ;;  %3867 = vmatprep.mubr.bf16.mxu0 %v17197_v21  ;;  %v15138_v20 = vld [vmem:[%s17080_s29 + $0xe40] ss:$24 sps:$4 sm:$0xff]  }
  0xdc   : > { %2903 = vmatprep.subr.bf16.mxu1 %v15045_v22  ;;  %3974 = vmatprep.subr.bf16.mxu0 %v15048_v23  ;;  %v15142_v22 = vld [vmem:[%s17080_s29 + $0x1150] ss:$24 sps:$4 sm:$0xff]   ;;  %v15147_v23 = vld [vmem:[%s17080_s29 + $0xe74] ss:$24 sps:$4 sm:$0xff]  }
  0xde   : > { %2904 = vmatpush1.bf16.msra.mxu1 %v15043_v24  ;;  %3975 = vmatpush1.bf16.msra.mxu0 %v15046_v25  ;;  %v15150_v24 = vld [vmem:[%s17080_s29 + $0x1184] ss:$24 sps:$4 sm:$0xff]   ;;  %v15145_v25 = vld [vmem:[%s17080_s29 + $0xe70] ss:$24 sps:$4 sm:$0xff]  }
  0xdf   : > { %2905 = vmatprep.subr.bf16.mxu1 %v15056_v26  ;;  %3976 = vmatprep.subr.bf16.mxu0 %v15060_v28  ;;  %v15148_v26 = vld [vmem:[%s17080_s29 + $0x1180] ss:$24 sps:$4 sm:$0xff]   ;;  %v15159_v28 = vld [vmem:[%s17080_s29 + $0xea4] ss:$24 sps:$4 sm:$0xff]  }
  0xe1   : > { %2797 = vmatmul.mubr.bf16.gmra.mrb[8].mxu1 %v15041_v27  ;;  %3868 = vmatmul.mubr.bf16.gmra.mrb[8].mxu0 %v17209_v29  ;;  %v15113_v27 = vld [vmem:[%s17146_s22 + $0x900] ss:$144 sps:$4 sm:$0xff]  }
  0xe2   : > { %2806 = vmatprep.mubr.bf16.mxu1 %v15049_v30  ;;  %3877 = vmatprep.mubr.bf16.mxu0 %v17213_v31  ;;  %v15162_v30 = vld [vmem:[%s17080_s29 + $0x11b4] ss:$24 sps:$4 sm:$0xff]  }
  0xe3   : > { %2906 = vmatpush1.bf16.msra.mxu1 %v15054_v32  ;;  %3977 = vmatpush1.bf16.msra.mxu0 %v15058_v33  ;;  %v17299_v32 = vld [vmem:[%s17146_s22 + $0x908] ss:$144 sps:$4 sm:$0xff]   ;;  %v15121_v33 = vld [vmem:[%s17146_s22 + $0xa24] ss:$144 sps:$4 sm:$0xff]  }
  0xe4   : > { %2907 = vmatprep.subr.bf16.mxu1 %v15063_v34  ;;  %3978 = vmatprep.subr.bf16.mxu0 %v15066_v35  ;;  %v17303_v34 = vld [vmem:[%s17146_s22 + $0xa2c] ss:$144 sps:$4 sm:$0xff]   ;;  %v15157_v35 = vld [vmem:[%s17080_s29 + $0xea0] ss:$24 sps:$4 sm:$0xff]  }
  0xe7   : > { %2908 = vmatpush1.bf16.msra.mxu1 %v15061_v36  ;;  %3979 = vmatpush1.bf16.msra.mxu0 %v15064_v39  ;;  %v15160_v36 = vld [vmem:[%s17080_s29 + $0x11b0] ss:$24 sps:$4 sm:$0xff]   ;;  %v15174_v39 = vld [vmem:[%s17080_s29 + $0x11e4] ss:$24 sps:$4 sm:$0xff]  }
  0xe8   : > { %2909 = vmatprep.subr.bf16.mxu1 %v15075_v40  ;;  %3980 = vmatprep.subr.bf16.mxu0 %v15078_v41  ;;  %v15169_v40 = vld [vmem:[%s17080_s29 + $0xed0] ss:$24 sps:$4 sm:$0xff]  }
  0xe9   : > { %2807 = vmatmul.mubr.bf16.gmra.mrb[12].mxu1 %v15053_v37  ;;  %3878 = vmatmul.mubr.bf16.gmra.mrb[12].mxu0 %v17224_v38  ;;  %v15171_v37 = vld [vmem:[%s17080_s29 + $0xed4] ss:$24 sps:$4 sm:$0xff]   ;;  %v15125_v41 = vld [vmem:[%s17146_s22 + $0xa20] ss:$144 sps:$4 sm:$0xff]  }
  0xea   : > { %2816 = vmatprep.mubr.bf16.mxu1 %v15067_v42  ;;  %3887 = vmatprep.mubr.bf16.mxu0 %v17231_v43  ;;  %v15172_v42 = vld [vmem:[%s17080_s29 + $0x11e0] ss:$24 sps:$4 sm:$0xff]  }
  0xeb   : > { %2910 = vmatpush1.bf16.msra.mxu1 %v15073_v44  ;;  %3981 = vmatpush1.bf16.msra.mxu0 %v15076_v45  ;;  %v15179_v44 = vld [vmem:[%s17080_s29 + $0xf04] ss:$24 sps:$4 sm:$0xff]  }
  0xec   : > { %2911 = vmatprep.subr.bf16.mxu1 %v15087_v46  ;;  %3982 = vmatprep.subr.bf16.mxu0 %v15090_v47  ;;  %v15183_v45 = vld [vmem:[%s17080_s29 + $0x4] ss:$24 sps:$4 sm:$0xff]   ;;  %v17317_v46 = vld [vmem:[%s17146_s22 + $0xa28] ss:$144 sps:$4 sm:$0xff]  }
  0xed   : > { %v15133_v47 = vld [vmem:[%s17146_s22 + $0xb44] ss:$144 sps:$4 sm:$0xff]  }
  0xef   : > { %2912 = vmatpush1.bf16.msra.mxu1 %v15085_v48  ;;  %3983 = vmatpush1.bf16.msra.mxu0 %v15088_v49  ;;  %v17321_v48 = vld [vmem:[%s17146_s22 + $0xb4c] ss:$144 sps:$4 sm:$0xff]   ;;  %v15137_v49 = vld [vmem:[%s17146_s22 + $0xb40] ss:$144 sps:$4 sm:$0xff]  }
  0xf0   : > { %2913 = vmatprep.subr.bf16.mxu1 %v15098_v52  ;;  %3984 = vmatprep.subr.bf16.mxu0 %v15102_v53  ;;  %v15151_v52 = vld [vmem:[%s17146_s22 + $0xc64] ss:$144 sps:$4 sm:$0xff]   ;;  %v17331_v53 = vld [vmem:[%s17146_s22 + $0xc6c] ss:$144 sps:$4 sm:$0xff]  }
  0xf1   : > { %2817 = vmatmul.mubr.bf16.gmra.mrb[16].mxu1 %v15071_v51  ;;  %3888 = vmatmul.mubr.bf16.gmra.mrb[16].mxu0 %v17245_v54  ;;  %v17327_v51 = vld [vmem:[%s17146_s22 + $0xb48] ss:$144 sps:$4 sm:$0xff]  }
  0xf2   : > { %2826 = vmatprep.mubr.bf16.mxu1 %v15079_v55  ;;  %3897 = vmatprep.mubr.bf16.mxu0 %v17249_v56  ;;  %v15155_v55 = vld [vmem:[%s17146_s22 + $0xc60] ss:$144 sps:$4 sm:$0xff]  }
  0xf3   : > { %2914 = vmatpush1.bf16.msra.mxu1 %v15096_v57  ;;  %3985 = vmatpush1.bf16.msra.mxu0 %v15100_v58  ;;  %v17337_v57 = vld [vmem:[%s17146_s22 + $0xc68] ss:$144 sps:$4 sm:$0xff]   ;;  %v15163_v58 = vld [vmem:[%s17146_s22 + $0xd84] ss:$144 sps:$4 sm:$0xff]  }
  0xf4   : > { %2915 = vmatprep.subr.bf16.mxu1 %v15105_v59  ;;  %3986 = vmatprep.subr.bf16.mxu0 %v15108_v60  ;;  %v17341_v59 = vld [vmem:[%s17146_s22 + $0xd8c] ss:$144 sps:$4 sm:$0xff]   ;;  %v15167_v60 = vld [vmem:[%s17146_s22 + $0xd80] ss:$144 sps:$4 sm:$0xff]  }
  0xf7   : > { %2916 = vmatpush1.bf16.msra.mxu1 %v15103_v61  ;;  %3987 = vmatpush1.bf16.msra.mxu0 %v15106_v0  ;;  %v17347_v61 = vld [vmem:[%s17146_s22 + $0xd88] ss:$144 sps:$4 sm:$0xff]  }
  0xf8   : > { %2917 = vmatprep.subr.bf16.mxu1 %v15117_v1  ;;  %3988 = vmatprep.subr.bf16.mxu0 %v15120_v2  ;;  %v15177_v0 = vld [vmem:[%s17080_s29 + $0xf00] ss:$24 sps:$4 sm:$0xff]  }
  0xf9   : > { %2827 = vmatmul.mubr.bf16.gmra.mrb[20].mxu1 %v15083_v62  ;;  %3898 = vmatmul.mubr.bf16.gmra.mrb[20].mxu0 %v17260_v63  ;;  %v17350_v62 = vld [vmem:[%s17146_s22 + $0x134] ss:$144 sps:$4 sm:$0xff]   ;;  %v17357_v1 = vld [vmem:[%s17146_s22 + $0x130] ss:$144 sps:$4 sm:$0xff]  }
  0xfa   : > { %2836 = vmatprep.mubr.bf16.mxu1 %v15091_v3  ;;  %3907 = vmatprep.mubr.bf16.mxu0 %v17267_v4  ;;  %v15181_v2 = vld [vmem:[%s17080_s29] ss:$24 sps:$4 sm:$0xff]   ;;  %v15186_v3 = vld [vmem:[%s17080_s29 + $0xf34] ss:$24 sps:$4 sm:$0xff]  }
  0xfb   : > { %2918 = vmatpush1.bf16.msra.mxu1 %v15115_v5  ;;  %3989 = vmatpush1.bf16.msra.mxu0 %v15118_v7  ;;  %v15189_v5 = vld [vmem:[%s17080_s29 + $0x34] ss:$24 sps:$4 sm:$0xff]  }
  0xfc   : > { %2919 = vmatprep.subr.bf16.mxu1 %v15129_v8  ;;  %3990 = vmatprep.subr.bf16.mxu0 %v15132_v9  ;;  %v17363_v7 = vld [vmem:[%s17146_s22 + $0x254] ss:$144 sps:$4 sm:$0xff]   ;;  %v15184_v8 = vld [vmem:[%s17080_s29 + $0xf30] ss:$24 sps:$4 sm:$0xff]  }
  0xfd   : > { %v15195_v9 = vld [vmem:[%s17080_s29 + $0xf64] ss:$24 sps:$4 sm:$0xff]  }
  0xff   : > { %2920 = vmatpush1.bf16.msra.mxu1 %v15127_v10  ;;  %3991 = vmatpush1.bf16.msra.mxu0 %v15130_v14  ;;  %v15198_v10 = vld [vmem:[%s17080_s29 + $0x64] ss:$24 sps:$4 sm:$0xff]   ;;  %v15196_v14 = vld [vmem:[%s17080_s29 + $0x60] ss:$24 sps:$4 sm:$0xff]  }
 0x100   : > { %2921 = vmatprep.subr.bf16.mxu1 %v15140_v15  ;;  %3992 = vmatprep.subr.bf16.mxu0 %v15144_v16  ;;  %v17379_v15 = vld [vmem:[%s17146_s22 + $0x374] ss:$144 sps:$4 sm:$0xff]  }
 0x101   : > { %2837 = vmatmul.mubr.bf16.gmra.mrb[24].mxu1 %v15095_v12  ;;  %3908 = vmatmul.mubr.bf16.gmra.mrb[24].mxu0 %v17278_v13  ;;  %v15193_v12 = vld [vmem:[%s17080_s29 + $0xf60] ss:$24 sps:$4 sm:$0xff]   ;;  %v15204_v16 = vld [vmem:[%s17080_s29 + $0xf94] ss:$24 sps:$4 sm:$0xff]  }
 0x102   : > { %2846 = vmatprep.mubr.bf16.mxu1 %v15109_v18  ;;  %3917 = vmatprep.mubr.bf16.mxu0 %v17285_v19  ;;  %v15207_v18 = vld [vmem:[%s17080_s29 + $0x94] ss:$24 sps:$4 sm:$0xff]  }
 0x103   : > { %2922 = vmatpush1.bf16.msra.mxu1 %v15138_v20  ;;  %3993 = vmatpush1.bf16.msra.mxu0 %v15142_v22  ;;  %v15205_v20 = vld [vmem:[%s17080_s29 + $0x90] ss:$24 sps:$4 sm:$0xff]   ;;  %v15212_v22 = vld [vmem:[%s17080_s29 + $0xfc4] ss:$24 sps:$4 sm:$0xff]  }
 0x104   : > { %2923 = vmatprep.subr.bf16.mxu1 %v15147_v23  ;;  %3994 = vmatprep.subr.bf16.mxu0 %v15150_v24  ;;  %v15216_v23 = vld [vmem:[%s17080_s29 + $0xc4] ss:$24 sps:$4 sm:$0xff]  }
 0x105   : > { %v17395_v24 = vld [vmem:[%s17146_s22 + $0x494] ss:$144 sps:$4 sm:$0xff]  }
 0x107   : > { %2924 = vmatpush1.bf16.msra.mxu1 %v15145_v25  ;;  %3995 = vmatpush1.bf16.msra.mxu0 %v15148_v26  ;;  %v15210_v25 = vld [vmem:[%s17080_s29 + $0xfc0] ss:$24 sps:$4 sm:$0xff]  }
 0x108   : > { %2925 = vmatprep.subr.bf16.mxu1 %v15159_v28  ;;  %3996 = vmatprep.subr.bf16.mxu0 %v15162_v30  ;;  %v15214_v26 = vld [vmem:[%s17080_s29 + $0xc0] ss:$24 sps:$4 sm:$0xff]   ;;  %v15217_v28 = vld [vmem:[%s17080_s29 + $0xff0] ss:$24 sps:$4 sm:$0xff]  }
 0x109   : > { %2847 = vmatmul.mubr.bf16.gmra.mrb[28].mxu1 %v15113_v27  ;;  %3918 = vmatmul.mubr.bf16.gmra.mrb[28].mxu0 %v17299_v32  ;;  %v15222_v27 = vld [vmem:[%s17080_s29 + $0xf4] ss:$24 sps:$4 sm:$0xff]   ;;  %v15220_v30 = vld [vmem:[%s17080_s29 + $0xf0] ss:$24 sps:$4 sm:$0xff]  }
 0x10a   : > { %2856 = vmatprep.mubr.bf16.mxu1 %v15121_v33  ;;  %3927 = vmatprep.mubr.bf16.mxu0 %v17303_v34  ;;  %v15228_v33 = vld [vmem:[%s17080_s29 + $0x1024] ss:$24 sps:$4 sm:$0xff]  }
 0x10b   : > { %2926 = vmatpush1.bf16.msra.mxu1 %v15157_v35  ;;  %3997 = vmatpush1.bf16.msra.mxu0 %v15160_v36  ;;  %v15231_v35 = vld [vmem:[%s17080_s29 + $0x124] ss:$24 sps:$4 sm:$0xff]   ;;  %v17410_v36 = vld [vmem:[%s17146_s22 + $0x490] ss:$144 sps:$4 sm:$0xff]  }
 0x10c   : > { %2927 = vmatprep.subr.bf16.mxu1 %v15171_v37  ;;  %3998 = vmatprep.subr.bf16.mxu0 %v15174_v39  ;;  %v15226_v37 = vld [vmem:[%s17080_s29 + $0x1020] ss:$24 sps:$4 sm:$0xff]   ;;  %v15237_v39 = vld [vmem:[%s17080_s29 + $0x1054] ss:$24 sps:$4 sm:$0xff]  }
 0x10f   : > { %2928 = vmatpush1.bf16.msra.mxu1 %v15169_v40  ;;  %3999 = vmatpush1.bf16.msra.mxu0 %v15172_v42  ;;  %v15240_v40 = vld [vmem:[%s17080_s29 + $0x154] ss:$24 sps:$4 sm:$0xff]   ;;  %v15238_v42 = vld [vmem:[%s17080_s29 + $0x150] ss:$24 sps:$4 sm:$0xff]  }
 0x110   : > { %3050 = vmatprep.subr.bf16.mxu1 %v15179_v44  ;;  %5591 = vmatprep.subr.bf16.mxu0 %v15183_v45  ;;  %v15245_v44 = vld [vmem:[%s17080_s29 + $0x1084] ss:$24 sps:$4 sm:$0xff]  }
 0x111   : > { %2857 = vmatmul.mubr.bf16.gmra.mrb[32].mxu1 %v15125_v41  ;;  %3928 = vmatmul.mubr.bf16.gmra.mrb[32].mxu0 %v17317_v46  ;;  %v15235_v41 = vld [vmem:[%s17080_s29 + $0x1050] ss:$24 sps:$4 sm:$0xff]   ;;  %v15249_v45 = vld [vmem:[%s17080_s29 + $0x184] ss:$24 sps:$4 sm:$0xff]  }
 0x112   : > { %2866 = vmatprep.mubr.bf16.mxu1 %v15133_v47  ;;  %3937 = vmatprep.mubr.bf16.mxu0 %v17321_v48  ;;  %v17428_v47 = vld [vmem:[%s17146_s22 + $0x5b0] ss:$144 sps:$4 sm:$0xff]  }
 0x119   : > { %2867 = vmatmul.mubr.bf16.gmra.mrb[36].mxu1 %v15137_v49  ;;  %3938 = vmatmul.mubr.bf16.gmra.mrb[36].mxu0 %v17327_v51  ;;  %v15243_v49 = vld [vmem:[%s17080_s29 + $0x1080] ss:$24 sps:$4 sm:$0xff]  }
 0x11a   : > { %2876 = vmatprep.mubr.bf16.mxu1 %v15151_v52  ;;  %3947 = vmatprep.mubr.bf16.mxu0 %v17331_v53  ;;  %v15252_v52 = vld [vmem:[%s17080_s29 + $0x10b4] ss:$24 sps:$4 sm:$0xff]  }
 0x121   : > { %2877 = vmatmul.mubr.bf16.gmra.mrb[40].mxu1 %v15155_v55  ;;  %3948 = vmatmul.mubr.bf16.gmra.mrb[40].mxu0 %v17337_v57  ;;  %v15255_v55 = vld [vmem:[%s17080_s29 + $0x1b4] ss:$24 sps:$4 sm:$0xff]  }
 0x122   : > { %2886 = vmatprep.mubr.bf16.mxu1 %v15163_v58  ;;  %3957 = vmatprep.mubr.bf16.mxu0 %v17341_v59  ;;  %v15250_v58 = vld [vmem:[%s17080_s29 + $0x10b0] ss:$24 sps:$4 sm:$0xff]  }
 0x129   : > { %2887 = vmatmul.mubr.bf16.gmra.mrb[44].mxu1 %v15167_v60  ;;  %3958 = vmatmul.mubr.bf16.gmra.mrb[44].mxu0 %v17347_v61  ;;  %v15253_v60 = vld [vmem:[%s17080_s29 + $0x1b0] ss:$24 sps:$4 sm:$0xff]  }
 0x12a   : > { %2929 = vmatprep.mubr.bf16.mxu1 %v17151_v50  ;;  %4000 = vmatprep.mubr.bf16.mxu0 %v17350_v62  ;;  %v15187_v50 = vld [vmem:[%s17080_s29 + $0x30] ss:$24 sps:$4 sm:$0xff]  }
 0x131   : > { %2930 = vmatmul.mubr.bf16.vlgmr.msra.gmra.mrb[0].mxu1 %v17174_v6  ;;  %4001 = vmatmul.mubr.bf16.vlgmr.msra.gmra.mrb[0].mxu0 %v17357_v1  ;;  %v17374_v6 = vld [vmem:[%s17146_s22 + $0x250] ss:$144 sps:$4 sm:$0xff]  }
 0x132   : > { %3051 = vmatpush1.bf16.msra.mxu1 %v15177_v0  ;;  %5592 = vmatpush1.bf16.msra.mxu0 %v15181_v2  ;;  %v15261_v0 = vld [vmem:[%s17080_s29 + $0x10e4] ss:$24 sps:$4 sm:$0xff]  }
 0x133   : > { %3052 = vmatprep.subr.bf16.mxu1 %v15186_v3  ;;  %5593 = vmatprep.subr.bf16.mxu0 %v15189_v5  ;;  %v15264_v2 = vld [vmem:[%s17080_s29 + $0x1e4] ss:$24 sps:$4 sm:$0xff]   ;;  %v17446_v3 = vld [vmem:[%s17146_s22 + $0x6d0] ss:$144 sps:$4 sm:$0xff]  }
 0x134   : > { %2939 = vmatprep.mubr.bf16.mxu1 %v17181_v11  ;;  %4010 = vmatprep.mubr.bf16.mxu0 %v17363_v7  ;;  %v15202_v11 = vld [vmem:[%s17080_s29 + $0xf90] ss:$24 sps:$4 sm:$0xff]   ;;  %v15259_v5 = vld [vmem:[%s17080_s29 + $0x10e0] ss:$24 sps:$4 sm:$0xff]  }
 0x136   : > { %3053 = vmatpush1.bf16.msra.mxu1 %v15184_v8  ;;  %5594 = vmatpush1.bf16.msra.mxu0 %v15187_v50  ;;  %v15270_v8 = vld [vmem:[%s17080_s29 + $0x1114] ss:$24 sps:$4 sm:$0xff]  }
 0x137   : > { %3054 = vmatprep.subr.bf16.mxu1 %v15195_v9  ;;  %5595 = vmatprep.subr.bf16.mxu0 %v15198_v10  ;;  %v15273_v50 = vld [vmem:[%s17080_s29 + $0x214] ss:$24 sps:$4 sm:$0xff]   ;;  %v15268_v9 = vld [vmem:[%s17080_s29 + $0x1110] ss:$24 sps:$4 sm:$0xff]  }
 0x138   : > { %v15271_v10 = vld [vmem:[%s17080_s29 + $0x210] ss:$24 sps:$4 sm:$0xff]  }
 0x139   : > { %2940 = vmatmul.mubr.bf16.gmra.mrb[4].mxu1 %v17191_v17  ;;  %4011 = vmatmul.mubr.bf16.gmra.mrb[4].mxu0 %v17374_v6  ;;  %v17392_v17 = vld [vmem:[%s17146_s22 + $0x370] ss:$144 sps:$4 sm:$0xff]  }
 0x13a   : > { %3055 = vmatpush1.bf16.msra.mxu1 %v15193_v12  ;;  %5596 = vmatpush1.bf16.msra.mxu0 %v15196_v14  ;;  %v15278_v12 = vld [vmem:[%s17080_s29 + $0x1144] ss:$24 sps:$4 sm:$0xff]  }
 0x13b   : > { %2949 = vmatprep.mubr.bf16.mxu1 %v17197_v21  ;;  %4020 = vmatprep.mubr.bf16.mxu0 %v17379_v15  ;;  %v15219_v21 = vld [vmem:[%s17080_s29 + $0xff4] ss:$24 sps:$4 sm:$0xff]   ;;  %v15282_v14 = vld [vmem:[%s17080_s29 + $0x244] ss:$24 sps:$4 sm:$0xff]  }
 0x13c   : > { %3056 = vmatprep.subr.bf16.mxu1 %v15204_v16  ;;  %5597 = vmatprep.subr.bf16.mxu0 %v15207_v18  ;;  %v17467_v16 = vld [vmem:[%s17146_s22 + $0x914] ss:$144 sps:$4 sm:$0xff]   ;;  %v15276_v18 = vld [vmem:[%s17080_s29 + $0x1140] ss:$24 sps:$4 sm:$0xff]  }
 0x13e   : > { %3057 = vmatpush1.bf16.msra.mxu1 %v15202_v11  ;;  %5598 = vmatpush1.bf16.msra.mxu0 %v15205_v20  ;;  %v15285_v11 = vld [vmem:[%s17080_s29 + $0x1174] ss:$24 sps:$4 sm:$0xff]  }
 0x13f   : > { %3058 = vmatprep.subr.bf16.mxu1 %v15212_v22  ;;  %5599 = vmatprep.subr.bf16.mxu0 %v15216_v23  ;;  %v15288_v20 = vld [vmem:[%s17080_s29 + $0x274] ss:$24 sps:$4 sm:$0xff]   ;;  %v15283_v22 = vld [vmem:[%s17080_s29 + $0x1170] ss:$24 sps:$4 sm:$0xff]  }
 0x140   : > { %v17479_v23 = vld [vmem:[%s17146_s22 + $0x910] ss:$144 sps:$4 sm:$0xff]  }
 0x141   : > { %2950 = vmatmul.mubr.bf16.gmra.mrb[8].mxu1 %v17209_v29  ;;  %4021 = vmatmul.mubr.bf16.gmra.mrb[8].mxu0 %v17392_v17  ;;  %v17413_v29 = vld [vmem:[%s17146_s22 + $0x5b4] ss:$144 sps:$4 sm:$0xff]  }
 0x142   : > { %2959 = vmatprep.mubr.bf16.mxu1 %v17213_v31  ;;  %4030 = vmatprep.mubr.bf16.mxu0 %v17395_v24  ;;  %v15229_v31 = vld [vmem:[%s17080_s29 + $0x120] ss:$24 sps:$4 sm:$0xff]  }
 0x143   : > { %3059 = vmatpush1.bf16.msra.mxu1 %v15210_v25  ;;  %5600 = vmatpush1.bf16.msra.mxu0 %v15214_v26  ;;  %v15286_v25 = vld [vmem:[%s17080_s29 + $0x270] ss:$24 sps:$4 sm:$0xff]   ;;  %v17483_v26 = vld [vmem:[%s17146_s22 + $0xa34] ss:$144 sps:$4 sm:$0xff]  }
 0x144   : > { %3060 = vmatprep.subr.bf16.mxu1 %v15219_v21  ;;  %5601 = vmatprep.subr.bf16.mxu0 %v15222_v27  ;;  %v15297_v21 = vld [vmem:[%s17080_s29 + $0x2a4] ss:$24 sps:$4 sm:$0xff]   ;;  %v15295_v27 = vld [vmem:[%s17080_s29 + $0x2a0] ss:$24 sps:$4 sm:$0xff]  }
 0x147   : > { %3061 = vmatpush1.bf16.msra.mxu1 %v15217_v28  ;;  %5602 = vmatpush1.bf16.msra.mxu0 %v15220_v30  ;;  %v15303_v28 = vld [vmem:[%s17080_s29 + $0x11d4] ss:$24 sps:$4 sm:$0xff]  }
 0x148   : > { %3062 = vmatprep.subr.bf16.mxu1 %v15228_v33  ;;  %5603 = vmatprep.subr.bf16.mxu0 %v15231_v35  ;;  %v15306_v30 = vld [vmem:[%s17080_s29 + $0x2d4] ss:$24 sps:$4 sm:$0xff]   ;;  %v15301_v33 = vld [vmem:[%s17080_s29 + $0x11d0] ss:$24 sps:$4 sm:$0xff]  }
 0x149   : > { %2960 = vmatmul.mubr.bf16.gmra.mrb[12].mxu1 %v17224_v38  ;;  %4031 = vmatmul.mubr.bf16.gmra.mrb[12].mxu0 %v17410_v36  ;;  %v17431_v38 = vld [vmem:[%s17146_s22 + $0x6d4] ss:$144 sps:$4 sm:$0xff]   ;;  %v15304_v35 = vld [vmem:[%s17080_s29 + $0x2d0] ss:$24 sps:$4 sm:$0xff]  }
 0x14a   : > { %2969 = vmatprep.mubr.bf16.mxu1 %v17231_v43  ;;  %4040 = vmatprep.mubr.bf16.mxu0 %v17413_v29  ;;  %v15247_v43 = vld [vmem:[%s17080_s29 + $0x180] ss:$24 sps:$4 sm:$0xff]  }
 0x14b   : > { %3063 = vmatpush1.bf16.msra.mxu1 %v15226_v37  ;;  %5604 = vmatpush1.bf16.msra.mxu0 %v15229_v31  ;;  %v15312_v37 = vld [vmem:[%s17080_s29 + $0x90c] ss:$24 sps:$4 sm:$0xff]   ;;  %v17499_v31 = vld [vmem:[%s17146_s22 + $0xa30] ss:$144 sps:$4 sm:$0xff]  }
 0x14c   : > { %3064 = vmatprep.subr.bf16.mxu1 %v15237_v39  ;;  %5605 = vmatprep.subr.bf16.mxu0 %v15240_v40  ;;  %v15315_v39 = vld [vmem:[%s17080_s29 + $0x304] ss:$24 sps:$4 sm:$0xff]  }
 0x14d   : > { %v17503_v40 = vld [vmem:[%s17146_s22 + $0xb54] ss:$144 sps:$4 sm:$0xff]  }
 0x14f   : > { %3065 = vmatpush1.bf16.msra.mxu1 %v15235_v41  ;;  %5606 = vmatpush1.bf16.msra.mxu0 %v15238_v42  ;;  %v15310_v41 = vld [vmem:[%s17080_s29 + $0x908] ss:$24 sps:$4 sm:$0xff]  }
 0x150   : > { %3066 = vmatprep.subr.bf16.mxu1 %v15245_v44  ;;  %5607 = vmatprep.subr.bf16.mxu0 %v15249_v45  ;;  %v15313_v42 = vld [vmem:[%s17080_s29 + $0x300] ss:$24 sps:$4 sm:$0xff]   ;;  %v15321_v44 = vld [vmem:[%s17080_s29 + $0x334] ss:$24 sps:$4 sm:$0xff]  }
 0x151   : > { %2970 = vmatmul.mubr.bf16.gmra.mrb[16].mxu1 %v17245_v54  ;;  %4041 = vmatmul.mubr.bf16.gmra.mrb[16].mxu0 %v17428_v47  ;;  %v17449_v54 = vld [vmem:[%s17146_s22 + $0x7f4] ss:$144 sps:$4 sm:$0xff]   ;;  %v15316_v45 = vld [vmem:[%s17080_s29 + $0x938] ss:$24 sps:$4 sm:$0xff]  }
 0x152   : > { %2979 = vmatprep.mubr.bf16.mxu1 %v17249_v56  ;;  %4050 = vmatprep.mubr.bf16.mxu0 %v17431_v38  ;;  %v15262_v56 = vld [vmem:[%s17080_s29 + $0x1e0] ss:$24 sps:$4 sm:$0xff]  }
 0x153   : > { %3067 = vmatpush1.bf16.msra.mxu1 %v15243_v49  ;;  %5608 = vmatpush1.bf16.msra.mxu0 %v15247_v43  ;;  %v15324_v49 = vld [vmem:[%s17080_s29 + $0x96c] ss:$24 sps:$4 sm:$0xff]  }
 0x154   : > { %3068 = vmatprep.subr.bf16.mxu1 %v15252_v52  ;;  %5609 = vmatprep.subr.bf16.mxu0 %v15255_v55  ;;  %v17548_v43 = vld [vmem:[%s17146_s22 + $0x124] ss:$144 sps:$4 sm:$0xff]   ;;  %v15325_v52 = vld [vmem:[%s17080_s29 + $0x360] ss:$24 sps:$4 sm:$0xff]  }
 0x155   : > { %v15330_v55 = vld [vmem:[%s17080_s29 + $0x99c] ss:$24 sps:$4 sm:$0xff]  }
 0x157   : > { %3069 = vmatpush1.bf16.msra.mxu1 %v15250_v58  ;;  %5610 = vmatpush1.bf16.msra.mxu0 %v15253_v60  ;;  %v15333_v58 = vld [vmem:[%s17080_s29 + $0x394] ss:$24 sps:$4 sm:$0xff]   ;;  %v15328_v60 = vld [vmem:[%s17080_s29 + $0x998] ss:$24 sps:$4 sm:$0xff]  }
 0x158   : > { %3070 = vmatprep.subr.bf16.mxu1 %v15261_v0  ;;  %5611 = vmatprep.subr.bf16.mxu0 %v15264_v2  ;;  %v15331_v0 = vld [vmem:[%s17080_s29 + $0x390] ss:$24 sps:$4 sm:$0xff]   ;;  %v15336_v2 = vld [vmem:[%s17080_s29 + $0x9cc] ss:$24 sps:$4 sm:$0xff]  }
 0x159   : > { %2980 = vmatmul.mubr.bf16.gmra.mrb[20].mxu1 %v17260_v63  ;;  %4051 = vmatmul.mubr.bf16.gmra.mrb[20].mxu0 %v17446_v3  ;;  %v17464_v63 = vld [vmem:[%s17146_s22 + $0x7f0] ss:$144 sps:$4 sm:$0xff]  }
 0x15a   : > { %2989 = vmatprep.mubr.bf16.mxu1 %v17267_v4  ;;  %4060 = vmatprep.mubr.bf16.mxu0 %v17449_v54  ;;  %v15280_v4 = vld [vmem:[%s17080_s29 + $0x240] ss:$24 sps:$4 sm:$0xff]  }
 0x15b   : > { %3071 = vmatpush1.bf16.msra.mxu1 %v15259_v5  ;;  %5612 = vmatpush1.bf16.msra.mxu0 %v15262_v56  ;;  %v15339_v5 = vld [vmem:[%s17080_s29 + $0x3c4] ss:$24 sps:$4 sm:$0xff]  }
 0x15c   : > { %3072 = vmatprep.subr.bf16.mxu1 %v15270_v8  ;;  %5613 = vmatprep.subr.bf16.mxu0 %v15273_v50  ;;  %v17566_v56 = vld [vmem:[%s17146_s22 + $0x244] ss:$144 sps:$4 sm:$0xff]   ;;  %v15337_v8 = vld [vmem:[%s17080_s29 + $0x3c0] ss:$24 sps:$4 sm:$0xff]  }
 0x15d   : > { %v15342_v50 = vld [vmem:[%s17080_s29 + $0x9fc] ss:$24 sps:$4 sm:$0xff]  }
 0x15f   : > { %3073 = vmatpush1.bf16.msra.mxu1 %v15268_v9  ;;  %5614 = vmatpush1.bf16.msra.mxu0 %v15271_v10  ;;  %v15345_v9 = vld [vmem:[%s17080_s29 + $0x3f4] ss:$24 sps:$4 sm:$0xff]  }
 0x160   : > { %3074 = vmatprep.subr.bf16.mxu1 %v15278_v12  ;;  %5615 = vmatprep.subr.bf16.mxu0 %v15282_v14  ;;  %v17580_v10 = vld [vmem:[%s17146_s22 + $0x364] ss:$144 sps:$4 sm:$0xff]   ;;  %v15340_v12 = vld [vmem:[%s17080_s29 + $0x9f8] ss:$24 sps:$4 sm:$0xff]  }
 0x161   : > { %2990 = vmatmul.mubr.bf16.gmra.mrb[24].mxu1 %v17278_v13  ;;  %4061 = vmatmul.mubr.bf16.gmra.mrb[24].mxu0 %v17464_v63  ;;  %v15294_v13 = vld [vmem:[%s17080_s29 + $0x11a4] ss:$24 sps:$4 sm:$0xff]   ;;  %v15343_v14 = vld [vmem:[%s17080_s29 + $0x3f0] ss:$24 sps:$4 sm:$0xff]  }
 0x162   : > { %2999 = vmatprep.mubr.bf16.mxu1 %v17285_v19  ;;  %4070 = vmatprep.mubr.bf16.mxu0 %v17467_v16  ;;  %v15292_v19 = vld [vmem:[%s17080_s29 + $0x11a0] ss:$24 sps:$4 sm:$0xff]  }
 0x163   : > { %3075 = vmatpush1.bf16.msra.mxu1 %v15276_v18  ;;  %5616 = vmatpush1.bf16.msra.mxu0 %v15280_v4  ;;  %v15348_v18 = vld [vmem:[%s17080_s29 + $0xa2c] ss:$24 sps:$4 sm:$0xff]   ;;  %v15346_v4 = vld [vmem:[%s17080_s29 + $0xa28] ss:$24 sps:$4 sm:$0xff]  }
 0x164   : > { %3076 = vmatprep.subr.bf16.mxu1 %v15285_v11  ;;  %5617 = vmatprep.subr.bf16.mxu0 %v15288_v20  ;;  %v15349_v11 = vld [vmem:[%s17080_s29 + $0x420] ss:$24 sps:$4 sm:$0xff]   ;;  %v15357_v20 = vld [vmem:[%s17080_s29 + $0x454] ss:$24 sps:$4 sm:$0xff]  }
 0x167   : > { %3077 = vmatpush1.bf16.msra.mxu1 %v15283_v22  ;;  %5618 = vmatpush1.bf16.msra.mxu0 %v15286_v25  ;;  %v17593_v22 = vld [vmem:[%s17146_s22 + $0x360] ss:$144 sps:$4 sm:$0xff]  }
 0x168   : > { %3078 = vmatprep.subr.bf16.mxu1 %v15294_v13  ;;  %5619 = vmatprep.subr.bf16.mxu0 %v15297_v21  ;;  %v15352_v25 = vld [vmem:[%s17080_s29 + $0xa58] ss:$24 sps:$4 sm:$0xff]   ;;  %v17600_v21 = vld [vmem:[%s17146_s22 + $0x484] ss:$144 sps:$4 sm:$0xff]  }
 0x169   : > { %3000 = vmatmul.mubr.bf16.gmra.mrb[28].mxu1 %v17299_v32  ;;  %4071 = vmatmul.mubr.bf16.gmra.mrb[28].mxu0 %v17479_v23  ;;  %v17510_v32 = vld [vmem:[%s17146_s22 + $0xb50] ss:$144 sps:$4 sm:$0xff]  }
 0x16a   : > { %3009 = vmatprep.mubr.bf16.mxu1 %v17303_v34  ;;  %4080 = vmatprep.mubr.bf16.mxu0 %v17483_v26  ;;  %v17513_v34 = vld [vmem:[%s17146_s22 + $0xc74] ss:$144 sps:$4 sm:$0xff]   ;;  %v15355_v13 = vld [vmem:[%s17080_s29 + $0x450] ss:$24 sps:$4 sm:$0xff]  }
 0x16b   : > { %3079 = vmatpush1.bf16.msra.mxu1 %v15292_v19  ;;  %5620 = vmatpush1.bf16.msra.mxu0 %v15295_v27  ;;  %v15360_v19 = vld [vmem:[%s17080_s29 + $0xa8c] ss:$24 sps:$4 sm:$0xff]  }
 0x16c   : > { %3080 = vmatprep.subr.bf16.mxu1 %v15303_v28  ;;  %5621 = vmatprep.subr.bf16.mxu0 %v15306_v30  ;;  %v15363_v27 = vld [vmem:[%s17080_s29 + $0x484] ss:$24 sps:$4 sm:$0xff]   ;;  %v15361_v28 = vld [vmem:[%s17080_s29 + $0x480] ss:$24 sps:$4 sm:$0xff]  }
 0x16d   : > { %v15366_v30 = vld [vmem:[%s17080_s29 + $0xabc] ss:$24 sps:$4 sm:$0xff]  }
 0x16f   : > { %3081 = vmatpush1.bf16.msra.mxu1 %v15301_v33  ;;  %5622 = vmatpush1.bf16.msra.mxu0 %v15304_v35  ;;  %v17611_v33 = vld [vmem:[%s17146_s22 + $0x480] ss:$144 sps:$4 sm:$0xff]  }
 0x170   : > { %3203 = vmatprep.subr.bf16.mxu1 %v15312_v37  ;;  %5744 = vmatprep.subr.bf16.mxu0 %v15315_v39  ;;  %v15364_v35 = vld [vmem:[%s17080_s29 + $0xab8] ss:$24 sps:$4 sm:$0xff]   ;;  %v17618_v39 = vld [vmem:[%s17146_s22 + $0x5a4] ss:$144 sps:$4 sm:$0xff]  }
 0x171   : > { %3010 = vmatmul.mubr.bf16.gmra.mrb[32].mxu1 %v17317_v46  ;;  %4081 = vmatmul.mubr.bf16.gmra.mrb[32].mxu0 %v17499_v31  ;;  %v17520_v46 = vld [vmem:[%s17146_s22 + $0xc70] ss:$144 sps:$4 sm:$0xff]  }
 0x172   : > { %3019 = vmatprep.mubr.bf16.mxu1 %v17321_v48  ;;  %4090 = vmatprep.mubr.bf16.mxu0 %v17503_v40  ;;  %v17523_v48 = vld [vmem:[%s17146_s22 + $0xd94] ss:$144 sps:$4 sm:$0xff]   ;;  %v15367_v37 = vld [vmem:[%s17080_s29 + $0x4b0] ss:$24 sps:$4 sm:$0xff]  }
 0x179   : > { %3020 = vmatmul.mubr.bf16.gmra.mrb[36].mxu1 %v17327_v51  ;;  %4091 = vmatmul.mubr.bf16.gmra.mrb[36].mxu0 %v17510_v32  ;;  %v17530_v51 = vld [vmem:[%s17146_s22 + $0xd90] ss:$144 sps:$4 sm:$0xff]  }
 0x17a   : > { %3029 = vmatprep.mubr.bf16.mxu1 %v17331_v53  ;;  %4100 = vmatprep.mubr.bf16.mxu0 %v17513_v34  ;;  %v15309_v53 = vld [vmem:[%s17146_s22 + $0x4] ss:$144 sps:$4 sm:$0xff]  }
 0x181   : > { %3030 = vmatmul.mubr.bf16.gmra.mrb[40].mxu1 %v17337_v57  ;;  %4101 = vmatmul.mubr.bf16.gmra.mrb[40].mxu0 %v17520_v46  ;;  %v15307_v57 = vld [vmem:[%s17146_s22] ss:$144 sps:$4 sm:$0xff]  }
 0x182   : > { %3039 = vmatprep.mubr.bf16.mxu1 %v17341_v59  ;;  %4110 = vmatprep.mubr.bf16.mxu0 %v17523_v48  ;;  %v15318_v59 = vld [vmem:[%s17080_s29 + $0x93c] ss:$24 sps:$4 sm:$0xff]  }
 0x189   : > { %3040 = vmatmul.mubr.bf16.gmra.mrb[44].mxu1 %v17347_v61  ;;  %4111 = vmatmul.mubr.bf16.gmra.mrb[44].mxu0 %v17530_v51  ;;  %v15319_v61 = vld [vmem:[%s17080_s29 + $0x330] ss:$24 sps:$4 sm:$0xff]  }
 0x18a   : > { %3082 = vmatprep.mubr.bf16.mxu1 %v17350_v62  ;;  %5623 = vmatprep.mubr.bf16.mxu0 %v15309_v53  ;;  %v15327_v62 = vld [vmem:[%s17080_s29 + $0x364] ss:$24 sps:$4 sm:$0xff]  }
 0x18b   : > { %v15372_v53 = vld [vmem:[%s17080_s29 + $0xaec] ss:$24 sps:$4 sm:$0xff]  }
 0x191   : > { %3083 = vmatmul.mubr.bf16.vlgmr.msra.gmra.mrb[0].mxu1 %v17357_v1  ;;  %5624 = vmatmul.mubr.bf16.vlgmr.msra.gmra.mrb[48].mxu0 %v15307_v57  ;;  %v15322_v1 = vld [vmem:[%s17080_s29 + $0x968] ss:$24 sps:$4 sm:$0xff]   ;;  %v15375_v57 = vld [vmem:[%s17080_s29 + $0x4e4] ss:$24 sps:$4 sm:$0xff]  }
 0x192   : > { %3204 = vmatpush1.bf16.msra.mxu1 %v15310_v41  ;;  %5745 = vmatpush1.bf16.msra.mxu0 %v15313_v42  ;;  %v15373_v41 = vld [vmem:[%s17080_s29 + $0x4e0] ss:$24 sps:$4 sm:$0xff]   ;;  %v15378_v42 = vld [vmem:[%s17080_s29 + $0xb1c] ss:$24 sps:$4 sm:$0xff]  }
 0x193   : > { %3205 = vmatprep.subr.bf16.mxu1 %v15318_v59  ;;  %5746 = vmatprep.subr.bf16.mxu0 %v15321_v44  ;;  %v15381_v59 = vld [vmem:[%s17080_s29 + $0x514] ss:$24 sps:$4 sm:$0xff]  }
 0x194   : > { %3092 = vmatprep.mubr.bf16.mxu1 %v17363_v7  ;;  %5633 = vmatprep.mubr.bf16.mxu0 %v17548_v43  ;;  %v17557_v7 = vld [vmem:[%s17146_s22 + $0x120] ss:$144 sps:$4 sm:$0xff]   ;;  %v17634_v44 = vld [vmem:[%s17146_s22 + $0x6c4] ss:$144 sps:$4 sm:$0xff]  }
 0x196   : > { %3206 = vmatpush1.bf16.msra.mxu1 %v15316_v45  ;;  %5747 = vmatpush1.bf16.msra.mxu0 %v15319_v61  ;;  %v15376_v45 = vld [vmem:[%s17080_s29 + $0xb18] ss:$24 sps:$4 sm:$0xff]  }
 0x197   : > { %3207 = vmatprep.subr.bf16.mxu1 %v15324_v49  ;;  %5748 = vmatprep.subr.bf16.mxu0 %v15327_v62  ;;  %v15379_v61 = vld [vmem:[%s17080_s29 + $0x510] ss:$24 sps:$4 sm:$0xff]   ;;  %v15384_v49 = vld [vmem:[%s17080_s29 + $0xb4c] ss:$24 sps:$4 sm:$0xff]  }
 0x198   : > { %v15382_v62 = vld [vmem:[%s17080_s29 + $0xb48] ss:$24 sps:$4 sm:$0xff]  }
 0x199   : > { %3093 = vmatmul.mubr.bf16.gmra.mrb[4].mxu1 %v17374_v6  ;;  %5634 = vmatmul.mubr.bf16.gmra.mrb[52].mxu0 %v17557_v7  ;;  %v15334_v6 = vld [vmem:[%s17080_s29 + $0x9c8] ss:$24 sps:$4 sm:$0xff]  }
 0x19a   : > { %3208 = vmatpush1.bf16.msra.mxu1 %v15322_v1  ;;  %5749 = vmatpush1.bf16.msra.mxu0 %v15325_v52  ;;  %v15385_v1 = vld [vmem:[%s17080_s29 + $0x540] ss:$24 sps:$4 sm:$0xff]   ;;  %v15393_v52 = vld [vmem:[%s17080_s29 + $0x574] ss:$24 sps:$4 sm:$0xff]  }
 0x19b   : > { %3102 = vmatprep.mubr.bf16.mxu1 %v17379_v15  ;;  %5643 = vmatprep.mubr.bf16.mxu0 %v17566_v56  ;;  %v17575_v15 = vld [vmem:[%s17146_s22 + $0x240] ss:$144 sps:$4 sm:$0xff]  }
 0x19c   : > { %3209 = vmatprep.subr.bf16.mxu1 %v15330_v55  ;;  %5750 = vmatprep.subr.bf16.mxu0 %v15333_v58  ;;  %v17647_v55 = vld [vmem:[%s17146_s22 + $0x6c0] ss:$144 sps:$4 sm:$0xff]  }
 0x19d   : > { %v15388_v58 = vld [vmem:[%s17080_s29 + $0xb78] ss:$24 sps:$4 sm:$0xff]  }
 0x19e   : > { %3210 = vmatpush1.bf16.msra.mxu1 %v15328_v60  ;;  %5751 = vmatpush1.bf16.msra.mxu0 %v15331_v0  ;;  %v15391_v60 = vld [vmem:[%s17080_s29 + $0x570] ss:$24 sps:$4 sm:$0xff]   ;;  %v17654_v0 = vld [vmem:[%s17146_s22 + $0x7e4] ss:$144 sps:$4 sm:$0xff]  }
 0x19f   : > { %3211 = vmatprep.subr.bf16.mxu1 %v15336_v2  ;;  %5752 = vmatprep.subr.bf16.mxu0 %v15339_v5  ;;  %v15396_v2 = vld [vmem:[%s17080_s29 + $0xbac] ss:$24 sps:$4 sm:$0xff]  }
 0x1a0   : > { %v15399_v5 = vld [vmem:[%s17080_s29 + $0x5a4] ss:$24 sps:$4 sm:$0xff]  }
 0x1a1   : > { %3103 = vmatmul.mubr.bf16.gmra.mrb[8].mxu1 %v17392_v17  ;;  %5644 = vmatmul.mubr.bf16.gmra.mrb[56].mxu0 %v17575_v15  ;;  %v15351_v17 = vld [vmem:[%s17080_s29 + $0x424] ss:$24 sps:$4 sm:$0xff]  }
 0x1a2   : > { %3112 = vmatprep.mubr.bf16.mxu1 %v17395_v24  ;;  %5653 = vmatprep.mubr.bf16.mxu0 %v17580_v10  ;;  %v15354_v24 = vld [vmem:[%s17080_s29 + $0xa5c] ss:$24 sps:$4 sm:$0xff]  }
 0x1a3   : > { %3212 = vmatpush1.bf16.msra.mxu1 %v15334_v6  ;;  %5753 = vmatpush1.bf16.msra.mxu0 %v15337_v8  ;;  %v15397_v6 = vld [vmem:[%s17080_s29 + $0x5a0] ss:$24 sps:$4 sm:$0xff]   ;;  %v15402_v8 = vld [vmem:[%s17080_s29 + $0xbdc] ss:$24 sps:$4 sm:$0xff]  }
 0x1a4   : > { %3213 = vmatprep.subr.bf16.mxu1 %v15342_v50  ;;  %5754 = vmatprep.subr.bf16.mxu0 %v15345_v9  ;;  %v17665_v50 = vld [vmem:[%s17146_s22 + $0x7e0] ss:$144 sps:$4 sm:$0xff]  }
 0x1a5   : > { %v15400_v9 = vld [vmem:[%s17080_s29 + $0xbd8] ss:$24 sps:$4 sm:$0xff]  }
 0x1a7   : > { %3214 = vmatpush1.bf16.msra.mxu1 %v15340_v12  ;;  %5755 = vmatpush1.bf16.msra.mxu0 %v15343_v14  ;;  %v17671_v12 = vld [vmem:[%s17146_s22 + $0x904] ss:$144 sps:$4 sm:$0xff]   ;;  %v15403_v14 = vld [vmem:[%s17080_s29 + $0x5d0] ss:$24 sps:$4 sm:$0xff]  }
 0x1a8   : > { %3215 = vmatprep.subr.bf16.mxu1 %v15348_v18  ;;  %5756 = vmatprep.subr.bf16.mxu0 %v15351_v17  ;;  %v15411_v18 = vld [vmem:[%s17080_s29 + $0xc0c] ss:$24 sps:$4 sm:$0xff]  }
 0x1a9   : > { %3113 = vmatmul.mubr.bf16.gmra.mrb[12].mxu1 %v17410_v36  ;;  %5654 = vmatmul.mubr.bf16.gmra.mrb[60].mxu0 %v17593_v22  ;;  %v15358_v36 = vld [vmem:[%s17080_s29 + $0xa88] ss:$24 sps:$4 sm:$0xff]   ;;  %v15414_v17 = vld [vmem:[%s17080_s29 + $0x604] ss:$24 sps:$4 sm:$0xff]  }
 0x1aa   : > { %3122 = vmatprep.mubr.bf16.mxu1 %v17413_v29  ;;  %5663 = vmatprep.mubr.bf16.mxu0 %v17600_v21  ;;  %v15369_v29 = vld [vmem:[%s17080_s29 + $0x4b4] ss:$24 sps:$4 sm:$0xff]  }
 0x1ab   : > { %3216 = vmatpush1.bf16.msra.mxu1 %v15346_v4  ;;  %5757 = vmatpush1.bf16.msra.mxu0 %v15349_v11  ;;  %v17689_v4 = vld [vmem:[%s17146_s22 + $0xa20] ss:$144 sps:$4 sm:$0xff]  }
 0x1ac   : > { %3217 = vmatprep.subr.bf16.mxu1 %v15354_v24  ;;  %5758 = vmatprep.subr.bf16.mxu0 %v15357_v20  ;;  %v17710_v11 = vld [vmem:[%s17146_s22 + $0xc60] ss:$144 sps:$4 sm:$0xff]   ;;  %v15417_v20 = vld [vmem:[%s17080_s29 + $0xc3c] ss:$24 sps:$4 sm:$0xff]  }
 0x1ad   : > { %v15409_v24 = vld [vmem:[%s17080_s29 + $0xc08] ss:$24 sps:$4 sm:$0xff]  }
 0x1af   : > { %3218 = vmatpush1.bf16.msra.mxu1 %v15352_v25  ;;  %5759 = vmatpush1.bf16.msra.mxu0 %v15355_v13  ;;  %v15420_v25 = vld [vmem:[%s17080_s29 + $0x634] ss:$24 sps:$4 sm:$0xff]   ;;  %v15415_v13 = vld [vmem:[%s17080_s29 + $0xc38] ss:$24 sps:$4 sm:$0xff]  }
 0x1b0   : > { %3219 = vmatprep.subr.bf16.mxu1 %v15360_v19  ;;  %5760 = vmatprep.subr.bf16.mxu0 %v15363_v27  ;;  %v15418_v19 = vld [vmem:[%s17080_s29 + $0x630] ss:$24 sps:$4 sm:$0xff]   ;;  %v15426_v27 = vld [vmem:[%s17080_s29 + $0x664] ss:$24 sps:$4 sm:$0xff]  }
 0x1b1   : > { %3123 = vmatmul.mubr.bf16.gmra.mrb[16].mxu1 %v17428_v47  ;;  %5664 = vmatmul.mubr.bf16.gmra.mrb[64].mxu0 %v17611_v33  ;;  %v15370_v47 = vld [vmem:[%s17080_s29 + $0xae8] ss:$24 sps:$4 sm:$0xff]  }
 0x1b2   : > { %3132 = vmatprep.mubr.bf16.mxu1 %v17431_v38  ;;  %5673 = vmatprep.mubr.bf16.mxu0 %v17618_v39  ;;  %v17629_v38 = vld [vmem:[%s17146_s22 + $0x5a0] ss:$144 sps:$4 sm:$0xff]  }
 0x1b3   : > { %3220 = vmatpush1.bf16.msra.mxu1 %v15358_v36  ;;  %5761 = vmatpush1.bf16.msra.mxu0 %v15361_v28  ;;  %v15421_v36 = vld [vmem:[%s17080_s29 + $0xc68] ss:$24 sps:$4 sm:$0xff]   ;;  %v15429_v28 = vld [vmem:[%s17080_s29 + $0xc9c] ss:$24 sps:$4 sm:$0xff]  }
 0x1b4   : > { %3221 = vmatprep.subr.bf16.mxu1 %v15366_v30  ;;  %5762 = vmatprep.subr.bf16.mxu0 %v15369_v29  ;;  %v15432_v30 = vld [vmem:[%s17080_s29 + $0x694] ss:$24 sps:$4 sm:$0xff]   ;;  %v15427_v29 = vld [vmem:[%s17080_s29 + $0xc98] ss:$24 sps:$4 sm:$0xff]  }
 0x1b7   : > { %3222 = vmatpush1.bf16.msra.mxu1 %v15364_v35  ;;  %5763 = vmatpush1.bf16.msra.mxu0 %v15367_v37  ;;  %v15430_v35 = vld [vmem:[%s17080_s29 + $0x690] ss:$24 sps:$4 sm:$0xff]   ;;  %v15435_v37 = vld [vmem:[%s17080_s29 + $0xccc] ss:$24 sps:$4 sm:$0xff]  }
 0x1b8   : > { %3223 = vmatprep.subr.bf16.mxu1 %v15372_v53  ;;  %5764 = vmatprep.subr.bf16.mxu0 %v15375_v57  ;;  %v15438_v53 = vld [vmem:[%s17080_s29 + $0x6c4] ss:$24 sps:$4 sm:$0xff]  }
 0x1b9   : > { %3133 = vmatmul.mubr.bf16.gmra.mrb[20].mxu1 %v17446_v3  ;;  %5674 = vmatmul.mubr.bf16.gmra.mrb[68].mxu0 %v17629_v38  ;;  %v15387_v3 = vld [vmem:[%s17080_s29 + $0x544] ss:$24 sps:$4 sm:$0xff]  }
 0x1ba   : > { %3142 = vmatprep.mubr.bf16.mxu1 %v17449_v54  ;;  %5683 = vmatprep.mubr.bf16.mxu0 %v17634_v44  ;;  %v15390_v54 = vld [vmem:[%s17080_s29 + $0xb7c] ss:$24 sps:$4 sm:$0xff]  }
 0x1bb   : > { %3224 = vmatpush1.bf16.msra.mxu1 %v15370_v47  ;;  %5765 = vmatpush1.bf16.msra.mxu0 %v15373_v41  ;;  %v17744_v57 = vld [vmem:[%s17146_s22 + $0x24c] ss:$144 sps:$4 sm:$0xff]   ;;  %v15436_v47 = vld [vmem:[%s17080_s29 + $0x6c0] ss:$24 sps:$4 sm:$0xff]  }
 0x1bc   : > { %3225 = vmatprep.subr.bf16.mxu1 %v15378_v42  ;;  %5766 = vmatprep.subr.bf16.mxu0 %v15381_v59  ;;  %v15441_v41 = vld [vmem:[%s17080_s29 + $0xcfc] ss:$24 sps:$4 sm:$0xff]   ;;  %v15439_v59 = vld [vmem:[%s17080_s29 + $0xcf8] ss:$24 sps:$4 sm:$0xff]  }
 0x1bd   : > { %v15444_v42 = vld [vmem:[%s17080_s29 + $0x6f4] ss:$24 sps:$4 sm:$0xff]  }
 0x1bf   : > { %3226 = vmatpush1.bf16.msra.mxu1 %v15376_v45  ;;  %5767 = vmatpush1.bf16.msra.mxu0 %v15379_v61  ;;  %v15442_v45 = vld [vmem:[%s17080_s29 + $0x6f0] ss:$24 sps:$4 sm:$0xff]   ;;  %v17760_v61 = vld [vmem:[%s17146_s22 + $0x36c] ss:$144 sps:$4 sm:$0xff]  }
 0x1c0   : > { %3227 = vmatprep.subr.bf16.mxu1 %v15384_v49  ;;  %5768 = vmatprep.subr.bf16.mxu0 %v15387_v3  ;;  %v15447_v49 = vld [vmem:[%s17080_s29 + $0xd2c] ss:$24 sps:$4 sm:$0xff]  }
 0x1c1   : > { %3143 = vmatmul.mubr.bf16.gmra.mrb[24].mxu1 %v17464_v63  ;;  %5684 = vmatmul.mubr.bf16.gmra.mrb[72].mxu0 %v17647_v55  ;;  %v15394_v63 = vld [vmem:[%s17080_s29 + $0xba8] ss:$24 sps:$4 sm:$0xff]   ;;  %v15450_v3 = vld [vmem:[%s17080_s29 + $0x724] ss:$24 sps:$4 sm:$0xff]  }
 0x1c2   : > { %3152 = vmatprep.mubr.bf16.mxu1 %v17467_v16  ;;  %5693 = vmatprep.mubr.bf16.mxu0 %v17654_v0  ;;  %v15405_v16 = vld [vmem:[%s17080_s29 + $0x5d4] ss:$24 sps:$4 sm:$0xff]  }
 0x1c3   : > { %3228 = vmatpush1.bf16.msra.mxu1 %v15382_v62  ;;  %5769 = vmatpush1.bf16.msra.mxu0 %v15385_v1  ;;  %v15453_v62 = vld [vmem:[%s17080_s29 + $0xd5c] ss:$24 sps:$4 sm:$0xff]  }
 0x1c4   : > { %3229 = vmatprep.subr.bf16.mxu1 %v15390_v54  ;;  %5770 = vmatprep.subr.bf16.mxu0 %v15393_v52  ;;  %v15456_v1 = vld [vmem:[%s17080_s29 + $0x754] ss:$24 sps:$4 sm:$0xff]   ;;  %v17771_v54 = vld [vmem:[%s17146_s22 + $0x368] ss:$144 sps:$4 sm:$0xff]  }
 0x1c5   : > { %v15451_v52 = vld [vmem:[%s17080_s29 + $0xd58] ss:$24 sps:$4 sm:$0xff]  }
 0x1c7   : > { %3230 = vmatpush1.bf16.msra.mxu1 %v15388_v58  ;;  %5771 = vmatpush1.bf16.msra.mxu0 %v15391_v60  ;;  %v15454_v58 = vld [vmem:[%s17080_s29 + $0x750] ss:$24 sps:$4 sm:$0xff]   ;;  %v17778_v60 = vld [vmem:[%s17146_s22 + $0x48c] ss:$144 sps:$4 sm:$0xff]  }
 0x1c8   : > { %3231 = vmatprep.subr.bf16.mxu1 %v15396_v2  ;;  %5772 = vmatprep.subr.bf16.mxu0 %v15399_v5  ;;  %v15459_v2 = vld [vmem:[%s17080_s29 + $0xd8c] ss:$24 sps:$4 sm:$0xff]  }
 0x1c9   : > { %3153 = vmatmul.mubr.bf16.gmra.mrb[28].mxu1 %v17479_v23  ;;  %5694 = vmatmul.mubr.bf16.gmra.mrb[76].mxu0 %v17665_v50  ;;  %v17679_v23 = vld [vmem:[%s17146_s22 + $0x900] ss:$144 sps:$4 sm:$0xff]   ;;  %v15462_v5 = vld [vmem:[%s17080_s29 + $0x784] ss:$24 sps:$4 sm:$0xff]  }
 0x1ca   : > { %3162 = vmatprep.mubr.bf16.mxu1 %v17483_v26  ;;  %5703 = vmatprep.mubr.bf16.mxu0 %v17671_v12  ;;  %v17684_v26 = vld [vmem:[%s17146_s22 + $0xa24] ss:$144 sps:$4 sm:$0xff]  }
 0x1cb   : > { %3232 = vmatpush1.bf16.msra.mxu1 %v15394_v63  ;;  %5773 = vmatpush1.bf16.msra.mxu0 %v15397_v6  ;;  %v15460_v63 = vld [vmem:[%s17080_s29 + $0x780] ss:$24 sps:$4 sm:$0xff]   ;;  %v15465_v6 = vld [vmem:[%s17080_s29 + $0xdbc] ss:$24 sps:$4 sm:$0xff]  }
 0x1cc   : > { %3233 = vmatprep.subr.bf16.mxu1 %v15402_v8  ;;  %5774 = vmatprep.subr.bf16.mxu0 %v15405_v16  ;;  %v17789_v8 = vld [vmem:[%s17146_s22 + $0x488] ss:$144 sps:$4 sm:$0xff]  }
 0x1cd   : > { %v15463_v16 = vld [vmem:[%s17080_s29 + $0xdb8] ss:$24 sps:$4 sm:$0xff]  }
 0x1cf   : > { %3234 = vmatpush1.bf16.msra.mxu1 %v15400_v9  ;;  %5775 = vmatpush1.bf16.msra.mxu0 %v15403_v14  ;;  %v15466_v9 = vld [vmem:[%s17080_s29 + $0x7b0] ss:$24 sps:$4 sm:$0xff]   ;;  %v17796_v14 = vld [vmem:[%s17146_s22 + $0x5ac] ss:$144 sps:$4 sm:$0xff]  }
 0x1d0   : > { %3356 = vmatprep.subr.bf16.mxu1 %v15411_v18  ;;  %5897 = vmatprep.subr.bf16.mxu0 %v15414_v17  ;;  %v15471_v18 = vld [vmem:[%s17080_s29 + $0xdec] ss:$24 sps:$4 sm:$0xff]  }
 0x1d1   : > { %3163 = vmatmul.mubr.bf16.gmra.mrb[32].mxu1 %v17499_v31  ;;  %5704 = vmatmul.mubr.bf16.gmra.mrb[80].mxu0 %v17679_v23  ;;  %v17694_v31 = vld [vmem:[%s17146_s22 + $0xb44] ss:$144 sps:$4 sm:$0xff]  }
 0x1d2   : > { %3172 = vmatprep.mubr.bf16.mxu1 %v17503_v40  ;;  %5713 = vmatprep.mubr.bf16.mxu0 %v17684_v26  ;;  %v17699_v40 = vld [vmem:[%s17146_s22 + $0xb40] ss:$144 sps:$4 sm:$0xff]   ;;  %v15474_v17 = vld [vmem:[%s17080_s29 + $0x7e4] ss:$24 sps:$4 sm:$0xff]  }
 0x1d9   : > { %3173 = vmatmul.mubr.bf16.gmra.mrb[36].mxu1 %v17510_v32  ;;  %5714 = vmatmul.mubr.bf16.gmra.mrb[84].mxu0 %v17689_v4  ;;  %v17704_v32 = vld [vmem:[%s17146_s22 + $0xc64] ss:$144 sps:$4 sm:$0xff]  }
 0x1da   : > { %3182 = vmatprep.mubr.bf16.mxu1 %v17513_v34  ;;  %5723 = vmatprep.mubr.bf16.mxu0 %v17694_v31  ;;  %v15408_v34 = vld [vmem:[%s17146_s22 + $0xc] ss:$144 sps:$4 sm:$0xff]  }
 0x1e1   : > { %3183 = vmatmul.mubr.bf16.gmra.mrb[40].mxu1 %v17520_v46  ;;  %5724 = vmatmul.mubr.bf16.gmra.mrb[88].mxu0 %v17699_v40  ;;  %v15406_v46 = vld [vmem:[%s17146_s22 + $0x8] ss:$144 sps:$4 sm:$0xff]  }
 0x1e2   : > { %3192 = vmatprep.mubr.bf16.mxu1 %v17523_v48  ;;  %5733 = vmatprep.mubr.bf16.mxu0 %v17704_v32  ;;  %v15412_v48 = vld [vmem:[%s17080_s29 + $0x600] ss:$24 sps:$4 sm:$0xff]  }
 0x1e9   : > { %3193 = vmatmul.mubr.bf16.gmra.mrb[44].mxu1 %v17530_v51  ;;  %5734 = vmatmul.mubr.bf16.gmra.mrb[92].mxu0 %v17710_v11  ;;  %v15423_v51 = vld [vmem:[%s17080_s29 + $0xc6c] ss:$24 sps:$4 sm:$0xff]  }
 0x1ea   : > { %3235 = vmatprep.mubr.bf16.mxu1 %v17548_v43  ;;  %5776 = vmatprep.mubr.bf16.mxu0 %v15408_v34  ;;  %v17726_v43 = vld [vmem:[%s17146_s22 + $0x12c] ss:$144 sps:$4 sm:$0xff]   ;;  %v15472_v34 = vld [vmem:[%s17080_s29 + $0x7e0] ss:$24 sps:$4 sm:$0xff]  }
 0x1f1   : > { %3236 = vmatmul.mubr.bf16.vlgmr.msra.gmra.mrb[48].mxu1 %v17557_v7  ;;  %5777 = vmatmul.mubr.bf16.vlgmr.msra.gmra.mrb[48].mxu0 %v15406_v46  ;;  %v15424_v7 = vld [vmem:[%s17080_s29 + $0x660] ss:$24 sps:$4 sm:$0xff]   ;;  %v15477_v46 = vld [vmem:[%s17080_s29 + $0xe1c] ss:$24 sps:$4 sm:$0xff]  }
 0x1f2   : > { %3357 = vmatpush1.bf16.msra.mxu1 %v15409_v24  ;;  %5898 = vmatpush1.bf16.msra.mxu0 %v15412_v48  ;;  %v17807_v24 = vld [vmem:[%s17146_s22 + $0x5a8] ss:$144 sps:$4 sm:$0xff]  }
 0x1f3   : > { %3358 = vmatprep.subr.bf16.mxu1 %v15417_v20  ;;  %5899 = vmatprep.subr.bf16.mxu0 %v15420_v25  ;;  %v15475_v48 = vld [vmem:[%s17080_s29 + $0xe18] ss:$24 sps:$4 sm:$0xff]   ;;  %v17814_v25 = vld [vmem:[%s17146_s22 + $0x6cc] ss:$144 sps:$4 sm:$0xff]  }
 0x1f4   : > { %3245 = vmatprep.mubr.bf16.mxu1 %v17566_v56  ;;  %5786 = vmatprep.mubr.bf16.mxu0 %v17726_v43  ;;  %v17735_v56 = vld [vmem:[%s17146_s22 + $0x128] ss:$144 sps:$4 sm:$0xff]  }
 0x1f5   : > { %v15478_v20 = vld [vmem:[%s17080_s29 + $0x810] ss:$24 sps:$4 sm:$0xff]  }
 0x1f6   : > { %3359 = vmatpush1.bf16.msra.mxu1 %v15415_v13  ;;  %5900 = vmatpush1.bf16.msra.mxu0 %v15418_v19  ;;  %v15483_v13 = vld [vmem:[%s17080_s29 + $0xe4c] ss:$24 sps:$4 sm:$0xff]  }
 0x1f7   : > { %3360 = vmatprep.subr.bf16.mxu1 %v15423_v51  ;;  %5901 = vmatprep.subr.bf16.mxu0 %v15426_v27  ;;  %v15486_v19 = vld [vmem:[%s17080_s29 + $0x844] ss:$24 sps:$4 sm:$0xff]   ;;  %v15492_v27 = vld [vmem:[%s17080_s29 + $0x874] ss:$24 sps:$4 sm:$0xff]  }
 0x1f8   : > { %v15489_v51 = vld [vmem:[%s17080_s29 + $0xe7c] ss:$24 sps:$4 sm:$0xff]  }
 0x1f9   : > { %3246 = vmatmul.mubr.bf16.gmra.mrb[52].mxu1 %v17575_v15  ;;  %5787 = vmatmul.mubr.bf16.gmra.mrb[52].mxu0 %v17735_v56  ;;  %v15433_v15 = vld [vmem:[%s17080_s29 + $0xcc8] ss:$24 sps:$4 sm:$0xff]  }
 0x1fa   : > { %3361 = vmatpush1.bf16.msra.mxu1 %v15421_v36  ;;  %5902 = vmatpush1.bf16.msra.mxu0 %v15424_v7  ;;  %v17825_v36 = vld [vmem:[%s17146_s22 + $0x6c8] ss:$144 sps:$4 sm:$0xff]  }
 0x1fb   : > { %3255 = vmatprep.mubr.bf16.mxu1 %v17580_v10  ;;  %5796 = vmatprep.mubr.bf16.mxu0 %v17744_v57  ;;  %v17753_v10 = vld [vmem:[%s17146_s22 + $0x248] ss:$144 sps:$4 sm:$0xff]  }
 0x1fc   : > { %3362 = vmatprep.subr.bf16.mxu1 %v15429_v28  ;;  %5903 = vmatprep.subr.bf16.mxu0 %v15432_v30  ;;  %v15487_v7 = vld [vmem:[%s17080_s29 + $0xe78] ss:$24 sps:$4 sm:$0xff]   ;;  %v17832_v30 = vld [vmem:[%s17146_s22 + $0x7ec] ss:$144 sps:$4 sm:$0xff]  }
 0x1fd   : > { %v15490_v28 = vld [vmem:[%s17080_s29 + $0x870] ss:$24 sps:$4 sm:$0xff]  }
 0x1fe   : > { %3363 = vmatpush1.bf16.msra.mxu1 %v15427_v29  ;;  %5904 = vmatpush1.bf16.msra.mxu0 %v15430_v35  ;;  %v15495_v29 = vld [vmem:[%s17080_s29 + $0xeac] ss:$24 sps:$4 sm:$0xff]  }
 0x1ff   : > { %3364 = vmatprep.subr.bf16.mxu1 %v15435_v37  ;;  %5905 = vmatprep.subr.bf16.mxu0 %v15438_v53  ;;  %v15498_v35 = vld [vmem:[%s17080_s29 + $0x8a4] ss:$24 sps:$4 sm:$0xff]   ;;  %v15496_v37 = vld [vmem:[%s17080_s29 + $0x8a0] ss:$24 sps:$4 sm:$0xff]  }
 0x200   : > { %v15501_v53 = vld [vmem:[%s17080_s29 + $0xedc] ss:$24 sps:$4 sm:$0xff]  }
 0x201   : > { %3256 = vmatmul.mubr.bf16.gmra.mrb[56].mxu1 %v17593_v22  ;;  %5797 = vmatmul.mubr.bf16.gmra.mrb[56].mxu0 %v17753_v10  ;;  %v15445_v22 = vld [vmem:[%s17080_s29 + $0xd28] ss:$24 sps:$4 sm:$0xff]  }
 0x202   : > { %3265 = vmatprep.mubr.bf16.mxu1 %v17600_v21  ;;  %5806 = vmatprep.mubr.bf16.mxu0 %v17760_v61  ;;  %v15448_v21 = vld [vmem:[%s17080_s29 + $0x720] ss:$24 sps:$4 sm:$0xff]  }
 0x203   : > { %3365 = vmatpush1.bf16.msra.mxu1 %v15433_v15  ;;  %5906 = vmatpush1.bf16.msra.mxu0 %v15436_v47  ;;  %v17843_v15 = vld [vmem:[%s17146_s22 + $0x7e8] ss:$144 sps:$4 sm:$0xff]  }
 0x204   : > { %3366 = vmatprep.subr.bf16.mxu1 %v15441_v41  ;;  %5907 = vmatprep.subr.bf16.mxu0 %v15444_v42  ;;  %v15499_v47 = vld [vmem:[%s17080_s29 + $0xed8] ss:$24 sps:$4 sm:$0xff]   ;;  %v17850_v42 = vld [vmem:[%s17146_s22 + $0x90c] ss:$144 sps:$4 sm:$0xff]  }
 0x205   : > { %v15502_v41 = vld [vmem:[%s17080_s29 + $0x8d0] ss:$24 sps:$4 sm:$0xff]  }
 0x207   : > { %3367 = vmatpush1.bf16.msra.mxu1 %v15439_v59  ;;  %5908 = vmatpush1.bf16.msra.mxu0 %v15442_v45  ;;  %v15510_v59 = vld [vmem:[%s17080_s29 + $0xf0c] ss:$24 sps:$4 sm:$0xff]  }
 0x208   : > { %3368 = vmatprep.subr.bf16.mxu1 %v15447_v49  ;;  %5909 = vmatprep.subr.bf16.mxu0 %v15450_v3  ;;  %v15513_v45 = vld [vmem:[%s17080_s29 + $0x14] ss:$24 sps:$4 sm:$0xff]   ;;  %v17867_v49 = vld [vmem:[%s17146_s22 + $0xa28] ss:$144 sps:$4 sm:$0xff]  }
 0x209   : > { %3266 = vmatmul.mubr.bf16.gmra.mrb[60].mxu1 %v17611_v33  ;;  %5807 = vmatmul.mubr.bf16.gmra.mrb[60].mxu0 %v17771_v54  ;;  %v15457_v33 = vld [vmem:[%s17080_s29 + $0xd88] ss:$24 sps:$4 sm:$0xff]   ;;  %v17882_v3 = vld [vmem:[%s17146_s22 + $0xc6c] ss:$144 sps:$4 sm:$0xff]  }
 0x20a   : > { %3275 = vmatprep.mubr.bf16.mxu1 %v17618_v39  ;;  %5816 = vmatprep.mubr.bf16.mxu0 %v17778_v60  ;;  %v15468_v39 = vld [vmem:[%s17080_s29 + $0x7b4] ss:$24 sps:$4 sm:$0xff]  }
 0x20b   : > { %3369 = vmatpush1.bf16.msra.mxu1 %v15445_v22  ;;  %5910 = vmatpush1.bf16.msra.mxu0 %v15448_v21  ;;  %v16476_v22 = vld [vmem:[%s17146_s22 + $0xd80] ss:$144 sps:$4 sm:$0xff]  }
 0x20c   : > { %3370 = vmatprep.subr.bf16.mxu1 %v15453_v62  ;;  %5911 = vmatprep.subr.bf16.mxu0 %v15456_v1  ;;  %v15505_v21 = vld [vmem:[%s17146_s22 + $0x10] ss:$144 sps:$4 sm:$0xff]  }
 0x20d   : > { %v15508_v62 = vld [vmem:[%s17080_s29 + $0xf08] ss:$24 sps:$4 sm:$0xff]  }
 0x20e   : > { %v15511_v1 = vld [vmem:[%s17080_s29 + $0x10] ss:$24 sps:$4 sm:$0xff]  }
 0x20f   : > { %3371 = vmatpush1.bf16.msra.mxu1 %v15451_v52  ;;  %5912 = vmatpush1.bf16.msra.mxu0 %v15454_v58  ;;  %v15516_v52 = vld [vmem:[%s17080_s29 + $0xf3c] ss:$24 sps:$4 sm:$0xff]  }
 0x210   : > { %3372 = vmatprep.subr.bf16.mxu1 %v15459_v2  ;;  %5913 = vmatprep.subr.bf16.mxu0 %v15462_v5  ;;  %v15519_v58 = vld [vmem:[%s17080_s29 + $0x44] ss:$24 sps:$4 sm:$0xff]   ;;  %v15514_v2 = vld [vmem:[%s17080_s29 + $0xf38] ss:$24 sps:$4 sm:$0xff]  }
 0x211   : > { %3276 = vmatmul.mubr.bf16.gmra.mrb[64].mxu1 %v17629_v38  ;;  %5817 = vmatmul.mubr.bf16.gmra.mrb[64].mxu0 %v17789_v8  ;;  %v15469_v38 = vld [vmem:[%s17080_s29 + $0xde8] ss:$24 sps:$4 sm:$0xff]  }
 0x212   : > { %3285 = vmatprep.mubr.bf16.mxu1 %v17634_v44  ;;  %5826 = vmatprep.mubr.bf16.mxu0 %v17796_v14  ;;  %v15480_v44 = vld [vmem:[%s17080_s29 + $0x814] ss:$24 sps:$4 sm:$0xff]   ;;  %v15517_v5 = vld [vmem:[%s17080_s29 + $0x40] ss:$24 sps:$4 sm:$0xff]  }
 0x213   : > { %3373 = vmatpush1.bf16.msra.mxu1 %v15457_v33  ;;  %5914 = vmatpush1.bf16.msra.mxu0 %v15460_v63  ;;  %v15522_v33 = vld [vmem:[%s17080_s29 + $0xf6c] ss:$24 sps:$4 sm:$0xff]  }
 0x214   : > { %3374 = vmatprep.subr.bf16.mxu1 %v15465_v6  ;;  %5915 = vmatprep.subr.bf16.mxu0 %v15468_v39  ;;  %v17904_v63 = vld [vmem:[%s17146_s22 + $0x134] ss:$144 sps:$4 sm:$0xff]   ;;  %v15523_v6 = vld [vmem:[%s17080_s29 + $0x70] ss:$24 sps:$4 sm:$0xff]  }
 0x215   : > { %v15528_v39 = vld [vmem:[%s17080_s29 + $0xf9c] ss:$24 sps:$4 sm:$0xff]  }
 0x217   : > { %3375 = vmatpush1.bf16.msra.mxu1 %v15463_v16  ;;  %5916 = vmatpush1.bf16.msra.mxu0 %v15466_v9  ;;  %v15531_v16 = vld [vmem:[%s17080_s29 + $0xa4] ss:$24 sps:$4 sm:$0xff]   ;;  %v15526_v9 = vld [vmem:[%s17080_s29 + $0xf98] ss:$24 sps:$4 sm:$0xff]  }
 0x218   : > { %3376 = vmatprep.subr.bf16.mxu1 %v15471_v18  ;;  %5917 = vmatprep.subr.bf16.mxu0 %v15474_v17  ;;  %v15529_v18 = vld [vmem:[%s17080_s29 + $0xa0] ss:$24 sps:$4 sm:$0xff]   ;;  %v15534_v17 = vld [vmem:[%s17080_s29 + $0xfcc] ss:$24 sps:$4 sm:$0xff]  }
 0x219   : > { %3286 = vmatmul.mubr.bf16.gmra.mrb[68].mxu1 %v17647_v55  ;;  %5827 = vmatmul.mubr.bf16.gmra.mrb[68].mxu0 %v17807_v24  ;;  %v15481_v55 = vld [vmem:[%s17080_s29 + $0xe48] ss:$24 sps:$4 sm:$0xff]  }
 0x21a   : > { %3295 = vmatprep.mubr.bf16.mxu1 %v17654_v0  ;;  %5836 = vmatprep.mubr.bf16.mxu0 %v17814_v25  ;;  %v15484_v0 = vld [vmem:[%s17080_s29 + $0x840] ss:$24 sps:$4 sm:$0xff]  }
 0x21b   : > { %3377 = vmatpush1.bf16.msra.mxu1 %v15469_v38  ;;  %5918 = vmatpush1.bf16.msra.mxu0 %v15472_v34  ;;  %v15537_v38 = vld [vmem:[%s17080_s29 + $0xd4] ss:$24 sps:$4 sm:$0xff]  }
 0x21c   : > { %3378 = vmatprep.subr.bf16.mxu1 %v15477_v46  ;;  %5919 = vmatprep.subr.bf16.mxu0 %v15480_v44  ;;  %v17922_v34 = vld [vmem:[%s17146_s22 + $0x254] ss:$144 sps:$4 sm:$0xff]   ;;  %v15535_v46 = vld [vmem:[%s17080_s29 + $0xd0] ss:$24 sps:$4 sm:$0xff]  }
 0x21d   : > { %v15540_v44 = vld [vmem:[%s17080_s29 + $0xffc] ss:$24 sps:$4 sm:$0xff]  }
 0x21f   : > { %3379 = vmatpush1.bf16.msra.mxu1 %v15475_v48  ;;  %5920 = vmatpush1.bf16.msra.mxu0 %v15478_v20  ;;  %v15543_v48 = vld [vmem:[%s17080_s29 + $0x104] ss:$24 sps:$4 sm:$0xff]  }
 0x220   : > { %3380 = vmatprep.subr.bf16.mxu1 %v15483_v13  ;;  %5921 = vmatprep.subr.bf16.mxu0 %v15486_v19  ;;  %v17936_v20 = vld [vmem:[%s17146_s22 + $0x374] ss:$144 sps:$4 sm:$0xff]   ;;  %v15538_v13 = vld [vmem:[%s17080_s29 + $0xff8] ss:$24 sps:$4 sm:$0xff]  }
 0x221   : > { %3296 = vmatmul.mubr.bf16.gmra.mrb[72].mxu1 %v17665_v50  ;;  %5837 = vmatmul.mubr.bf16.gmra.mrb[72].mxu0 %v17825_v36  ;;  %v15493_v50 = vld [vmem:[%s17080_s29 + $0xea8] ss:$24 sps:$4 sm:$0xff]  }
 0x222   : > { %3305 = vmatprep.mubr.bf16.mxu1 %v17671_v12  ;;  %5846 = vmatprep.mubr.bf16.mxu0 %v17832_v30  ;;  %v15504_v12 = vld [vmem:[%s17080_s29 + $0x8d4] ss:$24 sps:$4 sm:$0xff]   ;;  %v15541_v19 = vld [vmem:[%s17080_s29 + $0x100] ss:$24 sps:$4 sm:$0xff]  }
 0x223   : > { %3381 = vmatpush1.bf16.msra.mxu1 %v15481_v55  ;;  %5922 = vmatpush1.bf16.msra.mxu0 %v15484_v0  ;;  %v15546_v55 = vld [vmem:[%s17080_s29 + $0x102c] ss:$24 sps:$4 sm:$0xff]  }
 0x224   : > { %3382 = vmatprep.subr.bf16.mxu1 %v15489_v51  ;;  %5923 = vmatprep.subr.bf16.mxu0 %v15492_v27  ;;  %v15544_v51 = vld [vmem:[%s17080_s29 + $0x1028] ss:$24 sps:$4 sm:$0xff]  }
 0x225   : > { %v15547_v27 = vld [vmem:[%s17080_s29 + $0x130] ss:$24 sps:$4 sm:$0xff]  }
 0x227   : > { %3383 = vmatpush1.bf16.msra.mxu1 %v15487_v7  ;;  %5924 = vmatpush1.bf16.msra.mxu0 %v15490_v28  ;;  %v15552_v28 = vld [vmem:[%s17080_s29 + $0x105c] ss:$24 sps:$4 sm:$0xff]  }
 0x228   : > { %3384 = vmatprep.subr.bf16.mxu1 %v15495_v29  ;;  %5925 = vmatprep.subr.bf16.mxu0 %v15498_v35  ;;  %v15555_v29 = vld [vmem:[%s17080_s29 + $0x164] ss:$24 sps:$4 sm:$0xff]  }
 0x229   : > { %3306 = vmatmul.mubr.bf16.gmra.mrb[76].mxu1 %v17679_v23  ;;  %5847 = vmatmul.mubr.bf16.gmra.mrb[76].mxu0 %v17843_v15  ;;  %v17857_v23 = vld [vmem:[%s17146_s22 + $0x908] ss:$144 sps:$4 sm:$0xff]  }
 0x22a   : > { %3315 = vmatprep.mubr.bf16.mxu1 %v17684_v26  ;;  %5856 = vmatprep.mubr.bf16.mxu0 %v17850_v42  ;;  %v17862_v26 = vld [vmem:[%s17146_s22 + $0xa2c] ss:$144 sps:$4 sm:$0xff]  }
 0x22b   : > { %3385 = vmatpush1.bf16.msra.mxu1 %v15493_v50  ;;  %5926 = vmatpush1.bf16.msra.mxu0 %v15496_v37  ;;  %v17957_v50 = vld [vmem:[%s17146_s22 + $0x370] ss:$144 sps:$4 sm:$0xff]  }
 0x22c   : > { %3386 = vmatprep.subr.bf16.mxu1 %v15501_v53  ;;  %5927 = vmatprep.subr.bf16.mxu0 %v15504_v12  ;;  %v15550_v37 = vld [vmem:[%s17080_s29 + $0x1058] ss:$24 sps:$4 sm:$0xff]   ;;  %v17964_v12 = vld [vmem:[%s17146_s22 + $0x494] ss:$144 sps:$4 sm:$0xff]  }
 0x22d   : > { %v15553_v53 = vld [vmem:[%s17080_s29 + $0x160] ss:$24 sps:$4 sm:$0xff]  }
 0x22f   : > { %3387 = vmatpush1.bf16.msra.mxu1 %v15499_v47  ;;  %5928 = vmatpush1.bf16.msra.mxu0 %v15502_v41  ;;  %v15558_v47 = vld [vmem:[%s17080_s29 + $0x108c] ss:$24 sps:$4 sm:$0xff]  }
 0x230   : > { %3509 = vmatprep.subr.bf16.mxu1 %v15510_v59  ;;  %6509 = vmatprep.subr.bf16.mxu0 %v15513_v45  ;;  %v15561_v41 = vld [vmem:[%s17080_s29 + $0x194] ss:$24 sps:$4 sm:$0xff]   ;;  %v15556_v45 = vld [vmem:[%s17080_s29 + $0x1088] ss:$24 sps:$4 sm:$0xff]  }
 0x231   : > { %3316 = vmatmul.mubr.bf16.gmra.mrb[80].mxu1 %v17689_v4  ;;  %5857 = vmatmul.mubr.bf16.gmra.mrb[80].mxu0 %v17857_v23  ;;  %v17872_v4 = vld [vmem:[%s17146_s22 + $0xb4c] ss:$144 sps:$4 sm:$0xff]  }
 0x232   : > { %3325 = vmatprep.mubr.bf16.mxu1 %v17694_v31  ;;  %5866 = vmatprep.mubr.bf16.mxu0 %v17862_v26  ;;  %v17877_v31 = vld [vmem:[%s17146_s22 + $0xb48] ss:$144 sps:$4 sm:$0xff]  }
 0x239   : > { %3326 = vmatmul.mubr.bf16.gmra.mrb[84].mxu1 %v17699_v40  ;;  %5867 = vmatmul.mubr.bf16.gmra.mrb[84].mxu0 %v17867_v49  ;;  %v16474_v40 = vld [vmem:[%s17146_s22 + $0xd84] ss:$144 sps:$4 sm:$0xff]  }
 0x23a   : > { %3335 = vmatprep.mubr.bf16.mxu1 %v17704_v32  ;;  %5876 = vmatprep.mubr.bf16.mxu0 %v17872_v4  ;;  %v15507_v32 = vld [vmem:[%s17146_s22 + $0x14] ss:$144 sps:$4 sm:$0xff]  }
 0x241   : > { %3336 = vmatmul.mubr.bf16.gmra.mrb[88].mxu1 %v17710_v11  ;;  %5877 = vmatmul.mubr.bf16.gmra.mrb[88].mxu0 %v17877_v31  ;;  %v17888_v11 = vld [vmem:[%s17146_s22 + $0xc68] ss:$144 sps:$4 sm:$0xff]  }
 0x242   : > { %3345 = vmatprep.mubr.bf16.mxu1 %v16474_v40  ;;  %5886 = vmatprep.mubr.bf16.mxu0 %v17882_v3 }
 0x249   : > { %3346 = vmatmul.mubr.bf16.gmra.mrb[92].mxu1 %v16476_v22  ;;  %5887 = vmatmul.mubr.bf16.gmra.mrb[92].mxu0 %v17888_v11  ;;  %v15567_v22 = vld [vmem:[%s17080_s29 + $0x1c4] ss:$24 sps:$4 sm:$0xff]  }
 0x24a   : > { %3388 = vmatprep.mubr.bf16.mxu1 %v17726_v43  ;;  %5929 = vmatprep.mubr.bf16.mxu0 %v15507_v32  ;;  %v15525_v43 = vld [vmem:[%s17080_s29 + $0x74] ss:$24 sps:$4 sm:$0xff]  }
 0x24b   : > { %v15564_v32 = vld [vmem:[%s17080_s29 + $0x10bc] ss:$24 sps:$4 sm:$0xff]  }
 0x251   : > { %3389 = vmatmul.mubr.bf16.vlgmr.msra.gmra.mrb[48].mxu1 %v17735_v56  ;;  %5930 = vmatmul.mubr.bf16.vlgmr.msra.gmra.mrb[48].mxu0 %v15505_v21  ;;  %v15520_v56 = vld [vmem:[%s17080_s29 + $0xf68] ss:$24 sps:$4 sm:$0xff]  }
 0x252   : > { %3510 = vmatpush1.bf16.msra.mxu1 %v15508_v62  ;;  %6510 = vmatpush1.bf16.msra.mxu0 %v15511_v1  ;;  %v17983_v62 = vld [vmem:[%s17146_s22 + $0x490] ss:$144 sps:$4 sm:$0xff]  }
 0x253   : > { %3511 = vmatprep.subr.bf16.mxu1 %v15516_v52  ;;  %6511 = vmatprep.subr.bf16.mxu0 %v15519_v58  ;;  %v15562_v1 = vld [vmem:[%s17080_s29 + $0x10b8] ss:$24 sps:$4 sm:$0xff]   ;;  %v17990_v58 = vld [vmem:[%s17146_s22 + $0x5b4] ss:$144 sps:$4 sm:$0xff]  }
 0x254   : > { %3398 = vmatprep.mubr.bf16.mxu1 %v17744_v57  ;;  %5939 = vmatprep.mubr.bf16.mxu0 %v17904_v63  ;;  %v17913_v57 = vld [vmem:[%s17146_s22 + $0x130] ss:$144 sps:$4 sm:$0xff]  }
 0x255   : > { %v15565_v52 = vld [vmem:[%s17080_s29 + $0x1c0] ss:$24 sps:$4 sm:$0xff]  }
 0x256   : > { %3512 = vmatpush1.bf16.msra.mxu1 %v15514_v2  ;;  %6512 = vmatpush1.bf16.msra.mxu0 %v15517_v5  ;;  %v15570_v2 = vld [vmem:[%s17080_s29 + $0x10ec] ss:$24 sps:$4 sm:$0xff]  }
 0x257   : > { %3513 = vmatprep.subr.bf16.mxu1 %v15522_v33  ;;  %6513 = vmatprep.subr.bf16.mxu0 %v15525_v43  ;;  %v15573_v5 = vld [vmem:[%s17080_s29 + $0x1f4] ss:$24 sps:$4 sm:$0xff]   ;;  %v15568_v43 = vld [vmem:[%s17080_s29 + $0x10e8] ss:$24 sps:$4 sm:$0xff]  }
 0x259   : > { %3399 = vmatmul.mubr.bf16.gmra.mrb[52].mxu1 %v17753_v10  ;;  %5940 = vmatmul.mubr.bf16.gmra.mrb[52].mxu0 %v17913_v57  ;;  %v15532_v10 = vld [vmem:[%s17080_s29 + $0xfc8] ss:$24 sps:$4 sm:$0xff]  }
 0x25a   : > { %3514 = vmatpush1.bf16.msra.mxu1 %v15520_v56  ;;  %6514 = vmatpush1.bf16.msra.mxu0 %v15523_v6  ;;  %v15571_v56 = vld [vmem:[%s17080_s29 + $0x1f0] ss:$24 sps:$4 sm:$0xff]   ;;  %v15576_v6 = vld [vmem:[%s17080_s29 + $0x111c] ss:$24 sps:$4 sm:$0xff]  }
 0x25b   : > { %3408 = vmatprep.mubr.bf16.mxu1 %v17760_v61  ;;  %5949 = vmatprep.mubr.bf16.mxu0 %v17922_v34  ;;  %v17931_v61 = vld [vmem:[%s17146_s22 + $0x250] ss:$144 sps:$4 sm:$0xff]  }
 0x25c   : > { %3515 = vmatprep.subr.bf16.mxu1 %v15528_v39  ;;  %6515 = vmatprep.subr.bf16.mxu0 %v15531_v16  ;;  %v15579_v39 = vld [vmem:[%s17080_s29 + $0x224] ss:$24 sps:$4 sm:$0xff]  }
 0x25e   : > { %3516 = vmatpush1.bf16.msra.mxu1 %v15526_v9  ;;  %6516 = vmatpush1.bf16.msra.mxu0 %v15529_v18  ;;  %v18009_v9 = vld [vmem:[%s17146_s22 + $0x5b0] ss:$144 sps:$4 sm:$0xff]   ;;  %v18014_v18 = vld [vmem:[%s17146_s22 + $0x6d4] ss:$144 sps:$4 sm:$0xff]  }
 0x25f   : > { %3517 = vmatprep.subr.bf16.mxu1 %v15534_v17  ;;  %6517 = vmatprep.subr.bf16.mxu0 %v15537_v38  ;;  %v15574_v17 = vld [vmem:[%s17080_s29 + $0x1118] ss:$24 sps:$4 sm:$0xff]  }
 0x260   : > { %v15577_v38 = vld [vmem:[%s17080_s29 + $0x220] ss:$24 sps:$4 sm:$0xff]  }
 0x261   : > { %3409 = vmatmul.mubr.bf16.gmra.mrb[56].mxu1 %v17771_v54  ;;  %5950 = vmatmul.mubr.bf16.gmra.mrb[56].mxu0 %v17931_v61  ;;  %v15549_v54 = vld [vmem:[%s17080_s29 + $0x134] ss:$24 sps:$4 sm:$0xff]  }
 0x262   : > { %3418 = vmatprep.mubr.bf16.mxu1 %v17778_v60  ;;  %5959 = vmatprep.mubr.bf16.mxu0 %v17936_v20 }
 0x263   : > { %3518 = vmatpush1.bf16.msra.mxu1 %v15532_v10  ;;  %6518 = vmatpush1.bf16.msra.mxu0 %v15535_v46  ;;  %v15582_v10 = vld [vmem:[%s17080_s29 + $0x114c] ss:$24 sps:$4 sm:$0xff]  }
 0x264   : > { %v17943_v0 = vpop.f32.mrb[0].mxu1  ;;  %3519 = vmatprep.subr.bf16.mxu1 %v15540_v44  ;;  %6519 = vmatprep.subr.bf16.mxu0 %v15543_v48  ;;  %v15580_v44 = vld [vmem:[%s17080_s29 + $0x1148] ss:$24 sps:$4 sm:$0xff]  }
 0x265   : > { %v17945_v60 = vpop.f32.mrb[1].mxu1  ;;  %v15583_v48 = vld [vmem:[%s17080_s29 + $0x250] ss:$24 sps:$4 sm:$0xff]  }
 0x266   : > { %v17949_v7 = vpop.f32.mrb[2].mxu1 }
 0x267   : > { %v17953_v35 = vpop.f32.mrb[3].mxu1  ;;  %3520 = vmatpush1.bf16.msra.mxu1 %v15538_v13  ;;  %6520 = vmatpush1.bf16.msra.mxu0 %v15541_v19  ;;  %v15588_v19 = vld [vmem:[%s17080_s29 + $0x117c] ss:$24 sps:$4 sm:$0xff]  }
 0x268   : > { %21329 = vst [vmem:[#allocation24_spill] sm:$0xff] %v17953_v35  ;;  %3521 = vmatprep.subr.bf16.mxu1 %v15546_v55  ;;  %6521 = vmatprep.subr.bf16.mxu0 %v15549_v54  ;;  %v15591_v55 = vld [vmem:[%s17080_s29 + $0x284] ss:$24 sps:$4 sm:$0xff]  }
 0x269   : > { %3419 = vmatmul.mubr.bf16.gmra.mrb[60].mxu1 %v17789_v8  ;;  %5960 = vmatmul.mubr.bf16.gmra.mrb[60].mxu0 %v17957_v50 }
 0x26a   : > { %3428 = vmatprep.mubr.bf16.mxu1 %v17796_v14  ;;  %5969 = vmatprep.mubr.bf16.mxu0 %v17964_v12  ;;  %v15559_v14 = vld [vmem:[%s17080_s29 + $0x190] ss:$24 sps:$4 sm:$0xff]  }
 0x26b   : > { %3522 = vmatpush1.bf16.msra.mxu1 %v15544_v51  ;;  %6522 = vmatpush1.bf16.msra.mxu0 %v15547_v27  ;;  %v18035_v51 = vld [vmem:[%s17146_s22 + $0x6d0] ss:$144 sps:$4 sm:$0xff]  }
 0x26c   : > { %v17969_v8 = vpop.f32.mrb[4].mxu1  ;;  %3523 = vmatprep.subr.bf16.mxu1 %v15552_v28  ;;  %6523 = vmatprep.subr.bf16.mxu0 %v15555_v29  ;;  %v15586_v27 = vld [vmem:[%s17080_s29 + $0x1178] ss:$24 sps:$4 sm:$0xff]   ;;  %v18042_v29 = vld [vmem:[%s17146_s22 + $0x7f4] ss:$144 sps:$4 sm:$0xff]  }
 0x26d   : > { %21330 = vst [vmem:[#allocation25_spill] sm:$0xff] %v17969_v8  ;;  %v17971_v59 = vpop.f32.mrb[5].mxu1  ;;  %v15589_v28 = vld [vmem:[%s17080_s29 + $0x280] ss:$24 sps:$4 sm:$0xff]   ;;  %v15939_v8 = vld [vmem:[%s17080_s29 + $0x15f4] ss:$24 sps:$4 sm:$0xff]  }
 0x26e   : > { %21331 = vst [vmem:[#allocation26_spill] sm:$0xff] %v17971_v59  ;;  %v17975_v40 = vpop.f32.mrb[6].mxu1  ;;  %v18579_v59 = vld [vmem:[%s17146_s22 + $0x250] ss:$144 sps:$4 sm:$0xff]  }
 0x26f   : > { %21332 = vst [vmem:[#allocation27_spill] sm:$0xff] %v17975_v40  ;;  %v17979_v21 = vpop.f32.mrb[7].mxu1  ;;  %3524 = vmatpush1.bf16.msra.mxu1 %v15550_v37  ;;  %6524 = vmatpush1.bf16.msra.mxu0 %v15553_v53  ;;  %v15594_v37 = vld [vmem:[%s17080_s29 + $0x11ac] ss:$24 sps:$4 sm:$0xff]  }
 0x270   : > { %21333 = vst [vmem:[#allocation28_spill] sm:$0xff] %v17979_v21  ;;  %3525 = vmatprep.subr.bf16.mxu1 %v15558_v47  ;;  %6525 = vmatprep.subr.bf16.mxu0 %v15561_v41  ;;  %v15597_v53 = vld [vmem:[%s17080_s29 + $0x2b4] ss:$24 sps:$4 sm:$0xff]   ;;  %v15592_v41 = vld [vmem:[%s17080_s29 + $0x11a8] ss:$24 sps:$4 sm:$0xff]  }
 0x271   : > { %3429 = vmatmul.mubr.bf16.gmra.mrb[64].mxu1 %v17807_v24  ;;  %5970 = vmatmul.mubr.bf16.gmra.mrb[64].mxu0 %v17983_v62  ;;  %v15813_v21 = vld [vmem:[%s17080_s29 + $0x1264] ss:$24 sps:$4 sm:$0xff]   ;;  %v15831_v40 = vld [vmem:[%s17080_s29 + $0x12f4] ss:$24 sps:$4 sm:$0xff]  }
 0x272   : > { %3438 = vmatprep.mubr.bf16.mxu1 %v17814_v25  ;;  %5979 = vmatprep.mubr.bf16.mxu0 %v17990_v58 }
 0x273   : > { %3526 = vmatpush1.bf16.msra.mxu1 %v15556_v45  ;;  %6526 = vmatpush1.bf16.msra.mxu0 %v15559_v14  ;;  %v15600_v14 = vld [vmem:[%s17080_s29 + $0x11dc] ss:$24 sps:$4 sm:$0xff]  }
 0x274   : > { %v17995_v24 = vpop.f32.mrb[8].mxu1  ;;  %3527 = vmatprep.subr.bf16.mxu1 %v15564_v32  ;;  %6527 = vmatprep.subr.bf16.mxu0 %v15567_v22  ;;  %v15603_v32 = vld [vmem:[%s17080_s29 + $0x2e4] ss:$24 sps:$4 sm:$0xff]  }
 0x275   : > { %21334 = vst [vmem:[#allocation29_spill] sm:$0xff] %v17995_v24  ;;  %v17997_v33 = vpop.f32.mrb[9].mxu1  ;;  %v15810_v24 = vld [vmem:[%s17080_s29 + $0x36c] ss:$24 sps:$4 sm:$0xff]  }
 0x276   : > { %21335 = vst [vmem:[#allocation30_spill] sm:$0xff] %v17997_v33  ;;  %v18001_v25 = vpop.f32.mrb[10].mxu1  ;;  %v15805_v33 = vld [vmem:[%s17080_s29 + $0x1230] ss:$24 sps:$4 sm:$0xff]  }
 0x277   : > { %21336 = vst [vmem:[#allocation31_spill] sm:$0xff] %v18001_v25  ;;  %v18005_v16 = vpop.f32.mrb[11].mxu1  ;;  %3528 = vmatpush1.bf16.msra.mxu1 %v15562_v1  ;;  %6528 = vmatpush1.bf16.msra.mxu0 %v15565_v52  ;;  %v18061_v1 = vld [vmem:[%s17146_s22 + $0x7f0] ss:$144 sps:$4 sm:$0xff]   ;;  %v15807_v25 = vld [vmem:[%s17080_s29 + $0x1234] ss:$24 sps:$4 sm:$0xff]  }
 0x278   : > { %21337 = vst [vmem:[#allocation32_spill] sm:$0xff] %v18005_v16  ;;  %3529 = vmatprep.subr.bf16.mxu1 %v15570_v2  ;;  %6529 = vmatprep.subr.bf16.mxu0 %v15573_v5  ;;  %v15598_v52 = vld [vmem:[%s17080_s29 + $0x11d8] ss:$24 sps:$4 sm:$0xff]   ;;  %v18068_v5 = vld [vmem:[%s17146_s22 + $0x914] ss:$144 sps:$4 sm:$0xff]  }
 0x279   : > { %3439 = vmatmul.mubr.bf16.gmra.mrb[68].mxu1 %v17825_v36  ;;  %5980 = vmatmul.mubr.bf16.gmra.mrb[68].mxu0 %v18009_v9  ;;  %v15585_v36 = vld [vmem:[%s17080_s29 + $0x254] ss:$24 sps:$4 sm:$0xff]   ;;  %v15601_v2 = vld [vmem:[%s17080_s29 + $0x2e0] ss:$24 sps:$4 sm:$0xff]  }
 0x27a   : > { %3448 = vmatprep.mubr.bf16.mxu1 %v17832_v30  ;;  %5989 = vmatprep.mubr.bf16.mxu0 %v18014_v18  ;;  %v15804_v16 = vld [vmem:[%s17080_s29 + $0x33c] ss:$24 sps:$4 sm:$0xff]  }
 0x27b   : > { %3530 = vmatpush1.bf16.msra.mxu1 %v15568_v43  ;;  %6530 = vmatpush1.bf16.msra.mxu0 %v15571_v56  ;;  %v15606_v43 = vld [vmem:[%s17080_s29 + $0x914] ss:$24 sps:$4 sm:$0xff]  }
 0x27c   : > { %v18021_v46 = vpop.f32.mrb[12].mxu1  ;;  %3531 = vmatprep.subr.bf16.mxu1 %v15576_v6  ;;  %6531 = vmatprep.subr.bf16.mxu0 %v15579_v39  ;;  %v15609_v56 = vld [vmem:[%s17080_s29 + $0x314] ss:$24 sps:$4 sm:$0xff]  }
 0x27d   : > { %21338 = vst [vmem:[#allocation33_spill] sm:$0xff] %v18021_v46  ;;  %v18023_v30 = vpop.f32.mrb[13].mxu1  ;;  %v15799_v46 = vld [vmem:[%s17080_s29 + $0x1200] ss:$24 sps:$4 sm:$0xff]  }
 0x27e   : > { %21339 = vst [vmem:[#allocation34_spill] sm:$0xff] %v18023_v30  ;;  %v18027_v13 = vpop.f32.mrb[14].mxu1  ;;  %v18534_v30 = vld [vmem:[%s17146_s22 + $0x14] ss:$144 sps:$4 sm:$0xff]  }
 0x27f   : > { %21340 = vst [vmem:[#allocation35_spill] sm:$0xff] %v18027_v13  ;;  %v18031_v54 = vpop.f32.mrb[15].mxu1  ;;  %3532 = vmatpush1.bf16.msra.mxu1 %v15574_v17  ;;  %6532 = vmatpush1.bf16.msra.mxu0 %v15577_v38  ;;  %v18088_v38 = vld [vmem:[%s17146_s22 + $0xa34] ss:$144 sps:$4 sm:$0xff]   ;;  %v18485_v13 = vld [vmem:[%s17146_s22 + $0x7e8] ss:$144 sps:$4 sm:$0xff]  }
 0x280   : > { %21341 = vst [vmem:[#allocation36_spill] sm:$0xff] %v18031_v54  ;;  %3533 = vmatprep.subr.bf16.mxu1 %v15582_v10  ;;  %6533 = vmatprep.subr.bf16.mxu0 %v15585_v36  ;;  %v15787_v54 = vld [vmem:[%s17080_s29 + $0x8b0] ss:$24 sps:$4 sm:$0xff]  }
 0x281   : > { %3449 = vmatmul.mubr.bf16.gmra.mrb[72].mxu1 %v17843_v15  ;;  %5990 = vmatmul.mubr.bf16.gmra.mrb[72].mxu0 %v18035_v51 }
 0x282   : > { %3458 = vmatprep.mubr.bf16.mxu1 %v17850_v42  ;;  %5999 = vmatprep.mubr.bf16.mxu0 %v18042_v29  ;;  %v15595_v42 = vld [vmem:[%s17080_s29 + $0x2b0] ss:$24 sps:$4 sm:$0xff]  }
 0x283   : > { %3534 = vmatpush1.bf16.msra.mxu1 %v15580_v44  ;;  %6534 = vmatpush1.bf16.msra.mxu0 %v15583_v48 }
 0x284   : > { %v18047_v15 = vpop.f32.mrb[16].mxu1  ;;  %3535 = vmatprep.subr.bf16.mxu1 %v15588_v19  ;;  %6535 = vmatprep.subr.bf16.mxu0 %v15591_v55 }
 0x285   : > { %21342 = vst [vmem:[#allocation37_spill] sm:$0xff] %v18047_v15  ;;  %v18049_v47 = vpop.f32.mrb[17].mxu1  ;;  %v15784_v15 = vld [vmem:[%s17080_s29 + $0x2a8] ss:$24 sps:$4 sm:$0xff]  }
 0x286   : > { %21343 = vst [vmem:[#allocation38_spill] sm:$0xff] %v18049_v47  ;;  %v18053_v45 = vpop.f32.mrb[18].mxu1  ;;  %v15775_v47 = vld [vmem:[%s17080_s29 + $0x850] ss:$24 sps:$4 sm:$0xff]  }
 0x287   : > { %21344 = vst [vmem:[#allocation39_spill] sm:$0xff] %v18053_v45  ;;  %v18057_v22 = vpop.f32.mrb[19].mxu1  ;;  %3536 = vmatpush1.bf16.msra.mxu1 %v15586_v27  ;;  %6536 = vmatpush1.bf16.msra.mxu0 %v15589_v28  ;;  %v15772_v45 = vld [vmem:[%s17080_s29 + $0x248] ss:$24 sps:$4 sm:$0xff]  }
 0x288   : > { %21345 = vst [vmem:[#allocation40_spill] sm:$0xff] %v18057_v22  ;;  %3537 = vmatprep.subr.bf16.mxu1 %v15594_v37  ;;  %6537 = vmatprep.subr.bf16.mxu0 %v15597_v53  ;;  %v18124_v37 = vld [vmem:[%s17146_s22 + $0xc74] ss:$144 sps:$4 sm:$0xff]   ;;  %v15763_v22 = vld [vmem:[%s17080_s29 + $0x7f0] ss:$24 sps:$4 sm:$0xff]  }
 0x289   : > { %3459 = vmatmul.mubr.bf16.gmra.mrb[76].mxu1 %v17857_v23  ;;  %6000 = vmatmul.mubr.bf16.gmra.mrb[76].mxu0 %v18061_v1 }
 0x28a   : > { %3468 = vmatprep.mubr.bf16.mxu1 %v17862_v26  ;;  %6009 = vmatprep.mubr.bf16.mxu0 %v18068_v5  ;;  %v18083_v26 = vld [vmem:[%s17146_s22 + $0x910] ss:$144 sps:$4 sm:$0xff]  }
 0x28b   : > { %3538 = vmatpush1.bf16.msra.mxu1 %v15592_v41  ;;  %6538 = vmatpush1.bf16.msra.mxu0 %v15595_v42 }
 0x28c   : > { %v18073_v6 = vpop.f32.mrb[20].mxu1  ;;  %3539 = vmatprep.subr.bf16.mxu1 %v15600_v14  ;;  %6539 = vmatprep.subr.bf16.mxu0 %v15603_v32  ;;  %v16500_v14 = vld [vmem:[%s17146_s22 + $0xd88] ss:$144 sps:$4 sm:$0xff]   ;;  %v18137_v32 = vld [vmem:[%s17146_s22 + $0xc70] ss:$144 sps:$4 sm:$0xff]  }
 0x28d   : > { %21346 = vst [vmem:[#allocation41_spill] sm:$0xff] %v18073_v6  ;;  %v18075_v23 = vpop.f32.mrb[21].mxu1  ;;  %v15760_v6 = vld [vmem:[%s17080_s29 + $0x1e8] ss:$24 sps:$4 sm:$0xff]  }
 0x28e   : > { %21347 = vst [vmem:[#allocation42_spill] sm:$0xff] %v18075_v23  ;;  %v18077_v39 = vpop.f32.mrb[22].mxu1  ;;  %v15751_v23 = vld [vmem:[%s17080_s29 + $0x790] ss:$24 sps:$4 sm:$0xff]  }
 0x28f   : > { %21348 = vst [vmem:[#allocation43_spill] sm:$0xff] %v18077_v39  ;;  %v18079_v17 = vpop.f32.mrb[23].mxu1  ;;  %3540 = vmatpush1.bf16.msra.mxu1 %v15598_v52  ;;  %6540 = vmatpush1.bf16.msra.mxu0 %v15601_v2  ;;  %v18142_v52 = vld [vmem:[%s17146_s22 + $0x4] ss:$144 sps:$4 sm:$0xff]   ;;  %v15748_v39 = vld [vmem:[%s17080_s29 + $0x188] ss:$24 sps:$4 sm:$0xff]  }
 0x290   : > { %21349 = vst [vmem:[#allocation44_spill] sm:$0xff] %v18079_v17  ;;  %3662 = vmatprep.subr.bf16.mxu1 %v15606_v43  ;;  %6662 = vmatprep.subr.bf16.mxu0 %v15609_v56  ;;  %v15739_v17 = vld [vmem:[%s17080_s29 + $0x730] ss:$24 sps:$4 sm:$0xff]  }
 0x291   : > { %3469 = vmatmul.mubr.bf16.gmra.mrb[80].mxu1 %v17867_v49  ;;  %6010 = vmatmul.mubr.bf16.gmra.mrb[80].mxu0 %v18083_v26  ;;  %v18101_v49 = vld [vmem:[%s17146_s22 + $0xa30] ss:$144 sps:$4 sm:$0xff]  }
 0x292   : > { %3478 = vmatprep.mubr.bf16.mxu1 %v17872_v4  ;;  %6019 = vmatprep.mubr.bf16.mxu0 %v18088_v38  ;;  %v18106_v4 = vld [vmem:[%s17146_s22 + $0xb54] ss:$144 sps:$4 sm:$0xff]  }
 0x294   : > { %v18091_v10 = vpop.f32.mrb[24].mxu1 }
 0x295   : > { %21350 = vst [vmem:[#allocation45_spill] sm:$0xff] %v18091_v10  ;;  %v18093_v36 = vpop.f32.mrb[25].mxu1  ;;  %v18395_v10 = vld [vmem:[%s17146_s22 + $0x248] ss:$144 sps:$4 sm:$0xff]  }
 0x296   : > { %21351 = vst [vmem:[#allocation46_spill] sm:$0xff] %v18093_v36  ;;  %v18095_v44 = vpop.f32.mrb[26].mxu1  ;;  %v15735_v36 = vld [vmem:[%s17080_s29 + $0x704] ss:$24 sps:$4 sm:$0xff]  }
 0x297   : > { %21352 = vst [vmem:[#allocation47_spill] sm:$0xff] %v18095_v44  ;;  %v18097_v48 = vpop.f32.mrb[27].mxu1  ;;  %v15732_v44 = vld [vmem:[%s17080_s29 + $0xfc] ss:$24 sps:$4 sm:$0xff]  }
 0x298   : > { %21353 = vst [vmem:[#allocation48_spill] sm:$0xff] %v18097_v48  ;;  %v15729_v48 = vld [vmem:[%s17080_s29 + $0x6d4] ss:$24 sps:$4 sm:$0xff]  }
 0x299   : > { %3479 = vmatmul.mubr.bf16.gmra.mrb[84].mxu1 %v17877_v31  ;;  %6020 = vmatmul.mubr.bf16.gmra.mrb[84].mxu0 %v18101_v49  ;;  %v18119_v31 = vld [vmem:[%s17146_s22 + $0xb50] ss:$144 sps:$4 sm:$0xff]  }
 0x29a   : > { %3488 = vmatprep.mubr.bf16.mxu1 %v17882_v3  ;;  %6029 = vmatprep.mubr.bf16.mxu0 %v18106_v4  ;;  %v16498_v3 = vld [vmem:[%s17146_s22 + $0xd8c] ss:$144 sps:$4 sm:$0xff]  }
 0x29c   : > { %v18109_v19 = vpop.f32.mrb[28].mxu1 }
 0x29d   : > { %21354 = vst [vmem:[#allocation49_spill] sm:$0xff] %v18109_v19  ;;  %v18111_v55 = vpop.f32.mrb[29].mxu1  ;;  %v18377_v19 = vld [vmem:[%s17146_s22 + $0x128] ss:$144 sps:$4 sm:$0xff]  }
 0x29e   : > { %21355 = vst [vmem:[#allocation50_spill] sm:$0xff] %v18111_v55  ;;  %v18113_v27 = vpop.f32.mrb[30].mxu1  ;;  %v18368_v55 = vld [vmem:[%s17146_s22 + $0x12c] ss:$144 sps:$4 sm:$0xff]  }
 0x29f   : > { %21356 = vst [vmem:[#allocation51_spill] sm:$0xff] %v18113_v27  ;;  %v18115_v28 = vpop.f32.mrb[31].mxu1  ;;  %v15631_v27 = vld [vmem:[%s17080_s29 + $0x3d0] ss:$24 sps:$4 sm:$0xff]  }
 0x2a0   : > { %21357 = vst [vmem:[#allocation52_spill] sm:$0xff] %v18115_v28  ;;  %v15627_v28 = vld [vmem:[%s17080_s29 + $0x3a4] ss:$24 sps:$4 sm:$0xff]  }
 0x2a1   : > { %3489 = vmatmul.mubr.bf16.gmra.mrb[88].mxu1 %v17888_v11  ;;  %6030 = vmatmul.mubr.bf16.gmra.mrb[88].mxu0 %v18119_v31 }
 0x2a2   : > { %3498 = vmatprep.mubr.bf16.mxu1 %v16498_v3  ;;  %6039 = vmatprep.mubr.bf16.mxu0 %v18124_v37  ;;  %v15604_v3 = vld [vmem:[%s17080_s29 + $0x910] ss:$24 sps:$4 sm:$0xff]  }
 0x2a4   : > { %v18127_v53 = vpop.f32.mrb[32].mxu1 }
 0x2a5   : > { %21358 = vst [vmem:[#allocation53_spill] sm:$0xff] %v18127_v53  ;;  %v18129_v41 = vpop.f32.mrb[33].mxu1 }
 0x2a6   : > { %21359 = vst [vmem:[#allocation54_spill] sm:$0xff] %v18129_v41  ;;  %v18131_v42 = vpop.f32.mrb[34].mxu1  ;;  %v18159_v41 = vld [vmem:[%s17146_s22] ss:$144 sps:$4 sm:$0xff]  }
 0x2a7   : > { %21360 = vst [vmem:[#allocation55_spill] sm:$0xff] %v18131_v42  ;;  %v18133_v11 = vpop.f32.mrb[35].mxu1  ;;  %v15615_v42 = vld [vmem:[%s17080_s29 + $0x344] ss:$24 sps:$4 sm:$0xff]  }
 0x2a8   : > { %21361 = vst [vmem:[#allocation56_spill] sm:$0xff] %v18133_v11 }
 0x2a9   : > { %3499 = vmatmul.mubr.bf16.gmra.mrb[92].mxu1 %v16500_v14  ;;  %6040 = vmatmul.mubr.bf16.gmra.mrb[92].mxu0 %v18137_v32  ;;  %v15607_v14 = vld [vmem:[%s17080_s29 + $0x310] ss:$24 sps:$4 sm:$0xff]  }
 0x2aa   : > { %3541 = vmatprep.mubr.bf16.mxu1 %v17904_v63  ;;  %6541 = vmatprep.mubr.bf16.mxu0 %v18142_v52  ;;  %v15612_v63 = vld [vmem:[%s17080_s29 + $0x944] ss:$24 sps:$4 sm:$0xff]  }
 0x2ac   : > { %v18145_v2 = vpop.f32.mrb[36].mxu1 }
 0x2ad   : > { %21362 = vst [vmem:[#allocation57_spill] sm:$0xff] %v18145_v2  ;;  %v18147_v43 = vpop.f32.mrb[37].mxu1  ;;  %v15618_v2 = vld [vmem:[%s17080_s29 + $0x974] ss:$24 sps:$4 sm:$0xff]  }
 0x2ae   : > { %21363 = vst [vmem:[#allocation58_spill] sm:$0xff] %v18147_v43  ;;  %v18149_v56 = vpop.f32.mrb[38].mxu1  ;;  %v15610_v43 = vld [vmem:[%s17080_s29 + $0x940] ss:$24 sps:$4 sm:$0xff]  }
 0x2af   : > { %21364 = vst [vmem:[#allocation59_spill] sm:$0xff] %v18149_v56  ;;  %v18153_v11 = vpop.f32.mrb[39].mxu1  ;;  %v15613_v56 = vld [vmem:[%s17080_s29 + $0x340] ss:$24 sps:$4 sm:$0xff]  }
 0x2b0   : > { %21365 = vst [vmem:[#allocation60_spill] sm:$0xff] %v18153_v11  ;;  %v15621_v11 = vld [vmem:[%s17080_s29 + $0x374] ss:$24 sps:$4 sm:$0xff]  }
 0x2b1   : > { %3542 = vmatmul.mubr.bf16.vlgmr.msra.gmra.mrb[48].mxu1 %v17913_v57  ;;  %6542 = vmatmul.mubr.bf16.vlgmr.msra.gmra.mrb[0].mxu0 %v18159_v41  ;;  %v18170_v57 = vld [vmem:[%s17146_s22 + $0x124] ss:$144 sps:$4 sm:$0xff]  }
 0x2b2   : > { %3663 = vmatpush1.bf16.msra.mxu1 %v15604_v3  ;;  %6663 = vmatpush1.bf16.msra.mxu0 %v15607_v14 }
 0x2b3   : > { %3664 = vmatprep.subr.bf16.mxu1 %v15612_v63  ;;  %6664 = vmatprep.subr.bf16.mxu0 %v15615_v42  ;;  %v15616_v42 = vld [vmem:[%s17080_s29 + $0x970] ss:$24 sps:$4 sm:$0xff]  }
 0x2b4   : > { %v18166_v53 = vpop.f32.mrb[40].mxu1  ;;  %3551 = vmatprep.mubr.bf16.mxu1 %v17922_v34  ;;  %6551 = vmatprep.mubr.bf16.mxu0 %v18170_v57  ;;  %v15619_v63 = vld [vmem:[%s17080_s29 + $0x370] ss:$24 sps:$4 sm:$0xff]   ;;  %v15624_v34 = vld [vmem:[%s17080_s29 + $0x9a4] ss:$24 sps:$4 sm:$0xff]  }
 0x2b5   : > { %21366 = vst [vmem:[#allocation61_spill] sm:$0xff] %v18166_v53  ;;  %v18173_v3 = vpop.f32.mrb[41].mxu1 }
 0x2b6   : > { %21367 = vst [vmem:[#allocation62_spill] sm:$0xff] %v18173_v3  ;;  %v18175_v14 = vpop.f32.mrb[42].mxu1  ;;  %3665 = vmatpush1.bf16.msra.mxu1 %v15610_v43  ;;  %6665 = vmatpush1.bf16.msra.mxu0 %v15613_v56  ;;  %v18185_v3 = vld [vmem:[%s17146_s22 + $0x120] ss:$144 sps:$4 sm:$0xff]  }
 0x2b7   : > { %21368 = vst [vmem:[#allocation63_spill] sm:$0xff] %v18175_v14  ;;  %v18179_v53 = vpop.f32.mrb[43].mxu1  ;;  %3666 = vmatprep.subr.bf16.mxu1 %v15618_v2  ;;  %6666 = vmatprep.subr.bf16.mxu0 %v15621_v11  ;;  %v15622_v43 = vld [vmem:[%s17080_s29 + $0x9a0] ss:$24 sps:$4 sm:$0xff]   ;;  %v15630_v11 = vld [vmem:[%s17080_s29 + $0x9d4] ss:$24 sps:$4 sm:$0xff]  }
 0x2b8   : > { %21369 = vst [vmem:[#allocation64_spill] sm:$0xff] %v18179_v53  ;;  %v15625_v56 = vld [vmem:[%s17080_s29 + $0x3a0] ss:$24 sps:$4 sm:$0xff]   ;;  %v18192_v53 = vld [vmem:[%s17146_s22 + $0x244] ss:$144 sps:$4 sm:$0xff]  }
 0x2b9   : > { %3552 = vmatmul.mubr.bf16.gmra.mrb[52].mxu1 %v17931_v61  ;;  %6552 = vmatmul.mubr.bf16.gmra.mrb[4].mxu0 %v18185_v3  ;;  %v15633_v61 = vld [vmem:[%s17080_s29 + $0x3d4] ss:$24 sps:$4 sm:$0xff]   ;;  %v15628_v14 = vld [vmem:[%s17080_s29 + $0x9d0] ss:$24 sps:$4 sm:$0xff]  }
 0x2ba   : > { %3667 = vmatpush1.bf16.msra.mxu1 %v15616_v42  ;;  %6667 = vmatpush1.bf16.msra.mxu0 %v15619_v63 }
 0x2bb   : > { %3561 = vmatprep.mubr.bf16.mxu1 %v17936_v20  ;;  %6561 = vmatprep.mubr.bf16.mxu0 %v18192_v53 }
 0x2bc   : > { %v18197_v2 = vpop.f32.mrb[44].mxu1  ;;  %3668 = vmatprep.subr.bf16.mxu1 %v15624_v34  ;;  %6668 = vmatprep.subr.bf16.mxu0 %v15627_v28  ;;  %v15639_v34 = vld [vmem:[%s17080_s29 + $0x404] ss:$24 sps:$4 sm:$0xff]   ;;  %v18211_v28 = vld [vmem:[%s17146_s22 + $0x240] ss:$144 sps:$4 sm:$0xff]  }
 0x2bd   : > { %21370 = vst [vmem:[#allocation65_spill] sm:$0xff] %v18197_v2  ;;  %v18199_v42 = vpop.f32.mrb[45].mxu1  ;;  %v15636_v2 = vld [vmem:[%s17080_s29 + $0xa04] ss:$24 sps:$4 sm:$0xff]  }
 0x2be   : > { %21371 = vst [vmem:[#allocation66_spill] sm:$0xff] %v18199_v42  ;;  %v18201_v63 = vpop.f32.mrb[46].mxu1  ;;  %3669 = vmatpush1.bf16.msra.mxu1 %v15622_v43  ;;  %6669 = vmatpush1.bf16.msra.mxu0 %v15625_v56  ;;  %v18216_v43 = vld [vmem:[%s17146_s22 + $0x364] ss:$144 sps:$4 sm:$0xff]   ;;  %v15634_v56 = vld [vmem:[%s17080_s29 + $0xa00] ss:$24 sps:$4 sm:$0xff]  }
 0x2bf   : > { %21372 = vst [vmem:[#allocation67_spill] sm:$0xff] %v18201_v63  ;;  %v18203_v20 = vpop.f32.mrb[47].mxu1  ;;  %3670 = vmatprep.subr.bf16.mxu1 %v15630_v11  ;;  %6670 = vmatprep.subr.bf16.mxu0 %v15633_v61  ;;  %v15637_v11 = vld [vmem:[%s17080_s29 + $0x400] ss:$24 sps:$4 sm:$0xff]   ;;  %v15645_v61 = vld [vmem:[%s17080_s29 + $0x434] ss:$24 sps:$4 sm:$0xff]  }
 0x2c0   : > { %21373 = vst [vmem:[#allocation68_spill] sm:$0xff] %v18203_v20  ;;  %v15643_v20 = vld [vmem:[%s17080_s29 + $0x430] ss:$24 sps:$4 sm:$0xff]   ;;  %v15717_v42 = vld [vmem:[%s17080_s29 + $0x674] ss:$24 sps:$4 sm:$0xff]  }
 0x2c1   : > { %3562 = vmatmul.mubr.bf16.gmra.mrb[56].mxu1 %v17957_v50  ;;  %6562 = vmatmul.mubr.bf16.gmra.mrb[8].mxu0 %v18211_v28  ;;  %v15642_v50 = vld [vmem:[%s17080_s29 + $0xa34] ss:$24 sps:$4 sm:$0xff]   ;;  %v18301_v63 = vld [vmem:[%s17146_s22 + $0x7e0] ss:$144 sps:$4 sm:$0xff]  }
 0x2c2   : > { %3571 = vmatprep.mubr.bf16.mxu1 %v17964_v12  ;;  %6571 = vmatprep.mubr.bf16.mxu0 %v18216_v43  ;;  %v15640_v12 = vld [vmem:[%s17080_s29 + $0xa30] ss:$24 sps:$4 sm:$0xff]  }
 0x2c3   : > { %3671 = vmatpush1.bf16.msra.mxu1 %v15628_v14  ;;  %6671 = vmatpush1.bf16.msra.mxu0 %v15631_v27  ;;  %v15648_v14 = vld [vmem:[%s17080_s29 + $0xa64] ss:$24 sps:$4 sm:$0xff]  }
 0x2c4   : > { %3672 = vmatprep.subr.bf16.mxu1 %v15636_v2  ;;  %6672 = vmatprep.subr.bf16.mxu0 %v15639_v34  ;;  %v15651_v27 = vld [vmem:[%s17080_s29 + $0x464] ss:$24 sps:$4 sm:$0xff]   ;;  %v18229_v2 = vld [vmem:[%s17146_s22 + $0x360] ss:$144 sps:$4 sm:$0xff]  }
 0x2c5   : > { %v18234_v34 = vld [vmem:[%s17146_s22 + $0x484] ss:$144 sps:$4 sm:$0xff]  }
 0x2c7   : > { %3673 = vmatpush1.bf16.msra.mxu1 %v15634_v56  ;;  %6673 = vmatpush1.bf16.msra.mxu0 %v15637_v11  ;;  %v15646_v56 = vld [vmem:[%s17080_s29 + $0xa60] ss:$24 sps:$4 sm:$0xff]  }
 0x2c8   : > { %3674 = vmatprep.subr.bf16.mxu1 %v15642_v50  ;;  %6674 = vmatprep.subr.bf16.mxu0 %v15645_v61  ;;  %v15649_v11 = vld [vmem:[%s17080_s29 + $0x460] ss:$24 sps:$4 sm:$0xff]   ;;  %v15657_v50 = vld [vmem:[%s17080_s29 + $0x494] ss:$24 sps:$4 sm:$0xff]   ;;  %v15655_v61 = vld [vmem:[%s17080_s29 + $0x490] ss:$24 sps:$4 sm:$0xff]  }
 0x2c9   : > { %3572 = vmatmul.mubr.bf16.gmra.mrb[60].mxu1 %v17983_v62  ;;  %6572 = vmatmul.mubr.bf16.gmra.mrb[12].mxu0 %v18229_v2  ;;  %v15654_v62 = vld [vmem:[%s17080_s29 + $0xa94] ss:$24 sps:$4 sm:$0xff]  }
 0x2ca   : > { %3581 = vmatprep.mubr.bf16.mxu1 %v17990_v58  ;;  %6581 = vmatprep.mubr.bf16.mxu0 %v18234_v34  ;;  %v15652_v58 = vld [vmem:[%s17080_s29 + $0xa90] ss:$24 sps:$4 sm:$0xff]  }
 0x2cb   : > { %3675 = vmatpush1.bf16.msra.mxu1 %v15640_v12  ;;  %6675 = vmatpush1.bf16.msra.mxu0 %v15643_v20  ;;  %v15660_v12 = vld [vmem:[%s17080_s29 + $0xac4] ss:$24 sps:$4 sm:$0xff]  }
 0x2cc   : > { %3676 = vmatprep.subr.bf16.mxu1 %v15648_v14  ;;  %6676 = vmatprep.subr.bf16.mxu0 %v15651_v27  ;;  %v15663_v20 = vld [vmem:[%s17080_s29 + $0x4c4] ss:$24 sps:$4 sm:$0xff]   ;;  %v18247_v14 = vld [vmem:[%s17146_s22 + $0x480] ss:$144 sps:$4 sm:$0xff]  }
 0x2cd   : > { %v18252_v27 = vld [vmem:[%s17146_s22 + $0x5a4] ss:$144 sps:$4 sm:$0xff]  }
 0x2cf   : > { %3677 = vmatpush1.bf16.msra.mxu1 %v15646_v56  ;;  %6677 = vmatpush1.bf16.msra.mxu0 %v15649_v11  ;;  %v15658_v56 = vld [vmem:[%s17080_s29 + $0xac0] ss:$24 sps:$4 sm:$0xff]  }
 0x2d0   : > { %3678 = vmatprep.subr.bf16.mxu1 %v15654_v62  ;;  %6678 = vmatprep.subr.bf16.mxu0 %v15657_v50  ;;  %v15661_v11 = vld [vmem:[%s17080_s29 + $0x4c0] ss:$24 sps:$4 sm:$0xff]   ;;  %v15669_v62 = vld [vmem:[%s17080_s29 + $0x4f4] ss:$24 sps:$4 sm:$0xff]   ;;  %v15667_v50 = vld [vmem:[%s17080_s29 + $0x4f0] ss:$24 sps:$4 sm:$0xff]  }
 0x2d1   : > { %3582 = vmatmul.mubr.bf16.gmra.mrb[64].mxu1 %v18009_v9  ;;  %6582 = vmatmul.mubr.bf16.gmra.mrb[16].mxu0 %v18247_v14  ;;  %v15666_v9 = vld [vmem:[%s17080_s29 + $0xaf4] ss:$24 sps:$4 sm:$0xff]  }
 0x2d2   : > { %3591 = vmatprep.mubr.bf16.mxu1 %v18014_v18  ;;  %6591 = vmatprep.mubr.bf16.mxu0 %v18252_v27  ;;  %v15664_v18 = vld [vmem:[%s17080_s29 + $0xaf0] ss:$24 sps:$4 sm:$0xff]  }
 0x2d3   : > { %3679 = vmatpush1.bf16.msra.mxu1 %v15652_v58  ;;  %6679 = vmatpush1.bf16.msra.mxu0 %v15655_v61  ;;  %v15672_v58 = vld [vmem:[%s17080_s29 + $0xb24] ss:$24 sps:$4 sm:$0xff]  }
 0x2d4   : > { %3680 = vmatprep.subr.bf16.mxu1 %v15660_v12  ;;  %6680 = vmatprep.subr.bf16.mxu0 %v15663_v20  ;;  %v15675_v61 = vld [vmem:[%s17080_s29 + $0x524] ss:$24 sps:$4 sm:$0xff]   ;;  %v18265_v12 = vld [vmem:[%s17146_s22 + $0x5a0] ss:$144 sps:$4 sm:$0xff]  }
 0x2d5   : > { %v18270_v20 = vld [vmem:[%s17146_s22 + $0x6c4] ss:$144 sps:$4 sm:$0xff]  }
 0x2d7   : > { %3681 = vmatpush1.bf16.msra.mxu1 %v15658_v56  ;;  %6681 = vmatpush1.bf16.msra.mxu0 %v15661_v11  ;;  %v15670_v56 = vld [vmem:[%s17080_s29 + $0xb20] ss:$24 sps:$4 sm:$0xff]  }
 0x2d8   : > { %3682 = vmatprep.subr.bf16.mxu1 %v15666_v9  ;;  %6682 = vmatprep.subr.bf16.mxu0 %v15669_v62  ;;  %v15673_v11 = vld [vmem:[%s17080_s29 + $0x520] ss:$24 sps:$4 sm:$0xff]   ;;  %v15681_v9 = vld [vmem:[%s17080_s29 + $0x554] ss:$24 sps:$4 sm:$0xff]   ;;  %v15679_v62 = vld [vmem:[%s17080_s29 + $0x550] ss:$24 sps:$4 sm:$0xff]  }
 0x2d9   : > { %3592 = vmatmul.mubr.bf16.gmra.mrb[68].mxu1 %v18035_v51  ;;  %6592 = vmatmul.mubr.bf16.gmra.mrb[20].mxu0 %v18265_v12  ;;  %v15678_v51 = vld [vmem:[%s17080_s29 + $0xb54] ss:$24 sps:$4 sm:$0xff]  }
 0x2da   : > { %3601 = vmatprep.mubr.bf16.mxu1 %v18042_v29  ;;  %6601 = vmatprep.mubr.bf16.mxu0 %v18270_v20  ;;  %v15676_v29 = vld [vmem:[%s17080_s29 + $0xb50] ss:$24 sps:$4 sm:$0xff]  }
 0x2db   : > { %3683 = vmatpush1.bf16.msra.mxu1 %v15664_v18  ;;  %6683 = vmatpush1.bf16.msra.mxu0 %v15667_v50  ;;  %v15684_v18 = vld [vmem:[%s17080_s29 + $0xb84] ss:$24 sps:$4 sm:$0xff]  }
 0x2dc   : > { %3684 = vmatprep.subr.bf16.mxu1 %v15672_v58  ;;  %6684 = vmatprep.subr.bf16.mxu0 %v15675_v61  ;;  %v15687_v50 = vld [vmem:[%s17080_s29 + $0x584] ss:$24 sps:$4 sm:$0xff]   ;;  %v18283_v58 = vld [vmem:[%s17146_s22 + $0x6c0] ss:$144 sps:$4 sm:$0xff]  }
 0x2dd   : > { %v18288_v61 = vld [vmem:[%s17146_s22 + $0x7e4] ss:$144 sps:$4 sm:$0xff]  }
 0x2df   : > { %3685 = vmatpush1.bf16.msra.mxu1 %v15670_v56  ;;  %6685 = vmatpush1.bf16.msra.mxu0 %v15673_v11  ;;  %v15682_v56 = vld [vmem:[%s17080_s29 + $0xb80] ss:$24 sps:$4 sm:$0xff]  }
 0x2e0   : > { %3686 = vmatprep.subr.bf16.mxu1 %v15678_v51  ;;  %6686 = vmatprep.subr.bf16.mxu0 %v15681_v9  ;;  %v15685_v11 = vld [vmem:[%s17080_s29 + $0x580] ss:$24 sps:$4 sm:$0xff]   ;;  %v15693_v51 = vld [vmem:[%s17080_s29 + $0x5b4] ss:$24 sps:$4 sm:$0xff]   ;;  %v15691_v9 = vld [vmem:[%s17080_s29 + $0x5b0] ss:$24 sps:$4 sm:$0xff]  }
 0x2e1   : > { %3602 = vmatmul.mubr.bf16.gmra.mrb[72].mxu1 %v18061_v1  ;;  %6602 = vmatmul.mubr.bf16.gmra.mrb[24].mxu0 %v18283_v58  ;;  %v15690_v1 = vld [vmem:[%s17080_s29 + $0xbb4] ss:$24 sps:$4 sm:$0xff]  }
 0x2e2   : > { %3611 = vmatprep.mubr.bf16.mxu1 %v18068_v5  ;;  %6611 = vmatprep.mubr.bf16.mxu0 %v18288_v61  ;;  %v15688_v5 = vld [vmem:[%s17080_s29 + $0xbb0] ss:$24 sps:$4 sm:$0xff]  }
 0x2e3   : > { %3687 = vmatpush1.bf16.msra.mxu1 %v15676_v29  ;;  %6687 = vmatpush1.bf16.msra.mxu0 %v15679_v62  ;;  %v15696_v29 = vld [vmem:[%s17080_s29 + $0xbe4] ss:$24 sps:$4 sm:$0xff]  }
 0x2e4   : > { %3688 = vmatprep.subr.bf16.mxu1 %v15684_v18  ;;  %6688 = vmatprep.subr.bf16.mxu0 %v15687_v50  ;;  %v15699_v62 = vld [vmem:[%s17080_s29 + $0x5e4] ss:$24 sps:$4 sm:$0xff]   ;;  %v15694_v50 = vld [vmem:[%s17080_s29 + $0xbe0] ss:$24 sps:$4 sm:$0xff]  }
 0x2e5   : > { %v18306_v18 = vld [vmem:[%s17146_s22 + $0x904] ss:$144 sps:$4 sm:$0xff]  }
 0x2e7   : > { %3689 = vmatpush1.bf16.msra.mxu1 %v15682_v56  ;;  %6689 = vmatpush1.bf16.msra.mxu0 %v15685_v11  ;;  %v15697_v56 = vld [vmem:[%s17080_s29 + $0x5e0] ss:$24 sps:$4 sm:$0xff]   ;;  %v15705_v11 = vld [vmem:[%s17080_s29 + $0x614] ss:$24 sps:$4 sm:$0xff]  }
 0x2e8   : > { %3690 = vmatprep.subr.bf16.mxu1 %v15690_v1  ;;  %6690 = vmatprep.subr.bf16.mxu0 %v15693_v51  ;;  %v18320_v1 = vld [vmem:[%s17146_s22 + $0xa24] ss:$144 sps:$4 sm:$0xff]   ;;  %v18325_v51 = vld [vmem:[%s17146_s22 + $0xa20] ss:$144 sps:$4 sm:$0xff]  }
 0x2e9   : > { %3612 = vmatmul.mubr.bf16.gmra.mrb[76].mxu1 %v18083_v26  ;;  %6612 = vmatmul.mubr.bf16.gmra.mrb[28].mxu0 %v18301_v63  ;;  %v15702_v26 = vld [vmem:[%s17080_s29 + $0xc] ss:$24 sps:$4 sm:$0xff]  }
 0x2ea   : > { %3621 = vmatprep.mubr.bf16.mxu1 %v18088_v38  ;;  %6621 = vmatprep.mubr.bf16.mxu0 %v18306_v18  ;;  %v18315_v38 = vld [vmem:[%s17146_s22 + $0x900] ss:$144 sps:$4 sm:$0xff]  }
 0x2eb   : > { %3691 = vmatpush1.bf16.msra.mxu1 %v15688_v5  ;;  %6691 = vmatpush1.bf16.msra.mxu0 %v15691_v9  ;;  %v18340_v5 = vld [vmem:[%s17146_s22 + $0xc64] ss:$144 sps:$4 sm:$0xff]   ;;  %v18345_v9 = vld [vmem:[%s17146_s22 + $0xc60] ss:$144 sps:$4 sm:$0xff]  }
 0x2ec   : > { %3692 = vmatprep.subr.bf16.mxu1 %v15696_v29  ;;  %6692 = vmatprep.subr.bf16.mxu0 %v15699_v62  ;;  %v15700_v29 = vld [vmem:[%s17080_s29 + $0x8] ss:$24 sps:$4 sm:$0xff]  }
 0x2ed   : > { %v15703_v62 = vld [vmem:[%s17080_s29 + $0x610] ss:$24 sps:$4 sm:$0xff]  }
 0x2ef   : > { %3693 = vmatpush1.bf16.msra.mxu1 %v15694_v50  ;;  %6693 = vmatpush1.bf16.msra.mxu0 %v15697_v56  ;;  %v15708_v50 = vld [vmem:[%s17080_s29 + $0x3c] ss:$24 sps:$4 sm:$0xff]  }
 0x2f0   : > { %6050 = vmatprep.subr.bf16.mxu1 %v15702_v26  ;;  %6815 = vmatprep.subr.bf16.mxu0 %v15705_v11  ;;  %v15711_v56 = vld [vmem:[%s17080_s29 + $0x644] ss:$24 sps:$4 sm:$0xff]   ;;  %v18359_v26 = vld [vmem:[%s17146_s22 + $0x8] ss:$144 sps:$4 sm:$0xff]  }
 0x2f1   : > { %3622 = vmatmul.mubr.bf16.gmra.mrb[80].mxu1 %v18101_v49  ;;  %6622 = vmatmul.mubr.bf16.gmra.mrb[32].mxu0 %v18315_v38  ;;  %v18330_v49 = vld [vmem:[%s17146_s22 + $0xb44] ss:$144 sps:$4 sm:$0xff]   ;;  %v15706_v11 = vld [vmem:[%s17080_s29 + $0x38] ss:$24 sps:$4 sm:$0xff]  }
 0x2f2   : > { %3631 = vmatprep.mubr.bf16.mxu1 %v18106_v4  ;;  %6631 = vmatprep.mubr.bf16.mxu0 %v18320_v1  ;;  %v18335_v4 = vld [vmem:[%s17146_s22 + $0xb40] ss:$144 sps:$4 sm:$0xff]  }
 0x2f9   : > { %3632 = vmatmul.mubr.bf16.gmra.mrb[84].mxu1 %v18119_v31  ;;  %6632 = vmatmul.mubr.bf16.gmra.mrb[36].mxu0 %v18325_v51  ;;  %v16524_v31 = vld [vmem:[%s17146_s22 + $0xd94] ss:$144 sps:$4 sm:$0xff]  }
 0x2fa   : > { %3641 = vmatprep.mubr.bf16.mxu1 %v18124_v37  ;;  %6641 = vmatprep.mubr.bf16.mxu0 %v18330_v49  ;;  %v16526_v37 = vld [vmem:[%s17146_s22 + $0xd90] ss:$144 sps:$4 sm:$0xff]  }
 0x301   : > { %3642 = vmatmul.mubr.bf16.gmra.mrb[88].mxu1 %v18137_v32  ;;  %6642 = vmatmul.mubr.bf16.gmra.mrb[40].mxu0 %v18335_v4  ;;  %v18350_v32 = vld [vmem:[%s17146_s22 + $0xc] ss:$144 sps:$4 sm:$0xff]  }
 0x302   : > { %3651 = vmatprep.mubr.bf16.mxu1 %v16524_v31  ;;  %6651 = vmatprep.mubr.bf16.mxu0 %v18340_v5  ;;  %v15709_v31 = vld [vmem:[%s17080_s29 + $0x640] ss:$24 sps:$4 sm:$0xff]  }
 0x309   : > { %3652 = vmatmul.mubr.bf16.gmra.mrb[92].mxu1 %v16526_v37  ;;  %6652 = vmatmul.mubr.bf16.gmra.mrb[44].mxu0 %v18345_v9  ;;  %v15714_v37 = vld [vmem:[%s17080_s29 + $0x6c] ss:$24 sps:$4 sm:$0xff]  }
 0x30a   : > { %3694 = vmatprep.mubr.bf16.mxu1 %v18170_v57  ;;  %6694 = vmatprep.mubr.bf16.mxu0 %v18350_v32 }
 0x311   : > { %3695 = vmatmul.mubr.bf16.vlgmr.msra.gmra.mrb[96].mxu1 %v18185_v3  ;;  %6695 = vmatmul.mubr.bf16.vlgmr.msra.gmra.mrb[0].mxu0 %v18359_v26 }
 0x312   : > { %6051 = vmatpush1.bf16.msra.mxu1 %v15700_v29  ;;  %6816 = vmatpush1.bf16.msra.mxu0 %v15703_v62  ;;  %v15712_v29 = vld [vmem:[%s17080_s29 + $0x68] ss:$24 sps:$4 sm:$0xff]  }
 0x313   : > { %6052 = vmatprep.subr.bf16.mxu1 %v15708_v50  ;;  %6817 = vmatprep.subr.bf16.mxu0 %v15711_v56  ;;  %v15715_v62 = vld [vmem:[%s17080_s29 + $0x670] ss:$24 sps:$4 sm:$0xff]   ;;  %v15720_v50 = vld [vmem:[%s17080_s29 + $0x9c] ss:$24 sps:$4 sm:$0xff]  }
 0x314   : > { %3704 = vmatprep.mubr.bf16.mxu1 %v18192_v53  ;;  %6704 = vmatprep.mubr.bf16.mxu0 %v18368_v55  ;;  %v15723_v56 = vld [vmem:[%s17080_s29 + $0x6a4] ss:$24 sps:$4 sm:$0xff]  }
 0x316   : > { %6053 = vmatpush1.bf16.msra.mxu1 %v15706_v11  ;;  %6818 = vmatpush1.bf16.msra.mxu0 %v15709_v31  ;;  %v15718_v11 = vld [vmem:[%s17080_s29 + $0x98] ss:$24 sps:$4 sm:$0xff]  }
 0x317   : > { %6054 = vmatprep.subr.bf16.mxu1 %v15714_v37  ;;  %6819 = vmatprep.subr.bf16.mxu0 %v15717_v42  ;;  %v15721_v31 = vld [vmem:[%s17080_s29 + $0x6a0] ss:$24 sps:$4 sm:$0xff]   ;;  %v18384_v42 = vld [vmem:[%s17146_s22 + $0x24c] ss:$144 sps:$4 sm:$0xff]  }
 0x318   : > { %v15726_v37 = vld [vmem:[%s17080_s29 + $0xcc] ss:$24 sps:$4 sm:$0xff]  }
 0x319   : > { %3705 = vmatmul.mubr.bf16.gmra.mrb[100].mxu1 %v18211_v28  ;;  %6705 = vmatmul.mubr.bf16.gmra.mrb[4].mxu0 %v18377_v19 }
 0x31a   : > { %6055 = vmatpush1.bf16.msra.mxu1 %v15712_v29  ;;  %6820 = vmatpush1.bf16.msra.mxu0 %v15715_v62  ;;  %v15724_v29 = vld [vmem:[%s17080_s29 + $0xc8] ss:$24 sps:$4 sm:$0xff]  }
 0x31b   : > { %3714 = vmatprep.mubr.bf16.mxu1 %v18216_v43  ;;  %6714 = vmatprep.mubr.bf16.mxu0 %v18384_v42  ;;  %v15727_v62 = vld [vmem:[%s17080_s29 + $0x6d0] ss:$24 sps:$4 sm:$0xff]  }
 0x31c   : > { %6056 = vmatprep.subr.bf16.mxu1 %v15720_v50  ;;  %6821 = vmatprep.subr.bf16.mxu0 %v15723_v56  ;;  %v18400_v50 = vld [vmem:[%s17146_s22 + $0x36c] ss:$144 sps:$4 sm:$0xff]   ;;  %v15733_v56 = vld [vmem:[%s17080_s29 + $0x700] ss:$24 sps:$4 sm:$0xff]  }
 0x31e   : > { %6057 = vmatpush1.bf16.msra.mxu1 %v15718_v11  ;;  %6822 = vmatpush1.bf16.msra.mxu0 %v15721_v31  ;;  %v15738_v11 = vld [vmem:[%s17080_s29 + $0x12c] ss:$24 sps:$4 sm:$0xff]  }
 0x31f   : > { %6058 = vmatprep.subr.bf16.mxu1 %v15726_v37  ;;  %6823 = vmatprep.subr.bf16.mxu0 %v15729_v48  ;;  %v15730_v48 = vld [vmem:[%s17080_s29 + $0xf8] ss:$24 sps:$4 sm:$0xff]   ;;  %v15741_v31 = vld [vmem:[%s17080_s29 + $0x734] ss:$24 sps:$4 sm:$0xff]   ;;  %v15736_v37 = vld [vmem:[%s17080_s29 + $0x128] ss:$24 sps:$4 sm:$0xff]  }
 0x321   : > { %3715 = vmatmul.mubr.bf16.gmra.mrb[104].mxu1 %v18229_v2  ;;  %6715 = vmatmul.mubr.bf16.gmra.mrb[8].mxu0 %v18395_v10 }
 0x322   : > { %3724 = vmatprep.mubr.bf16.mxu1 %v18234_v34  ;;  %6724 = vmatprep.mubr.bf16.mxu0 %v18400_v50 }
 0x323   : > { %6059 = vmatpush1.bf16.msra.mxu1 %v15724_v29  ;;  %6824 = vmatpush1.bf16.msra.mxu0 %v15727_v62  ;;  %v15744_v29 = vld [vmem:[%s17080_s29 + $0x15c] ss:$24 sps:$4 sm:$0xff]  }
 0x324   : > { %6060 = vmatprep.subr.bf16.mxu1 %v15732_v44  ;;  %6825 = vmatprep.subr.bf16.mxu0 %v15735_v36  ;;  %v15747_v62 = vld [vmem:[%s17080_s29 + $0x764] ss:$24 sps:$4 sm:$0xff]   ;;  %v18413_v44 = vld [vmem:[%s17146_s22 + $0x368] ss:$144 sps:$4 sm:$0xff]  }
 0x325   : > { %v18418_v36 = vld [vmem:[%s17146_s22 + $0x48c] ss:$144 sps:$4 sm:$0xff]  }
 0x327   : > { %6061 = vmatpush1.bf16.msra.mxu1 %v15730_v48  ;;  %6826 = vmatpush1.bf16.msra.mxu0 %v15733_v56  ;;  %v15742_v48 = vld [vmem:[%s17080_s29 + $0x158] ss:$24 sps:$4 sm:$0xff]  }
 0x328   : > { %6062 = vmatprep.subr.bf16.mxu1 %v15738_v11  ;;  %6827 = vmatprep.subr.bf16.mxu0 %v15741_v31  ;;  %v15745_v56 = vld [vmem:[%s17080_s29 + $0x760] ss:$24 sps:$4 sm:$0xff]   ;;  %v15750_v11 = vld [vmem:[%s17080_s29 + $0x18c] ss:$24 sps:$4 sm:$0xff]  }
 0x329   : > { %3725 = vmatmul.mubr.bf16.gmra.mrb[108].mxu1 %v18247_v14  ;;  %6725 = vmatmul.mubr.bf16.gmra.mrb[12].mxu0 %v18413_v44  ;;  %v15753_v31 = vld [vmem:[%s17080_s29 + $0x794] ss:$24 sps:$4 sm:$0xff]  }
 0x32a   : > { %3734 = vmatprep.mubr.bf16.mxu1 %v18252_v27  ;;  %6734 = vmatprep.mubr.bf16.mxu0 %v18418_v36 }
 0x32b   : > { %6063 = vmatpush1.bf16.msra.mxu1 %v15736_v37  ;;  %6828 = vmatpush1.bf16.msra.mxu0 %v15739_v17  ;;  %v15756_v37 = vld [vmem:[%s17080_s29 + $0x1bc] ss:$24 sps:$4 sm:$0xff]  }
 0x32c   : > { %6064 = vmatprep.subr.bf16.mxu1 %v15744_v29  ;;  %6829 = vmatprep.subr.bf16.mxu0 %v15747_v62  ;;  %v15759_v17 = vld [vmem:[%s17080_s29 + $0x7c4] ss:$24 sps:$4 sm:$0xff]   ;;  %v18431_v29 = vld [vmem:[%s17146_s22 + $0x488] ss:$144 sps:$4 sm:$0xff]  }
 0x32d   : > { %v18436_v62 = vld [vmem:[%s17146_s22 + $0x5ac] ss:$144 sps:$4 sm:$0xff]  }
 0x32f   : > { %6065 = vmatpush1.bf16.msra.mxu1 %v15742_v48  ;;  %6830 = vmatpush1.bf16.msra.mxu0 %v15745_v56  ;;  %v15754_v48 = vld [vmem:[%s17080_s29 + $0x1b8] ss:$24 sps:$4 sm:$0xff]  }
 0x330   : > { %6066 = vmatprep.subr.bf16.mxu1 %v15750_v11  ;;  %6831 = vmatprep.subr.bf16.mxu0 %v15753_v31  ;;  %v15757_v56 = vld [vmem:[%s17080_s29 + $0x7c0] ss:$24 sps:$4 sm:$0xff]   ;;  %v15762_v11 = vld [vmem:[%s17080_s29 + $0x1ec] ss:$24 sps:$4 sm:$0xff]  }
 0x331   : > { %3735 = vmatmul.mubr.bf16.gmra.mrb[112].mxu1 %v18265_v12  ;;  %6735 = vmatmul.mubr.bf16.gmra.mrb[16].mxu0 %v18431_v29  ;;  %v15765_v31 = vld [vmem:[%s17080_s29 + $0x7f4] ss:$24 sps:$4 sm:$0xff]  }
 0x332   : > { %3744 = vmatprep.mubr.bf16.mxu1 %v18270_v20  ;;  %6744 = vmatprep.mubr.bf16.mxu0 %v18436_v62 }
 0x333   : > { %6067 = vmatpush1.bf16.msra.mxu1 %v15748_v39  ;;  %6832 = vmatpush1.bf16.msra.mxu0 %v15751_v23  ;;  %v15768_v39 = vld [vmem:[%s17080_s29 + $0x21c] ss:$24 sps:$4 sm:$0xff]  }
 0x334   : > { %6068 = vmatprep.subr.bf16.mxu1 %v15756_v37  ;;  %6833 = vmatprep.subr.bf16.mxu0 %v15759_v17  ;;  %v15771_v23 = vld [vmem:[%s17080_s29 + $0x824] ss:$24 sps:$4 sm:$0xff]   ;;  %v18449_v37 = vld [vmem:[%s17146_s22 + $0x5a8] ss:$144 sps:$4 sm:$0xff]  }
 0x335   : > { %v18454_v17 = vld [vmem:[%s17146_s22 + $0x6cc] ss:$144 sps:$4 sm:$0xff]  }
 0x337   : > { %6069 = vmatpush1.bf16.msra.mxu1 %v15754_v48  ;;  %6834 = vmatpush1.bf16.msra.mxu0 %v15757_v56  ;;  %v15766_v48 = vld [vmem:[%s17080_s29 + $0x218] ss:$24 sps:$4 sm:$0xff]  }
 0x338   : > { %6070 = vmatprep.subr.bf16.mxu1 %v15762_v11  ;;  %6835 = vmatprep.subr.bf16.mxu0 %v15765_v31  ;;  %v15769_v56 = vld [vmem:[%s17080_s29 + $0x820] ss:$24 sps:$4 sm:$0xff]   ;;  %v15774_v11 = vld [vmem:[%s17080_s29 + $0x24c] ss:$24 sps:$4 sm:$0xff]  }
 0x339   : > { %3745 = vmatmul.mubr.bf16.gmra.mrb[116].mxu1 %v18283_v58  ;;  %6745 = vmatmul.mubr.bf16.gmra.mrb[20].mxu0 %v18449_v37  ;;  %v15777_v31 = vld [vmem:[%s17080_s29 + $0x854] ss:$24 sps:$4 sm:$0xff]  }
 0x33a   : > { %3754 = vmatprep.mubr.bf16.mxu1 %v18288_v61  ;;  %6754 = vmatprep.mubr.bf16.mxu0 %v18454_v17 }
 0x33b   : > { %6071 = vmatpush1.bf16.msra.mxu1 %v15760_v6  ;;  %6836 = vmatpush1.bf16.msra.mxu0 %v15763_v22  ;;  %v15780_v6 = vld [vmem:[%s17080_s29 + $0x27c] ss:$24 sps:$4 sm:$0xff]  }
 0x33c   : > { %6072 = vmatprep.subr.bf16.mxu1 %v15768_v39  ;;  %6837 = vmatprep.subr.bf16.mxu0 %v15771_v23  ;;  %v15783_v22 = vld [vmem:[%s17080_s29 + $0x884] ss:$24 sps:$4 sm:$0xff]   ;;  %v18467_v39 = vld [vmem:[%s17146_s22 + $0x6c8] ss:$144 sps:$4 sm:$0xff]  }
 0x33d   : > { %v18472_v23 = vld [vmem:[%s17146_s22 + $0x7ec] ss:$144 sps:$4 sm:$0xff]  }
 0x33f   : > { %6073 = vmatpush1.bf16.msra.mxu1 %v15766_v48  ;;  %6838 = vmatpush1.bf16.msra.mxu0 %v15769_v56  ;;  %v15778_v48 = vld [vmem:[%s17080_s29 + $0x278] ss:$24 sps:$4 sm:$0xff]  }
 0x340   : > { %6074 = vmatprep.subr.bf16.mxu1 %v15774_v11  ;;  %6839 = vmatprep.subr.bf16.mxu0 %v15777_v31  ;;  %v15781_v56 = vld [vmem:[%s17080_s29 + $0x880] ss:$24 sps:$4 sm:$0xff]   ;;  %v15786_v11 = vld [vmem:[%s17080_s29 + $0x2ac] ss:$24 sps:$4 sm:$0xff]  }
 0x341   : > { %3755 = vmatmul.mubr.bf16.gmra.mrb[120].mxu1 %v18301_v63  ;;  %6755 = vmatmul.mubr.bf16.gmra.mrb[24].mxu0 %v18467_v39  ;;  %v15789_v31 = vld [vmem:[%s17080_s29 + $0x8b4] ss:$24 sps:$4 sm:$0xff]  }
 0x342   : > { %3764 = vmatprep.mubr.bf16.mxu1 %v18306_v18  ;;  %6764 = vmatprep.mubr.bf16.mxu0 %v18472_v23 }
 0x343   : > { %6075 = vmatpush1.bf16.msra.mxu1 %v15772_v45  ;;  %6840 = vmatpush1.bf16.msra.mxu0 %v15775_v47  ;;  %v15792_v45 = vld [vmem:[%s17080_s29 + $0x2dc] ss:$24 sps:$4 sm:$0xff]  }
 0x344   : > { %6076 = vmatprep.subr.bf16.mxu1 %v15780_v6  ;;  %6841 = vmatprep.subr.bf16.mxu0 %v15783_v22  ;;  %v15795_v47 = vld [vmem:[%s17080_s29 + $0x8e4] ss:$24 sps:$4 sm:$0xff]   ;;  %v15790_v22 = vld [vmem:[%s17080_s29 + $0x2d8] ss:$24 sps:$4 sm:$0xff]  }
 0x345   : > { %v18490_v6 = vld [vmem:[%s17146_s22 + $0x90c] ss:$144 sps:$4 sm:$0xff]  }
 0x347   : > { %6077 = vmatpush1.bf16.msra.mxu1 %v15778_v48  ;;  %6842 = vmatpush1.bf16.msra.mxu0 %v15781_v56  ;;  %v15793_v48 = vld [vmem:[%s17080_s29 + $0x8e0] ss:$24 sps:$4 sm:$0xff]   ;;  %v15798_v56 = vld [vmem:[%s17080_s29 + $0x30c] ss:$24 sps:$4 sm:$0xff]  }
 0x348   : > { %6078 = vmatprep.subr.bf16.mxu1 %v15786_v11  ;;  %6843 = vmatprep.subr.bf16.mxu0 %v15789_v31  ;;  %v15801_v11 = vld [vmem:[%s17080_s29 + $0x1204] ss:$24 sps:$4 sm:$0xff]   ;;  %v18499_v31 = vld [vmem:[%s17146_s22 + $0x908] ss:$144 sps:$4 sm:$0xff]  }
 0x349   : > { %3765 = vmatmul.mubr.bf16.gmra.mrb[124].mxu1 %v18315_v38  ;;  %6765 = vmatmul.mubr.bf16.gmra.mrb[28].mxu0 %v18485_v13 }
 0x34a   : > { %3774 = vmatprep.mubr.bf16.mxu1 %v18320_v1  ;;  %6774 = vmatprep.mubr.bf16.mxu0 %v18490_v6 }
 0x34b   : > { %6079 = vmatpush1.bf16.msra.mxu1 %v15784_v15  ;;  %6844 = vmatpush1.bf16.msra.mxu0 %v15787_v54  ;;  %v18504_v54 = vld [vmem:[%s17146_s22 + $0xa2c] ss:$144 sps:$4 sm:$0xff]   ;;  %v18509_v15 = vld [vmem:[%s17146_s22 + $0xa28] ss:$144 sps:$4 sm:$0xff]  }
 0x34c   : > { %6080 = vmatprep.subr.bf16.mxu1 %v15792_v45  ;;  %6845 = vmatprep.subr.bf16.mxu0 %v15795_v47  ;;  %v18514_v45 = vld [vmem:[%s17146_s22 + $0xb4c] ss:$144 sps:$4 sm:$0xff]   ;;  %v18519_v47 = vld [vmem:[%s17146_s22 + $0xb48] ss:$144 sps:$4 sm:$0xff]  }
 0x34f   : > { %6081 = vmatpush1.bf16.msra.mxu1 %v15790_v22  ;;  %6846 = vmatpush1.bf16.msra.mxu0 %v15793_v48  ;;  %v16550_v22 = vld [vmem:[%s17146_s22 + $0xd84] ss:$144 sps:$4 sm:$0xff]   ;;  %v18524_v48 = vld [vmem:[%s17146_s22 + $0xc6c] ss:$144 sps:$4 sm:$0xff]  }
 0x350   : > { %6203 = vmatprep.subr.bf16.mxu1 %v15798_v56  ;;  %9129 = vmatprep.subr.bf16.mxu0 %v15801_v11  ;;  %v16552_v56 = vld [vmem:[%s17146_s22 + $0xd80] ss:$144 sps:$4 sm:$0xff]   ;;  %v18529_v11 = vld [vmem:[%s17146_s22 + $0xc68] ss:$144 sps:$4 sm:$0xff]  }
 0x351   : > { %3775 = vmatmul.mubr.bf16.gmra.mrb[128].mxu1 %v18325_v51  ;;  %6775 = vmatmul.mubr.bf16.gmra.mrb[32].mxu0 %v18499_v31 }
 0x352   : > { %3784 = vmatprep.mubr.bf16.mxu1 %v18330_v49  ;;  %6784 = vmatprep.mubr.bf16.mxu0 %v18504_v54 }
 0x359   : > { %3785 = vmatmul.mubr.bf16.gmra.mrb[132].mxu1 %v18335_v4  ;;  %6785 = vmatmul.mubr.bf16.gmra.mrb[36].mxu0 %v18509_v15 }
 0x35a   : > { %3794 = vmatprep.mubr.bf16.mxu1 %v18340_v5  ;;  %6794 = vmatprep.mubr.bf16.mxu0 %v18514_v45 }
 0x361   : > { %3795 = vmatmul.mubr.bf16.gmra.mrb[136].mxu1 %v18345_v9  ;;  %6795 = vmatmul.mubr.bf16.gmra.mrb[40].mxu0 %v18519_v47 }
 0x362   : > { %3804 = vmatprep.mubr.bf16.mxu1 %v16550_v22  ;;  %6804 = vmatprep.mubr.bf16.mxu0 %v18524_v48  ;;  %v15796_v22 = vld [vmem:[%s17080_s29 + $0x308] ss:$24 sps:$4 sm:$0xff]  }
 0x369   : > { %3805 = vmatmul.mubr.bf16.gmra.mrb[140].mxu1 %v16552_v56  ;;  %6805 = vmatmul.mubr.bf16.gmra.mrb[44].mxu0 %v18529_v11  ;;  %v18543_v56 = vld [vmem:[%s17146_s22 + $0x10] ss:$144 sps:$4 sm:$0xff]  }
 0x36a   : > { %6082 = vmatprep.mubr.bf16.mxu1 %v18142_v52  ;;  %6847 = vmatprep.mubr.bf16.mxu0 %v18534_v30  ;;  %v15802_v52 = vld [vmem:[%s17080_s29 + $0x338] ss:$24 sps:$4 sm:$0xff]  }
 0x371   : > { %6083 = vmatmul.mubr.bf16.vlgmr.msra.gmra.mrb[48].mxu1 %v18159_v41  ;;  %6848 = vmatmul.mubr.bf16.vlgmr.msra.gmra.mrb[0].mxu0 %v18543_v56  ;;  %v18552_v41 = vld [vmem:[%s17146_s22 + $0x134] ss:$144 sps:$4 sm:$0xff]  }
 0x372   : > { %6204 = vmatpush1.bf16.msra.mxu1 %v15796_v22  ;;  %9130 = vmatpush1.bf16.msra.mxu0 %v15799_v46  ;;  %v15808_v46 = vld [vmem:[%s17080_s29 + $0x368] ss:$24 sps:$4 sm:$0xff]  }
 0x373   : > { %6205 = vmatprep.subr.bf16.mxu1 %v15804_v16  ;;  %9131 = vmatprep.subr.bf16.mxu0 %v15807_v25  ;;  %v15811_v22 = vld [vmem:[%s17080_s29 + $0x1260] ss:$24 sps:$4 sm:$0xff]   ;;  %v15816_v25 = vld [vmem:[%s17080_s29 + $0x39c] ss:$24 sps:$4 sm:$0xff]  }
 0x374   : > { %6092 = vmatprep.mubr.bf16.mxu1 %v18170_v57  ;;  %6857 = vmatprep.mubr.bf16.mxu0 %v18552_v41  ;;  %v15819_v16 = vld [vmem:[%s17080_s29 + $0x1294] ss:$24 sps:$4 sm:$0xff]   ;;  %v18561_v57 = vld [vmem:[%s17146_s22 + $0x130] ss:$144 sps:$4 sm:$0xff]  }
 0x376   : > { %6206 = vmatpush1.bf16.msra.mxu1 %v15802_v52  ;;  %9132 = vmatpush1.bf16.msra.mxu0 %v15805_v33  ;;  %v15814_v33 = vld [vmem:[%s17080_s29 + $0x398] ss:$24 sps:$4 sm:$0xff]  }
 0x377   : > { %6207 = vmatprep.subr.bf16.mxu1 %v15810_v24  ;;  %9133 = vmatprep.subr.bf16.mxu0 %v15813_v21  ;;  %v15817_v52 = vld [vmem:[%s17080_s29 + $0x1290] ss:$24 sps:$4 sm:$0xff]   ;;  %v18568_v21 = vld [vmem:[%s17146_s22 + $0x254] ss:$144 sps:$4 sm:$0xff]  }
 0x378   : > { %v15822_v24 = vld [vmem:[%s17080_s29 + $0x3cc] ss:$24 sps:$4 sm:$0xff]  }
 0x379   : > { %6093 = vmatmul.mubr.bf16.gmra.mrb[52].mxu1 %v18185_v3  ;;  %6858 = vmatmul.mubr.bf16.gmra.mrb[4].mxu0 %v18561_v57  ;;  %v15825_v3 = vld [vmem:[%s17080_s29 + $0x12c4] ss:$24 sps:$4 sm:$0xff]  }
 0x37a   : > { %6208 = vmatpush1.bf16.msra.mxu1 %v15808_v46  ;;  %9134 = vmatpush1.bf16.msra.mxu0 %v15811_v22  ;;  %v15820_v46 = vld [vmem:[%s17080_s29 + $0x3c8] ss:$24 sps:$4 sm:$0xff]  }
 0x37b   : > { %6102 = vmatprep.mubr.bf16.mxu1 %v18192_v53  ;;  %6867 = vmatprep.mubr.bf16.mxu0 %v18568_v21  ;;  %v15823_v22 = vld [vmem:[%s17080_s29 + $0x12c0] ss:$24 sps:$4 sm:$0xff]   ;;  %v15828_v53 = vld [vmem:[%s17080_s29 + $0x3fc] ss:$24 sps:$4 sm:$0xff]  }
 0x37c   : > { %6209 = vmatprep.subr.bf16.mxu1 %v15816_v25  ;;  %9135 = vmatprep.subr.bf16.mxu0 %v15819_v16  ;;  %v18584_v25 = vld [vmem:[%s17146_s22 + $0x374] ss:$144 sps:$4 sm:$0xff]   ;;  %v15826_v16 = vld [vmem:[%s17080_s29 + $0x3f8] ss:$24 sps:$4 sm:$0xff]  }
 0x37e   : > { %6210 = vmatpush1.bf16.msra.mxu1 %v15814_v33  ;;  %9136 = vmatpush1.bf16.msra.mxu0 %v15817_v52  ;;  %v15829_v33 = vld [vmem:[%s17080_s29 + $0x12f0] ss:$24 sps:$4 sm:$0xff]   ;;  %v15837_v52 = vld [vmem:[%s17080_s29 + $0x1324] ss:$24 sps:$4 sm:$0xff]  }
 0x37f   : > { %6211 = vmatprep.subr.bf16.mxu1 %v15822_v24  ;;  %9137 = vmatprep.subr.bf16.mxu0 %v15825_v3  ;;  %v15835_v24 = vld [vmem:[%s17080_s29 + $0x1320] ss:$24 sps:$4 sm:$0xff]   ;;  %v15840_v3 = vld [vmem:[%s17080_s29 + $0x45c] ss:$24 sps:$4 sm:$0xff]  }
 0x381   : > { %6103 = vmatmul.mubr.bf16.gmra.mrb[56].mxu1 %v18211_v28  ;;  %6868 = vmatmul.mubr.bf16.gmra.mrb[8].mxu0 %v18579_v59  ;;  %v15834_v28 = vld [vmem:[%s17080_s29 + $0x42c] ss:$24 sps:$4 sm:$0xff]  }
 0x382   : > { %6112 = vmatprep.mubr.bf16.mxu1 %v18216_v43  ;;  %6877 = vmatprep.mubr.bf16.mxu0 %v18584_v25  ;;  %v15832_v43 = vld [vmem:[%s17080_s29 + $0x428] ss:$24 sps:$4 sm:$0xff]  }
 0x383   : > { %6212 = vmatpush1.bf16.msra.mxu1 %v15820_v46  ;;  %9138 = vmatpush1.bf16.msra.mxu0 %v15823_v22  ;;  %v15843_v46 = vld [vmem:[%s17080_s29 + $0x1354] ss:$24 sps:$4 sm:$0xff]   ;;  %v18597_v22 = vld [vmem:[%s17146_s22 + $0x370] ss:$144 sps:$4 sm:$0xff]  }
 0x384   : > { %6213 = vmatprep.subr.bf16.mxu1 %v15828_v53  ;;  %9139 = vmatprep.subr.bf16.mxu0 %v15831_v40  ;;  %v18602_v40 = vld [vmem:[%s17146_s22 + $0x494] ss:$144 sps:$4 sm:$0xff]   ;;  %v15838_v53 = vld [vmem:[%s17080_s29 + $0x458] ss:$24 sps:$4 sm:$0xff]  }
 0x387   : > { %6214 = vmatpush1.bf16.msra.mxu1 %v15826_v16  ;;  %9140 = vmatpush1.bf16.msra.mxu0 %v15829_v33  ;;  %v15841_v16 = vld [vmem:[%s17080_s29 + $0x1350] ss:$24 sps:$4 sm:$0xff]   ;;  %v15849_v33 = vld [vmem:[%s17080_s29 + $0x1384] ss:$24 sps:$4 sm:$0xff]  }
 0x388   : > { %6215 = vmatprep.subr.bf16.mxu1 %v15834_v28  ;;  %9141 = vmatprep.subr.bf16.mxu0 %v15837_v52  ;;  %v15847_v28 = vld [vmem:[%s17080_s29 + $0x1380] ss:$24 sps:$4 sm:$0xff]   ;;  %v15852_v52 = vld [vmem:[%s17080_s29 + $0x4bc] ss:$24 sps:$4 sm:$0xff]  }
 0x389   : > { %6113 = vmatmul.mubr.bf16.gmra.mrb[60].mxu1 %v18229_v2  ;;  %6878 = vmatmul.mubr.bf16.gmra.mrb[12].mxu0 %v18597_v22  ;;  %v15846_v2 = vld [vmem:[%s17080_s29 + $0x48c] ss:$24 sps:$4 sm:$0xff]  }
 0x38a   : > { %6122 = vmatprep.mubr.bf16.mxu1 %v18234_v34  ;;  %6887 = vmatprep.mubr.bf16.mxu0 %v18602_v40  ;;  %v15844_v34 = vld [vmem:[%s17080_s29 + $0x488] ss:$24 sps:$4 sm:$0xff]  }
 0x38b   : > { %6216 = vmatpush1.bf16.msra.mxu1 %v15832_v43  ;;  %9142 = vmatpush1.bf16.msra.mxu0 %v15835_v24  ;;  %v15855_v43 = vld [vmem:[%s17080_s29 + $0x13b4] ss:$24 sps:$4 sm:$0xff]   ;;  %v18615_v24 = vld [vmem:[%s17146_s22 + $0x490] ss:$144 sps:$4 sm:$0xff]  }
 0x38c   : > { %6217 = vmatprep.subr.bf16.mxu1 %v15840_v3  ;;  %9143 = vmatprep.subr.bf16.mxu0 %v15843_v46  ;;  %v18620_v3 = vld [vmem:[%s17146_s22 + $0x5b4] ss:$144 sps:$4 sm:$0xff]   ;;  %v15850_v46 = vld [vmem:[%s17080_s29 + $0x4b8] ss:$24 sps:$4 sm:$0xff]  }
 0x38f   : > { %6218 = vmatpush1.bf16.msra.mxu1 %v15838_v53  ;;  %9144 = vmatpush1.bf16.msra.mxu0 %v15841_v16  ;;  %v15853_v53 = vld [vmem:[%s17080_s29 + $0x13b0] ss:$24 sps:$4 sm:$0xff]   ;;  %v15861_v16 = vld [vmem:[%s17080_s29 + $0x13e4] ss:$24 sps:$4 sm:$0xff]  }
 0x390   : > { %6219 = vmatprep.subr.bf16.mxu1 %v15846_v2  ;;  %9145 = vmatprep.subr.bf16.mxu0 %v15849_v33  ;;  %v15859_v2 = vld [vmem:[%s17080_s29 + $0x13e0] ss:$24 sps:$4 sm:$0xff]   ;;  %v15864_v33 = vld [vmem:[%s17080_s29 + $0x51c] ss:$24 sps:$4 sm:$0xff]  }
 0x391   : > { %6123 = vmatmul.mubr.bf16.gmra.mrb[64].mxu1 %v18247_v14  ;;  %6888 = vmatmul.mubr.bf16.gmra.mrb[16].mxu0 %v18615_v24  ;;  %v15858_v14 = vld [vmem:[%s17080_s29 + $0x4ec] ss:$24 sps:$4 sm:$0xff]  }
 0x392   : > { %6132 = vmatprep.mubr.bf16.mxu1 %v18252_v27  ;;  %6897 = vmatprep.mubr.bf16.mxu0 %v18620_v3  ;;  %v15856_v27 = vld [vmem:[%s17080_s29 + $0x4e8] ss:$24 sps:$4 sm:$0xff]  }
 0x393   : > { %6220 = vmatpush1.bf16.msra.mxu1 %v15844_v34  ;;  %9146 = vmatpush1.bf16.msra.mxu0 %v15847_v28  ;;  %v15867_v34 = vld [vmem:[%s17080_s29 + $0x1414] ss:$24 sps:$4 sm:$0xff]   ;;  %v18633_v28 = vld [vmem:[%s17146_s22 + $0x5b0] ss:$144 sps:$4 sm:$0xff]  }
 0x394   : > { %6221 = vmatprep.subr.bf16.mxu1 %v15852_v52  ;;  %9147 = vmatprep.subr.bf16.mxu0 %v15855_v43  ;;  %v18638_v52 = vld [vmem:[%s17146_s22 + $0x6d4] ss:$144 sps:$4 sm:$0xff]   ;;  %v15862_v43 = vld [vmem:[%s17080_s29 + $0x518] ss:$24 sps:$4 sm:$0xff]  }
 0x397   : > { %6222 = vmatpush1.bf16.msra.mxu1 %v15850_v46  ;;  %9148 = vmatpush1.bf16.msra.mxu0 %v15853_v53  ;;  %v15865_v46 = vld [vmem:[%s17080_s29 + $0x1410] ss:$24 sps:$4 sm:$0xff]   ;;  %v15873_v53 = vld [vmem:[%s17080_s29 + $0x1444] ss:$24 sps:$4 sm:$0xff]  }
 0x398   : > { %6223 = vmatprep.subr.bf16.mxu1 %v15858_v14  ;;  %9149 = vmatprep.subr.bf16.mxu0 %v15861_v16  ;;  %v15871_v14 = vld [vmem:[%s17080_s29 + $0x1440] ss:$24 sps:$4 sm:$0xff]   ;;  %v15876_v16 = vld [vmem:[%s17080_s29 + $0x57c] ss:$24 sps:$4 sm:$0xff]  }
 0x399   : > { %6133 = vmatmul.mubr.bf16.gmra.mrb[68].mxu1 %v18265_v12  ;;  %6898 = vmatmul.mubr.bf16.gmra.mrb[20].mxu0 %v18633_v28  ;;  %v15870_v12 = vld [vmem:[%s17080_s29 + $0x54c] ss:$24 sps:$4 sm:$0xff]  }
 0x39a   : > { %6142 = vmatprep.mubr.bf16.mxu1 %v18270_v20  ;;  %6907 = vmatprep.mubr.bf16.mxu0 %v18638_v52  ;;  %v15868_v20 = vld [vmem:[%s17080_s29 + $0x548] ss:$24 sps:$4 sm:$0xff]  }
 0x39b   : > { %6224 = vmatpush1.bf16.msra.mxu1 %v15856_v27  ;;  %9150 = vmatpush1.bf16.msra.mxu0 %v15859_v2  ;;  %v15879_v27 = vld [vmem:[%s17080_s29 + $0x1474] ss:$24 sps:$4 sm:$0xff]   ;;  %v18651_v2 = vld [vmem:[%s17146_s22 + $0x6d0] ss:$144 sps:$4 sm:$0xff]  }
 0x39c   : > { %6225 = vmatprep.subr.bf16.mxu1 %v15864_v33  ;;  %9151 = vmatprep.subr.bf16.mxu0 %v15867_v34  ;;  %v18656_v33 = vld [vmem:[%s17146_s22 + $0x7f4] ss:$144 sps:$4 sm:$0xff]   ;;  %v15874_v34 = vld [vmem:[%s17080_s29 + $0x578] ss:$24 sps:$4 sm:$0xff]  }
 0x39f   : > { %6226 = vmatpush1.bf16.msra.mxu1 %v15862_v43  ;;  %9152 = vmatpush1.bf16.msra.mxu0 %v15865_v46  ;;  %v15877_v43 = vld [vmem:[%s17080_s29 + $0x1470] ss:$24 sps:$4 sm:$0xff]   ;;  %v15885_v46 = vld [vmem:[%s17080_s29 + $0x14a4] ss:$24 sps:$4 sm:$0xff]  }
 0x3a0   : > { %6227 = vmatprep.subr.bf16.mxu1 %v15870_v12  ;;  %9153 = vmatprep.subr.bf16.mxu0 %v15873_v53  ;;  %v15883_v12 = vld [vmem:[%s17080_s29 + $0x14a0] ss:$24 sps:$4 sm:$0xff]   ;;  %v15888_v53 = vld [vmem:[%s17080_s29 + $0x5dc] ss:$24 sps:$4 sm:$0xff]  }
 0x3a1   : > { %6143 = vmatmul.mubr.bf16.gmra.mrb[72].mxu1 %v18283_v58  ;;  %6908 = vmatmul.mubr.bf16.gmra.mrb[24].mxu0 %v18651_v2  ;;  %v15882_v58 = vld [vmem:[%s17080_s29 + $0x5ac] ss:$24 sps:$4 sm:$0xff]  }
 0x3a2   : > { %6152 = vmatprep.mubr.bf16.mxu1 %v18288_v61  ;;  %6917 = vmatprep.mubr.bf16.mxu0 %v18656_v33  ;;  %v15880_v61 = vld [vmem:[%s17080_s29 + $0x5a8] ss:$24 sps:$4 sm:$0xff]  }
 0x3a3   : > { %6228 = vmatpush1.bf16.msra.mxu1 %v15868_v20  ;;  %9154 = vmatpush1.bf16.msra.mxu0 %v15871_v14  ;;  %v15891_v20 = vld [vmem:[%s17080_s29 + $0x14d4] ss:$24 sps:$4 sm:$0xff]   ;;  %v18669_v14 = vld [vmem:[%s17146_s22 + $0x7f0] ss:$144 sps:$4 sm:$0xff]  }
 0x3a4   : > { %6229 = vmatprep.subr.bf16.mxu1 %v15876_v16  ;;  %9155 = vmatprep.subr.bf16.mxu0 %v15879_v27  ;;  %v18674_v16 = vld [vmem:[%s17146_s22 + $0x914] ss:$144 sps:$4 sm:$0xff]   ;;  %v15886_v27 = vld [vmem:[%s17080_s29 + $0x5d8] ss:$24 sps:$4 sm:$0xff]  }
 0x3a7   : > { %6230 = vmatpush1.bf16.msra.mxu1 %v15874_v34  ;;  %9156 = vmatpush1.bf16.msra.mxu0 %v15877_v43  ;;  %v15889_v34 = vld [vmem:[%s17080_s29 + $0x14d0] ss:$24 sps:$4 sm:$0xff]   ;;  %v15900_v43 = vld [vmem:[%s17080_s29 + $0x1504] ss:$24 sps:$4 sm:$0xff]  }
 0x3a8   : > { %6231 = vmatprep.subr.bf16.mxu1 %v15882_v58  ;;  %9157 = vmatprep.subr.bf16.mxu0 %v15885_v46  ;;  %v18688_v58 = vld [vmem:[%s17146_s22 + $0xa34] ss:$144 sps:$4 sm:$0xff]   ;;  %v18693_v46 = vld [vmem:[%s17146_s22 + $0xa30] ss:$144 sps:$4 sm:$0xff]  }
 0x3a9   : > { %6153 = vmatmul.mubr.bf16.gmra.mrb[76].mxu1 %v18301_v63  ;;  %6918 = vmatmul.mubr.bf16.gmra.mrb[28].mxu0 %v18669_v14  ;;  %v15897_v63 = vld [vmem:[%s17080_s29 + $0x60c] ss:$24 sps:$4 sm:$0xff]  }
 0x3aa   : > { %6162 = vmatprep.mubr.bf16.mxu1 %v18306_v18  ;;  %6927 = vmatprep.mubr.bf16.mxu0 %v18674_v16  ;;  %v18683_v18 = vld [vmem:[%s17146_s22 + $0x910] ss:$144 sps:$4 sm:$0xff]  }
 0x3ab   : > { %6232 = vmatpush1.bf16.msra.mxu1 %v15880_v61  ;;  %9158 = vmatpush1.bf16.msra.mxu0 %v15883_v12  ;;  %v18716_v61 = vld [vmem:[%s17146_s22 + $0xc70] ss:$144 sps:$4 sm:$0xff]  }
 0x3ac   : > { %6233 = vmatprep.subr.bf16.mxu1 %v15888_v53  ;;  %9159 = vmatprep.subr.bf16.mxu0 %v15891_v20  ;;  %v15898_v12 = vld [vmem:[%s17080_s29 + $0x1500] ss:$24 sps:$4 sm:$0xff]   ;;  %v15903_v53 = vld [vmem:[%s17080_s29 + $0x63c] ss:$24 sps:$4 sm:$0xff]  }
 0x3ad   : > { %v15906_v20 = vld [vmem:[%s17080_s29 + $0x1534] ss:$24 sps:$4 sm:$0xff]  }
 0x3af   : > { %6234 = vmatpush1.bf16.msra.mxu1 %v15886_v27  ;;  %9160 = vmatpush1.bf16.msra.mxu0 %v15889_v34  ;;  %v18729_v27 = vld [vmem:[%s17146_s22 + $0x364] ss:$144 sps:$4 sm:$0xff]  }
 0x3b0   : > { %6356 = vmatprep.subr.bf16.mxu1 %v15897_v63  ;;  %9282 = vmatprep.subr.bf16.mxu0 %v15900_v43  ;;  %v15912_v34 = vld [vmem:[%s17080_s29 + $0x66c] ss:$24 sps:$4 sm:$0xff]   ;;  %v15910_v43 = vld [vmem:[%s17080_s29 + $0x668] ss:$24 sps:$4 sm:$0xff]  }
 0x3b1   : > { %6163 = vmatmul.mubr.bf16.gmra.mrb[80].mxu1 %v18315_v38  ;;  %6928 = vmatmul.mubr.bf16.gmra.mrb[32].mxu0 %v18683_v18  ;;  %v18698_v38 = vld [vmem:[%s17146_s22 + $0xb54] ss:$144 sps:$4 sm:$0xff]  }
 0x3b2   : > { %6172 = vmatprep.mubr.bf16.mxu1 %v18320_v1  ;;  %6937 = vmatprep.mubr.bf16.mxu0 %v18688_v58  ;;  %v18703_v1 = vld [vmem:[%s17146_s22 + $0xb50] ss:$144 sps:$4 sm:$0xff]   ;;  %v15915_v63 = vld [vmem:[%s17080_s29 + $0x1564] ss:$24 sps:$4 sm:$0xff]  }
 0x3b9   : > { %6173 = vmatmul.mubr.bf16.gmra.mrb[84].mxu1 %v18325_v51  ;;  %6938 = vmatmul.mubr.bf16.gmra.mrb[36].mxu0 %v18693_v46  ;;  %v18708_v51 = vld [vmem:[%s17146_s22 + $0xc74] ss:$144 sps:$4 sm:$0xff]  }
 0x3ba   : > { %6182 = vmatprep.mubr.bf16.mxu1 %v18330_v49  ;;  %6947 = vmatprep.mubr.bf16.mxu0 %v18698_v38  ;;  %v18712_v49 = vld [vmem:[%s17146_s22 + $0x244] ss:$144 sps:$4 sm:$0xff]  }
 0x3c1   : > { %6183 = vmatmul.mubr.bf16.gmra.mrb[88].mxu1 %v18335_v4  ;;  %6948 = vmatmul.mubr.bf16.gmra.mrb[40].mxu0 %v18703_v1  ;;  %v18722_v4 = vld [vmem:[%s17146_s22 + $0x240] ss:$144 sps:$4 sm:$0xff]  }
 0x3c2   : > { %6192 = vmatprep.mubr.bf16.mxu1 %v18340_v5  ;;  %6957 = vmatprep.mubr.bf16.mxu0 %v18708_v51  ;;  %v15895_v5 = vld [vmem:[%s17080_s29 + $0x608] ss:$24 sps:$4 sm:$0xff]  }
 0x3c9   : > { %6193 = vmatmul.mubr.bf16.gmra.mrb[92].mxu1 %v18345_v9  ;;  %6958 = vmatmul.mubr.bf16.gmra.mrb[44].mxu0 %v18716_v61  ;;  %v15901_v9 = vld [vmem:[%s17080_s29 + $0x638] ss:$24 sps:$4 sm:$0xff]  }
 0x3ca   : > { %6235 = vmatprep.mubr.bf16.mxu1 %v18350_v32  ;;  %9161 = vmatprep.mubr.bf16.mxu0 %v18712_v49  ;;  %v15904_v32 = vld [vmem:[%s17080_s29 + $0x1530] ss:$24 sps:$4 sm:$0xff]  }
 0x3d1   : > { %6236 = vmatmul.mubr.bf16.vlgmr.msra.gmra.mrb[48].mxu1 %v18359_v26  ;;  %9162 = vmatmul.mubr.bf16.vlgmr.msra.gmra.mrb[48].mxu0 %v18722_v4  ;;  %v18740_v26 = vld [vmem:[%s17146_s22 + $0x360] ss:$144 sps:$4 sm:$0xff]  }
 0x3d2   : > { %6357 = vmatpush1.bf16.msra.mxu1 %v15895_v5  ;;  %9283 = vmatpush1.bf16.msra.mxu0 %v15898_v12  ;;  %v15913_v5 = vld [vmem:[%s17080_s29 + $0x1560] ss:$24 sps:$4 sm:$0xff]   ;;  %v18745_v12 = vld [vmem:[%s17146_s22 + $0x484] ss:$144 sps:$4 sm:$0xff]  }
 0x3d3   : > { %6358 = vmatprep.subr.bf16.mxu1 %v15903_v53  ;;  %9284 = vmatprep.subr.bf16.mxu0 %v15906_v20  ;;  %v15921_v53 = vld [vmem:[%s17080_s29 + $0x69c] ss:$24 sps:$4 sm:$0xff]  }
 0x3d4   : > { %6245 = vmatprep.mubr.bf16.mxu1 %v18368_v55  ;;  %9171 = vmatprep.mubr.bf16.mxu0 %v18729_v27  ;;  %v15924_v20 = vld [vmem:[%s17080_s29 + $0x1594] ss:$24 sps:$4 sm:$0xff]   ;;  %v15919_v55 = vld [vmem:[%s17080_s29 + $0x698] ss:$24 sps:$4 sm:$0xff]  }
 0x3d6   : > { %6359 = vmatpush1.bf16.msra.mxu1 %v15901_v9  ;;  %9285 = vmatpush1.bf16.msra.mxu0 %v15904_v32  ;;  %v15922_v9 = vld [vmem:[%s17080_s29 + $0x1590] ss:$24 sps:$4 sm:$0xff]   ;;  %v15929_v32 = vld [vmem:[%s17080_s29 + $0x6cc] ss:$24 sps:$4 sm:$0xff]  }
 0x3d7   : > { %6360 = vmatprep.subr.bf16.mxu1 %v15912_v34  ;;  %9286 = vmatprep.subr.bf16.mxu0 %v15915_v63  ;;  %v15933_v34 = vld [vmem:[%s17080_s29 + $0x15c4] ss:$24 sps:$4 sm:$0xff]   ;;  %v18758_v63 = vld [vmem:[%s17146_s22 + $0x480] ss:$144 sps:$4 sm:$0xff]  }
 0x3d9   : > { %6246 = vmatmul.mubr.bf16.gmra.mrb[52].mxu1 %v18377_v19  ;;  %9172 = vmatmul.mubr.bf16.gmra.mrb[52].mxu0 %v18740_v26  ;;  %v18761_v19 = vld [vmem:[%s17146_s22 + $0x5a4] ss:$144 sps:$4 sm:$0xff]  }
 0x3da   : > { %6361 = vmatpush1.bf16.msra.mxu1 %v15910_v43  ;;  %9287 = vmatpush1.bf16.msra.mxu0 %v15913_v5  ;;  %v15927_v43 = vld [vmem:[%s17080_s29 + $0x6c8] ss:$24 sps:$4 sm:$0xff]  }
 0x3db   : > { %6255 = vmatprep.mubr.bf16.mxu1 %v18384_v42  ;;  %9181 = vmatprep.mubr.bf16.mxu0 %v18745_v12  ;;  %v15931_v5 = vld [vmem:[%s17080_s29 + $0x15c0] ss:$24 sps:$4 sm:$0xff]   ;;  %v15936_v42 = vld [vmem:[%s17080_s29 + $0x6fc] ss:$24 sps:$4 sm:$0xff]  }
 0x3dc   : > { %6362 = vmatprep.subr.bf16.mxu1 %v15921_v53  ;;  %9288 = vmatprep.subr.bf16.mxu0 %v15924_v20  ;;  %v15934_v53 = vld [vmem:[%s17080_s29 + $0x6f8] ss:$24 sps:$4 sm:$0xff]  }
 0x3dd   : > { %v15937_v20 = vld [vmem:[%s17080_s29 + $0x15f0] ss:$24 sps:$4 sm:$0xff]  }
 0x3de   : > { %6363 = vmatpush1.bf16.msra.mxu1 %v15919_v55  ;;  %9289 = vmatpush1.bf16.msra.mxu0 %v15922_v9  ;;  %v15948_v9 = vld [vmem:[%s17080_s29 + $0x1624] ss:$24 sps:$4 sm:$0xff]  }
 0x3df   : > { %6364 = vmatprep.subr.bf16.mxu1 %v15929_v32  ;;  %9290 = vmatprep.subr.bf16.mxu0 %v15933_v34  ;;  %v18780_v34 = vld [vmem:[%s17146_s22 + $0x5a0] ss:$144 sps:$4 sm:$0xff]  }
 0x3e1   : > { %6256 = vmatmul.mubr.bf16.gmra.mrb[56].mxu1 %v18395_v10  ;;  %9182 = vmatmul.mubr.bf16.gmra.mrb[56].mxu0 %v18758_v63  ;;  %v15945_v10 = vld [vmem:[%s17080_s29 + $0x72c] ss:$24 sps:$4 sm:$0xff]  }
 0x3e2   : > { %6265 = vmatprep.mubr.bf16.mxu1 %v18400_v50  ;;  %9191 = vmatprep.mubr.bf16.mxu0 %v18761_v19 }
 0x3e3   : > { %6365 = vmatpush1.bf16.msra.mxu1 %v15927_v43  ;;  %9291 = vmatpush1.bf16.msra.mxu0 %v15931_v5  ;;  %v18785_v43 = vld [vmem:[%s17146_s22 + $0x6c4] ss:$144 sps:$4 sm:$0xff]  }
 0x3e4   : > { %v18773_v55 = vpop.f32.mrb[96].mxu1  ;;  %6366 = vmatprep.subr.bf16.mxu1 %v15936_v42  ;;  %9292 = vmatprep.subr.bf16.mxu0 %v15939_v8  ;;  %v15946_v42 = vld [vmem:[%s17080_s29 + $0x1620] ss:$24 sps:$4 sm:$0xff]   ;;  %v15954_v8 = vld [vmem:[%s17080_s29 + $0x75c] ss:$24 sps:$4 sm:$0xff]  }
 0x3e5   : > { %21374 = vst [vmem:[#allocation69_spill] sm:$0xff] %v18773_v55  ;;  %v18777_v32 = vpop.f32.mrb[97].mxu1  ;;  %v15943_v55 = vld [vmem:[%s17080_s29 + $0x728] ss:$24 sps:$4 sm:$0xff]  }
 0x3e6   : > { %21375 = vst [vmem:[#allocation70_spill] sm:$0xff] %v18777_v32  ;;  %v18782_v50 = vpop.f32.mrb[98].mxu1  ;;  %v15957_v32 = vld [vmem:[%s17080_s29 + $0x1654] ss:$24 sps:$4 sm:$0xff]  }
 0x3e7   : > { %21376 = vst [vmem:[#allocation71_spill] sm:$0xff] %v18782_v50  ;;  %v18787_v5 = vpop.f32.mrb[99].mxu1  ;;  %6367 = vmatpush1.bf16.msra.mxu1 %v15934_v53  ;;  %9293 = vmatpush1.bf16.msra.mxu0 %v15937_v20  ;;  %v15952_v53 = vld [vmem:[%s17080_s29 + $0x758] ss:$24 sps:$4 sm:$0xff]  }
 0x3e8   : > { %21377 = vst [vmem:[#allocation72_spill] sm:$0xff] %v18787_v5  ;;  %6368 = vmatprep.subr.bf16.mxu1 %v15945_v10  ;;  %9294 = vmatprep.subr.bf16.mxu0 %v15948_v9  ;;  %v15955_v20 = vld [vmem:[%s17080_s29 + $0x1650] ss:$24 sps:$4 sm:$0xff]   ;;  %v15966_v9 = vld [vmem:[%s17080_s29 + $0x1684] ss:$24 sps:$4 sm:$0xff]  }
 0x3e9   : > { %6266 = vmatmul.mubr.bf16.gmra.mrb[60].mxu1 %v18413_v44  ;;  %9192 = vmatmul.mubr.bf16.gmra.mrb[60].mxu0 %v18780_v34  ;;  %v15962_v44 = vld [vmem:[%s17080_s29 + $0x78c] ss:$24 sps:$4 sm:$0xff]   ;;  %v18806_v50 = vld [vmem:[%s17146_s22 + $0x6c0] ss:$144 sps:$4 sm:$0xff]  }
 0x3ea   : > { %6275 = vmatprep.mubr.bf16.mxu1 %v18418_v36  ;;  %9201 = vmatprep.mubr.bf16.mxu0 %v18785_v43 }
 0x3eb   : > { %6369 = vmatpush1.bf16.msra.mxu1 %v15943_v55  ;;  %9295 = vmatpush1.bf16.msra.mxu0 %v15946_v42  ;;  %v18811_v55 = vld [vmem:[%s17146_s22 + $0x7e4] ss:$144 sps:$4 sm:$0xff]  }
 0x3ec   : > { %v18799_v10 = vpop.f32.mrb[100].mxu1  ;;  %6370 = vmatprep.subr.bf16.mxu1 %v15954_v8  ;;  %9296 = vmatprep.subr.bf16.mxu0 %v15957_v32  ;;  %v15964_v8 = vld [vmem:[%s17080_s29 + $0x1680] ss:$24 sps:$4 sm:$0xff]   ;;  %v15969_v32 = vld [vmem:[%s17080_s29 + $0x7bc] ss:$24 sps:$4 sm:$0xff]  }
 0x3ed   : > { %21378 = vst [vmem:[#allocation73_spill] sm:$0xff] %v18799_v10  ;;  %v18803_v5 = vpop.f32.mrb[101].mxu1  ;;  %v15960_v10 = vld [vmem:[%s17080_s29 + $0x788] ss:$24 sps:$4 sm:$0xff]  }
 0x3ee   : > { %21379 = vst [vmem:[#allocation74_spill] sm:$0xff] %v18803_v5  ;;  %v18808_v36 = vpop.f32.mrb[102].mxu1  ;;  %v15972_v5 = vld [vmem:[%s17080_s29 + $0x16b4] ss:$24 sps:$4 sm:$0xff]  }
 0x3ef   : > { %21380 = vst [vmem:[#allocation75_spill] sm:$0xff] %v18808_v36  ;;  %v18813_v42 = vpop.f32.mrb[103].mxu1  ;;  %6371 = vmatpush1.bf16.msra.mxu1 %v15952_v53  ;;  %9297 = vmatpush1.bf16.msra.mxu0 %v15955_v20  ;;  %v15967_v53 = vld [vmem:[%s17080_s29 + $0x7b8] ss:$24 sps:$4 sm:$0xff]  }
 0x3f0   : > { %21381 = vst [vmem:[#allocation76_spill] sm:$0xff] %v18813_v42  ;;  %6372 = vmatprep.subr.bf16.mxu1 %v15962_v44  ;;  %9298 = vmatprep.subr.bf16.mxu0 %v15966_v9  ;;  %v15970_v20 = vld [vmem:[%s17080_s29 + $0x16b0] ss:$24 sps:$4 sm:$0xff]   ;;  %v15981_v9 = vld [vmem:[%s17080_s29 + $0x16e4] ss:$24 sps:$4 sm:$0xff]  }
 0x3f1   : > { %6276 = vmatmul.mubr.bf16.gmra.mrb[64].mxu1 %v18431_v29  ;;  %9202 = vmatmul.mubr.bf16.gmra.mrb[64].mxu0 %v18806_v50  ;;  %v15978_v29 = vld [vmem:[%s17080_s29 + $0x7ec] ss:$24 sps:$4 sm:$0xff]   ;;  %v18832_v36 = vld [vmem:[%s17146_s22 + $0x7e0] ss:$144 sps:$4 sm:$0xff]  }
 0x3f2   : > { %6285 = vmatprep.mubr.bf16.mxu1 %v18436_v62  ;;  %9211 = vmatprep.mubr.bf16.mxu0 %v18811_v55 }
 0x3f3   : > { %6373 = vmatpush1.bf16.msra.mxu1 %v15960_v10  ;;  %9299 = vmatpush1.bf16.msra.mxu0 %v15964_v8  ;;  %v18837_v10 = vld [vmem:[%s17146_s22 + $0x904] ss:$144 sps:$4 sm:$0xff]  }
 0x3f4   : > { %v18825_v44 = vpop.f32.mrb[104].mxu1  ;;  %6374 = vmatprep.subr.bf16.mxu1 %v15969_v32  ;;  %9300 = vmatprep.subr.bf16.mxu0 %v15972_v5  ;;  %v15979_v32 = vld [vmem:[%s17080_s29 + $0x16e0] ss:$24 sps:$4 sm:$0xff]   ;;  %v15987_v5 = vld [vmem:[%s17080_s29 + $0x81c] ss:$24 sps:$4 sm:$0xff]  }
 0x3f5   : > { %21382 = vst [vmem:[#allocation77_spill] sm:$0xff] %v18825_v44  ;;  %v18829_v42 = vpop.f32.mrb[105].mxu1  ;;  %v15976_v44 = vld [vmem:[%s17080_s29 + $0x7e8] ss:$24 sps:$4 sm:$0xff]  }
 0x3f6   : > { %21383 = vst [vmem:[#allocation78_spill] sm:$0xff] %v18829_v42  ;;  %v18834_v62 = vpop.f32.mrb[106].mxu1  ;;  %v15990_v42 = vld [vmem:[%s17080_s29 + $0x1714] ss:$24 sps:$4 sm:$0xff]  }
 0x3f7   : > { %21384 = vst [vmem:[#allocation79_spill] sm:$0xff] %v18834_v62  ;;  %v18839_v8 = vpop.f32.mrb[107].mxu1  ;;  %6375 = vmatpush1.bf16.msra.mxu1 %v15967_v53  ;;  %9301 = vmatpush1.bf16.msra.mxu0 %v15970_v20  ;;  %v15985_v53 = vld [vmem:[%s17080_s29 + $0x818] ss:$24 sps:$4 sm:$0xff]  }
 0x3f8   : > { %21385 = vst [vmem:[#allocation80_spill] sm:$0xff] %v18839_v8  ;;  %6376 = vmatprep.subr.bf16.mxu1 %v15978_v29  ;;  %9302 = vmatprep.subr.bf16.mxu0 %v15981_v9  ;;  %v15988_v20 = vld [vmem:[%s17080_s29 + $0x1710] ss:$24 sps:$4 sm:$0xff]   ;;  %v15999_v9 = vld [vmem:[%s17080_s29 + $0x1744] ss:$24 sps:$4 sm:$0xff]  }
 0x3f9   : > { %6286 = vmatmul.mubr.bf16.gmra.mrb[68].mxu1 %v18449_v37  ;;  %9212 = vmatmul.mubr.bf16.gmra.mrb[68].mxu0 %v18832_v36  ;;  %v15995_v37 = vld [vmem:[%s17080_s29 + $0x84c] ss:$24 sps:$4 sm:$0xff]   ;;  %v18858_v62 = vld [vmem:[%s17146_s22 + $0x900] ss:$144 sps:$4 sm:$0xff]  }
 0x3fa   : > { %6295 = vmatprep.mubr.bf16.mxu1 %v18454_v17  ;;  %9221 = vmatprep.mubr.bf16.mxu0 %v18837_v10 }
 0x3fb   : > { %6377 = vmatpush1.bf16.msra.mxu1 %v15976_v44  ;;  %9303 = vmatpush1.bf16.msra.mxu0 %v15979_v32  ;;  %v18863_v44 = vld [vmem:[%s17146_s22 + $0xa24] ss:$144 sps:$4 sm:$0xff]  }
 0x3fc   : > { %v18851_v29 = vpop.f32.mrb[108].mxu1  ;;  %6378 = vmatprep.subr.bf16.mxu1 %v15987_v5  ;;  %9304 = vmatprep.subr.bf16.mxu0 %v15990_v42  ;;  %v15997_v5 = vld [vmem:[%s17080_s29 + $0x1740] ss:$24 sps:$4 sm:$0xff]   ;;  %v16002_v42 = vld [vmem:[%s17080_s29 + $0x87c] ss:$24 sps:$4 sm:$0xff]  }
 0x3fd   : > { %21386 = vst [vmem:[#allocation81_spill] sm:$0xff] %v18851_v29  ;;  %v18855_v8 = vpop.f32.mrb[109].mxu1  ;;  %v15993_v29 = vld [vmem:[%s17080_s29 + $0x848] ss:$24 sps:$4 sm:$0xff]  }
 0x3fe   : > { %21387 = vst [vmem:[#allocation82_spill] sm:$0xff] %v18855_v8  ;;  %v18860_v17 = vpop.f32.mrb[110].mxu1  ;;  %v16005_v8 = vld [vmem:[%s17080_s29 + $0x1774] ss:$24 sps:$4 sm:$0xff]  }
 0x3ff   : > { %21388 = vst [vmem:[#allocation83_spill] sm:$0xff] %v18860_v17  ;;  %v18865_v32 = vpop.f32.mrb[111].mxu1  ;;  %6379 = vmatpush1.bf16.msra.mxu1 %v15985_v53  ;;  %9305 = vmatpush1.bf16.msra.mxu0 %v15988_v20  ;;  %v16000_v53 = vld [vmem:[%s17080_s29 + $0x878] ss:$24 sps:$4 sm:$0xff]  }
 0x400   : > { %21389 = vst [vmem:[#allocation84_spill] sm:$0xff] %v18865_v32  ;;  %6380 = vmatprep.subr.bf16.mxu1 %v15995_v37  ;;  %9306 = vmatprep.subr.bf16.mxu0 %v15999_v9  ;;  %v16003_v20 = vld [vmem:[%s17080_s29 + $0x1770] ss:$24 sps:$4 sm:$0xff]   ;;  %v16014_v9 = vld [vmem:[%s17080_s29 + $0x17a4] ss:$24 sps:$4 sm:$0xff]  }
 0x401   : > { %6296 = vmatmul.mubr.bf16.gmra.mrb[72].mxu1 %v18467_v39  ;;  %9222 = vmatmul.mubr.bf16.gmra.mrb[72].mxu0 %v18858_v62  ;;  %v16011_v39 = vld [vmem:[%s17080_s29 + $0x8ac] ss:$24 sps:$4 sm:$0xff]   ;;  %v18884_v17 = vld [vmem:[%s17146_s22 + $0xa20] ss:$144 sps:$4 sm:$0xff]  }
 0x402   : > { %6305 = vmatprep.mubr.bf16.mxu1 %v18472_v23  ;;  %9231 = vmatprep.mubr.bf16.mxu0 %v18863_v44 }
 0x403   : > { %6381 = vmatpush1.bf16.msra.mxu1 %v15993_v29  ;;  %9307 = vmatpush1.bf16.msra.mxu0 %v15997_v5  ;;  %v18889_v29 = vld [vmem:[%s17146_s22 + $0xb44] ss:$144 sps:$4 sm:$0xff]  }
 0x404   : > { %v18877_v37 = vpop.f32.mrb[112].mxu1  ;;  %6382 = vmatprep.subr.bf16.mxu1 %v16002_v42  ;;  %9308 = vmatprep.subr.bf16.mxu0 %v16005_v8  ;;  %v16012_v42 = vld [vmem:[%s17080_s29 + $0x17a0] ss:$24 sps:$4 sm:$0xff]   ;;  %v16020_v8 = vld [vmem:[%s17080_s29 + $0x8dc] ss:$24 sps:$4 sm:$0xff]  }
 0x405   : > { %21390 = vst [vmem:[#allocation85_spill] sm:$0xff] %v18877_v37  ;;  %v18881_v32 = vpop.f32.mrb[113].mxu1  ;;  %v16009_v37 = vld [vmem:[%s17080_s29 + $0x8a8] ss:$24 sps:$4 sm:$0xff]  }
 0x406   : > { %21391 = vst [vmem:[#allocation86_spill] sm:$0xff] %v18881_v32  ;;  %v18886_v23 = vpop.f32.mrb[114].mxu1  ;;  %v16023_v32 = vld [vmem:[%s17080_s29 + $0x17d4] ss:$24 sps:$4 sm:$0xff]  }
 0x407   : > { %21392 = vst [vmem:[#allocation87_spill] sm:$0xff] %v18886_v23  ;;  %v18891_v5 = vpop.f32.mrb[115].mxu1  ;;  %6383 = vmatpush1.bf16.msra.mxu1 %v16000_v53  ;;  %9309 = vmatpush1.bf16.msra.mxu0 %v16003_v20  ;;  %v16018_v53 = vld [vmem:[%s17080_s29 + $0x8d8] ss:$24 sps:$4 sm:$0xff]  }
 0x408   : > { %21393 = vst [vmem:[#allocation88_spill] sm:$0xff] %v18891_v5  ;;  %6384 = vmatprep.subr.bf16.mxu1 %v16011_v39  ;;  %9310 = vmatprep.subr.bf16.mxu0 %v16014_v9  ;;  %v16021_v20 = vld [vmem:[%s17080_s29 + $0x17d0] ss:$24 sps:$4 sm:$0xff]   ;;  %v16029_v39 = vld [vmem:[%s17080_s29 + $0x1804] ss:$24 sps:$4 sm:$0xff]  }
 0x409   : > { %6306 = vmatmul.mubr.bf16.gmra.mrb[76].mxu1 %v18485_v13  ;;  %9232 = vmatmul.mubr.bf16.gmra.mrb[76].mxu0 %v18884_v17  ;;  %v16032_v9 = vld [vmem:[%s17080_s29 + $0x120c] ss:$24 sps:$4 sm:$0xff]   ;;  %v18910_v13 = vld [vmem:[%s17146_s22 + $0xb40] ss:$144 sps:$4 sm:$0xff]  }
 0x40a   : > { %6315 = vmatprep.mubr.bf16.mxu1 %v18490_v6  ;;  %9241 = vmatprep.mubr.bf16.mxu0 %v18889_v29  ;;  %v18915_v6 = vld [vmem:[%s17146_s22 + $0xc64] ss:$144 sps:$4 sm:$0xff]  }
 0x40b   : > { %6385 = vmatpush1.bf16.msra.mxu1 %v16009_v37  ;;  %9311 = vmatpush1.bf16.msra.mxu0 %v16012_v42 }
 0x40c   : > { %v18903_v5 = vpop.f32.mrb[116].mxu1  ;;  %6386 = vmatprep.subr.bf16.mxu1 %v16020_v8  ;;  %9312 = vmatprep.subr.bf16.mxu0 %v16023_v32  ;;  %v18928_v8 = vld [vmem:[%s17146_s22 + $0xc60] ss:$144 sps:$4 sm:$0xff]  }
 0x40d   : > { %21394 = vst [vmem:[#allocation89_spill] sm:$0xff] %v18903_v5  ;;  %v18907_v23 = vpop.f32.mrb[117].mxu1  ;;  %v18964_v5 = vld [vmem:[%s17146_s22 + $0xea0] ss:$144 sps:$4 sm:$0xff]  }
 0x40e   : > { %21395 = vst [vmem:[#allocation90_spill] sm:$0xff] %v18907_v23  ;;  %v18912_v35 = vpop.f32.mrb[118].mxu1 }
 0x40f   : > { %21396 = vst [vmem:[#allocation91_spill] sm:$0xff] %v18912_v35  ;;  %v18917_v37 = vpop.f32.mrb[119].mxu1  ;;  %6387 = vmatpush1.bf16.msra.mxu1 %v16018_v53  ;;  %9313 = vmatpush1.bf16.msra.mxu0 %v16021_v20  ;;  %v18933_v20 = vld [vmem:[%s17146_s22 + $0xd84] ss:$144 sps:$4 sm:$0xff]  }
 0x410   : > { %21397 = vst [vmem:[#allocation92_spill] sm:$0xff] %v18917_v37  ;;  %9435 = vmatprep.subr.bf16.mxu0 %v16029_v39  ;;  %9588 = vmatprep.subr.bf16.mxu1 %v16032_v9  ;;  %v18946_v9 = vld [vmem:[%s17146_s22 + $0xd80] ss:$144 sps:$4 sm:$0xff]   ;;  %v18951_v35 = vld [vmem:[%s17146_s22 + $0xea4] ss:$144 sps:$4 sm:$0xff]  }
 0x411   : > { %6316 = vmatmul.mubr.bf16.gmra.mrb[80].mxu1 %v18499_v31  ;;  %9242 = vmatmul.mubr.bf16.gmra.mrb[80].mxu0 %v18910_v13 }
 0x412   : > { %6325 = vmatprep.mubr.bf16.mxu1 %v18504_v54  ;;  %9251 = vmatprep.mubr.bf16.mxu0 %v18915_v6 }
 0x414   : > { %v18923_v32 = vpop.f32.mrb[120].mxu1 }
 0x415   : > { %21398 = vst [vmem:[#allocation93_spill] sm:$0xff] %v18923_v32  ;;  %v18925_v42 = vpop.f32.mrb[121].mxu1  ;;  %v16060_v32 = vld [vmem:[%s17080_s29 + $0x18c0] ss:$24 sps:$4 sm:$0xff]  }
 0x416   : > { %21399 = vst [vmem:[#allocation94_spill] sm:$0xff] %v18925_v42  ;;  %v18930_v53 = vpop.f32.mrb[122].mxu1 }
 0x417   : > { %21400 = vst [vmem:[#allocation95_spill] sm:$0xff] %v18930_v53  ;;  %v18935_v39 = vpop.f32.mrb[123].mxu1 }
 0x418   : > { %21401 = vst [vmem:[#allocation96_spill] sm:$0xff] %v18935_v39  ;;  %v18993_v39 = vld [vmem:[%s17146_s22 + $0x36c] ss:$144 sps:$4 sm:$0xff]  }
 0x419   : > { %6326 = vmatmul.mubr.bf16.gmra.mrb[84].mxu1 %v18509_v15  ;;  %9252 = vmatmul.mubr.bf16.gmra.mrb[84].mxu0 %v18928_v8 }
 0x41a   : > { %6335 = vmatprep.mubr.bf16.mxu1 %v18514_v45  ;;  %9261 = vmatprep.mubr.bf16.mxu0 %v18933_v20 }
 0x41c   : > { %v18941_v31 = vpop.f32.mrb[124].mxu1 }
 0x41d   : > { %21402 = vst [vmem:[#allocation97_spill] sm:$0xff] %v18941_v31  ;;  %v18943_v54 = vpop.f32.mrb[125].mxu1  ;;  %v16035_v31 = vld [vmem:[%s17080_s29 + $0x1834] ss:$24 sps:$4 sm:$0xff]  }
 0x41e   : > { %21403 = vst [vmem:[#allocation98_spill] sm:$0xff] %v18943_v54  ;;  %v18948_v37 = vpop.f32.mrb[126].mxu1 }
 0x41f   : > { %21404 = vst [vmem:[#allocation99_spill] sm:$0xff] %v18948_v37  ;;  %v18953_v23 = vpop.f32.mrb[127].mxu1 }
 0x420   : > { %21405 = vst [vmem:[#allocation100_spill] sm:$0xff] %v18953_v23 }
 0x421   : > { %6336 = vmatmul.mubr.bf16.gmra.mrb[88].mxu1 %v18519_v47  ;;  %9262 = vmatmul.mubr.bf16.gmra.mrb[88].mxu0 %v18946_v9  ;;  %v18969_v47 = vld [vmem:[%s17146_s22 + $0x24c] ss:$144 sps:$4 sm:$0xff]  }
 0x422   : > { %6345 = vmatprep.mubr.bf16.mxu1 %v18524_v48  ;;  %9271 = vmatprep.mubr.bf16.mxu0 %v18951_v35 }
 0x424   : > { %v18959_v15 = vpop.f32.mrb[128].mxu1 }
 0x425   : > { %21406 = vst [vmem:[#allocation101_spill] sm:$0xff] %v18959_v15  ;;  %v18961_v45 = vpop.f32.mrb[129].mxu1 }
 0x426   : > { %21407 = vst [vmem:[#allocation102_spill] sm:$0xff] %v18961_v45  ;;  %v18966_v23 = vpop.f32.mrb[130].mxu1 }
 0x427   : > { %21408 = vst [vmem:[#allocation103_spill] sm:$0xff] %v18966_v23  ;;  %v18971_v37 = vpop.f32.mrb[131].mxu1  ;;  %v18982_v23 = vld [vmem:[%s17146_s22 + $0x248] ss:$144 sps:$4 sm:$0xff]  }
 0x428   : > { %21409 = vst [vmem:[#allocation104_spill] sm:$0xff] %v18971_v37  ;;  %v16027_v37 = vld [vmem:[%s17080_s29 + $0x1800] ss:$24 sps:$4 sm:$0xff]  }
 0x429   : > { %6346 = vmatmul.mubr.bf16.gmra.mrb[92].mxu1 %v18529_v11  ;;  %9272 = vmatmul.mubr.bf16.gmra.mrb[92].mxu0 %v18964_v5  ;;  %v16030_v11 = vld [vmem:[%s17080_s29 + $0x1208] ss:$24 sps:$4 sm:$0xff]  }
 0x42a   : > { %6388 = vmatprep.mubr.bf16.mxu1 %v18534_v30  ;;  %9314 = vmatprep.mubr.bf16.mxu0 %v18969_v47  ;;  %v16038_v30 = vld [vmem:[%s17080_s29 + $0x123c] ss:$24 sps:$4 sm:$0xff]  }
 0x42c   : > { %v18977_v48 = vpop.f32.mrb[132].mxu1 }
 0x42d   : > { %21410 = vst [vmem:[#allocation105_spill] sm:$0xff] %v18977_v48  ;;  %v18979_v45 = vpop.f32.mrb[133].mxu1  ;;  %v16044_v48 = vld [vmem:[%s17080_s29 + $0x1864] ss:$24 sps:$4 sm:$0xff]  }
 0x42e   : > { %21411 = vst [vmem:[#allocation106_spill] sm:$0xff] %v18979_v45  ;;  %v18984_v15 = vpop.f32.mrb[134].mxu1  ;;  %v16033_v45 = vld [vmem:[%s17080_s29 + $0x1830] ss:$24 sps:$4 sm:$0xff]  }
 0x42f   : > { %21412 = vst [vmem:[#allocation107_spill] sm:$0xff] %v18984_v15  ;;  %v18988_v54 = vpop.f32.mrb[135].mxu1  ;;  %v16036_v15 = vld [vmem:[%s17080_s29 + $0x1238] ss:$24 sps:$4 sm:$0xff]  }
 0x430   : > { %21413 = vst [vmem:[#allocation108_spill] sm:$0xff] %v18988_v54  ;;  %v16047_v54 = vld [vmem:[%s17080_s29 + $0x126c] ss:$24 sps:$4 sm:$0xff]  }
 0x431   : > { %6389 = vmatmul.mubr.bf16.vlgmr.msra.gmra.mrb[48].mxu1 %v18543_v56  ;;  %9315 = vmatmul.mubr.bf16.vlgmr.msra.gmra.mrb[48].mxu0 %v18982_v23 }
 0x432   : > { %9436 = vmatpush1.bf16.msra.mxu0 %v16027_v37  ;;  %9589 = vmatpush1.bf16.msra.mxu1 %v16030_v11  ;;  %v19008_v37 = vld [vmem:[%s17146_s22 + $0x368] ss:$144 sps:$4 sm:$0xff]  }
 0x433   : > { %9437 = vmatprep.subr.bf16.mxu0 %v16035_v31  ;;  %9590 = vmatprep.subr.bf16.mxu1 %v16038_v30  ;;  %v16042_v31 = vld [vmem:[%s17080_s29 + $0x1860] ss:$24 sps:$4 sm:$0xff]  }
 0x434   : > { %v19001_v53 = vpop.f32.mrb[136].mxu1  ;;  %6398 = vmatprep.mubr.bf16.mxu1 %v18552_v41  ;;  %9324 = vmatprep.mubr.bf16.mxu0 %v18993_v39  ;;  %v16045_v30 = vld [vmem:[%s17080_s29 + $0x1268] ss:$24 sps:$4 sm:$0xff]   ;;  %v19017_v41 = vld [vmem:[%s17146_s22 + $0x48c] ss:$144 sps:$4 sm:$0xff]  }
 0x435   : > { %21414 = vst [vmem:[#allocation109_spill] sm:$0xff] %v19001_v53  ;;  %v19005_v56 = vpop.f32.mrb[137].mxu1  ;;  %v16053_v53 = vld [vmem:[%s17080_s29 + $0x1894] ss:$24 sps:$4 sm:$0xff]  }
 0x436   : > { %21415 = vst [vmem:[#allocation110_spill] sm:$0xff] %v19005_v56  ;;  %v19010_v11 = vpop.f32.mrb[138].mxu1  ;;  %9438 = vmatpush1.bf16.msra.mxu0 %v16033_v45  ;;  %9591 = vmatpush1.bf16.msra.mxu1 %v16036_v15  ;;  %v16056_v56 = vld [vmem:[%s17080_s29 + $0x129c] ss:$24 sps:$4 sm:$0xff]   ;;  %v16051_v15 = vld [vmem:[%s17080_s29 + $0x1890] ss:$24 sps:$4 sm:$0xff]  }
 0x437   : > { %21416 = vst [vmem:[#allocation111_spill] sm:$0xff] %v19010_v11  ;;  %v19014_v42 = vpop.f32.mrb[139].mxu1  ;;  %9439 = vmatprep.subr.bf16.mxu0 %v16044_v48  ;;  %9592 = vmatprep.subr.bf16.mxu1 %v16047_v54  ;;  %v16054_v45 = vld [vmem:[%s17080_s29 + $0x1298] ss:$24 sps:$4 sm:$0xff]   ;;  %v16062_v54 = vld [vmem:[%s17080_s29 + $0x18c4] ss:$24 sps:$4 sm:$0xff]  }
 0x438   : > { %21417 = vst [vmem:[#allocation112_spill] sm:$0xff] %v19014_v42  ;;  %v16065_v48 = vld [vmem:[%s17080_s29 + $0x12cc] ss:$24 sps:$4 sm:$0xff]  }
 0x439   : > { %6399 = vmatmul.mubr.bf16.gmra.mrb[52].mxu1 %v18561_v57  ;;  %9325 = vmatmul.mubr.bf16.gmra.mrb[52].mxu0 %v19008_v37 }
 0x43a   : > { %9440 = vmatpush1.bf16.msra.mxu0 %v16042_v31  ;;  %9593 = vmatpush1.bf16.msra.mxu1 %v16045_v30  ;;  %v19034_v31 = vld [vmem:[%s17146_s22 + $0x488] ss:$144 sps:$4 sm:$0xff]  }
 0x43b   : > { %6408 = vmatprep.mubr.bf16.mxu1 %v18568_v21  ;;  %9334 = vmatprep.mubr.bf16.mxu0 %v19017_v41  ;;  %v19039_v21 = vld [vmem:[%s17146_s22 + $0x5ac] ss:$144 sps:$4 sm:$0xff]  }
 0x43c   : > { %v19029_v42 = vpop.f32.mrb[140].mxu1  ;;  %9441 = vmatprep.subr.bf16.mxu0 %v16053_v53  ;;  %9594 = vmatprep.subr.bf16.mxu1 %v16056_v56  ;;  %v16063_v53 = vld [vmem:[%s17080_s29 + $0x12c8] ss:$24 sps:$4 sm:$0xff]   ;;  %v16068_v56 = vld [vmem:[%s17080_s29 + $0x18f4] ss:$24 sps:$4 sm:$0xff]  }
 0x43d   : > { %v19031_v57 = vpop.f32.mrb[141].mxu1 }
 0x43e   : > { %21418 = vst [vmem:[#allocation113_spill] sm:$0xff] %v19031_v57  ;;  %v19036_v30 = vpop.f32.mrb[142].mxu1  ;;  %9442 = vmatpush1.bf16.msra.mxu0 %v16051_v15  ;;  %9595 = vmatpush1.bf16.msra.mxu1 %v16054_v45  ;;  %v16071_v57 = vld [vmem:[%s17080_s29 + $0x12fc] ss:$24 sps:$4 sm:$0xff]   ;;  %v16066_v15 = vld [vmem:[%s17080_s29 + $0x18f0] ss:$24 sps:$4 sm:$0xff]  }
 0x43f   : > { %21419 = vst [vmem:[#allocation114_spill] sm:$0xff] %v19036_v30  ;;  %v19041_v11 = vpop.f32.mrb[143].mxu1  ;;  %9443 = vmatprep.subr.bf16.mxu0 %v16062_v54  ;;  %9596 = vmatprep.subr.bf16.mxu1 %v16065_v48  ;;  %v16069_v45 = vld [vmem:[%s17080_s29 + $0x12f8] ss:$24 sps:$4 sm:$0xff]   ;;  %v16077_v54 = vld [vmem:[%s17080_s29 + $0x1924] ss:$24 sps:$4 sm:$0xff]  }
 0x440   : > { %21420 = vst [vmem:[#allocation115_spill] sm:$0xff] %v19041_v11  ;;  %v16080_v48 = vld [vmem:[%s17080_s29 + $0x132c] ss:$24 sps:$4 sm:$0xff]   ;;  %v19056_v11 = vld [vmem:[%s17146_s22 + $0x5a8] ss:$144 sps:$4 sm:$0xff]  }
 0x441   : > { %6409 = vmatmul.mubr.bf16.gmra.mrb[56].mxu1 %v18579_v59  ;;  %9335 = vmatmul.mubr.bf16.gmra.mrb[56].mxu0 %v19034_v31  ;;  %v19059_v59 = vld [vmem:[%s17146_s22 + $0x6cc] ss:$144 sps:$4 sm:$0xff]  }
 0x442   : > { %6418 = vmatprep.mubr.bf16.mxu1 %v18584_v25  ;;  %9344 = vmatprep.mubr.bf16.mxu0 %v19039_v21  ;;  %v16075_v25 = vld [vmem:[%s17080_s29 + $0x1920] ss:$24 sps:$4 sm:$0xff]   ;;  %v16203_v30 = vld [vmem:[%s17080_s29 + $0x1304] ss:$24 sps:$4 sm:$0xff]  }
 0x443   : > { %9444 = vmatpush1.bf16.msra.mxu0 %v16060_v32  ;;  %9597 = vmatpush1.bf16.msra.mxu1 %v16063_v53  ;;  %v16078_v32 = vld [vmem:[%s17080_s29 + $0x1328] ss:$24 sps:$4 sm:$0xff]   ;;  %v16086_v53 = vld [vmem:[%s17080_s29 + $0x1954] ss:$24 sps:$4 sm:$0xff]  }
 0x444   : > { %9445 = vmatprep.subr.bf16.mxu0 %v16068_v56  ;;  %9598 = vmatprep.subr.bf16.mxu1 %v16071_v57  ;;  %v16089_v57 = vld [vmem:[%s17080_s29 + $0x135c] ss:$24 sps:$4 sm:$0xff]   ;;  %v16084_v56 = vld [vmem:[%s17080_s29 + $0x1950] ss:$24 sps:$4 sm:$0xff]  }
 0x447   : > { %9446 = vmatpush1.bf16.msra.mxu0 %v16066_v15  ;;  %9599 = vmatpush1.bf16.msra.mxu1 %v16069_v45  ;;  %v16087_v15 = vld [vmem:[%s17080_s29 + $0x1358] ss:$24 sps:$4 sm:$0xff]   ;;  %v16095_v45 = vld [vmem:[%s17080_s29 + $0x1984] ss:$24 sps:$4 sm:$0xff]  }
 0x448   : > { %9447 = vmatprep.subr.bf16.mxu0 %v16077_v54  ;;  %9600 = vmatprep.subr.bf16.mxu1 %v16080_v48  ;;  %v16098_v54 = vld [vmem:[%s17080_s29 + $0x138c] ss:$24 sps:$4 sm:$0xff]   ;;  %v19074_v48 = vld [vmem:[%s17146_s22 + $0x6c8] ss:$144 sps:$4 sm:$0xff]  }
 0x449   : > { %6419 = vmatmul.mubr.bf16.gmra.mrb[60].mxu1 %v18597_v22  ;;  %9345 = vmatmul.mubr.bf16.gmra.mrb[60].mxu0 %v19056_v11  ;;  %v19077_v22 = vld [vmem:[%s17146_s22 + $0x7ec] ss:$144 sps:$4 sm:$0xff]  }
 0x44a   : > { %6428 = vmatprep.mubr.bf16.mxu1 %v18602_v40  ;;  %9354 = vmatprep.mubr.bf16.mxu0 %v19059_v59  ;;  %v16093_v40 = vld [vmem:[%s17080_s29 + $0x1980] ss:$24 sps:$4 sm:$0xff]  }
 0x44b   : > { %9448 = vmatpush1.bf16.msra.mxu0 %v16075_v25  ;;  %9601 = vmatpush1.bf16.msra.mxu1 %v16078_v32  ;;  %v16096_v25 = vld [vmem:[%s17080_s29 + $0x1388] ss:$24 sps:$4 sm:$0xff]   ;;  %v16101_v32 = vld [vmem:[%s17080_s29 + $0x19b4] ss:$24 sps:$4 sm:$0xff]  }
 0x44c   : > { %9449 = vmatprep.subr.bf16.mxu0 %v16086_v53  ;;  %9602 = vmatprep.subr.bf16.mxu1 %v16089_v57  ;;  %v16104_v53 = vld [vmem:[%s17080_s29 + $0x13bc] ss:$24 sps:$4 sm:$0xff]   ;;  %v16099_v57 = vld [vmem:[%s17080_s29 + $0x19b0] ss:$24 sps:$4 sm:$0xff]  }
 0x44f   : > { %9450 = vmatpush1.bf16.msra.mxu0 %v16084_v56  ;;  %9603 = vmatpush1.bf16.msra.mxu1 %v16087_v15  ;;  %v16102_v56 = vld [vmem:[%s17080_s29 + $0x13b8] ss:$24 sps:$4 sm:$0xff]   ;;  %v16110_v15 = vld [vmem:[%s17080_s29 + $0x19e4] ss:$24 sps:$4 sm:$0xff]  }
 0x450   : > { %9451 = vmatprep.subr.bf16.mxu0 %v16095_v45  ;;  %9604 = vmatprep.subr.bf16.mxu1 %v16098_v54  ;;  %v16113_v45 = vld [vmem:[%s17080_s29 + $0x13ec] ss:$24 sps:$4 sm:$0xff]   ;;  %v19092_v54 = vld [vmem:[%s17146_s22 + $0x7e8] ss:$144 sps:$4 sm:$0xff]  }
 0x451   : > { %6429 = vmatmul.mubr.bf16.gmra.mrb[64].mxu1 %v18615_v24  ;;  %9355 = vmatmul.mubr.bf16.gmra.mrb[64].mxu0 %v19074_v48  ;;  %v19095_v24 = vld [vmem:[%s17146_s22 + $0x90c] ss:$144 sps:$4 sm:$0xff]  }
 0x452   : > { %6438 = vmatprep.mubr.bf16.mxu1 %v18620_v3  ;;  %9364 = vmatprep.mubr.bf16.mxu0 %v19077_v22  ;;  %v16108_v3 = vld [vmem:[%s17080_s29 + $0x19e0] ss:$24 sps:$4 sm:$0xff]  }
 0x453   : > { %9452 = vmatpush1.bf16.msra.mxu0 %v16093_v40  ;;  %9605 = vmatpush1.bf16.msra.mxu1 %v16096_v25  ;;  %v16111_v40 = vld [vmem:[%s17080_s29 + $0x13e8] ss:$24 sps:$4 sm:$0xff]   ;;  %v16119_v25 = vld [vmem:[%s17080_s29 + $0x1a14] ss:$24 sps:$4 sm:$0xff]  }
 0x454   : > { %9453 = vmatprep.subr.bf16.mxu0 %v16101_v32  ;;  %9606 = vmatprep.subr.bf16.mxu1 %v16104_v53  ;;  %v16122_v32 = vld [vmem:[%s17080_s29 + $0x141c] ss:$24 sps:$4 sm:$0xff]   ;;  %v16117_v53 = vld [vmem:[%s17080_s29 + $0x1a10] ss:$24 sps:$4 sm:$0xff]  }
 0x457   : > { %9454 = vmatpush1.bf16.msra.mxu0 %v16099_v57  ;;  %9607 = vmatpush1.bf16.msra.mxu1 %v16102_v56  ;;  %v16120_v57 = vld [vmem:[%s17080_s29 + $0x1418] ss:$24 sps:$4 sm:$0xff]   ;;  %v16128_v56 = vld [vmem:[%s17080_s29 + $0x1a44] ss:$24 sps:$4 sm:$0xff]  }
 0x458   : > { %9455 = vmatprep.subr.bf16.mxu0 %v16110_v15  ;;  %9608 = vmatprep.subr.bf16.mxu1 %v16113_v45  ;;  %v16131_v15 = vld [vmem:[%s17080_s29 + $0x144c] ss:$24 sps:$4 sm:$0xff]   ;;  %v19110_v45 = vld [vmem:[%s17146_s22 + $0x908] ss:$144 sps:$4 sm:$0xff]  }
 0x459   : > { %6439 = vmatmul.mubr.bf16.gmra.mrb[68].mxu1 %v18633_v28  ;;  %9365 = vmatmul.mubr.bf16.gmra.mrb[68].mxu0 %v19092_v54  ;;  %v19113_v28 = vld [vmem:[%s17146_s22 + $0xa2c] ss:$144 sps:$4 sm:$0xff]  }
 0x45a   : > { %6448 = vmatprep.mubr.bf16.mxu1 %v18638_v52  ;;  %9374 = vmatprep.mubr.bf16.mxu0 %v19095_v24  ;;  %v16126_v52 = vld [vmem:[%s17080_s29 + $0x1a40] ss:$24 sps:$4 sm:$0xff]  }
 0x45b   : > { %9456 = vmatpush1.bf16.msra.mxu0 %v16108_v3  ;;  %9609 = vmatpush1.bf16.msra.mxu1 %v16111_v40  ;;  %v16129_v3 = vld [vmem:[%s17080_s29 + $0x1448] ss:$24 sps:$4 sm:$0xff]   ;;  %v16134_v40 = vld [vmem:[%s17080_s29 + $0x1a74] ss:$24 sps:$4 sm:$0xff]  }
 0x45c   : > { %9457 = vmatprep.subr.bf16.mxu0 %v16119_v25  ;;  %9610 = vmatprep.subr.bf16.mxu1 %v16122_v32  ;;  %v16137_v25 = vld [vmem:[%s17080_s29 + $0x147c] ss:$24 sps:$4 sm:$0xff]   ;;  %v16132_v32 = vld [vmem:[%s17080_s29 + $0x1a70] ss:$24 sps:$4 sm:$0xff]  }
 0x45f   : > { %9458 = vmatpush1.bf16.msra.mxu0 %v16117_v53  ;;  %9611 = vmatpush1.bf16.msra.mxu1 %v16120_v57  ;;  %v16135_v53 = vld [vmem:[%s17080_s29 + $0x1478] ss:$24 sps:$4 sm:$0xff]   ;;  %v16143_v57 = vld [vmem:[%s17080_s29 + $0x1aa4] ss:$24 sps:$4 sm:$0xff]  }
 0x460   : > { %9459 = vmatprep.subr.bf16.mxu0 %v16128_v56  ;;  %9612 = vmatprep.subr.bf16.mxu1 %v16131_v15  ;;  %v16146_v56 = vld [vmem:[%s17080_s29 + $0x14ac] ss:$24 sps:$4 sm:$0xff]   ;;  %v19128_v15 = vld [vmem:[%s17146_s22 + $0xa28] ss:$144 sps:$4 sm:$0xff]  }
 0x461   : > { %6449 = vmatmul.mubr.bf16.gmra.mrb[72].mxu1 %v18651_v2  ;;  %9375 = vmatmul.mubr.bf16.gmra.mrb[72].mxu0 %v19110_v45  ;;  %v19131_v2 = vld [vmem:[%s17146_s22 + $0xb4c] ss:$144 sps:$4 sm:$0xff]  }
 0x462   : > { %6458 = vmatprep.mubr.bf16.mxu1 %v18656_v33  ;;  %9384 = vmatprep.mubr.bf16.mxu0 %v19113_v28  ;;  %v16141_v33 = vld [vmem:[%s17080_s29 + $0x1aa0] ss:$24 sps:$4 sm:$0xff]  }
 0x463   : > { %9460 = vmatpush1.bf16.msra.mxu0 %v16126_v52  ;;  %9613 = vmatpush1.bf16.msra.mxu1 %v16129_v3  ;;  %v16144_v52 = vld [vmem:[%s17080_s29 + $0x14a8] ss:$24 sps:$4 sm:$0xff]   ;;  %v16152_v3 = vld [vmem:[%s17080_s29 + $0x1ad4] ss:$24 sps:$4 sm:$0xff]  }
 0x464   : > { %9461 = vmatprep.subr.bf16.mxu0 %v16134_v40  ;;  %9614 = vmatprep.subr.bf16.mxu1 %v16137_v25  ;;  %v16155_v40 = vld [vmem:[%s17080_s29 + $0x14dc] ss:$24 sps:$4 sm:$0xff]   ;;  %v16150_v25 = vld [vmem:[%s17080_s29 + $0x1ad0] ss:$24 sps:$4 sm:$0xff]  }
 0x467   : > { %9462 = vmatpush1.bf16.msra.mxu0 %v16132_v32  ;;  %9615 = vmatpush1.bf16.msra.mxu1 %v16135_v53  ;;  %v16153_v32 = vld [vmem:[%s17080_s29 + $0x14d8] ss:$24 sps:$4 sm:$0xff]   ;;  %v16161_v53 = vld [vmem:[%s17080_s29 + $0x150c] ss:$24 sps:$4 sm:$0xff]  }
 0x468   : > { %9463 = vmatprep.subr.bf16.mxu0 %v16143_v57  ;;  %9616 = vmatprep.subr.bf16.mxu1 %v16146_v56  ;;  %v16164_v57 = vld [vmem:[%s17080_s29 + $0x1214] ss:$24 sps:$4 sm:$0xff]   ;;  %v19146_v56 = vld [vmem:[%s17146_s22 + $0xb48] ss:$144 sps:$4 sm:$0xff]  }
 0x469   : > { %6459 = vmatmul.mubr.bf16.gmra.mrb[76].mxu1 %v18669_v14  ;;  %9385 = vmatmul.mubr.bf16.gmra.mrb[76].mxu0 %v19128_v15  ;;  %v19149_v14 = vld [vmem:[%s17146_s22 + $0xc6c] ss:$144 sps:$4 sm:$0xff]  }
 0x46a   : > { %6468 = vmatprep.mubr.bf16.mxu1 %v18674_v16  ;;  %9394 = vmatprep.mubr.bf16.mxu0 %v19131_v2  ;;  %v19156_v16 = vld [vmem:[%s17146_s22 + $0xc68] ss:$144 sps:$4 sm:$0xff]  }
 0x46b   : > { %9464 = vmatpush1.bf16.msra.mxu0 %v16141_v33  ;;  %9617 = vmatpush1.bf16.msra.mxu1 %v16144_v52  ;;  %v19159_v33 = vld [vmem:[%s17146_s22 + $0xd8c] ss:$144 sps:$4 sm:$0xff]   ;;  %v16162_v52 = vld [vmem:[%s17080_s29 + $0x1210] ss:$24 sps:$4 sm:$0xff]  }
 0x46c   : > { %9465 = vmatprep.subr.bf16.mxu0 %v16152_v3  ;;  %9618 = vmatprep.subr.bf16.mxu1 %v16155_v40  ;;  %v16167_v3 = vld [vmem:[%s17080_s29 + $0x153c] ss:$24 sps:$4 sm:$0xff]  }
 0x46d   : > { %v16170_v40 = vld [vmem:[%s17080_s29 + $0x1244] ss:$24 sps:$4 sm:$0xff]  }
 0x46f   : > { %9466 = vmatpush1.bf16.msra.mxu0 %v16150_v25  ;;  %9619 = vmatpush1.bf16.msra.mxu1 %v16153_v32  ;;  %v19193_v25 = vld [vmem:[%s17146_s22 + $0x374] ss:$144 sps:$4 sm:$0xff]  }
 0x470   : > { %9741 = vmatprep.subr.bf16.mxu1 %v16161_v53  ;;  %10047 = vmatprep.subr.bf16.mxu0 %v16164_v57  ;;  %v16176_v32 = vld [vmem:[%s17080_s29 + $0x156c] ss:$24 sps:$4 sm:$0xff]   ;;  %v19204_v57 = vld [vmem:[%s17146_s22 + $0x370] ss:$144 sps:$4 sm:$0xff]  }
 0x471   : > { %6469 = vmatmul.mubr.bf16.gmra.mrb[80].mxu1 %v18683_v18  ;;  %9395 = vmatmul.mubr.bf16.gmra.mrb[80].mxu0 %v19146_v56  ;;  %v19166_v18 = vld [vmem:[%s17146_s22 + $0xd88] ss:$144 sps:$4 sm:$0xff]   ;;  %v16179_v53 = vld [vmem:[%s17080_s29 + $0x1274] ss:$24 sps:$4 sm:$0xff]  }
 0x472   : > { %6478 = vmatprep.mubr.bf16.mxu1 %v18688_v58  ;;  %9404 = vmatprep.mubr.bf16.mxu0 %v19149_v14  ;;  %v19169_v58 = vld [vmem:[%s17146_s22 + $0xeac] ss:$144 sps:$4 sm:$0xff]  }
 0x479   : > { %6479 = vmatmul.mubr.bf16.gmra.mrb[84].mxu1 %v18693_v46  ;;  %9405 = vmatmul.mubr.bf16.gmra.mrb[84].mxu0 %v19156_v16  ;;  %v19176_v46 = vld [vmem:[%s17146_s22 + $0xea8] ss:$144 sps:$4 sm:$0xff]  }
 0x47a   : > { %6488 = vmatprep.mubr.bf16.mxu1 %v18698_v38  ;;  %9414 = vmatprep.mubr.bf16.mxu0 %v19159_v33  ;;  %v19179_v38 = vld [vmem:[%s17146_s22 + $0x254] ss:$144 sps:$4 sm:$0xff]  }
 0x481   : > { %6489 = vmatmul.mubr.bf16.gmra.mrb[88].mxu1 %v18703_v1  ;;  %9415 = vmatmul.mubr.bf16.gmra.mrb[88].mxu0 %v19166_v18  ;;  %v19186_v1 = vld [vmem:[%s17146_s22 + $0x250] ss:$144 sps:$4 sm:$0xff]  }
 0x482   : > { %6498 = vmatprep.mubr.bf16.mxu1 %v18708_v51  ;;  %9424 = vmatprep.mubr.bf16.mxu0 %v19169_v58  ;;  %v16159_v51 = vld [vmem:[%s17080_s29 + $0x1508] ss:$24 sps:$4 sm:$0xff]  }
 0x489   : > { %6499 = vmatmul.mubr.bf16.gmra.mrb[92].mxu1 %v18716_v61  ;;  %9425 = vmatmul.mubr.bf16.gmra.mrb[92].mxu0 %v19176_v46  ;;  %v16168_v61 = vld [vmem:[%s17080_s29 + $0x1240] ss:$24 sps:$4 sm:$0xff]  }
 0x48a   : > { %9467 = vmatprep.mubr.bf16.mxu0 %v19179_v38  ;;  %9620 = vmatprep.mubr.bf16.mxu1 %v18712_v49  ;;  %v16165_v49 = vld [vmem:[%s17080_s29 + $0x1538] ss:$24 sps:$4 sm:$0xff]  }
 0x491   : > { %9468 = vmatmul.mubr.bf16.vlgmr.msra.gmra.mrb[48].mxu0 %v19186_v1  ;;  %9621 = vmatmul.mubr.bf16.vlgmr.msra.gmra.mrb[48].mxu1 %v18722_v4  ;;  %v16174_v4 = vld [vmem:[%s17080_s29 + $0x1568] ss:$24 sps:$4 sm:$0xff]  }
 0x492   : > { %9742 = vmatpush1.bf16.msra.mxu1 %v16159_v51  ;;  %10048 = vmatpush1.bf16.msra.mxu0 %v16162_v52  ;;  %v16177_v51 = vld [vmem:[%s17080_s29 + $0x1270] ss:$24 sps:$4 sm:$0xff]   ;;  %v19209_v52 = vld [vmem:[%s17146_s22 + $0x494] ss:$144 sps:$4 sm:$0xff]  }
 0x493   : > { %9743 = vmatprep.subr.bf16.mxu1 %v16167_v3  ;;  %10049 = vmatprep.subr.bf16.mxu0 %v16170_v40  ;;  %v16185_v3 = vld [vmem:[%s17080_s29 + $0x159c] ss:$24 sps:$4 sm:$0xff]  }
 0x494   : > { %9477 = vmatprep.mubr.bf16.mxu0 %v19193_v25  ;;  %9630 = vmatprep.mubr.bf16.mxu1 %v18729_v27  ;;  %v16188_v40 = vld [vmem:[%s17080_s29 + $0x12a4] ss:$24 sps:$4 sm:$0xff]   ;;  %v16183_v27 = vld [vmem:[%s17080_s29 + $0x1598] ss:$24 sps:$4 sm:$0xff]  }
 0x496   : > { %9744 = vmatpush1.bf16.msra.mxu1 %v16165_v49  ;;  %10050 = vmatpush1.bf16.msra.mxu0 %v16168_v61  ;;  %v16186_v49 = vld [vmem:[%s17080_s29 + $0x12a0] ss:$24 sps:$4 sm:$0xff]   ;;  %v16194_v61 = vld [vmem:[%s17080_s29 + $0x15cc] ss:$24 sps:$4 sm:$0xff]  }
 0x497   : > { %9745 = vmatprep.subr.bf16.mxu1 %v16176_v32  ;;  %10051 = vmatprep.subr.bf16.mxu0 %v16179_v53  ;;  %v16197_v32 = vld [vmem:[%s17080_s29 + $0x12d4] ss:$24 sps:$4 sm:$0xff]   ;;  %v19222_v53 = vld [vmem:[%s17146_s22 + $0x490] ss:$144 sps:$4 sm:$0xff]  }
 0x499   : > { %9478 = vmatmul.mubr.bf16.gmra.mrb[52].mxu0 %v19204_v57  ;;  %9631 = vmatmul.mubr.bf16.gmra.mrb[52].mxu1 %v18740_v26  ;;  %v19225_v26 = vld [vmem:[%s17146_s22 + $0x5b4] ss:$144 sps:$4 sm:$0xff]  }
 0x49a   : > { %9746 = vmatpush1.bf16.msra.mxu1 %v16174_v4  ;;  %10052 = vmatpush1.bf16.msra.mxu0 %v16177_v51  ;;  %v16192_v4 = vld [vmem:[%s17080_s29 + $0x15c8] ss:$24 sps:$4 sm:$0xff]  }
 0x49b   : > { %9487 = vmatprep.mubr.bf16.mxu0 %v19209_v52  ;;  %9640 = vmatprep.mubr.bf16.mxu1 %v18745_v12  ;;  %v16195_v51 = vld [vmem:[%s17080_s29 + $0x12d0] ss:$24 sps:$4 sm:$0xff]   ;;  %v16200_v12 = vld [vmem:[%s17080_s29 + $0x15fc] ss:$24 sps:$4 sm:$0xff]  }
 0x49c   : > { %9747 = vmatprep.subr.bf16.mxu1 %v16185_v3  ;;  %10053 = vmatprep.subr.bf16.mxu0 %v16188_v40  ;;  %v16198_v3 = vld [vmem:[%s17080_s29 + $0x15f8] ss:$24 sps:$4 sm:$0xff]  }
 0x49d   : > { %v16201_v40 = vld [vmem:[%s17080_s29 + $0x1300] ss:$24 sps:$4 sm:$0xff]  }
 0x49e   : > { %9748 = vmatpush1.bf16.msra.mxu1 %v16183_v27  ;;  %10054 = vmatpush1.bf16.msra.mxu0 %v16186_v49  ;;  %v16209_v27 = vld [vmem:[%s17080_s29 + $0x162c] ss:$24 sps:$4 sm:$0xff]  }
 0x49f   : > { %9749 = vmatprep.subr.bf16.mxu1 %v16194_v61  ;;  %10055 = vmatprep.subr.bf16.mxu0 %v16197_v32  ;;  %v16212_v49 = vld [vmem:[%s17080_s29 + $0x1334] ss:$24 sps:$4 sm:$0xff]   ;;  %v19240_v61 = vld [vmem:[%s17146_s22 + $0x5b0] ss:$144 sps:$4 sm:$0xff]  }
 0x4a0   : > { %v19243_v32 = vld [vmem:[%s17146_s22 + $0x6d4] ss:$144 sps:$4 sm:$0xff]  }
 0x4a1   : > { %9488 = vmatmul.mubr.bf16.gmra.mrb[56].mxu0 %v19222_v53  ;;  %9641 = vmatmul.mubr.bf16.gmra.mrb[56].mxu1 %v18758_v63  ;;  %v16207_v63 = vld [vmem:[%s17080_s29 + $0x1628] ss:$24 sps:$4 sm:$0xff]  }
 0x4a2   : > { %9497 = vmatprep.mubr.bf16.mxu0 %v19225_v26  ;;  %9650 = vmatprep.mubr.bf16.mxu1 %v18761_v19  ;;  %v16210_v19 = vld [vmem:[%s17080_s29 + $0x1330] ss:$24 sps:$4 sm:$0xff]  }
 0x4a3   : > { %9750 = vmatpush1.bf16.msra.mxu1 %v16192_v4  ;;  %10056 = vmatpush1.bf16.msra.mxu0 %v16195_v51  ;;  %v16218_v4 = vld [vmem:[%s17080_s29 + $0x165c] ss:$24 sps:$4 sm:$0xff]   ;;  %v16216_v51 = vld [vmem:[%s17080_s29 + $0x1658] ss:$24 sps:$4 sm:$0xff]  }
 0x4a4   : > { %9751 = vmatprep.subr.bf16.mxu1 %v16200_v12  ;;  %10057 = vmatprep.subr.bf16.mxu0 %v16203_v30  ;;  %v16221_v30 = vld [vmem:[%s17080_s29 + $0x1364] ss:$24 sps:$4 sm:$0xff]   ;;  %v16219_v12 = vld [vmem:[%s17080_s29 + $0x1360] ss:$24 sps:$4 sm:$0xff]  }
 0x4a7   : > { %9752 = vmatpush1.bf16.msra.mxu1 %v16198_v3  ;;  %10058 = vmatpush1.bf16.msra.mxu0 %v16201_v40  ;;  %v16227_v3 = vld [vmem:[%s17080_s29 + $0x168c] ss:$24 sps:$4 sm:$0xff]  }
 0x4a8   : > { %9753 = vmatprep.subr.bf16.mxu1 %v16209_v27  ;;  %10059 = vmatprep.subr.bf16.mxu0 %v16212_v49  ;;  %v16230_v40 = vld [vmem:[%s17080_s29 + $0x1394] ss:$24 sps:$4 sm:$0xff]   ;;  %v19258_v27 = vld [vmem:[%s17146_s22 + $0x6d0] ss:$144 sps:$4 sm:$0xff]  }
 0x4a9   : > { %9498 = vmatmul.mubr.bf16.gmra.mrb[60].mxu0 %v19240_v61  ;;  %9651 = vmatmul.mubr.bf16.gmra.mrb[60].mxu1 %v18780_v34  ;;  %v19261_v49 = vld [vmem:[%s17146_s22 + $0x7f4] ss:$144 sps:$4 sm:$0xff]   ;;  %v16225_v34 = vld [vmem:[%s17080_s29 + $0x1688] ss:$24 sps:$4 sm:$0xff]  }
 0x4aa   : > { %9507 = vmatprep.mubr.bf16.mxu0 %v19243_v32  ;;  %9660 = vmatprep.mubr.bf16.mxu1 %v18785_v43  ;;  %v16228_v43 = vld [vmem:[%s17080_s29 + $0x1390] ss:$24 sps:$4 sm:$0xff]  }
 0x4ab   : > { %9754 = vmatpush1.bf16.msra.mxu1 %v16207_v63  ;;  %10060 = vmatpush1.bf16.msra.mxu0 %v16210_v19  ;;  %v16233_v63 = vld [vmem:[%s17080_s29 + $0x16bc] ss:$24 sps:$4 sm:$0xff]  }
 0x4ac   : > { %9755 = vmatprep.subr.bf16.mxu1 %v16218_v4  ;;  %10061 = vmatprep.subr.bf16.mxu0 %v16221_v30  ;;  %v16236_v19 = vld [vmem:[%s17080_s29 + $0x13c4] ss:$24 sps:$4 sm:$0xff]   ;;  %v16231_v4 = vld [vmem:[%s17080_s29 + $0x16b8] ss:$24 sps:$4 sm:$0xff]  }
 0x4ad   : > { %v16234_v30 = vld [vmem:[%s17080_s29 + $0x13c0] ss:$24 sps:$4 sm:$0xff]  }
 0x4af   : > { %9756 = vmatpush1.bf16.msra.mxu1 %v16216_v51  ;;  %10062 = vmatpush1.bf16.msra.mxu0 %v16219_v12  ;;  %v16242_v51 = vld [vmem:[%s17080_s29 + $0x16ec] ss:$24 sps:$4 sm:$0xff]  }
 0x4b0   : > { %9757 = vmatprep.subr.bf16.mxu1 %v16227_v3  ;;  %10063 = vmatprep.subr.bf16.mxu0 %v16230_v40  ;;  %v16245_v12 = vld [vmem:[%s17080_s29 + $0x13f4] ss:$24 sps:$4 sm:$0xff]   ;;  %v19276_v3 = vld [vmem:[%s17146_s22 + $0x7f0] ss:$144 sps:$4 sm:$0xff]  }
 0x4b1   : > { %9508 = vmatmul.mubr.bf16.gmra.mrb[64].mxu0 %v19258_v27  ;;  %9661 = vmatmul.mubr.bf16.gmra.mrb[64].mxu1 %v18806_v50  ;;  %v19279_v40 = vld [vmem:[%s17146_s22 + $0x914] ss:$144 sps:$4 sm:$0xff]   ;;  %v16240_v50 = vld [vmem:[%s17080_s29 + $0x16e8] ss:$24 sps:$4 sm:$0xff]  }
 0x4b2   : > { %9517 = vmatprep.mubr.bf16.mxu0 %v19261_v49  ;;  %9670 = vmatprep.mubr.bf16.mxu1 %v18811_v55  ;;  %v16243_v55 = vld [vmem:[%s17080_s29 + $0x13f0] ss:$24 sps:$4 sm:$0xff]  }
 0x4b3   : > { %9758 = vmatpush1.bf16.msra.mxu1 %v16225_v34  ;;  %10064 = vmatpush1.bf16.msra.mxu0 %v16228_v43  ;;  %v16251_v34 = vld [vmem:[%s17080_s29 + $0x171c] ss:$24 sps:$4 sm:$0xff]  }
 0x4b4   : > { %9759 = vmatprep.subr.bf16.mxu1 %v16233_v63  ;;  %10065 = vmatprep.subr.bf16.mxu0 %v16236_v19  ;;  %v16254_v43 = vld [vmem:[%s17080_s29 + $0x1424] ss:$24 sps:$4 sm:$0xff]   ;;  %v16249_v63 = vld [vmem:[%s17080_s29 + $0x1718] ss:$24 sps:$4 sm:$0xff]  }
 0x4b5   : > { %v16252_v19 = vld [vmem:[%s17080_s29 + $0x1420] ss:$24 sps:$4 sm:$0xff]  }
 0x4b7   : > { %9760 = vmatpush1.bf16.msra.mxu1 %v16231_v4  ;;  %10066 = vmatpush1.bf16.msra.mxu0 %v16234_v30  ;;  %v16260_v4 = vld [vmem:[%s17080_s29 + $0x174c] ss:$24 sps:$4 sm:$0xff]  }
 0x4b8   : > { %9761 = vmatprep.subr.bf16.mxu1 %v16242_v51  ;;  %10067 = vmatprep.subr.bf16.mxu0 %v16245_v12  ;;  %v16263_v30 = vld [vmem:[%s17080_s29 + $0x1454] ss:$24 sps:$4 sm:$0xff]   ;;  %v19294_v51 = vld [vmem:[%s17146_s22 + $0x910] ss:$144 sps:$4 sm:$0xff]  }
 0x4b9   : > { %9518 = vmatmul.mubr.bf16.gmra.mrb[68].mxu0 %v19276_v3  ;;  %9671 = vmatmul.mubr.bf16.gmra.mrb[68].mxu1 %v18832_v36  ;;  %v19297_v12 = vld [vmem:[%s17146_s22 + $0xa34] ss:$144 sps:$4 sm:$0xff]   ;;  %v16258_v36 = vld [vmem:[%s17080_s29 + $0x1748] ss:$24 sps:$4 sm:$0xff]  }
 0x4ba   : > { %9527 = vmatprep.mubr.bf16.mxu0 %v19279_v40  ;;  %9680 = vmatprep.mubr.bf16.mxu1 %v18837_v10  ;;  %v16261_v10 = vld [vmem:[%s17080_s29 + $0x1450] ss:$24 sps:$4 sm:$0xff]  }
 0x4bb   : > { %9762 = vmatpush1.bf16.msra.mxu1 %v16240_v50  ;;  %10068 = vmatpush1.bf16.msra.mxu0 %v16243_v55  ;;  %v16266_v50 = vld [vmem:[%s17080_s29 + $0x177c] ss:$24 sps:$4 sm:$0xff]  }
 0x4bc   : > { %9763 = vmatprep.subr.bf16.mxu1 %v16251_v34  ;;  %10069 = vmatprep.subr.bf16.mxu0 %v16254_v43  ;;  %v16269_v55 = vld [vmem:[%s17080_s29 + $0x1484] ss:$24 sps:$4 sm:$0xff]   ;;  %v16264_v34 = vld [vmem:[%s17080_s29 + $0x1778] ss:$24 sps:$4 sm:$0xff]  }
 0x4bd   : > { %v16267_v43 = vld [vmem:[%s17080_s29 + $0x1480] ss:$24 sps:$4 sm:$0xff]  }
 0x4bf   : > { %9764 = vmatpush1.bf16.msra.mxu1 %v16249_v63  ;;  %10070 = vmatpush1.bf16.msra.mxu0 %v16252_v19  ;;  %v16275_v63 = vld [vmem:[%s17080_s29 + $0x17ac] ss:$24 sps:$4 sm:$0xff]  }
 0x4c0   : > { %9765 = vmatprep.subr.bf16.mxu1 %v16260_v4  ;;  %10071 = vmatprep.subr.bf16.mxu0 %v16263_v30  ;;  %v16278_v19 = vld [vmem:[%s17080_s29 + $0x14b4] ss:$24 sps:$4 sm:$0xff]   ;;  %v19312_v4 = vld [vmem:[%s17146_s22 + $0xa30] ss:$144 sps:$4 sm:$0xff]  }
 0x4c1   : > { %9528 = vmatmul.mubr.bf16.gmra.mrb[72].mxu0 %v19294_v51  ;;  %9681 = vmatmul.mubr.bf16.gmra.mrb[72].mxu1 %v18858_v62  ;;  %v19315_v30 = vld [vmem:[%s17146_s22 + $0xb54] ss:$144 sps:$4 sm:$0xff]   ;;  %v16273_v62 = vld [vmem:[%s17080_s29 + $0x17a8] ss:$24 sps:$4 sm:$0xff]  }
 0x4c2   : > { %9537 = vmatprep.mubr.bf16.mxu0 %v19297_v12  ;;  %9690 = vmatprep.mubr.bf16.mxu1 %v18863_v44  ;;  %v16276_v44 = vld [vmem:[%s17080_s29 + $0x14b0] ss:$24 sps:$4 sm:$0xff]  }
 0x4c3   : > { %9766 = vmatpush1.bf16.msra.mxu1 %v16258_v36  ;;  %10072 = vmatpush1.bf16.msra.mxu0 %v16261_v10  ;;  %v16284_v36 = vld [vmem:[%s17080_s29 + $0x17dc] ss:$24 sps:$4 sm:$0xff]  }
 0x4c4   : > { %9767 = vmatprep.subr.bf16.mxu1 %v16266_v50  ;;  %10073 = vmatprep.subr.bf16.mxu0 %v16269_v55  ;;  %v16287_v10 = vld [vmem:[%s17080_s29 + $0x14e4] ss:$24 sps:$4 sm:$0xff]   ;;  %v16282_v50 = vld [vmem:[%s17080_s29 + $0x17d8] ss:$24 sps:$4 sm:$0xff]  }
 0x4c5   : > { %v16285_v55 = vld [vmem:[%s17080_s29 + $0x14e0] ss:$24 sps:$4 sm:$0xff]  }
 0x4c7   : > { %9768 = vmatpush1.bf16.msra.mxu1 %v16264_v34  ;;  %10074 = vmatpush1.bf16.msra.mxu0 %v16267_v43  ;;  %v16290_v34 = vld [vmem:[%s17080_s29 + $0x180c] ss:$24 sps:$4 sm:$0xff]  }
 0x4c8   : > { %9769 = vmatprep.subr.bf16.mxu1 %v16275_v63  ;;  %10075 = vmatprep.subr.bf16.mxu0 %v16278_v19  ;;  %v16293_v43 = vld [vmem:[%s17080_s29 + $0x1514] ss:$24 sps:$4 sm:$0xff]   ;;  %v19330_v63 = vld [vmem:[%s17146_s22 + $0xb50] ss:$144 sps:$4 sm:$0xff]  }
 0x4c9   : > { %9538 = vmatmul.mubr.bf16.gmra.mrb[76].mxu0 %v19312_v4  ;;  %9691 = vmatmul.mubr.bf16.gmra.mrb[76].mxu1 %v18884_v17  ;;  %v19333_v19 = vld [vmem:[%s17146_s22 + $0xc74] ss:$144 sps:$4 sm:$0xff]   ;;  %v19340_v17 = vld [vmem:[%s17146_s22 + $0xc70] ss:$144 sps:$4 sm:$0xff]  }
 0x4ca   : > { %9547 = vmatprep.mubr.bf16.mxu0 %v19315_v30  ;;  %9700 = vmatprep.mubr.bf16.mxu1 %v18889_v29  ;;  %v19343_v29 = vld [vmem:[%s17146_s22 + $0xd94] ss:$144 sps:$4 sm:$0xff]  }
 0x4cb   : > { %9770 = vmatpush1.bf16.msra.mxu1 %v16273_v62  ;;  %10076 = vmatpush1.bf16.msra.mxu0 %v16276_v44  ;;  %v16288_v62 = vld [vmem:[%s17080_s29 + $0x1808] ss:$24 sps:$4 sm:$0xff]   ;;  %v16296_v44 = vld [vmem:[%s17080_s29 + $0x183c] ss:$24 sps:$4 sm:$0xff]  }
 0x4cc   : > { %9771 = vmatprep.subr.bf16.mxu1 %v16284_v36  ;;  %10077 = vmatprep.subr.bf16.mxu0 %v16287_v10  ;;  %v16299_v36 = vld [vmem:[%s17080_s29 + $0x1544] ss:$24 sps:$4 sm:$0xff]  }
 0x4cd   : > { %v16302_v10 = vld [vmem:[%s17080_s29 + $0x186c] ss:$24 sps:$4 sm:$0xff]  }
 0x4cf   : > { %9772 = vmatpush1.bf16.msra.mxu1 %v16282_v50  ;;  %10078 = vmatpush1.bf16.msra.mxu0 %v16285_v55  ;;  %v16305_v50 = vld [vmem:[%s17080_s29 + $0x1574] ss:$24 sps:$4 sm:$0xff]  }
 0x4d0   : > { %9894 = vmatprep.subr.bf16.mxu1 %v16290_v34  ;;  %10200 = vmatprep.subr.bf16.mxu0 %v16293_v43  ;;  %v16580_v55 = vld [vmem:[%s17146_s22 + $0x364] ss:$144 sps:$4 sm:$0xff]   ;;  %v16303_v34 = vld [vmem:[%s17080_s29 + $0x1570] ss:$24 sps:$4 sm:$0xff]  }
 0x4d1   : > { %9548 = vmatmul.mubr.bf16.gmra.mrb[80].mxu0 %v19330_v63  ;;  %9701 = vmatmul.mubr.bf16.gmra.mrb[80].mxu1 %v18910_v13  ;;  %v19350_v13 = vld [vmem:[%s17146_s22 + $0xd90] ss:$144 sps:$4 sm:$0xff]   ;;  %v16308_v43 = vld [vmem:[%s17080_s29 + $0x189c] ss:$24 sps:$4 sm:$0xff]  }
 0x4d2   : > { %9557 = vmatprep.mubr.bf16.mxu0 %v19333_v19  ;;  %9710 = vmatprep.mubr.bf16.mxu1 %v18915_v6  ;;  %v19353_v6 = vld [vmem:[%s17146_s22 + $0xeb4] ss:$144 sps:$4 sm:$0xff]  }
 0x4d9   : > { %9558 = vmatmul.mubr.bf16.gmra.mrb[84].mxu0 %v19340_v17  ;;  %9711 = vmatmul.mubr.bf16.gmra.mrb[84].mxu1 %v18928_v8  ;;  %v19360_v8 = vld [vmem:[%s17146_s22 + $0xeb0] ss:$144 sps:$4 sm:$0xff]  }
 0x4da   : > { %9567 = vmatprep.mubr.bf16.mxu0 %v19343_v29  ;;  %9720 = vmatprep.mubr.bf16.mxu1 %v18933_v20  ;;  %v16578_v20 = vld [vmem:[%s17146_s22 + $0x244] ss:$144 sps:$4 sm:$0xff]  }
 0x4e1   : > { %9568 = vmatmul.mubr.bf16.gmra.mrb[88].mxu0 %v19350_v13  ;;  %9721 = vmatmul.mubr.bf16.gmra.mrb[88].mxu1 %v18946_v9  ;;  %v16291_v9 = vld [vmem:[%s17080_s29 + $0x1510] ss:$24 sps:$4 sm:$0xff]  }
 0x4e2   : > { %9577 = vmatprep.mubr.bf16.mxu0 %v19353_v6  ;;  %9730 = vmatprep.mubr.bf16.mxu1 %v18951_v35  ;;  %v16579_v35 = vld [vmem:[%s17146_s22 + $0x240] ss:$144 sps:$4 sm:$0xff]  }
 0x4e9   : > { %9578 = vmatmul.mubr.bf16.gmra.mrb[92].mxu0 %v19360_v8  ;;  %9731 = vmatmul.mubr.bf16.gmra.mrb[92].mxu1 %v18964_v5  ;;  %v16294_v5 = vld [vmem:[%s17080_s29 + $0x1838] ss:$24 sps:$4 sm:$0xff]  }
 0x4ea   : > { %9773 = vmatprep.mubr.bf16.mxu1 %v18969_v47  ;;  %10079 = vmatprep.mubr.bf16.mxu0 %v16578_v20  ;;  %v16297_v47 = vld [vmem:[%s17080_s29 + $0x1540] ss:$24 sps:$4 sm:$0xff]   ;;  %v16311_v20 = vld [vmem:[%s17080_s29 + $0x15a4] ss:$24 sps:$4 sm:$0xff]  }
 0x4f1   : > { %9774 = vmatmul.mubr.bf16.vlgmr.msra.gmra.mrb[48].mxu1 %v18982_v23  ;;  %10080 = vmatmul.mubr.bf16.vlgmr.msra.gmra.mrb[0].mxu0 %v16579_v35  ;;  %v16300_v23 = vld [vmem:[%s17080_s29 + $0x1868] ss:$24 sps:$4 sm:$0xff]   ;;  %v16317_v35 = vld [vmem:[%s17080_s29 + $0x15d4] ss:$24 sps:$4 sm:$0xff]  }
 0x4f2   : > { %9895 = vmatpush1.bf16.msra.mxu1 %v16288_v62  ;;  %10201 = vmatpush1.bf16.msra.mxu0 %v16291_v9  ;;  %v16581_v62 = vld [vmem:[%s17146_s22 + $0x360] ss:$144 sps:$4 sm:$0xff]  }
 0x4f3   : > { %9896 = vmatprep.subr.bf16.mxu1 %v16296_v44  ;;  %10202 = vmatprep.subr.bf16.mxu0 %v16299_v36  ;;  %v16309_v9 = vld [vmem:[%s17080_s29 + $0x15a0] ss:$24 sps:$4 sm:$0xff]   ;;  %v16582_v44 = vld [vmem:[%s17146_s22 + $0x484] ss:$144 sps:$4 sm:$0xff]  }
 0x4f4   : > { %9783 = vmatprep.mubr.bf16.mxu1 %v18993_v39  ;;  %10089 = vmatprep.mubr.bf16.mxu0 %v16580_v55  ;;  %v16306_v39 = vld [vmem:[%s17080_s29 + $0x1898] ss:$24 sps:$4 sm:$0xff]   ;;  %v16314_v36 = vld [vmem:[%s17080_s29 + $0x18cc] ss:$24 sps:$4 sm:$0xff]  }
 0x4f5   : > { %v16318_v55 = vld [vmem:[%s17080_s29 + $0x18f8] ss:$24 sps:$4 sm:$0xff]  }
 0x4f6   : > { %9897 = vmatpush1.bf16.msra.mxu1 %v16294_v5  ;;  %10203 = vmatpush1.bf16.msra.mxu0 %v16297_v47  ;;  %v16315_v5 = vld [vmem:[%s17080_s29 + $0x15d0] ss:$24 sps:$4 sm:$0xff]   ;;  %v16320_v47 = vld [vmem:[%s17080_s29 + $0x18fc] ss:$24 sps:$4 sm:$0xff]  }
 0x4f7   : > { %9898 = vmatprep.subr.bf16.mxu1 %v16302_v10  ;;  %10204 = vmatprep.subr.bf16.mxu0 %v16305_v50  ;;  %v16583_v10 = vld [vmem:[%s17146_s22 + $0x480] ss:$144 sps:$4 sm:$0xff]   ;;  %v16584_v50 = vld [vmem:[%s17146_s22 + $0x5a4] ss:$144 sps:$4 sm:$0xff]  }
 0x4f9   : > { %9784 = vmatmul.mubr.bf16.gmra.mrb[52].mxu1 %v19008_v37  ;;  %10090 = vmatmul.mubr.bf16.gmra.mrb[4].mxu0 %v16581_v62  ;;  %v16312_v37 = vld [vmem:[%s17080_s29 + $0x18c8] ss:$24 sps:$4 sm:$0xff]   ;;  %v16335_v62 = vld [vmem:[%s17080_s29 + $0x1664] ss:$24 sps:$4 sm:$0xff]  }
 0x4fa   : > { %9899 = vmatpush1.bf16.msra.mxu1 %v16300_v23  ;;  %10205 = vmatpush1.bf16.msra.mxu0 %v16303_v34  ;;  %v16321_v23 = vld [vmem:[%s17080_s29 + $0x1600] ss:$24 sps:$4 sm:$0xff]   ;;  %v16326_v34 = vld [vmem:[%s17080_s29 + $0x192c] ss:$24 sps:$4 sm:$0xff]  }
 0x4fb   : > { %9793 = vmatprep.mubr.bf16.mxu1 %v19017_v41  ;;  %10099 = vmatprep.mubr.bf16.mxu0 %v16582_v44  ;;  %v16323_v41 = vld [vmem:[%s17080_s29 + $0x1604] ss:$24 sps:$4 sm:$0xff]   ;;  %v16330_v44 = vld [vmem:[%s17080_s29 + $0x1958] ss:$24 sps:$4 sm:$0xff]  }
 0x4fc   : > { %9900 = vmatprep.subr.bf16.mxu1 %v16308_v43  ;;  %10206 = vmatprep.subr.bf16.mxu0 %v16311_v20  ;;  %v16324_v43 = vld [vmem:[%s17080_s29 + $0x1928] ss:$24 sps:$4 sm:$0xff]   ;;  %v16332_v20 = vld [vmem:[%s17080_s29 + $0x195c] ss:$24 sps:$4 sm:$0xff]  }
 0x4fe   : > { %9901 = vmatpush1.bf16.msra.mxu1 %v16306_v39  ;;  %10207 = vmatpush1.bf16.msra.mxu0 %v16309_v9  ;;  %v16585_v39 = vld [vmem:[%s17146_s22 + $0x5a0] ss:$144 sps:$4 sm:$0xff]   ;;  %v16586_v9 = vld [vmem:[%s17146_s22 + $0x6c4] ss:$144 sps:$4 sm:$0xff]  }
 0x4ff   : > { %9902 = vmatprep.subr.bf16.mxu1 %v16314_v36  ;;  %10208 = vmatprep.subr.bf16.mxu0 %v16317_v35  ;;  %v16333_v36 = vld [vmem:[%s17080_s29 + $0x1660] ss:$24 sps:$4 sm:$0xff]   ;;  %v16338_v35 = vld [vmem:[%s17080_s29 + $0x198c] ss:$24 sps:$4 sm:$0xff]  }
 0x501   : > { %9794 = vmatmul.mubr.bf16.gmra.mrb[56].mxu1 %v19034_v31  ;;  %10100 = vmatmul.mubr.bf16.gmra.mrb[8].mxu0 %v16583_v10  ;;  %v16329_v31 = vld [vmem:[%s17080_s29 + $0x1634] ss:$24 sps:$4 sm:$0xff]  }
 0x502   : > { %9803 = vmatprep.mubr.bf16.mxu1 %v19039_v21  ;;  %10109 = vmatprep.mubr.bf16.mxu0 %v16584_v50  ;;  %v16327_v21 = vld [vmem:[%s17080_s29 + $0x1630] ss:$24 sps:$4 sm:$0xff]   ;;  %v16588_v10 = vld [vmem:[%s17146_s22 + $0x7e4] ss:$144 sps:$4 sm:$0xff]  }
 0x503   : > { %9903 = vmatpush1.bf16.msra.mxu1 %v16312_v37  ;;  %10209 = vmatpush1.bf16.msra.mxu0 %v16315_v5  ;;  %v16336_v37 = vld [vmem:[%s17080_s29 + $0x1988] ss:$24 sps:$4 sm:$0xff]   ;;  %v16344_v5 = vld [vmem:[%s17080_s29 + $0x19bc] ss:$24 sps:$4 sm:$0xff]   ;;  %v16342_v50 = vld [vmem:[%s17080_s29 + $0x19b8] ss:$24 sps:$4 sm:$0xff]  }
 0x504   : > { %9904 = vmatprep.subr.bf16.mxu1 %v16320_v47  ;;  %10210 = vmatprep.subr.bf16.mxu0 %v16323_v41  ;;  %v16347_v47 = vld [vmem:[%s17080_s29 + $0x16c4] ss:$24 sps:$4 sm:$0xff]   ;;  %v16587_v41 = vld [vmem:[%s17146_s22 + $0x6c0] ss:$144 sps:$4 sm:$0xff]  }
 0x507   : > { %9905 = vmatpush1.bf16.msra.mxu1 %v16318_v55  ;;  %10211 = vmatpush1.bf16.msra.mxu0 %v16321_v23  ;;  %v16345_v55 = vld [vmem:[%s17080_s29 + $0x16c0] ss:$24 sps:$4 sm:$0xff]   ;;  %v16350_v23 = vld [vmem:[%s17080_s29 + $0x19ec] ss:$24 sps:$4 sm:$0xff]  }
 0x508   : > { %9906 = vmatprep.subr.bf16.mxu1 %v16326_v34  ;;  %10212 = vmatprep.subr.bf16.mxu0 %v16329_v31  ;;  %v16348_v34 = vld [vmem:[%s17080_s29 + $0x19e8] ss:$24 sps:$4 sm:$0xff]   ;;  %v16356_v31 = vld [vmem:[%s17080_s29 + $0x1a1c] ss:$24 sps:$4 sm:$0xff]  }
 0x509   : > { %9804 = vmatmul.mubr.bf16.gmra.mrb[60].mxu1 %v19056_v11  ;;  %10110 = vmatmul.mubr.bf16.gmra.mrb[12].mxu0 %v16585_v39  ;;  %v16341_v11 = vld [vmem:[%s17080_s29 + $0x1694] ss:$24 sps:$4 sm:$0xff]   ;;  %v16357_v39 = vld [vmem:[%s17080_s29 + $0x1720] ss:$24 sps:$4 sm:$0xff]  }
 0x50a   : > { %9813 = vmatprep.mubr.bf16.mxu1 %v19059_v59  ;;  %10119 = vmatprep.mubr.bf16.mxu0 %v16586_v9  ;;  %v16339_v59 = vld [vmem:[%s17080_s29 + $0x1690] ss:$24 sps:$4 sm:$0xff]   ;;  %v16362_v9 = vld [vmem:[%s17080_s29 + $0x1a4c] ss:$24 sps:$4 sm:$0xff]  }
 0x50b   : > { %9907 = vmatpush1.bf16.msra.mxu1 %v16324_v43  ;;  %10213 = vmatpush1.bf16.msra.mxu0 %v16327_v21  ;;  %v16359_v43 = vld [vmem:[%s17080_s29 + $0x1724] ss:$24 sps:$4 sm:$0xff]   ;;  %v16589_v21 = vld [vmem:[%s17146_s22 + $0x7e0] ss:$144 sps:$4 sm:$0xff]  }
 0x50c   : > { %9908 = vmatprep.subr.bf16.mxu1 %v16332_v20  ;;  %10214 = vmatprep.subr.bf16.mxu0 %v16335_v62  ;;  %v16590_v20 = vld [vmem:[%s17146_s22 + $0x904] ss:$144 sps:$4 sm:$0xff]   ;;  %v16354_v62 = vld [vmem:[%s17080_s29 + $0x1a18] ss:$24 sps:$4 sm:$0xff]  }
 0x50f   : > { %9909 = vmatpush1.bf16.msra.mxu1 %v16330_v44  ;;  %10215 = vmatpush1.bf16.msra.mxu0 %v16333_v36  ;;  %v16360_v44 = vld [vmem:[%s17080_s29 + $0x1a48] ss:$24 sps:$4 sm:$0xff]   ;;  %v16368_v36 = vld [vmem:[%s17080_s29 + $0x1a7c] ss:$24 sps:$4 sm:$0xff]  }
 0x510   : > { %9910 = vmatprep.subr.bf16.mxu1 %v16338_v35  ;;  %10216 = vmatprep.subr.bf16.mxu0 %v16341_v11  ;;  %v16371_v35 = vld [vmem:[%s17080_s29 + $0x1784] ss:$24 sps:$4 sm:$0xff]   ;;  %v16591_v11 = vld [vmem:[%s17146_s22 + $0x900] ss:$144 sps:$4 sm:$0xff]  }
 0x511   : > { %9814 = vmatmul.mubr.bf16.gmra.mrb[64].mxu1 %v19074_v48  ;;  %10120 = vmatmul.mubr.bf16.gmra.mrb[16].mxu0 %v16587_v41  ;;  %v16353_v48 = vld [vmem:[%s17080_s29 + $0x16f4] ss:$24 sps:$4 sm:$0xff]   ;;  %v16372_v41 = vld [vmem:[%s17080_s29 + $0x1aa8] ss:$24 sps:$4 sm:$0xff]  }
 0x512   : > { %9823 = vmatprep.mubr.bf16.mxu1 %v19077_v22  ;;  %10129 = vmatprep.mubr.bf16.mxu0 %v16588_v10  ;;  %v16351_v22 = vld [vmem:[%s17080_s29 + $0x16f0] ss:$24 sps:$4 sm:$0xff]   ;;  %v16380_v10 = vld [vmem:[%s17080_s29 + $0x1adc] ss:$24 sps:$4 sm:$0xff]  }
 0x513   : > { %9911 = vmatpush1.bf16.msra.mxu1 %v16336_v37  ;;  %10217 = vmatpush1.bf16.msra.mxu0 %v16339_v59  ;;  %v16592_v37 = vld [vmem:[%s17146_s22 + $0xa24] ss:$144 sps:$4 sm:$0xff]   ;;  %v16366_v59 = vld [vmem:[%s17080_s29 + $0x1a78] ss:$24 sps:$4 sm:$0xff]  }
 0x514   : > { %9912 = vmatprep.subr.bf16.mxu1 %v16344_v5  ;;  %10218 = vmatprep.subr.bf16.mxu0 %v16347_v47  ;;  %v16369_v5 = vld [vmem:[%s17080_s29 + $0x1780] ss:$24 sps:$4 sm:$0xff]   ;;  %v16374_v47 = vld [vmem:[%s17080_s29 + $0x1aac] ss:$24 sps:$4 sm:$0xff]  }
 0x517   : > { %9913 = vmatpush1.bf16.msra.mxu1 %v16342_v50  ;;  %10219 = vmatpush1.bf16.msra.mxu0 %v16345_v55  ;;  %v16383_v50 = vld [vmem:[%s17080_s29 + $0x17e4] ss:$24 sps:$4 sm:$0xff]   ;;  %v16593_v55 = vld [vmem:[%s17146_s22 + $0xa20] ss:$144 sps:$4 sm:$0xff]  }
 0x518   : > { %9914 = vmatprep.subr.bf16.mxu1 %v16350_v23  ;;  %10220 = vmatprep.subr.bf16.mxu0 %v16353_v48  ;;  %v16594_v23 = vld [vmem:[%s17146_s22 + $0xb44] ss:$144 sps:$4 sm:$0xff]   ;;  %v16378_v48 = vld [vmem:[%s17080_s29 + $0x1ad8] ss:$24 sps:$4 sm:$0xff]  }
 0x519   : > { %9824 = vmatmul.mubr.bf16.gmra.mrb[68].mxu1 %v19092_v54  ;;  %10130 = vmatmul.mubr.bf16.gmra.mrb[20].mxu0 %v16589_v21  ;;  %v16365_v54 = vld [vmem:[%s17080_s29 + $0x1754] ss:$24 sps:$4 sm:$0xff]   ;;  %v16384_v21 = vld [vmem:[%s17080_s29 + $0x1810] ss:$24 sps:$4 sm:$0xff]  }
 0x51a   : > { %9833 = vmatprep.mubr.bf16.mxu1 %v19095_v24  ;;  %10139 = vmatprep.mubr.bf16.mxu0 %v16590_v20  ;;  %v16363_v24 = vld [vmem:[%s17080_s29 + $0x1750] ss:$24 sps:$4 sm:$0xff]  }
 0x51b   : > { %9915 = vmatpush1.bf16.msra.mxu1 %v16348_v34  ;;  %10221 = vmatpush1.bf16.msra.mxu0 %v16351_v22  ;;  %v16381_v34 = vld [vmem:[%s17080_s29 + $0x17e0] ss:$24 sps:$4 sm:$0xff]   ;;  %v16386_v22 = vld [vmem:[%s17080_s29 + $0x1814] ss:$24 sps:$4 sm:$0xff]  }
 0x51c   : > { %9916 = vmatprep.subr.bf16.mxu1 %v16356_v31  ;;  %10222 = vmatprep.subr.bf16.mxu0 %v16359_v43  ;;  %v16597_v31 = vld [vmem:[%s17146_s22 + $0xc60] ss:$144 sps:$4 sm:$0xff]   ;;  %v16598_v43 = vld [vmem:[%s17146_s22 + $0xd84] ss:$144 sps:$4 sm:$0xff]   ;;  %v16603_v20 = vld [vmem:[%s17146_s22 + $0x248] ss:$144 sps:$4 sm:$0xff]  }
 0x51f   : > { %9917 = vmatpush1.bf16.msra.mxu1 %v16354_v62  ;;  %10223 = vmatpush1.bf16.msra.mxu0 %v16357_v39  ;;  %v16395_v62 = vld [vmem:[%s17080_s29 + $0x18a4] ss:$24 sps:$4 sm:$0xff]   ;;  %v16605_v39 = vld [vmem:[%s17146_s22 + $0x368] ss:$144 sps:$4 sm:$0xff]  }
 0x520   : > { %9918 = vmatprep.subr.bf16.mxu1 %v16362_v9  ;;  %10224 = vmatprep.subr.bf16.mxu0 %v16365_v54  ;;  %v16606_v9 = vld [vmem:[%s17146_s22 + $0x48c] ss:$144 sps:$4 sm:$0xff]  }
 0x521   : > { %9834 = vmatmul.mubr.bf16.gmra.mrb[72].mxu1 %v19110_v45  ;;  %10140 = vmatmul.mubr.bf16.gmra.mrb[24].mxu0 %v16591_v11  ;;  %v16377_v45 = vld [vmem:[%s17080_s29 + $0x17b4] ss:$24 sps:$4 sm:$0xff]  }
 0x522   : > { %9843 = vmatprep.mubr.bf16.mxu1 %v19113_v28  ;;  %10149 = vmatprep.mubr.bf16.mxu0 %v16592_v37  ;;  %v16375_v28 = vld [vmem:[%s17080_s29 + $0x17b0] ss:$24 sps:$4 sm:$0xff]   ;;  %v16398_v54 = vld [vmem:[%s17080_s29 + $0x18d4] ss:$24 sps:$4 sm:$0xff]  }
 0x523   : > { %9919 = vmatpush1.bf16.msra.mxu1 %v16360_v44  ;;  %10225 = vmatpush1.bf16.msra.mxu0 %v16363_v24  ;;  %v16396_v44 = vld [vmem:[%s17080_s29 + $0x18d0] ss:$24 sps:$4 sm:$0xff]   ;;  %v16404_v11 = vld [vmem:[%s17080_s29 + $0x1934] ss:$24 sps:$4 sm:$0xff]  }
 0x524   : > { %9920 = vmatprep.subr.bf16.mxu1 %v16368_v36  ;;  %10226 = vmatprep.subr.bf16.mxu0 %v16371_v35  ;;  %v16607_v24 = vld [vmem:[%s17146_s22 + $0x488] ss:$144 sps:$4 sm:$0xff]  }
 0x525   : > { %v16399_v36 = vld [vmem:[%s17080_s29 + $0x1900] ss:$24 sps:$4 sm:$0xff]  }
 0x527   : > { %9921 = vmatpush1.bf16.msra.mxu1 %v16366_v59  ;;  %10227 = vmatpush1.bf16.msra.mxu0 %v16369_v5 }
 0x528   : > { %9922 = vmatprep.subr.bf16.mxu1 %v16374_v47  ;;  %10228 = vmatprep.subr.bf16.mxu0 %v16377_v45  ;;  %v16402_v45 = vld [vmem:[%s17080_s29 + $0x1930] ss:$24 sps:$4 sm:$0xff]  }
 0x529   : > { %9844 = vmatmul.mubr.bf16.gmra.mrb[76].mxu1 %v19128_v15  ;;  %10150 = vmatmul.mubr.bf16.gmra.mrb[28].mxu0 %v16593_v55  ;;  %v16595_v15 = vld [vmem:[%s17146_s22 + $0xb40] ss:$144 sps:$4 sm:$0xff]   ;;  %v16410_v55 = vld [vmem:[%s17080_s29 + $0x1994] ss:$24 sps:$4 sm:$0xff]  }
 0x52a   : > { %9853 = vmatprep.mubr.bf16.mxu1 %v19131_v2  ;;  %10159 = vmatprep.mubr.bf16.mxu0 %v16594_v23  ;;  %v16596_v2 = vld [vmem:[%s17146_s22 + $0xc64] ss:$144 sps:$4 sm:$0xff]  }
 0x52b   : > { %9923 = vmatpush1.bf16.msra.mxu1 %v16372_v41  ;;  %10229 = vmatpush1.bf16.msra.mxu0 %v16375_v28  ;;  %v21422_v41 = vld [vmem:[#allocation24_spill] sm:$0xff]  ;;  %v21424_v23 = vld [vmem:[#allocation25_spill] sm:$0xff] }
 0x52c   : > { %9924 = vmatprep.subr.bf16.mxu1 %v16380_v10  ;;  %10230 = vmatprep.subr.bf16.mxu0 %v16383_v50  ;;  %v16405_v10 = vld [vmem:[%s17080_s29 + $0x1960] ss:$24 sps:$4 sm:$0xff]  }
 0x52f   : > { %9925 = vmatpush1.bf16.msra.mxu1 %v16378_v48  ;;  %10231 = vmatpush1.bf16.msra.mxu0 %v16381_v34  ;;  %v21425_v34 = vld [vmem:[#allocation26_spill] sm:$0xff] }
 0x530   : > { %10353 = vmatprep.subr.bf16.mxu0 %v16386_v22  ;;  %13591 = vmatprep.subr.bf16.mxu1 %v16386_v22 }
 0x531   : > { %9854 = vmatmul.mubr.bf16.gmra.mrb[80].mxu1 %v19146_v56  ;;  %10160 = vmatmul.mubr.bf16.gmra.mrb[32].mxu0 %v16595_v15  ;;  %v16599_v56 = vld [vmem:[%s17146_s22 + $0xd80] ss:$144 sps:$4 sm:$0xff]   ;;  %v21426_v15 = vld [vmem:[#allocation27_spill] sm:$0xff] }
 0x532   : > { %9863 = vmatprep.mubr.bf16.mxu1 %v19149_v14  ;;  %10169 = vmatprep.mubr.bf16.mxu0 %v16596_v2  ;;  %v16600_v14 = vld [vmem:[%s17146_s22 + $0xea4] ss:$144 sps:$4 sm:$0xff]  }
 0x539   : > { %9864 = vmatmul.mubr.bf16.gmra.mrb[84].mxu1 %v19156_v16  ;;  %10170 = vmatmul.mubr.bf16.gmra.mrb[36].mxu0 %v16597_v31  ;;  %v16601_v16 = vld [vmem:[%s17146_s22 + $0xea0] ss:$144 sps:$4 sm:$0xff]  }
 0x53a   : > { %9873 = vmatprep.mubr.bf16.mxu1 %v19159_v33  ;;  %10179 = vmatprep.mubr.bf16.mxu0 %v16598_v43  ;;  %v16602_v33 = vld [vmem:[%s17146_s22 + $0x24c] ss:$144 sps:$4 sm:$0xff]   ;;  %v16408_v43 = vld [vmem:[%s17080_s29 + $0x1990] ss:$24 sps:$4 sm:$0xff]  }
 0x541   : > { %9874 = vmatmul.mubr.bf16.gmra.mrb[88].mxu1 %v19166_v18  ;;  %10180 = vmatmul.mubr.bf16.gmra.mrb[40].mxu0 %v16599_v56  ;;  %v16389_v18 = vld [vmem:[%s17080_s29 + $0x1844] ss:$24 sps:$4 sm:$0xff]   ;;  %v21427_v56 = vld [vmem:[#allocation28_spill] sm:$0xff] }
 0x542   : > { %9883 = vmatprep.mubr.bf16.mxu1 %v19169_v58  ;;  %10189 = vmatprep.mubr.bf16.mxu0 %v16600_v14  ;;  %v16387_v58 = vld [vmem:[%s17080_s29 + $0x1840] ss:$24 sps:$4 sm:$0xff]  }
 0x549   : > { %9884 = vmatmul.mubr.bf16.gmra.mrb[92].mxu1 %v19176_v46  ;;  %10190 = vmatmul.mubr.bf16.gmra.mrb[44].mxu0 %v16601_v16  ;;  %v16392_v46 = vld [vmem:[%s17080_s29 + $0x1874] ss:$24 sps:$4 sm:$0xff]   ;;  %v16413_v16 = vld [vmem:[%s17080_s29 + $0x19c4] ss:$24 sps:$4 sm:$0xff]  }
 0x54a   : > { %9926 = vmatprep.mubr.bf16.mxu1 %v19179_v38  ;;  %10232 = vmatprep.mubr.bf16.mxu0 %v16602_v33  ;;  %v16604_v38 = vld [vmem:[%s17146_s22 + $0x36c] ss:$144 sps:$4 sm:$0xff]   ;;  %v16611_v33 = vld [vmem:[%s17146_s22 + $0x6c8] ss:$144 sps:$4 sm:$0xff]  }
 0x551   : > { %9927 = vmatmul.mubr.bf16.vlgmr.msra.gmra.mrb[48].mxu1 %v19186_v1  ;;  %10233 = vmatmul.mubr.bf16.vlgmr.msra.gmra.mrb[0].mxu0 %v16603_v20  ;;  %v16390_v1 = vld [vmem:[%s17080_s29 + $0x1870] ss:$24 sps:$4 sm:$0xff]  }
 0x552   : > { %10354 = vmatpush1.bf16.msra.mxu0 %v16384_v21  ;;  %13607 = vmatpush1.bf16.msra.mxu1 %v16384_v21  ;;  %v16612_v21 = vld [vmem:[%s17146_s22 + $0x7ec] ss:$144 sps:$4 sm:$0xff]  }
 0x553   : > { %10355 = vmatprep.subr.bf16.mxu0 %v16389_v18  ;;  %13592 = vmatprep.subr.bf16.mxu1 %v16389_v18  ;;  %v16411_v18 = vld [vmem:[%s17080_s29 + $0x19c0] ss:$24 sps:$4 sm:$0xff]  }
 0x554   : > { %9936 = vmatprep.mubr.bf16.mxu1 %v19193_v25  ;;  %10242 = vmatprep.mubr.bf16.mxu0 %v16604_v38  ;;  %v16393_v25 = vld [vmem:[%s17080_s29 + $0x18a0] ss:$24 sps:$4 sm:$0xff]  }
 0x556   : > { %10356 = vmatpush1.bf16.msra.mxu0 %v16387_v58  ;;  %13608 = vmatpush1.bf16.msra.mxu1 %v16387_v58  ;;  %v16416_v58 = vld [vmem:[%s17080_s29 + $0x19f4] ss:$24 sps:$4 sm:$0xff]  }
 0x557   : > { %10357 = vmatprep.subr.bf16.mxu0 %v16392_v46  ;;  %13593 = vmatprep.subr.bf16.mxu1 %v16392_v46  ;;  %v21428_v46 = vld [vmem:[#allocation29_spill] sm:$0xff] }
 0x559   : > { %9937 = vmatmul.mubr.bf16.gmra.mrb[52].mxu1 %v19204_v57  ;;  %10243 = vmatmul.mubr.bf16.gmra.mrb[4].mxu0 %v16605_v39  ;;  %v16401_v57 = vld [vmem:[%s17080_s29 + $0x1904] ss:$24 sps:$4 sm:$0xff]  }
 0x55a   : > { %10358 = vmatpush1.bf16.msra.mxu0 %v16390_v1  ;;  %13609 = vmatpush1.bf16.msra.mxu1 %v16390_v1  ;;  %v21429_v1 = vld [vmem:[#allocation30_spill] sm:$0xff]  ;;  %v21430_v39 = vld [vmem:[#allocation31_spill] sm:$0xff] }
 0x55b   : > { %9946 = vmatprep.mubr.bf16.mxu1 %v19209_v52  ;;  %10252 = vmatprep.mubr.bf16.mxu0 %v16606_v9  ;;  %v16608_v52 = vld [vmem:[%s17146_s22 + $0x5ac] ss:$144 sps:$4 sm:$0xff]  }
 0x55c   : > { %10359 = vmatprep.subr.bf16.mxu0 %v16395_v62  ;;  %13594 = vmatprep.subr.bf16.mxu1 %v16395_v62 }
 0x55e   : > { %10360 = vmatpush1.bf16.msra.mxu0 %v16393_v25  ;;  %13610 = vmatpush1.bf16.msra.mxu1 %v16393_v25 }
 0x55f   : > { %10361 = vmatprep.subr.bf16.mxu0 %v16398_v54  ;;  %13595 = vmatprep.subr.bf16.mxu1 %v16398_v54  ;;  %v16414_v54 = vld [vmem:[%s17080_s29 + $0x19f0] ss:$24 sps:$4 sm:$0xff]  }
 0x561   : > { %9947 = vmatmul.mubr.bf16.gmra.mrb[56].mxu1 %v19222_v53  ;;  %10253 = vmatmul.mubr.bf16.gmra.mrb[8].mxu0 %v16607_v24  ;;  %v16419_v24 = vld [vmem:[%s17080_s29 + $0x1a24] ss:$24 sps:$4 sm:$0xff]  }
 0x562   : > { %9956 = vmatprep.mubr.bf16.mxu1 %v19225_v26  ;;  %10262 = vmatprep.mubr.bf16.mxu0 %v16608_v52  ;;  %v16613_v52 = vld [vmem:[%s17146_s22 + $0x7e8] ss:$144 sps:$4 sm:$0xff]  }
 0x563   : > { %10362 = vmatpush1.bf16.msra.mxu0 %v16396_v44  ;;  %13611 = vmatpush1.bf16.msra.mxu1 %v16396_v44  ;;  %v21431_v44 = vld [vmem:[#allocation32_spill] sm:$0xff] }
 0x564   : > { %v9469_v35 = vpop.f32.mrb[48].mxu0  ;;  %10363 = vmatprep.subr.bf16.mxu0 %v16401_v57  ;;  %13596 = vmatprep.subr.bf16.mxu1 %v16401_v57 }
 0x565   : > { %v19502_v37 = vadd.f32 %v9469_v35, %v17943_v0  ;;  %v9471_v53 = vpop.f32.mrb[49].mxu0  ;;  %v16407_v0 = vld [vmem:[%s17080_s29 + $0x1964] ss:$24 sps:$4 sm:$0xff]   ;;  %v16417_v35 = vld [vmem:[%s17080_s29 + $0x1a20] ss:$24 sps:$4 sm:$0xff]  }
 0x566   : > { %v19505_v59 = vadd.f32 %v9471_v53, %v17945_v60  ;;  %v9473_v26 = vpop.f32.mrb[50].mxu0  ;;  %v16609_v60 = vld [vmem:[%s17146_s22 + $0x5a8] ss:$144 sps:$4 sm:$0xff]   ;;  %v16422_v53 = vld [vmem:[%s17080_s29 + $0x1a54] ss:$24 sps:$4 sm:$0xff]  }
 0x567   : > { %v19508_v5 = vadd.f32 %v9473_v26, %v17949_v7  ;;  %v9475_v47 = vpop.f32.mrb[51].mxu0  ;;  %10364 = vmatpush1.bf16.msra.mxu0 %v16399_v36  ;;  %13612 = vmatpush1.bf16.msra.mxu1 %v16399_v36  ;;  %v16610_v7 = vld [vmem:[%s17146_s22 + $0x6cc] ss:$144 sps:$4 sm:$0xff]   ;;  %v21432_v26 = vld [vmem:[#allocation33_spill] sm:$0xff] }
 0x568   : > { %v19512_v28 = vadd.f32 %v9475_v47, %v21422_v41  ;;  %10365 = vmatprep.subr.bf16.mxu0 %v16404_v11  ;;  %13597 = vmatprep.subr.bf16.mxu1 %v16404_v11  ;;  %v16614_v36 = vld [vmem:[%s17146_s22 + $0x90c] ss:$144 sps:$4 sm:$0xff]  }
 0x569   : > { %21421 = vst [vmem:[#allocation116_spill] sm:$0xff] %v19508_v5  ;;  %9957 = vmatmul.mubr.bf16.gmra.mrb[60].mxu1 %v19240_v61  ;;  %10263 = vmatmul.mubr.bf16.gmra.mrb[12].mxu0 %v16609_v60  ;;  %v21435_v60 = vld [vmem:[#allocation35_spill] sm:$0xff] }
 0x56a   : > { %21423 = vst [vmem:[#allocation24_spill] sm:$0xff] %v19512_v28  ;;  %9966 = vmatprep.mubr.bf16.mxu1 %v19243_v32  ;;  %10272 = vmatprep.mubr.bf16.mxu0 %v16610_v7 }
 0x56b   : > { %10366 = vmatpush1.bf16.msra.mxu0 %v16402_v45  ;;  %13613 = vmatpush1.bf16.msra.mxu1 %v16402_v45  ;;  %v21433_v45 = vld [vmem:[#allocation34_spill] sm:$0xff] }
 0x56c   : > { %v9479_v50 = vpop.f32.mrb[52].mxu0  ;;  %10367 = vmatprep.subr.bf16.mxu0 %v16407_v0  ;;  %13598 = vmatprep.subr.bf16.mxu1 %v16407_v0 }
 0x56d   : > { %v19522_v48 = vadd.f32 %v9479_v50, %v21424_v23  ;;  %v9481_v61 = vpop.f32.mrb[53].mxu0  ;;  %v16420_v50 = vld [vmem:[%s17080_s29 + $0x1a50] ss:$24 sps:$4 sm:$0xff]  }
 0x56e   : > { %v19525_v22 = vadd.f32 %v9481_v61, %v21425_v34  ;;  %v9483_v32 = vpop.f32.mrb[54].mxu0  ;;  %v16425_v61 = vld [vmem:[%s17080_s29 + $0x1a84] ss:$24 sps:$4 sm:$0xff]   ;;  %v16615_v34 = vld [vmem:[%s17146_s22 + $0x908] ss:$144 sps:$4 sm:$0xff]  }
 0x56f   : > { %v19528_v2 = vadd.f32 %v9483_v32, %v21426_v15  ;;  %v9485_v31 = vpop.f32.mrb[55].mxu0  ;;  %10368 = vmatpush1.bf16.msra.mxu0 %v16405_v10  ;;  %13614 = vmatpush1.bf16.msra.mxu1 %v16405_v10  ;;  %v16616_v32 = vld [vmem:[%s17146_s22 + $0xa2c] ss:$144 sps:$4 sm:$0xff]   ;;  %v16423_v15 = vld [vmem:[%s17080_s29 + $0x1a80] ss:$24 sps:$4 sm:$0xff]  }
 0x570   : > { %v19532_v14 = vadd.f32 %v9485_v31, %v21427_v56  ;;  %10369 = vmatprep.subr.bf16.mxu0 %v16410_v55  ;;  %13599 = vmatprep.subr.bf16.mxu1 %v16410_v55  ;;  %v21437_v55 = vld [vmem:[#allocation36_spill] sm:$0xff]  ;;  %v21439_v56 = vld [vmem:[#allocation37_spill] sm:$0xff] }
 0x571   : > { %9967 = vmatmul.mubr.bf16.gmra.mrb[64].mxu1 %v19258_v27  ;;  %10273 = vmatmul.mubr.bf16.gmra.mrb[16].mxu0 %v16611_v33 }
 0x572   : > { %9976 = vmatprep.mubr.bf16.mxu1 %v19261_v49  ;;  %10282 = vmatprep.mubr.bf16.mxu0 %v16612_v21  ;;  %v21441_v21 = vld [vmem:[#allocation38_spill] sm:$0xff] }
 0x573   : > { %10370 = vmatpush1.bf16.msra.mxu0 %v16408_v43  ;;  %13615 = vmatpush1.bf16.msra.mxu1 %v16408_v43  ;;  %v16428_v43 = vld [vmem:[%s17080_s29 + $0x1ab4] ss:$24 sps:$4 sm:$0xff]  }
 0x574   : > { %v9489_v20 = vpop.f32.mrb[56].mxu0  ;;  %10371 = vmatprep.subr.bf16.mxu0 %v16413_v16  ;;  %13600 = vmatprep.subr.bf16.mxu1 %v16413_v16 }
 0x575   : > { %v19542_v38 = vadd.f32 %v9489_v20, %v21428_v46  ;;  %v9491_v27 = vpop.f32.mrb[57].mxu0 }
 0x576   : > { %v19545_v62 = vadd.f32 %v9491_v27, %v21429_v1  ;;  %v9493_v49 = vpop.f32.mrb[58].mxu0  ;;  %v16426_v1 = vld [vmem:[%s17080_s29 + $0x1ab0] ss:$24 sps:$4 sm:$0xff]  }
 0x577   : > { %v19548_v25 = vadd.f32 %v9493_v49, %v21430_v39  ;;  %v9495_v9 = vpop.f32.mrb[59].mxu0  ;;  %10372 = vmatpush1.bf16.msra.mxu0 %v16411_v18  ;;  %13616 = vmatpush1.bf16.msra.mxu1 %v16411_v18  ;;  %v21445_v49 = vld [vmem:[#allocation40_spill] sm:$0xff] }
 0x578   : > { %v19552_v57 = vadd.f32 %v9495_v9, %v21431_v44  ;;  %10373 = vmatprep.subr.bf16.mxu0 %v16416_v58  ;;  %13601 = vmatprep.subr.bf16.mxu1 %v16416_v58  ;;  %v21443_v58 = vld [vmem:[#allocation39_spill] sm:$0xff]  ;;  %v16618_v44 = vld [vmem:[%s17146_s22 + $0xb4c] ss:$144 sps:$4 sm:$0xff]  }
 0x579   : > { %9977 = vmatmul.mubr.bf16.gmra.mrb[68].mxu1 %v19276_v3  ;;  %10283 = vmatmul.mubr.bf16.gmra.mrb[20].mxu0 %v16613_v52  ;;  %v16431_v9 = vld [vmem:[%s17080_s29 + $0x1ae4] ss:$24 sps:$4 sm:$0xff]  }
 0x57a   : > { %9986 = vmatprep.mubr.bf16.mxu1 %v19279_v40  ;;  %10292 = vmatprep.mubr.bf16.mxu0 %v16614_v36  ;;  %v21447_v36 = vld [vmem:[#allocation41_spill] sm:$0xff] }
 0x57b   : > { %10374 = vmatpush1.bf16.msra.mxu0 %v16414_v54  ;;  %13617 = vmatpush1.bf16.msra.mxu1 %v16414_v54  ;;  %v16617_v54 = vld [vmem:[%s17146_s22 + $0xa28] ss:$144 sps:$4 sm:$0xff]  }
 0x57c   : > { %v9499_v11 = vpop.f32.mrb[60].mxu0  ;;  %10375 = vmatprep.subr.bf16.mxu0 %v16419_v24  ;;  %13602 = vmatprep.subr.bf16.mxu1 %v16419_v24  ;;  %v16429_v24 = vld [vmem:[%s17080_s29 + $0x1ae0] ss:$24 sps:$4 sm:$0xff]  }
 0x57d   : > { %v19562_v47 = vadd.f32 %v9499_v11, %v21432_v26  ;;  %v9501_v3 = vpop.f32.mrb[61].mxu0 }
 0x57e   : > { %v19565_v41 = vadd.f32 %v9501_v3, %v21433_v45  ;;  %v9503_v0 = vpop.f32.mrb[62].mxu0  ;;  %v21451_v45 = vld [vmem:[#allocation43_spill] sm:$0xff] }
 0x57f   : > { %v19568_v7 = vadd.f32 %v9503_v0, %v21435_v60  ;;  %v9505_v10 = vpop.f32.mrb[63].mxu0  ;;  %10376 = vmatpush1.bf16.msra.mxu0 %v16417_v35  ;;  %13618 = vmatpush1.bf16.msra.mxu1 %v16417_v35 }
 0x580   : > { %21434 = vst [vmem:[#allocation25_spill] sm:$0xff] %v19565_v41  ;;  %v19572_v23 = vadd.f32 %v9505_v10, %v21437_v55  ;;  %10377 = vmatprep.subr.bf16.mxu0 %v16422_v53  ;;  %13603 = vmatprep.subr.bf16.mxu1 %v16422_v53  ;;  %v21449_v53 = vld [vmem:[#allocation42_spill] sm:$0xff]  ;;  %v21453_v10 = vld [vmem:[#allocation44_spill] sm:$0xff]  ;;  %v16619_v55 = vld [vmem:[%s17146_s22 + $0xb48] ss:$144 sps:$4 sm:$0xff]  }
 0x581   : > { %21436 = vst [vmem:[#allocation26_spill] sm:$0xff] %v19568_v7  ;;  %9987 = vmatmul.mubr.bf16.gmra.mrb[72].mxu1 %v19294_v51  ;;  %10293 = vmatmul.mubr.bf16.gmra.mrb[24].mxu0 %v16615_v34  ;;  %v21563_v7 = vld [vmem:[#allocation69_spill] sm:$0xff] }
 0x582   : > { %21438 = vst [vmem:[#allocation27_spill] sm:$0xff] %v19572_v23  ;;  %9996 = vmatprep.mubr.bf16.mxu1 %v19297_v12  ;;  %10302 = vmatprep.mubr.bf16.mxu0 %v16616_v32  ;;  %v21455_v32 = vld [vmem:[#allocation45_spill] sm:$0xff] }
 0x583   : > { %10378 = vmatpush1.bf16.msra.mxu0 %v16420_v50  ;;  %13619 = vmatpush1.bf16.msra.mxu1 %v16420_v50 }
 0x584   : > { %v9509_v31 = vpop.f32.mrb[64].mxu0  ;;  %10379 = vmatprep.subr.bf16.mxu0 %v16425_v61  ;;  %13604 = vmatprep.subr.bf16.mxu1 %v16425_v61  ;;  %v16620_v61 = vld [vmem:[%s17146_s22 + $0xc6c] ss:$144 sps:$4 sm:$0xff]  }
 0x585   : > { %v19582_v16 = vadd.f32 %v9509_v31, %v21439_v56  ;;  %v9511_v33 = vpop.f32.mrb[65].mxu0 }
 0x586   : > { %v19585_v18 = vadd.f32 %v9511_v33, %v21441_v21  ;;  %v9513_v20 = vpop.f32.mrb[66].mxu0  ;;  %v21459_v21 = vld [vmem:[#allocation47_spill] sm:$0xff] }
 0x587   : > { %21440 = vst [vmem:[#allocation28_spill] sm:$0xff] %v19582_v16  ;;  %v19588_v46 = vadd.f32 %v9513_v20, %v21443_v58  ;;  %v9515_v27 = vpop.f32.mrb[67].mxu0  ;;  %10380 = vmatpush1.bf16.msra.mxu0 %v16423_v15  ;;  %13620 = vmatpush1.bf16.msra.mxu1 %v16423_v15 }
 0x588   : > { %21442 = vst [vmem:[#allocation29_spill] sm:$0xff] %v19585_v18  ;;  %v19592_v39 = vadd.f32 %v9515_v27, %v21445_v49  ;;  %10381 = vmatprep.subr.bf16.mxu0 %v16428_v43  ;;  %13605 = vmatprep.subr.bf16.mxu1 %v16428_v43  ;;  %v21457_v43 = vld [vmem:[#allocation46_spill] sm:$0xff]  ;;  %v21461_v27 = vld [vmem:[#allocation48_spill] sm:$0xff]  ;;  %v16621_v49 = vld [vmem:[%s17146_s22 + $0xc68] ss:$144 sps:$4 sm:$0xff]  }
 0x589   : > { %21444 = vst [vmem:[#allocation30_spill] sm:$0xff] %v19588_v46  ;;  %9997 = vmatmul.mubr.bf16.gmra.mrb[76].mxu1 %v19312_v4  ;;  %10303 = vmatmul.mubr.bf16.gmra.mrb[28].mxu0 %v16617_v54 }
 0x58a   : > { %21446 = vst [vmem:[#allocation31_spill] sm:$0xff] %v19592_v39  ;;  %10006 = vmatprep.mubr.bf16.mxu1 %v19315_v30  ;;  %10312 = vmatprep.mubr.bf16.mxu0 %v16618_v44  ;;  %v21463_v44 = vld [vmem:[#allocation49_spill] sm:$0xff] }
 0x58b   : > { %10382 = vmatpush1.bf16.msra.mxu0 %v16426_v1  ;;  %13621 = vmatpush1.bf16.msra.mxu1 %v16426_v1 }
 0x58c   : > { %v9519_v52 = vpop.f32.mrb[68].mxu0  ;;  %10383 = vmatprep.subr.bf16.mxu0 %v16431_v9  ;;  %13606 = vmatprep.subr.bf16.mxu1 %v16431_v9  ;;  %v16622_v9 = vld [vmem:[%s17146_s22 + $0xd8c] ss:$144 sps:$4 sm:$0xff]  }
 0x58d   : > { %v19601_v35 = vadd.f32 %v9519_v52, %v21447_v36  ;;  %v9521_v11 = vpop.f32.mrb[69].mxu0  ;;  %v21465_v36 = vld [vmem:[#allocation50_spill] sm:$0xff] }
 0x58e   : > { %v19604_v26 = vadd.f32 %v9521_v11, %v21449_v53  ;;  %v9523_v3 = vpop.f32.mrb[70].mxu0 }
 0x58f   : > { %21448 = vst [vmem:[#allocation32_spill] sm:$0xff] %v19601_v35  ;;  %v19607_v0 = vadd.f32 %v9523_v3, %v21451_v45  ;;  %v9525_v60 = vpop.f32.mrb[71].mxu0  ;;  %10384 = vmatpush1.bf16.msra.mxu0 %v16429_v24  ;;  %13622 = vmatpush1.bf16.msra.mxu1 %v16429_v24  ;;  %v21467_v3 = vld [vmem:[#allocation51_spill] sm:$0xff] }
 0x590   : > { %21450 = vst [vmem:[#allocation33_spill] sm:$0xff] %v19604_v26  ;;  %v19610_v50 = vadd.f32 %v9525_v60, %v21453_v10  ;;  %v21469_v10 = vld [vmem:[#allocation52_spill] sm:$0xff] }
 0x591   : > { %21452 = vst [vmem:[#allocation34_spill] sm:$0xff] %v19607_v0  ;;  %10007 = vmatmul.mubr.bf16.gmra.mrb[80].mxu1 %v19330_v63  ;;  %10313 = vmatmul.mubr.bf16.gmra.mrb[32].mxu0 %v16619_v55 }
 0x592   : > { %21454 = vst [vmem:[#allocation35_spill] sm:$0xff] %v19610_v50  ;;  %10016 = vmatprep.mubr.bf16.mxu1 %v19333_v19  ;;  %10322 = vmatprep.mubr.bf16.mxu0 %v16620_v61  ;;  %v16623_v61 = vld [vmem:[%s17146_s22 + $0xd88] ss:$144 sps:$4 sm:$0xff]  }
 0x594   : > { %v9529_v34 = vpop.f32.mrb[72].mxu0 }
 0x595   : > { %v19617_v15 = vadd.f32 %v9529_v34, %v21455_v32  ;;  %v9531_v31 = vpop.f32.mrb[73].mxu0  ;;  %v16624_v34 = vld [vmem:[%s17146_s22 + $0xeac] ss:$144 sps:$4 sm:$0xff]  }
 0x596   : > { %v19620_v56 = vadd.f32 %v9531_v31, %v21457_v43  ;;  %v9533_v33 = vpop.f32.mrb[74].mxu0  ;;  %v21471_v31 = vld [vmem:[#allocation53_spill] sm:$0xff] }
 0x597   : > { %21456 = vst [vmem:[#allocation36_spill] sm:$0xff] %v19617_v15  ;;  %v19623_v20 = vadd.f32 %v9533_v33, %v21459_v21  ;;  %v9535_v58 = vpop.f32.mrb[75].mxu0  ;;  %v21473_v21 = vld [vmem:[#allocation54_spill] sm:$0xff] }
 0x598   : > { %21458 = vst [vmem:[#allocation37_spill] sm:$0xff] %v19620_v56  ;;  %v19626_v1 = vadd.f32 %v9535_v58, %v21461_v27 }
 0x599   : > { %21460 = vst [vmem:[#allocation38_spill] sm:$0xff] %v19623_v20  ;;  %10017 = vmatmul.mubr.bf16.gmra.mrb[84].mxu1 %v19340_v17  ;;  %10323 = vmatmul.mubr.bf16.gmra.mrb[36].mxu0 %v16621_v49  ;;  %v21475_v49 = vld [vmem:[#allocation55_spill] sm:$0xff] }
 0x59a   : > { %21462 = vst [vmem:[#allocation39_spill] sm:$0xff] %v19626_v1  ;;  %10026 = vmatprep.mubr.bf16.mxu1 %v19343_v29  ;;  %10332 = vmatprep.mubr.bf16.mxu0 %v16622_v9 }
 0x59c   : > { %v9539_v54 = vpop.f32.mrb[76].mxu0 }
 0x59d   : > { %v19633_v24 = vadd.f32 %v9539_v54, %v21463_v44  ;;  %v9541_v52 = vpop.f32.mrb[77].mxu0  ;;  %v21477_v44 = vld [vmem:[#allocation56_spill] sm:$0xff] }
 0x59e   : > { %v19636_v11 = vadd.f32 %v9541_v52, %v21465_v36  ;;  %v9543_v53 = vpop.f32.mrb[78].mxu0  ;;  %v16625_v36 = vld [vmem:[%s17146_s22 + $0xea8] ss:$144 sps:$4 sm:$0xff]  }
 0x59f   : > { %21464 = vst [vmem:[#allocation40_spill] sm:$0xff] %v19633_v24  ;;  %v19639_v45 = vadd.f32 %v9543_v53, %v21467_v3  ;;  %v9545_v60 = vpop.f32.mrb[79].mxu0  ;;  %v16626_v53 = vld [vmem:[%s17146_s22 + $0x254] ss:$144 sps:$4 sm:$0xff]  }
 0x5a0   : > { %21466 = vst [vmem:[#allocation41_spill] sm:$0xff] %v19636_v11  ;;  %v19642_v55 = vadd.f32 %v9545_v60, %v21469_v10  ;;  %v21479_v60 = vld [vmem:[#allocation57_spill] sm:$0xff]  ;;  %v21521_v24 = vld [vmem:[#allocation95_spill] sm:$0xff] }
 0x5a1   : > { %21468 = vst [vmem:[#allocation42_spill] sm:$0xff] %v19639_v45  ;;  %10027 = vmatmul.mubr.bf16.gmra.mrb[88].mxu1 %v19350_v13  ;;  %10333 = vmatmul.mubr.bf16.gmra.mrb[40].mxu0 %v16623_v61 }
 0x5a2   : > { %21470 = vst [vmem:[#allocation43_spill] sm:$0xff] %v19642_v55  ;;  %10036 = vmatprep.mubr.bf16.mxu1 %v19353_v6  ;;  %10342 = vmatprep.mubr.bf16.mxu0 %v16624_v34  ;;  %v21481_v34 = vld [vmem:[#allocation58_spill] sm:$0xff] }
 0x5a4   : > { %v9549_v32 = vpop.f32.mrb[80].mxu0 }
 0x5a5   : > { %v19649_v43 = vadd.f32 %v9549_v32, %v21471_v31  ;;  %v9551_v33 = vpop.f32.mrb[81].mxu0 }
 0x5a6   : > { %v19652_v58 = vadd.f32 %v9551_v33, %v21473_v21  ;;  %v9553_v27 = vpop.f32.mrb[82].mxu0  ;;  %v21483_v33 = vld [vmem:[#allocation59_spill] sm:$0xff] }
 0x5a7   : > { %21472 = vst [vmem:[#allocation44_spill] sm:$0xff] %v19649_v43  ;;  %v19655_v9 = vadd.f32 %v9553_v27, %v21475_v49  ;;  %v9555_v54 = vpop.f32.mrb[83].mxu0  ;;  %v21485_v49 = vld [vmem:[#allocation60_spill] sm:$0xff]  ;;  %v21519_v43 = vld [vmem:[#allocation94_spill] sm:$0xff] }
 0x5a8   : > { %21474 = vst [vmem:[#allocation45_spill] sm:$0xff] %v19652_v58  ;;  %v19658_v52 = vadd.f32 %v9555_v54, %v21477_v44  ;;  %v16627_v44 = vld [vmem:[%s17146_s22 + $0x250] ss:$144 sps:$4 sm:$0xff]  }
 0x5a9   : > { %21476 = vst [vmem:[#allocation46_spill] sm:$0xff] %v19655_v9  ;;  %10037 = vmatmul.mubr.bf16.gmra.mrb[92].mxu1 %v19360_v8  ;;  %10343 = vmatmul.mubr.bf16.gmra.mrb[44].mxu0 %v16625_v36 }
 0x5aa   : > { %21478 = vst [vmem:[#allocation47_spill] sm:$0xff] %v19658_v52  ;;  %10385 = vmatprep.mubr.bf16.mxu0 %v16626_v53  ;;  %10445 = vmatprep.mubr.bf16.mxu1 %v19279_v40  ;;  %v16628_v40 = vld [vmem:[%s17146_s22 + $0x374] ss:$144 sps:$4 sm:$0xff]  }
 0x5ab   : > { %v21487_v53 = vld [vmem:[#allocation61_spill] sm:$0xff] }
 0x5ac   : > { %v9559_v3 = vpop.f32.mrb[84].mxu0 }
 0x5ad   : > { %v19665_v10 = vadd.f32 %v9559_v3, %v21479_v60  ;;  %v9561_v61 = vpop.f32.mrb[85].mxu0 }
 0x5ae   : > { %v19668_v32 = vadd.f32 %v9561_v61, %v21481_v34  ;;  %v9563_v31 = vpop.f32.mrb[86].mxu0  ;;  %v21489_v61 = vld [vmem:[#allocation62_spill] sm:$0xff] }
 0x5af   : > { %21480 = vst [vmem:[#allocation48_spill] sm:$0xff] %v19665_v10  ;;  %v19671_v21 = vadd.f32 %v9563_v31, %v21483_v33  ;;  %v9565_v27 = vpop.f32.mrb[87].mxu0  ;;  %v21491_v33 = vld [vmem:[#allocation63_spill] sm:$0xff]  ;;  %v21517_v10 = vld [vmem:[#allocation93_spill] sm:$0xff] }
 0x5b0   : > { %21482 = vst [vmem:[#allocation49_spill] sm:$0xff] %v19668_v32  ;;  %v19674_v54 = vadd.f32 %v9565_v27, %v21485_v49 }
 0x5b1   : > { %21484 = vst [vmem:[#allocation50_spill] sm:$0xff] %v19671_v21  ;;  %10386 = vmatmul.mubr.bf16.vlgmr.msra.gmra.mrb[0].mxu0 %v16627_v44  ;;  %10446 = vmatmul.mubr.bf16.vlgmr.msra.gmra.mrb[144].mxu1 %v19294_v51  ;;  %v21493_v44 = vld [vmem:[#allocation64_spill] sm:$0xff] }
 0x5b2   : > { %21486 = vst [vmem:[#allocation51_spill] sm:$0xff] %v19674_v54  ;;  %10395 = vmatprep.mubr.bf16.mxu0 %v16628_v40  ;;  %10455 = vmatprep.mubr.bf16.mxu1 %v19297_v12  ;;  %v16629_v40 = vld [vmem:[%s17146_s22 + $0x370] ss:$144 sps:$4 sm:$0xff]   ;;  %v16630_v12 = vld [vmem:[%s17146_s22 + $0x494] ss:$144 sps:$4 sm:$0xff]  }
 0x5b4   : > { %v9569_v36 = vpop.f32.mrb[88].mxu0 }
 0x5b5   : > { %v19681_v3 = vadd.f32 %v9569_v36, %v21487_v53  ;;  %v9571_v60 = vpop.f32.mrb[89].mxu0  ;;  %v21495_v53 = vld [vmem:[#allocation65_spill] sm:$0xff] }
 0x5b6   : > { %v19684_v34 = vadd.f32 %v9571_v60, %v21489_v61  ;;  %v9573_v31 = vpop.f32.mrb[90].mxu0 }
 0x5b7   : > { %21488 = vst [vmem:[#allocation52_spill] sm:$0xff] %v19681_v3  ;;  %v19687_v27 = vadd.f32 %v9573_v31, %v21491_v33  ;;  %v9575_v49 = vpop.f32.mrb[91].mxu0  ;;  %v21497_v31 = vld [vmem:[#allocation66_spill] sm:$0xff] }
 0x5b8   : > { %21490 = vst [vmem:[#allocation53_spill] sm:$0xff] %v19684_v34  ;;  %v19690_v51 = vadd.f32 %v9575_v49, %v21493_v44  ;;  %v21499_v44 = vld [vmem:[#allocation67_spill] sm:$0xff] }
 0x5b9   : > { %21492 = vst [vmem:[#allocation54_spill] sm:$0xff] %v19687_v27  ;;  %10396 = vmatmul.mubr.bf16.gmra.mrb[4].mxu0 %v16629_v40  ;;  %10456 = vmatmul.mubr.bf16.gmra.mrb[148].mxu1 %v19312_v4 }
 0x5ba   : > { %21494 = vst [vmem:[#allocation55_spill] sm:$0xff] %v19690_v51  ;;  %10405 = vmatprep.mubr.bf16.mxu0 %v16630_v12  ;;  %10465 = vmatprep.mubr.bf16.mxu1 %v19315_v30  ;;  %v21501_v51 = vld [vmem:[#allocation68_spill] sm:$0xff] }
 0x5bb   : > { %v16631_v30 = vld [vmem:[%s17146_s22 + $0x490] ss:$144 sps:$4 sm:$0xff]  }
 0x5bc   : > { %v9579_v36 = vpop.f32.mrb[92].mxu0 }
 0x5bd   : > { %v19697_v60 = vadd.f32 %v9579_v36, %v21495_v53  ;;  %v9581_v61 = vpop.f32.mrb[93].mxu0  ;;  %v16632_v36 = vld [vmem:[%s17146_s22 + $0x5b4] ss:$144 sps:$4 sm:$0xff]   ;;  %v16633_v53 = vld [vmem:[%s17146_s22 + $0x5b0] ss:$144 sps:$4 sm:$0xff]  }
 0x5be   : > { %v19700_v33 = vadd.f32 %v9581_v61, %v21497_v31  ;;  %v9583_v49 = vpop.f32.mrb[94].mxu0  ;;  %v16634_v61 = vld [vmem:[%s17146_s22 + $0x6d4] ss:$144 sps:$4 sm:$0xff]  }
 0x5bf   : > { %21496 = vst [vmem:[#allocation56_spill] sm:$0xff] %v19697_v60  ;;  %v19703_v40 = vadd.f32 %v9583_v49, %v21499_v44  ;;  %v9585_v4 = vpop.f32.mrb[95].mxu0  ;;  %v16636_v31 = vld [vmem:[%s17146_s22 + $0x7f4] ss:$144 sps:$4 sm:$0xff]  }
 0x5c0   : > { %21498 = vst [vmem:[#allocation57_spill] sm:$0xff] %v19700_v33  ;;  %v19706_v12 = vadd.f32 %v9585_v4, %v21501_v51  ;;  %v16635_v51 = vld [vmem:[%s17146_s22 + $0x6d0] ss:$144 sps:$4 sm:$0xff]  }
 0x5c1   : > { %21500 = vst [vmem:[#allocation58_spill] sm:$0xff] %v19703_v40  ;;  %10406 = vmatmul.mubr.bf16.gmra.mrb[8].mxu0 %v16631_v30  ;;  %10466 = vmatmul.mubr.bf16.gmra.mrb[152].mxu1 %v19330_v63  ;;  %v16637_v63 = vld [vmem:[%s17146_s22 + $0x7f0] ss:$144 sps:$4 sm:$0xff]  }
 0x5c2   : > { %21502 = vst [vmem:[#allocation59_spill] sm:$0xff] %v19706_v12  ;;  %10415 = vmatprep.mubr.bf16.mxu0 %v16632_v36  ;;  %10475 = vmatprep.mubr.bf16.mxu1 %v19333_v19 }
 0x5c9   : > { %10416 = vmatmul.mubr.bf16.gmra.mrb[12].mxu0 %v16633_v53  ;;  %10476 = vmatmul.mubr.bf16.gmra.mrb[156].mxu1 %v19340_v17 }
 0x5ca   : > { %10425 = vmatprep.mubr.bf16.mxu0 %v16634_v61  ;;  %10485 = vmatprep.mubr.bf16.mxu1 %v19343_v29 }
 0x5d1   : > { %10426 = vmatmul.mubr.bf16.gmra.mrb[16].mxu0 %v16635_v51  ;;  %10486 = vmatmul.mubr.bf16.gmra.mrb[160].mxu1 %v19350_v13 }
 0x5d2   : > { %10435 = vmatprep.mubr.bf16.mxu0 %v16636_v31  ;;  %10495 = vmatprep.mubr.bf16.mxu1 %v19353_v6 }
 0x5d9   : > { %10436 = vmatmul.mubr.bf16.gmra.mrb[20].mxu0 %v16637_v63  ;;  %10496 = vmatmul.mubr.bf16.gmra.mrb[164].mxu1 %v19360_v8 }
 0x624   : > { %v19722_v19 = vpop.f32.mrb[48].mxu1 }
 0x625   : > { %v19724_v49 = vpop.f32.mrb[49].mxu1 }
 0x626   : > { %v19726_v17 = vpop.f32.mrb[50].mxu1 }
 0x627   : > { %v19728_v44 = vpop.f32.mrb[51].mxu1 }
 0x62c   : > { %v19730_v29 = vpop.f32.mrb[52].mxu1 }
 0x62d   : > { %v19732_v4 = vpop.f32.mrb[53].mxu1 }
 0x62e   : > { %v19734_v13 = vpop.f32.mrb[54].mxu1 }
 0x62f   : > { %v19736_v30 = vpop.f32.mrb[55].mxu1 }
 0x634   : > { %v19738_v6 = vpop.f32.mrb[56].mxu1 }
 0x635   : > { %v19740_v36 = vpop.f32.mrb[57].mxu1 }
 0x636   : > { %v19742_v8 = vpop.f32.mrb[58].mxu1 }
 0x637   : > { %v19744_v53 = vpop.f32.mrb[59].mxu1 }
 0x638   : > { %21503 = vst [vmem:[#allocation60_spill] sm:$0xff] %v19744_v53 }
 0x63c   : > { %v19746_v61 = vpop.f32.mrb[60].mxu1 }
 0x63d   : > { %21504 = vst [vmem:[#allocation61_spill] sm:$0xff] %v19746_v61  ;;  %v19748_v51 = vpop.f32.mrb[61].mxu1 }
 0x63e   : > { %21505 = vst [vmem:[#allocation62_spill] sm:$0xff] %v19748_v51  ;;  %v19750_v31 = vpop.f32.mrb[62].mxu1  ;;  %v21565_v51 = vld [vmem:[#allocation70_spill] sm:$0xff] }
 0x63f   : > { %21506 = vst [vmem:[#allocation63_spill] sm:$0xff] %v19750_v31  ;;  %v19752_v63 = vpop.f32.mrb[63].mxu1 }
 0x640   : > { %21507 = vst [vmem:[#allocation64_spill] sm:$0xff] %v19752_v63 }
 0x644   : > { %v19754_v12 = vpop.f32.mrb[64].mxu1 }
 0x645   : > { %21508 = vst [vmem:[#allocation65_spill] sm:$0xff] %v19754_v12  ;;  %v19756_v40 = vpop.f32.mrb[65].mxu1 }
 0x646   : > { %21509 = vst [vmem:[#allocation66_spill] sm:$0xff] %v19756_v40  ;;  %v19758_v33 = vpop.f32.mrb[66].mxu1 }
 0x647   : > { %21510 = vst [vmem:[#allocation67_spill] sm:$0xff] %v19758_v33  ;;  %v19760_v60 = vpop.f32.mrb[67].mxu1 }
 0x648   : > { %21511 = vst [vmem:[#allocation68_spill] sm:$0xff] %v19760_v60 }
 0x64c   : > { %v19762_v27 = vpop.f32.mrb[68].mxu1 }
 0x64d   : > { %21512 = vst [vmem:[#allocation117_spill] sm:$0xff] %v19762_v27  ;;  %v19764_v34 = vpop.f32.mrb[69].mxu1 }
 0x64e   : > { %21513 = vst [vmem:[#allocation118_spill] sm:$0xff] %v19764_v34  ;;  %v19766_v3 = vpop.f32.mrb[70].mxu1 }
 0x64f   : > { %21514 = vst [vmem:[#allocation119_spill] sm:$0xff] %v19766_v3  ;;  %v19768_v54 = vpop.f32.mrb[71].mxu1 }
 0x650   : > { %21515 = vst [vmem:[#allocation120_spill] sm:$0xff] %v19768_v54 }
 0x654   : > { %v19770_v21 = vpop.f32.mrb[72].mxu1  ;;  %v10294_v32 = vpop.f32.mrb[24].mxu0 }
 0x655   : > { %21516 = vst [vmem:[#allocation121_spill] sm:$0xff] %v19770_v21  ;;  %v19773_v52 = vadd.f32 %v10294_v32, %v21517_v10  ;;  %v19775_v9 = vpop.f32.mrb[73].mxu1  ;;  %v10296_v58 = vpop.f32.mrb[25].mxu0  ;;  %v21523_v21 = vld [vmem:[#allocation96_spill] sm:$0xff] }
 0x656   : > { %21518 = vst [vmem:[#allocation93_spill] sm:$0xff] %v19775_v9  ;;  %v19778_v55 = vadd.f32 %v10296_v58, %v21519_v43  ;;  %v19780_v45 = vpop.f32.mrb[74].mxu1  ;;  %v10298_v11 = vpop.f32.mrb[26].mxu0  ;;  %v21525_v9 = vld [vmem:[#allocation97_spill] sm:$0xff] }
 0x657   : > { %21520 = vst [vmem:[#allocation94_spill] sm:$0xff] %v19780_v45  ;;  %v19783_v1 = vadd.f32 %v10298_v11, %v21521_v24  ;;  %v19785_v20 = vpop.f32.mrb[75].mxu1  ;;  %v10300_v56 = vpop.f32.mrb[27].mxu0  ;;  %v21527_v45 = vld [vmem:[#allocation98_spill] sm:$0xff] }
 0x658   : > { %21522 = vst [vmem:[#allocation95_spill] sm:$0xff] %v19785_v20  ;;  %v19788_v15 = vadd.f32 %v10300_v56, %v21523_v21  ;;  %v21529_v20 = vld [vmem:[#allocation99_spill] sm:$0xff] }
 0x65c   : > { %v19790_v10 = vpop.f32.mrb[76].mxu1  ;;  %v10304_v32 = vpop.f32.mrb[28].mxu0 }
 0x65d   : > { %21524 = vst [vmem:[#allocation96_spill] sm:$0xff] %v19790_v10  ;;  %v19793_v54 = vadd.f32 %v10304_v32, %v21525_v9  ;;  %v19795_v43 = vpop.f32.mrb[77].mxu1  ;;  %v10306_v58 = vpop.f32.mrb[29].mxu0  ;;  %v21531_v10 = vld [vmem:[#allocation100_spill] sm:$0xff] }
 0x65e   : > { %21526 = vst [vmem:[#allocation97_spill] sm:$0xff] %v19795_v43  ;;  %v19798_v3 = vadd.f32 %v10306_v58, %v21527_v45  ;;  %v19800_v24 = vpop.f32.mrb[78].mxu1  ;;  %v10308_v11 = vpop.f32.mrb[30].mxu0  ;;  %v21533_v43 = vld [vmem:[#allocation101_spill] sm:$0xff] }
 0x65f   : > { %21528 = vst [vmem:[#allocation98_spill] sm:$0xff] %v19800_v24  ;;  %v19803_v50 = vadd.f32 %v10308_v11, %v21529_v20  ;;  %v19805_v56 = vpop.f32.mrb[79].mxu1  ;;  %v10310_v21 = vpop.f32.mrb[31].mxu0  ;;  %v21535_v24 = vld [vmem:[#allocation102_spill] sm:$0xff] }
 0x660   : > { %21530 = vst [vmem:[#allocation99_spill] sm:$0xff] %v19805_v56  ;;  %v19808_v0 = vadd.f32 %v10310_v21, %v21531_v10  ;;  %v21537_v56 = vld [vmem:[#allocation103_spill] sm:$0xff] }
 0x664   : > { %v19810_v9 = vpop.f32.mrb[80].mxu1  ;;  %v10314_v32 = vpop.f32.mrb[32].mxu0 }
 0x665   : > { %21532 = vst [vmem:[#allocation100_spill] sm:$0xff] %v19810_v9  ;;  %v19813_v34 = vadd.f32 %v10314_v32, %v21533_v43  ;;  %v19815_v45 = vpop.f32.mrb[81].mxu1  ;;  %v10316_v58 = vpop.f32.mrb[33].mxu0  ;;  %v21539_v9 = vld [vmem:[#allocation104_spill] sm:$0xff] }
 0x666   : > { %21534 = vst [vmem:[#allocation101_spill] sm:$0xff] %v19815_v45  ;;  %v19818_v27 = vadd.f32 %v10316_v58, %v21535_v24  ;;  %v19820_v20 = vpop.f32.mrb[82].mxu1  ;;  %v10318_v11 = vpop.f32.mrb[34].mxu0  ;;  %v21541_v45 = vld [vmem:[#allocation105_spill] sm:$0xff] }
 0x667   : > { %21536 = vst [vmem:[#allocation102_spill] sm:$0xff] %v19820_v20  ;;  %v19823_v26 = vadd.f32 %v10318_v11, %v21537_v56  ;;  %v19825_v10 = vpop.f32.mrb[83].mxu1  ;;  %v10320_v21 = vpop.f32.mrb[35].mxu0  ;;  %v21543_v20 = vld [vmem:[#allocation106_spill] sm:$0xff] }
 0x668   : > { %21538 = vst [vmem:[#allocation103_spill] sm:$0xff] %v19825_v10  ;;  %v19828_v35 = vadd.f32 %v10320_v21, %v21539_v9  ;;  %v21545_v10 = vld [vmem:[#allocation107_spill] sm:$0xff] }
 0x66c   : > { %v19830_v43 = vpop.f32.mrb[84].mxu1  ;;  %v10324_v32 = vpop.f32.mrb[36].mxu0 }
 0x66d   : > { %21540 = vst [vmem:[#allocation104_spill] sm:$0xff] %v19830_v43  ;;  %v19833_v60 = vadd.f32 %v10324_v32, %v21541_v45  ;;  %v19835_v24 = vpop.f32.mrb[85].mxu1  ;;  %v10326_v58 = vpop.f32.mrb[37].mxu0  ;;  %v21547_v43 = vld [vmem:[#allocation108_spill] sm:$0xff] }
 0x66e   : > { %21542 = vst [vmem:[#allocation105_spill] sm:$0xff] %v19835_v24  ;;  %v19838_v33 = vadd.f32 %v10326_v58, %v21543_v20  ;;  %v19840_v56 = vpop.f32.mrb[86].mxu1  ;;  %v10328_v11 = vpop.f32.mrb[38].mxu0  ;;  %v21549_v24 = vld [vmem:[#allocation109_spill] sm:$0xff] }
 0x66f   : > { %21544 = vst [vmem:[#allocation106_spill] sm:$0xff] %v19840_v56  ;;  %v19843_v39 = vadd.f32 %v10328_v11, %v21545_v10  ;;  %v19845_v9 = vpop.f32.mrb[87].mxu1  ;;  %v10330_v21 = vpop.f32.mrb[39].mxu0  ;;  %v21551_v56 = vld [vmem:[#allocation110_spill] sm:$0xff] }
 0x670   : > { %21546 = vst [vmem:[#allocation107_spill] sm:$0xff] %v19845_v9  ;;  %v19848_v46 = vadd.f32 %v10330_v21, %v21547_v43  ;;  %v21553_v9 = vld [vmem:[#allocation111_spill] sm:$0xff] }
 0x674   : > { %v19850_v45 = vpop.f32.mrb[88].mxu1  ;;  %v10334_v32 = vpop.f32.mrb[40].mxu0 }
 0x675   : > { %21548 = vst [vmem:[#allocation108_spill] sm:$0xff] %v19850_v45  ;;  %v19853_v40 = vadd.f32 %v10334_v32, %v21549_v24  ;;  %v19855_v20 = vpop.f32.mrb[89].mxu1  ;;  %v10336_v58 = vpop.f32.mrb[41].mxu0  ;;  %v21555_v45 = vld [vmem:[#allocation112_spill] sm:$0xff] }
 0x676   : > { %21550 = vst [vmem:[#allocation109_spill] sm:$0xff] %v19855_v20  ;;  %v19858_v12 = vadd.f32 %v10336_v58, %v21551_v56  ;;  %v19860_v10 = vpop.f32.mrb[90].mxu1  ;;  %v10338_v11 = vpop.f32.mrb[42].mxu0 }
 0x677   : > { %21552 = vst [vmem:[#allocation110_spill] sm:$0xff] %v19860_v10  ;;  %v19863_v18 = vadd.f32 %v10338_v11, %v21553_v9  ;;  %v19865_v43 = vpop.f32.mrb[91].mxu1  ;;  %v10340_v21 = vpop.f32.mrb[43].mxu0  ;;  %v21558_v10 = vld [vmem:[#allocation113_spill] sm:$0xff] }
 0x678   : > { %21554 = vst [vmem:[#allocation111_spill] sm:$0xff] %v19865_v43  ;;  %v19868_v16 = vadd.f32 %v10340_v21, %v21555_v45  ;;  %v21560_v43 = vld [vmem:[#allocation114_spill] sm:$0xff] }
 0x67c   : > { %v19870_v24 = vpop.f32.mrb[92].mxu1  ;;  %v10344_v32 = vpop.f32.mrb[44].mxu0 }
 0x67d   : > { %21556 = vst [vmem:[#allocation112_spill] sm:$0xff] %v19870_v24  ;;  %v19873_v20 = vadd.f32 %v10344_v32, %v19029_v42  ;;  %v19875_v56 = vpop.f32.mrb[93].mxu1  ;;  %v10346_v58 = vpop.f32.mrb[45].mxu0  ;;  %v21562_v24 = vld [vmem:[#allocation115_spill] sm:$0xff] }
 0x67e   : > { %21557 = vst [vmem:[#allocation122_spill] sm:$0xff] %v19875_v56  ;;  %v19878_v63 = vadd.f32 %v10346_v58, %v21558_v10  ;;  %v19880_v9 = vpop.f32.mrb[94].mxu1  ;;  %v10348_v11 = vpop.f32.mrb[46].mxu0 }
 0x67f   : > { %21559 = vst [vmem:[#allocation113_spill] sm:$0xff] %v19880_v9  ;;  %v19883_v31 = vadd.f32 %v10348_v11, %v21560_v43  ;;  %v19885_v45 = vpop.f32.mrb[95].mxu1  ;;  %v10350_v21 = vpop.f32.mrb[47].mxu0 }
 0x680   : > { %21561 = vst [vmem:[#allocation114_spill] sm:$0xff] %v19885_v45  ;;  %v19888_v23 = vadd.f32 %v10350_v21, %v21562_v24  ;;  %v21568_v24 = vld [vmem:[#allocation71_spill] sm:$0xff] }
 0x684   : > { %v10387_v42 = vpop.f32.mrb[0].mxu0  ;;  %v10447_v32 = vpop.f32.mrb[144].mxu1 }
 0x685   : > { %v19891_v56 = vadd.f32 %v10387_v42, %v21563_v7  ;;  %v19894_v10 = vadd.f32 %v19773_v52, %v10447_v32  ;;  %v10389_v58 = vpop.f32.mrb[1].mxu0  ;;  %v10449_v9 = vpop.f32.mrb[145].mxu1  ;;  %v21570_v52 = vld [vmem:[#allocation72_spill] sm:$0xff] }
 0x686   : > { %v19897_v61 = vadd.f32 %v10389_v58, %v21565_v51  ;;  %v19900_v43 = vadd.f32 %v19778_v55, %v10449_v9  ;;  %v10391_v11 = vpop.f32.mrb[2].mxu0  ;;  %v10451_v45 = vpop.f32.mrb[146].mxu1  ;;  %v21572_v55 = vld [vmem:[#allocation73_spill] sm:$0xff] }
 0x687   : > { %21564 = vst [vmem:[#allocation115_spill] sm:$0xff] %v19894_v10  ;;  %v19903_v21 = vadd.f32 %v10391_v11, %v21568_v24  ;;  %v19906_v41 = vadd.f32 %v19783_v1, %v10451_v45  ;;  %v10393_v7 = vpop.f32.mrb[3].mxu0  ;;  %v10453_v42 = vpop.f32.mrb[147].mxu1  ;;  %v21574_v1 = vld [vmem:[#allocation74_spill] sm:$0xff] }
 0x688   : > { %21566 = vst [vmem:[#allocation69_spill] sm:$0xff] %v19897_v61  ;;  %21567 = vst [vmem:[#allocation70_spill] sm:$0xff] %v19900_v43  ;;  %v19909_v32 = vadd.f32 %v10393_v7, %v21570_v52  ;;  %v19912_v10 = vadd.f32 %v19788_v15, %v10453_v42  ;;  %v21576_v15 = vld [vmem:[#allocation75_spill] sm:$0xff] }
 0x689   : > { %21569 = vst [vmem:[#allocation71_spill] sm:$0xff] %v19906_v41 }
 0x68a   : > { %21571 = vst [vmem:[#allocation72_spill] sm:$0xff] %v19912_v10 }
 0x68c   : > { %v10397_v51 = vpop.f32.mrb[4].mxu0  ;;  %v10457_v58 = vpop.f32.mrb[148].mxu1 }
 0x68d   : > { %v19915_v9 = vadd.f32 %v10397_v51, %v21572_v55  ;;  %v19918_v43 = vadd.f32 %v19793_v54, %v10457_v58  ;;  %v10399_v11 = vpop.f32.mrb[5].mxu0  ;;  %v10459_v24 = vpop.f32.mrb[149].mxu1  ;;  %v21578_v54 = vld [vmem:[#allocation76_spill] sm:$0xff] }
 0x68e   : > { %v19921_v45 = vadd.f32 %v10399_v11, %v21574_v1  ;;  %v19924_v41 = vadd.f32 %v19798_v3, %v10459_v24  ;;  %v10401_v7 = vpop.f32.mrb[6].mxu0  ;;  %v10461_v52 = vpop.f32.mrb[150].mxu1  ;;  %v21580_v3 = vld [vmem:[#allocation77_spill] sm:$0xff] }
 0x68f   : > { %21573 = vst [vmem:[#allocation73_spill] sm:$0xff] %v19918_v43  ;;  %v19927_v42 = vadd.f32 %v10401_v7, %v21576_v15  ;;  %v19930_v10 = vadd.f32 %v19803_v50, %v10461_v52  ;;  %v10403_v51 = vpop.f32.mrb[7].mxu0  ;;  %v10463_v55 = vpop.f32.mrb[151].mxu1  ;;  %v21582_v50 = vld [vmem:[#allocation78_spill] sm:$0xff] }
 0x690   : > { %21575 = vst [vmem:[#allocation74_spill] sm:$0xff] %v19924_v41  ;;  %v19933_v58 = vadd.f32 %v10403_v51, %v21578_v54  ;;  %v19936_v43 = vadd.f32 %v19808_v0, %v10463_v55  ;;  %v21584_v0 = vld [vmem:[#allocation79_spill] sm:$0xff] }
 0x691   : > { %21577 = vst [vmem:[#allocation75_spill] sm:$0xff] %v19930_v10 }
 0x692   : > { %21579 = vst [vmem:[#allocation76_spill] sm:$0xff] %v19936_v43 }
 0x694   : > { %v10407_v11 = vpop.f32.mrb[8].mxu0  ;;  %v10467_v1 = vpop.f32.mrb[152].mxu1 }
 0x695   : > { %v19939_v24 = vadd.f32 %v10407_v11, %v21580_v3  ;;  %v19942_v41 = vadd.f32 %v19813_v34, %v10467_v1  ;;  %v10409_v7 = vpop.f32.mrb[9].mxu0  ;;  %v10469_v15 = vpop.f32.mrb[153].mxu1  ;;  %v21587_v34 = vld [vmem:[#allocation80_spill] sm:$0xff] }
 0x696   : > { %v19945_v52 = vadd.f32 %v10409_v7, %v21582_v50  ;;  %v19948_v10 = vadd.f32 %v19818_v27, %v10469_v15  ;;  %v10411_v51 = vpop.f32.mrb[10].mxu0  ;;  %v10471_v54 = vpop.f32.mrb[154].mxu1  ;;  %v21590_v27 = vld [vmem:[#allocation81_spill] sm:$0xff] }
 0x697   : > { %21581 = vst [vmem:[#allocation77_spill] sm:$0xff] %v19942_v41  ;;  %v19951_v55 = vadd.f32 %v10411_v51, %v21584_v0  ;;  %v19954_v43 = vadd.f32 %v19823_v26, %v10471_v54  ;;  %v10413_v11 = vpop.f32.mrb[11].mxu0  ;;  %v10473_v3 = vpop.f32.mrb[155].mxu1  ;;  %v21592_v26 = vld [vmem:[#allocation82_spill] sm:$0xff] }
 0x698   : > { %21583 = vst [vmem:[#allocation78_spill] sm:$0xff] %v19948_v10  ;;  %v19957_v1 = vadd.f32 %v10413_v11, %v21587_v34  ;;  %v19960_v41 = vadd.f32 %v19828_v35, %v10473_v3  ;;  %v21594_v35 = vld [vmem:[#allocation83_spill] sm:$0xff] }
 0x699   : > { %21585 = vst [vmem:[#allocation79_spill] sm:$0xff] %v19951_v55  ;;  %21586 = vst [vmem:[#allocation123_spill] sm:$0xff] %v19954_v43 }
 0x69a   : > { %21588 = vst [vmem:[#allocation80_spill] sm:$0xff] %v19957_v1  ;;  %21589 = vst [vmem:[#allocation124_spill] sm:$0xff] %v19960_v41 }
 0x69c   : > { %v10417_v7 = vpop.f32.mrb[12].mxu0  ;;  %v10477_v50 = vpop.f32.mrb[156].mxu1 }
 0x69d   : > { %v19963_v15 = vadd.f32 %v10417_v7, %v21590_v27  ;;  %v19966_v10 = vadd.f32 %v19833_v60, %v10477_v50  ;;  %v10419_v51 = vpop.f32.mrb[13].mxu0  ;;  %v10479_v0 = vpop.f32.mrb[157].mxu1  ;;  %v21596_v60 = vld [vmem:[#allocation84_spill] sm:$0xff] }
 0x69e   : > { %v19969_v54 = vadd.f32 %v10419_v51, %v21592_v26  ;;  %v19972_v43 = vadd.f32 %v19838_v33, %v10479_v0  ;;  %v10421_v11 = vpop.f32.mrb[14].mxu0  ;;  %v10481_v34 = vpop.f32.mrb[158].mxu1  ;;  %v21599_v33 = vld [vmem:[#allocation85_spill] sm:$0xff] }
 0x69f   : > { %21591 = vst [vmem:[#allocation81_spill] sm:$0xff] %v19966_v10  ;;  %v19975_v3 = vadd.f32 %v10421_v11, %v21594_v35  ;;  %v19978_v41 = vadd.f32 %v19843_v39, %v10481_v34  ;;  %v10423_v7 = vpop.f32.mrb[15].mxu0  ;;  %v10483_v27 = vpop.f32.mrb[159].mxu1  ;;  %v21601_v39 = vld [vmem:[#allocation86_spill] sm:$0xff] }
 0x6a0   : > { %21593 = vst [vmem:[#allocation82_spill] sm:$0xff] %v19972_v43  ;;  %v19981_v50 = vadd.f32 %v10423_v7, %v21596_v60  ;;  %v19984_v10 = vadd.f32 %v19848_v46, %v10483_v27  ;;  %v21603_v46 = vld [vmem:[#allocation87_spill] sm:$0xff] }
 0x6a1   : > { %21595 = vst [vmem:[#allocation83_spill] sm:$0xff] %v19978_v41 }
 0x6a2   : > { %21597 = vst [vmem:[#allocation84_spill] sm:$0xff] %v19981_v50  ;;  %21598 = vst [vmem:[#allocation125_spill] sm:$0xff] %v19984_v10 }
 0x6a4   : > { %v10427_v51 = vpop.f32.mrb[16].mxu0  ;;  %v10487_v26 = vpop.f32.mrb[160].mxu1 }
 0x6a5   : > { %v19987_v0 = vadd.f32 %v10427_v51, %v21599_v33  ;;  %v19990_v43 = vadd.f32 %v19853_v40, %v10487_v26  ;;  %v10429_v11 = vpop.f32.mrb[17].mxu0  ;;  %v10489_v35 = vpop.f32.mrb[161].mxu1  ;;  %v21605_v40 = vld [vmem:[#allocation88_spill] sm:$0xff] }
 0x6a6   : > { %v19993_v34 = vadd.f32 %v10429_v11, %v21601_v39  ;;  %v19996_v41 = vadd.f32 %v19858_v12, %v10489_v35  ;;  %v10431_v7 = vpop.f32.mrb[18].mxu0  ;;  %v10491_v60 = vpop.f32.mrb[162].mxu1  ;;  %v21607_v35 = vld [vmem:[#allocation89_spill] sm:$0xff] }
 0x6a7   : > { %21600 = vst [vmem:[#allocation85_spill] sm:$0xff] %v19990_v43  ;;  %v19999_v27 = vadd.f32 %v10431_v7, %v21603_v46  ;;  %v20002_v10 = vadd.f32 %v19863_v18, %v10491_v60  ;;  %v10433_v51 = vpop.f32.mrb[19].mxu0  ;;  %v10493_v33 = vpop.f32.mrb[163].mxu1  ;;  %v21609_v60 = vld [vmem:[#allocation90_spill] sm:$0xff] }
 0x6a8   : > { %21602 = vst [vmem:[#allocation86_spill] sm:$0xff] %v19996_v41  ;;  %v20005_v26 = vadd.f32 %v10433_v51, %v21605_v40  ;;  %v20008_v43 = vadd.f32 %v19868_v16, %v10493_v33  ;;  %v21611_v33 = vld [vmem:[#allocation91_spill] sm:$0xff] }
 0x6a9   : > { %21604 = vst [vmem:[#allocation87_spill] sm:$0xff] %v20002_v10 }
 0x6aa   : > { %21606 = vst [vmem:[#allocation88_spill] sm:$0xff] %v20008_v43 }
 0x6ac   : > { %v10437_v11 = vpop.f32.mrb[20].mxu0  ;;  %v10497_v12 = vpop.f32.mrb[164].mxu1  ;;  %10653 = sbr.rel (%p13583_p4) target bundleno = 1792 (0x700), region = 48 }
 0x6ad   : > { %v20011_v39 = vadd.f32 %v10437_v11, %v21607_v35  ;;  %v20014_v7 = vadd.f32 %v19873_v20, %v10497_v12  ;;  %v10439_v46 = vpop.f32.mrb[21].mxu0  ;;  %v10499_v18 = vpop.f32.mrb[165].mxu1  ;;  %v21613_v20 = vld [vmem:[#allocation92_spill] sm:$0xff] }
 0x6ae   : > { %v20017_v10 = vadd.f32 %v10439_v46, %v21609_v60  ;;  %v20020_v51 = vadd.f32 %v19878_v63, %v10499_v18  ;;  %v10441_v40 = vpop.f32.mrb[22].mxu0  ;;  %v10501_v16 = vpop.f32.mrb[166].mxu1  ;;  %v10656_v63 = vlaneseq (!%p13583_p4)  ;;  %v10654_v18 = vld [vmem:[%s17090_s12] sm:$0x3f] (!%p13583_p4) }
 0x6af   : > { %21608 = vst [vmem:[#allocation89_spill] sm:$0xff] %v20014_v7  ;;  %v20023_v43 = vadd.f32 %v10441_v40, %v21611_v33  ;;  %v20026_v41 = vadd.f32 %v19883_v31, %v10501_v16  ;;  %v10443_v11 = vpop.f32.mrb[23].mxu0  ;;  %v10503_v35 = vpop.f32.mrb[167].mxu1 }
 0x6b0   : > { %21610 = vst [vmem:[#allocation90_spill] sm:$0xff] %v20020_v51  ;;  %v20029_v12 = vadd.f32 %v10443_v11, %v21613_v20  ;;  %v20032_v7 = vadd.f32 %v19888_v23, %v10503_v35  ;;  %v10657_v46 = vshrl.u32 (!%p13583_p4), %v10656_v63, 7 }
 0x6b1   : > { %21612 = vst [vmem:[#allocation91_spill] sm:$0xff] %v20026_v41 }
 0x6b2   : > { %21614 = vst [vmem:[#allocation92_spill] sm:$0xff] %v20032_v7  ;;  %v10658_v31 = vsub.s32 (!%p13583_p4), 0, %v10657_v46  ;;  %v10662_v60 = vsub.s32 (!%p13583_p4), 1, %v10657_v46  ;;  %v10666_v40 = vsub.s32 (!%p13583_p4), 2, %v10657_v46  ;;  %v10670_v16 = vsub.s32 (!%p13583_p4), 3, %v10657_v46 }
 0x6b3   : > { %v10674_v33 = vsub.s32 4, %v10657_v46  ;;  %v10678_v11 = vsub.s32 5, %v10657_v46 }
 0x6b4   : > { %v20040_v23 = vrot.slane %v10654_v18, %v10658_v31  ;;  %v20042_v35 = vrot.slane %v10654_v18, %v10662_v60  ;;  %v20044_v20 = vrot.slane %v10654_v18, %v10666_v40  ;;  %v20046_v7 = vrot.slane %v10654_v18, %v10670_v16 }
 0x6b5   : > { %v20048_v63 = vrot.slane %v10654_v18, %v10674_v33  ;;  %v20050_v41 = vrot.slane %v10654_v18, %v10678_v11 }
 0x6b6   : > { %v10686_v51 = vadd.f32 %v19502_v37, %v20040_v23  ;;  %v10687_v46 = vadd.f32 %v19505_v59, %v20042_v35  ;;  %v10688_v31 = vadd.f32 %v20044_v20, %v19722_v19  ;;  %v10689_v60 = vadd.f32 %v20046_v7, %v19724_v49 }
 0x6b7   : > { %v10690_v18 = vadd.f32 %v19891_v56, %v20048_v63  ;;  %v10691_v40 = vadd.f32 %v19897_v61, %v20050_v41  ;;  %v10692_v16 = vadd.f32 %v19508_v5, %v20040_v23  ;;  %v10693_v33 = vadd.f32 %v19512_v28, %v20042_v35 }
 0x6b8   : > { %10830 = vst [vmem:[%s20036_s5] sm:$0xff] %v10686_v51  ;;  %10831 = vst [vmem:[%s20036_s5 + $0x8] sm:$0xff] %v10687_v46  ;;  %v10694_v11 = vadd.f32 %v20044_v20, %v19726_v17  ;;  %v10695_v61 = vadd.f32 %v20046_v7, %v19728_v44  ;;  %v10696_v5 = vadd.f32 %v19903_v21, %v20048_v63 }
 0x6b9   : > { %10832 = vst [vmem:[%s20036_s5 + $0x10] sm:$0xff] %v10688_v31  ;;  %10833 = vst [vmem:[%s20036_s5 + $0x18] sm:$0xff] %v10689_v60  ;;  %v10697_v28 = vadd.f32 %v19909_v32, %v20050_v41  ;;  %v10698_v51 = vadd.f32 %v19522_v48, %v20040_v23  ;;  %v10699_v46 = vadd.f32 %v19525_v22, %v20042_v35 }
 0x6ba   : > { %10834 = vst [vmem:[%s20036_s5 + $0x20] sm:$0xff] %v10690_v18  ;;  %10835 = vst [vmem:[%s20036_s5 + $0x28] sm:$0xff] %v10691_v40  ;;  %v10700_v31 = vadd.f32 %v20044_v20, %v19730_v29  ;;  %v10701_v60 = vadd.f32 %v20046_v7, %v19732_v4  ;;  %v10702_v18 = vadd.f32 %v19915_v9, %v20048_v63 }
 0x6bb   : > { %10836 = vst [vmem:[%s20036_s5 + $0x30] sm:$0xff] %v10692_v16  ;;  %10837 = vst [vmem:[%s20036_s5 + $0x38] sm:$0xff] %v10693_v33  ;;  %v10703_v40 = vadd.f32 %v19921_v45, %v20050_v41  ;;  %v10704_v16 = vadd.f32 %v19528_v2, %v20040_v23  ;;  %v10705_v33 = vadd.f32 %v19532_v14, %v20042_v35 }
 0x6bc   : > { %10838 = vst [vmem:[%s20036_s5 + $0x40] sm:$0xff] %v10694_v11  ;;  %10839 = vst [vmem:[%s20036_s5 + $0x48] sm:$0xff] %v10695_v61  ;;  %v10708_v61 = vadd.f32 %v19927_v42, %v20048_v63  ;;  %v10709_v11 = vadd.f32 %v19933_v58, %v20050_v41 }
 0x6bd   : > { %10840 = vst [vmem:[%s20036_s5 + $0x50] sm:$0xff] %v10696_v5  ;;  %10841 = vst [vmem:[%s20036_s5 + $0x58] sm:$0xff] %v10697_v28  ;;  %v10706_v5 = vadd.f32 %v20044_v20, %v19734_v13  ;;  %v10707_v28 = vadd.f32 %v20046_v7, %v19736_v30 }
 0x6be   : > { %10842 = vst [vmem:[%s20036_s5 + $0x60] sm:$0xff] %v10698_v51  ;;  %10843 = vst [vmem:[%s20036_s5 + $0x68] sm:$0xff] %v10699_v46  ;;  %v10710_v51 = vadd.f32 %v19542_v38, %v20040_v23  ;;  %v10711_v46 = vadd.f32 %v19545_v62, %v20042_v35 }
 0x6bf   : > { %10844 = vst [vmem:[%s20036_s5 + $0x70] sm:$0xff] %v10700_v31  ;;  %10845 = vst [vmem:[%s20036_s5 + $0x78] sm:$0xff] %v10701_v60  ;;  %v10712_v31 = vadd.f32 %v20044_v20, %v19738_v6  ;;  %v10713_v60 = vadd.f32 %v20046_v7, %v19740_v36 }
 0x6c0   : > { %10846 = vst [vmem:[%s20036_s5 + $0x80] sm:$0xff] %v10702_v18  ;;  %10847 = vst [vmem:[%s20036_s5 + $0x88] sm:$0xff] %v10703_v40  ;;  %v10714_v18 = vadd.f32 %v19939_v24, %v20048_v63  ;;  %v10715_v40 = vadd.f32 %v19945_v52, %v20050_v41 }
 0x6c1   : > { %10848 = vst [vmem:[%s20036_s5 + $0x90] sm:$0xff] %v10704_v16  ;;  %10849 = vst [vmem:[%s20036_s5 + $0x98] sm:$0xff] %v10705_v33  ;;  %v10716_v16 = vadd.f32 %v19548_v25, %v20040_v23  ;;  %v10717_v33 = vadd.f32 %v19552_v57, %v20042_v35 }
 0x6c2   : > { %10850 = vst [vmem:[%s20036_s5 + $0xa0] sm:$0xff] %v10706_v5  ;;  %10851 = vst [vmem:[%s20036_s5 + $0xa8] sm:$0xff] %v10707_v28  ;;  %v10718_v5 = vadd.f32 %v20044_v20, %v19742_v8  ;;  %v10719_v28 = vadd.f32 %v20046_v7, %v19744_v53  ;;  %v21617_v53 = vld [vmem:[#allocation62_spill] sm:$0xff] }
 0x6c3   : > { %10852 = vst [vmem:[%s20036_s5 + $0xb0] sm:$0xff] %v10708_v61  ;;  %10853 = vst [vmem:[%s20036_s5 + $0xb8] sm:$0xff] %v10709_v11  ;;  %v10720_v61 = vadd.f32 %v19951_v55, %v20048_v63  ;;  %v10721_v11 = vadd.f32 %v19957_v1, %v20050_v41  ;;  %v10725_v1 = vadd.f32 %v20046_v7, %v21617_v53 }
 0x6c4   : > { %10854 = vst [vmem:[%s20036_s5 + $0xc0] sm:$0xff] %v10710_v51  ;;  %10855 = vst [vmem:[%s20036_s5 + $0xc8] sm:$0xff] %v10711_v46  ;;  %v10722_v51 = vadd.f32 %v19562_v47, %v20040_v23  ;;  %v21615_v46 = vld [vmem:[#allocation25_spill] sm:$0xff] }
 0x6c5   : > { %10856 = vst [vmem:[%s20036_s5 + $0xd0] sm:$0xff] %v10712_v31  ;;  %10857 = vst [vmem:[%s20036_s5 + $0xd8] sm:$0xff] %v10713_v60  ;;  %v10723_v31 = vadd.f32 %v21615_v46, %v20042_v35  ;;  %v21616_v60 = vld [vmem:[#allocation61_spill] sm:$0xff]  ;;  %v21619_v46 = vld [vmem:[#allocation27_spill] sm:$0xff] }
 0x6c6   : > { %10858 = vst [vmem:[%s20036_s5 + $0xe0] sm:$0xff] %v10714_v18  ;;  %10859 = vst [vmem:[%s20036_s5 + $0xe8] sm:$0xff] %v10715_v40  ;;  %v10724_v55 = vadd.f32 %v20044_v20, %v21616_v60  ;;  %v10726_v18 = vadd.f32 %v19963_v15, %v20048_v63  ;;  %v10727_v40 = vadd.f32 %v19969_v54, %v20050_v41 }
 0x6c7   : > { %10860 = vst [vmem:[%s20036_s5 + $0xf0] sm:$0xff] %v10716_v16  ;;  %10861 = vst [vmem:[%s20036_s5 + $0xf8] sm:$0xff] %v10717_v33  ;;  %v21618_v16 = vld [vmem:[#allocation26_spill] sm:$0xff]  ;;  %v10729_v53 = vadd.f32 %v21619_v46, %v20042_v35  ;;  %v10732_v60 = vadd.f32 %v19975_v3, %v20048_v63  ;;  %v21624_v46 = vld [vmem:[#allocation65_spill] sm:$0xff] }
 0x6c8   : > { %10862 = vst [vmem:[%s20036_s5 + $0x100] sm:$0xff] %v10718_v5  ;;  %10863 = vst [vmem:[%s20036_s5 + $0x108] sm:$0xff] %v10719_v28  ;;  %v10728_v33 = vadd.f32 %v21618_v16, %v20040_v23  ;;  %v21620_v5 = vld [vmem:[#allocation63_spill] sm:$0xff]  ;;  %v10733_v16 = vadd.f32 %v19981_v50, %v20050_v41 }
 0x6c9   : > { %10864 = vst [vmem:[%s20036_s5 + $0x110] sm:$0xff] %v10720_v61  ;;  %10865 = vst [vmem:[%s20036_s5 + $0x118] sm:$0xff] %v10721_v11  ;;  %v10730_v28 = vadd.f32 %v20044_v20, %v21620_v5  ;;  %v21621_v61 = vld [vmem:[#allocation64_spill] sm:$0xff]  ;;  %v10736_v5 = vadd.f32 %v20044_v20, %v21624_v46  ;;  %v10744_v46 = vadd.f32 %v19999_v27, %v20048_v63 }
 0x6ca   : > { %10866 = vst [vmem:[%s20036_s5 + $0x120] sm:$0xff] %v10722_v51  ;;  %10867 = vst [vmem:[%s20036_s5 + $0x128] sm:$0xff] %v10723_v31  ;;  %v10731_v11 = vadd.f32 %v20046_v7, %v21621_v61  ;;  %v21623_v51 = vld [vmem:[#allocation29_spill] sm:$0xff]  ;;  %v21625_v61 = vld [vmem:[#allocation66_spill] sm:$0xff] }
 0x6cb   : > { %10868 = vst [vmem:[%s20036_s5 + $0x130] sm:$0xff] %v10724_v55  ;;  %10869 = vst [vmem:[%s20036_s5 + $0x138] sm:$0xff] %v10725_v1  ;;  %v21622_v55 = vld [vmem:[#allocation28_spill] sm:$0xff]  ;;  %v10735_v31 = vadd.f32 %v21623_v51, %v20042_v35  ;;  %v10737_v50 = vadd.f32 %v20046_v7, %v21625_v61  ;;  %v10745_v61 = vadd.f32 %v20005_v26, %v20050_v41 }
 0x6cc   : > { %10870 = vst [vmem:[%s20036_s5 + $0x140] sm:$0xff] %v10726_v18  ;;  %10871 = vst [vmem:[%s20036_s5 + $0x148] sm:$0xff] %v10727_v40  ;;  %v10734_v1 = vadd.f32 %v21622_v55, %v20040_v23  ;;  %v10738_v18 = vadd.f32 %v19987_v0, %v20048_v63  ;;  %v10739_v40 = vadd.f32 %v19993_v34, %v20050_v41  ;;  %v21627_v55 = vld [vmem:[#allocation31_spill] sm:$0xff] }
 0x6cd   : > { %10872 = vst [vmem:[%s20036_s5 + $0x150] sm:$0xff] %v10728_v33  ;;  %10873 = vst [vmem:[%s20036_s5 + $0x158] sm:$0xff] %v10729_v53  ;;  %v21626_v33 = vld [vmem:[#allocation30_spill] sm:$0xff]  ;;  %v10741_v51 = vadd.f32 %v21627_v55, %v20042_v35 }
 0x6ce   : > { %10874 = vst [vmem:[%s20036_s5 + $0x160] sm:$0xff] %v10730_v28  ;;  %10875 = vst [vmem:[%s20036_s5 + $0x168] sm:$0xff] %v10731_v11  ;;  %v10740_v53 = vadd.f32 %v21626_v33, %v20040_v23  ;;  %v21628_v28 = vld [vmem:[#allocation67_spill] sm:$0xff]  ;;  %v21632_v33 = vld [vmem:[#allocation117_spill] sm:$0xff] }
 0x6cf   : > { %10876 = vst [vmem:[%s20036_s5 + $0x170] sm:$0xff] %v10732_v60  ;;  %10877 = vst [vmem:[%s20036_s5 + $0x178] sm:$0xff] %v10733_v16  ;;  %v10742_v11 = vadd.f32 %v20044_v20, %v21628_v28  ;;  %v21629_v60 = vld [vmem:[#allocation68_spill] sm:$0xff]  ;;  %v10748_v55 = vadd.f32 %v20044_v20, %v21632_v33  ;;  %v21633_v28 = vld [vmem:[#allocation118_spill] sm:$0xff]  ;;  %v10756_v33 = vadd.f32 %v20023_v43, %v20048_v63 }
 0x6d0   : > { %10878 = vst [vmem:[%s20036_s5 + $0x180] sm:$0xff] %v10734_v1  ;;  %10879 = vst [vmem:[%s20036_s5 + $0x188] sm:$0xff] %v10735_v31  ;;  %v10743_v16 = vadd.f32 %v20046_v7, %v21629_v60  ;;  %v21631_v31 = vld [vmem:[#allocation33_spill] sm:$0xff]  ;;  %v10749_v60 = vadd.f32 %v20046_v7, %v21633_v28  ;;  %v10757_v28 = vadd.f32 %v20029_v12, %v20050_v41 }
 0x6d1   : > { %10880 = vst [vmem:[%s20036_s5 + $0x190] sm:$0xff] %v10736_v5  ;;  %10881 = vst [vmem:[%s20036_s5 + $0x198] sm:$0xff] %v10737_v50  ;;  %v21630_v50 = vld [vmem:[#allocation32_spill] sm:$0xff]  ;;  %v10747_v5 = vadd.f32 %v21631_v31, %v20042_v35 }
 0x6d2   : > { %10882 = vst [vmem:[%s20036_s5 + $0x1a0] sm:$0xff] %v10738_v18  ;;  %10883 = vst [vmem:[%s20036_s5 + $0x1a8] sm:$0xff] %v10739_v40  ;;  %v10746_v1 = vadd.f32 %v21630_v50, %v20040_v23  ;;  %v10750_v18 = vadd.f32 %v20011_v39, %v20048_v63  ;;  %v10751_v40 = vadd.f32 %v20017_v10, %v20050_v41  ;;  %v21635_v50 = vld [vmem:[#allocation35_spill] sm:$0xff] }
 0x6d3   : > { %10884 = vst [vmem:[%s20036_s5 + $0x1b0] sm:$0xff] %v10740_v53  ;;  %10885 = vst [vmem:[%s20036_s5 + $0x1b8] sm:$0xff] %v10741_v51  ;;  %v21634_v53 = vld [vmem:[#allocation34_spill] sm:$0xff]  ;;  %v10753_v31 = vadd.f32 %v21635_v50, %v20042_v35 }
 0x6d4   : > { %10886 = vst [vmem:[%s20036_s5 + $0x1c0] sm:$0xff] %v10742_v11  ;;  %10887 = vst [vmem:[%s20036_s5 + $0x1c8] sm:$0xff] %v10743_v16  ;;  %v10752_v51 = vadd.f32 %v21634_v53, %v20040_v23  ;;  %v21636_v11 = vld [vmem:[#allocation119_spill] sm:$0xff]  ;;  %v21640_v53 = vld [vmem:[#allocation121_spill] sm:$0xff] }
 0x6d5   : > { %10888 = vst [vmem:[%s20036_s5 + $0x1d0] sm:$0xff] %v10744_v46  ;;  %10889 = vst [vmem:[%s20036_s5 + $0x1d8] sm:$0xff] %v10745_v61  ;;  %v10754_v16 = vadd.f32 %v20044_v20, %v21636_v11  ;;  %v21637_v46 = vld [vmem:[#allocation120_spill] sm:$0xff]  ;;  %v10760_v50 = vadd.f32 %v20044_v20, %v21640_v53  ;;  %v21641_v11 = vld [vmem:[#allocation93_spill] sm:$0xff] }
 0x6d6   : > { %10890 = vst [vmem:[%s20036_s5 + $0x1e0] sm:$0xff] %v10746_v1  ;;  %10891 = vst [vmem:[%s20036_s5 + $0x1e8] sm:$0xff] %v10747_v5  ;;  %v10755_v61 = vadd.f32 %v20046_v7, %v21637_v46  ;;  %v21638_v1 = vld [vmem:[#allocation36_spill] sm:$0xff]  ;;  %v10761_v46 = vadd.f32 %v20046_v7, %v21641_v11  ;;  %v21645_v53 = vld [vmem:[#allocation39_spill] sm:$0xff] }
 0x6d7   : > { %10892 = vst [vmem:[%s20036_s5 + $0x1f0] sm:$0xff] %v10748_v55  ;;  %10893 = vst [vmem:[%s20036_s5 + $0x1f8] sm:$0xff] %v10749_v60  ;;  %v10758_v5 = vadd.f32 %v21638_v1, %v20040_v23  ;;  %v21639_v55 = vld [vmem:[#allocation37_spill] sm:$0xff]  ;;  %v21644_v1 = vld [vmem:[#allocation38_spill] sm:$0xff]  ;;  %v10765_v11 = vadd.f32 %v21645_v53, %v20042_v35 }
 0x6d8   : > { %10894 = vst [vmem:[%s20036_s5 + $0x200] sm:$0xff] %v10750_v18  ;;  %10895 = vst [vmem:[%s20036_s5 + $0x208] sm:$0xff] %v10751_v40  ;;  %v10759_v60 = vadd.f32 %v21639_v55, %v20042_v35  ;;  %v21642_v18 = vld [vmem:[#allocation115_spill] sm:$0xff]  ;;  %v10764_v55 = vadd.f32 %v21644_v1, %v20040_v23  ;;  %v21649_v1 = vld [vmem:[#allocation72_spill] sm:$0xff] }
 0x6d9   : > { %10896 = vst [vmem:[%s20036_s5 + $0x210] sm:$0xff] %v10752_v51  ;;  %10897 = vst [vmem:[%s20036_s5 + $0x218] sm:$0xff] %v10753_v31  ;;  %v10762_v40 = vadd.f32 %v21642_v18, %v20048_v63  ;;  %v21643_v51 = vld [vmem:[#allocation70_spill] sm:$0xff]  ;;  %v21648_v18 = vld [vmem:[#allocation71_spill] sm:$0xff]  ;;  %v10769_v53 = vadd.f32 %v21649_v1, %v20050_v41 }
 0x6da   : > { %10898 = vst [vmem:[%s20036_s5 + $0x220] sm:$0xff] %v10754_v16  ;;  %10899 = vst [vmem:[%s20036_s5 + $0x228] sm:$0xff] %v10755_v61  ;;  %v10763_v31 = vadd.f32 %v21643_v51, %v20050_v41  ;;  %v21646_v16 = vld [vmem:[#allocation94_spill] sm:$0xff]  ;;  %v10768_v51 = vadd.f32 %v21648_v18, %v20048_v63  ;;  %v21653_v18 = vld [vmem:[#allocation97_spill] sm:$0xff] }
 0x6db   : > { %10900 = vst [vmem:[%s20036_s5 + $0x230] sm:$0xff] %v10756_v33  ;;  %10901 = vst [vmem:[%s20036_s5 + $0x238] sm:$0xff] %v10757_v28  ;;  %v10766_v61 = vadd.f32 %v20044_v20, %v21646_v16  ;;  %v21647_v33 = vld [vmem:[#allocation95_spill] sm:$0xff]  ;;  %v21652_v16 = vld [vmem:[#allocation96_spill] sm:$0xff]  ;;  %v10773_v1 = vadd.f32 %v20046_v7, %v21653_v18 }
 0x6dc   : > { %10902 = vst [vmem:[%s20036_s5 + $0x240] sm:$0xff] %v10758_v5  ;;  %10903 = vst [vmem:[%s20036_s5 + $0x248] sm:$0xff] %v10759_v60  ;;  %v10767_v28 = vadd.f32 %v20046_v7, %v21647_v33  ;;  %v21650_v5 = vld [vmem:[#allocation40_spill] sm:$0xff]  ;;  %v10772_v33 = vadd.f32 %v20044_v20, %v21652_v16  ;;  %v21657_v16 = vld [vmem:[#allocation43_spill] sm:$0xff] }
 0x6dd   : > { %10904 = vst [vmem:[%s20036_s5 + $0x250] sm:$0xff] %v10760_v50  ;;  %10905 = vst [vmem:[%s20036_s5 + $0x258] sm:$0xff] %v10761_v46  ;;  %v10770_v60 = vadd.f32 %v21650_v5, %v20040_v23  ;;  %v21651_v50 = vld [vmem:[#allocation41_spill] sm:$0xff]  ;;  %v21656_v5 = vld [vmem:[#allocation42_spill] sm:$0xff]  ;;  %v10777_v18 = vadd.f32 %v21657_v16, %v20042_v35 }
 0x6de   : > { %10906 = vst [vmem:[%s20036_s5 + $0x260] sm:$0xff] %v10762_v40  ;;  %10907 = vst [vmem:[%s20036_s5 + $0x268] sm:$0xff] %v10763_v31  ;;  %v10771_v46 = vadd.f32 %v21651_v50, %v20042_v35  ;;  %v21654_v40 = vld [vmem:[#allocation73_spill] sm:$0xff]  ;;  %v10776_v50 = vadd.f32 %v21656_v5, %v20040_v23  ;;  %v21661_v5 = vld [vmem:[#allocation76_spill] sm:$0xff] }
 0x6df   : > { %10908 = vst [vmem:[%s20036_s5 + $0x270] sm:$0xff] %v10764_v55  ;;  %10909 = vst [vmem:[%s20036_s5 + $0x278] sm:$0xff] %v10765_v11  ;;  %v10774_v31 = vadd.f32 %v21654_v40, %v20048_v63  ;;  %v21655_v55 = vld [vmem:[#allocation74_spill] sm:$0xff]  ;;  %v21660_v40 = vld [vmem:[#allocation75_spill] sm:$0xff]  ;;  %v10781_v16 = vadd.f32 %v21661_v5, %v20050_v41 }
 0x6e0   : > { %10910 = vst [vmem:[%s20036_s5 + $0x280] sm:$0xff] %v10766_v61  ;;  %10911 = vst [vmem:[%s20036_s5 + $0x288] sm:$0xff] %v10767_v28  ;;  %v10775_v11 = vadd.f32 %v21655_v55, %v20050_v41  ;;  %v21658_v61 = vld [vmem:[#allocation98_spill] sm:$0xff]  ;;  %v10780_v55 = vadd.f32 %v21660_v40, %v20048_v63  ;;  %v21665_v40 = vld [vmem:[#allocation101_spill] sm:$0xff] }
 0x6e1   : > { %10912 = vst [vmem:[%s20036_s5 + $0x290] sm:$0xff] %v10768_v51  ;;  %10913 = vst [vmem:[%s20036_s5 + $0x298] sm:$0xff] %v10769_v53  ;;  %v10778_v28 = vadd.f32 %v20044_v20, %v21658_v61  ;;  %v21659_v51 = vld [vmem:[#allocation99_spill] sm:$0xff]  ;;  %v21664_v61 = vld [vmem:[#allocation100_spill] sm:$0xff]  ;;  %v10785_v5 = vadd.f32 %v20046_v7, %v21665_v40 }
 0x6e2   : > { %10914 = vst [vmem:[%s20036_s5 + $0x2a0] sm:$0xff] %v10770_v60  ;;  %10915 = vst [vmem:[%s20036_s5 + $0x2a8] sm:$0xff] %v10771_v46  ;;  %v10779_v53 = vadd.f32 %v20046_v7, %v21659_v51  ;;  %v21662_v60 = vld [vmem:[#allocation44_spill] sm:$0xff]  ;;  %v10784_v51 = vadd.f32 %v20044_v20, %v21664_v61  ;;  %v21669_v61 = vld [vmem:[#allocation47_spill] sm:$0xff] }
 0x6e3   : > { %10916 = vst [vmem:[%s20036_s5 + $0x2b0] sm:$0xff] %v10772_v33  ;;  %10917 = vst [vmem:[%s20036_s5 + $0x2b8] sm:$0xff] %v10773_v1  ;;  %v10782_v46 = vadd.f32 %v21662_v60, %v20040_v23  ;;  %v21663_v33 = vld [vmem:[#allocation45_spill] sm:$0xff]  ;;  %v21668_v60 = vld [vmem:[#allocation46_spill] sm:$0xff]  ;;  %v10789_v40 = vadd.f32 %v21669_v61, %v20042_v35 }
 0x6e4   : > { %10918 = vst [vmem:[%s20036_s5 + $0x2c0] sm:$0xff] %v10774_v31  ;;  %10919 = vst [vmem:[%s20036_s5 + $0x2c8] sm:$0xff] %v10775_v11  ;;  %v10783_v1 = vadd.f32 %v21663_v33, %v20042_v35  ;;  %v21666_v31 = vld [vmem:[#allocation77_spill] sm:$0xff]  ;;  %v10788_v33 = vadd.f32 %v21668_v60, %v20040_v23  ;;  %v21673_v60 = vld [vmem:[#allocation124_spill] sm:$0xff] }
 0x6e5   : > { %10920 = vst [vmem:[%s20036_s5 + $0x2d0] sm:$0xff] %v10776_v50  ;;  %10921 = vst [vmem:[%s20036_s5 + $0x2d8] sm:$0xff] %v10777_v18  ;;  %v10786_v11 = vadd.f32 %v21666_v31, %v20048_v63  ;;  %v21667_v50 = vld [vmem:[#allocation78_spill] sm:$0xff]  ;;  %v21672_v31 = vld [vmem:[#allocation123_spill] sm:$0xff]  ;;  %v10793_v61 = vadd.f32 %v21673_v60, %v20050_v41 }
 0x6e6   : > { %10922 = vst [vmem:[%s20036_s5 + $0x2e0] sm:$0xff] %v10778_v28  ;;  %10923 = vst [vmem:[%s20036_s5 + $0x2e8] sm:$0xff] %v10779_v53  ;;  %v10787_v18 = vadd.f32 %v21667_v50, %v20050_v41  ;;  %v21670_v28 = vld [vmem:[#allocation102_spill] sm:$0xff]  ;;  %v10792_v50 = vadd.f32 %v21672_v31, %v20048_v63  ;;  %v21677_v31 = vld [vmem:[#allocation105_spill] sm:$0xff] }
 0x6e7   : > { %10924 = vst [vmem:[%s20036_s5 + $0x2f0] sm:$0xff] %v10780_v55  ;;  %10925 = vst [vmem:[%s20036_s5 + $0x2f8] sm:$0xff] %v10781_v16  ;;  %v10790_v53 = vadd.f32 %v20044_v20, %v21670_v28  ;;  %v21671_v55 = vld [vmem:[#allocation103_spill] sm:$0xff]  ;;  %v21676_v28 = vld [vmem:[#allocation104_spill] sm:$0xff]  ;;  %v10797_v60 = vadd.f32 %v20046_v7, %v21677_v31 }
 0x6e8   : > { %10926 = vst [vmem:[%s20036_s5 + $0x300] sm:$0xff] %v10782_v46  ;;  %10927 = vst [vmem:[%s20036_s5 + $0x308] sm:$0xff] %v10783_v1  ;;  %v10791_v16 = vadd.f32 %v20046_v7, %v21671_v55  ;;  %v21674_v46 = vld [vmem:[#allocation48_spill] sm:$0xff]  ;;  %v10796_v55 = vadd.f32 %v20044_v20, %v21676_v28  ;;  %v21681_v28 = vld [vmem:[#allocation51_spill] sm:$0xff] }
 0x6e9   : > { %10928 = vst [vmem:[%s20036_s5 + $0x310] sm:$0xff] %v10784_v51  ;;  %10929 = vst [vmem:[%s20036_s5 + $0x318] sm:$0xff] %v10785_v5  ;;  %v10794_v1 = vadd.f32 %v21674_v46, %v20040_v23  ;;  %v21675_v51 = vld [vmem:[#allocation49_spill] sm:$0xff]  ;;  %v21680_v46 = vld [vmem:[#allocation50_spill] sm:$0xff]  ;;  %v10801_v31 = vadd.f32 %v21681_v28, %v20042_v35 }
 0x6ea   : > { %10930 = vst [vmem:[%s20036_s5 + $0x320] sm:$0xff] %v10786_v11  ;;  %10931 = vst [vmem:[%s20036_s5 + $0x328] sm:$0xff] %v10787_v18  ;;  %v10795_v5 = vadd.f32 %v21675_v51, %v20042_v35  ;;  %v21678_v11 = vld [vmem:[#allocation81_spill] sm:$0xff]  ;;  %v10800_v51 = vadd.f32 %v21680_v46, %v20040_v23 }
 0x6eb   : > { %10932 = vst [vmem:[%s20036_s5 + $0x330] sm:$0xff] %v10788_v33  ;;  %10933 = vst [vmem:[%s20036_s5 + $0x338] sm:$0xff] %v10789_v40  ;;  %v10798_v18 = vadd.f32 %v21678_v11, %v20048_v63  ;;  %v21679_v33 = vld [vmem:[#allocation82_spill] sm:$0xff]  ;;  %v21684_v11 = vld [vmem:[#allocation83_spill] sm:$0xff] }
 0x6ec   : > { %10934 = vst [vmem:[%s20036_s5 + $0x340] sm:$0xff] %v10790_v53  ;;  %10935 = vst [vmem:[%s20036_s5 + $0x348] sm:$0xff] %v10791_v16  ;;  %v10799_v40 = vadd.f32 %v21679_v33, %v20050_v41  ;;  %v21682_v53 = vld [vmem:[#allocation106_spill] sm:$0xff]  ;;  %v10804_v33 = vadd.f32 %v21684_v11, %v20048_v63  ;;  %v21685_v46 = vld [vmem:[#allocation125_spill] sm:$0xff] }
 0x6ed   : > { %10936 = vst [vmem:[%s20036_s5 + $0x350] sm:$0xff] %v10792_v50  ;;  %10937 = vst [vmem:[%s20036_s5 + $0x358] sm:$0xff] %v10793_v61  ;;  %v10802_v16 = vadd.f32 %v20044_v20, %v21682_v53  ;;  %v21683_v50 = vld [vmem:[#allocation107_spill] sm:$0xff]  ;;  %v10805_v28 = vadd.f32 %v21685_v46, %v20050_v41  ;;  %v21688_v53 = vld [vmem:[#allocation108_spill] sm:$0xff] }
 0x6ee   : > { %10938 = vst [vmem:[%s20036_s5 + $0x360] sm:$0xff] %v10794_v1  ;;  %10939 = vst [vmem:[%s20036_s5 + $0x368] sm:$0xff] %v10795_v5  ;;  %v10803_v61 = vadd.f32 %v20046_v7, %v21683_v50  ;;  %v21686_v1 = vld [vmem:[#allocation52_spill] sm:$0xff]  ;;  %v10808_v50 = vadd.f32 %v20044_v20, %v21688_v53  ;;  %v21689_v11 = vld [vmem:[#allocation109_spill] sm:$0xff] }
 0x6ef   : > { %10940 = vst [vmem:[%s20036_s5 + $0x370] sm:$0xff] %v10796_v55  ;;  %10941 = vst [vmem:[%s20036_s5 + $0x378] sm:$0xff] %v10797_v60  ;;  %v10806_v5 = vadd.f32 %v21686_v1, %v20040_v23  ;;  %v21687_v55 = vld [vmem:[#allocation53_spill] sm:$0xff]  ;;  %v10809_v46 = vadd.f32 %v20046_v7, %v21689_v11  ;;  %v21692_v1 = vld [vmem:[#allocation54_spill] sm:$0xff] }
 0x6f0   : > { %10942 = vst [vmem:[%s20036_s5 + $0x380] sm:$0xff] %v10798_v18  ;;  %10943 = vst [vmem:[%s20036_s5 + $0x388] sm:$0xff] %v10799_v40  ;;  %v10807_v60 = vadd.f32 %v21687_v55, %v20042_v35  ;;  %v21690_v18 = vld [vmem:[#allocation85_spill] sm:$0xff]  ;;  %v10812_v55 = vadd.f32 %v21692_v1, %v20040_v23  ;;  %v21693_v53 = vld [vmem:[#allocation55_spill] sm:$0xff] }
 0x6f1   : > { %10944 = vst [vmem:[%s20036_s5 + $0x390] sm:$0xff] %v10800_v51  ;;  %10945 = vst [vmem:[%s20036_s5 + $0x398] sm:$0xff] %v10801_v31  ;;  %v10810_v40 = vadd.f32 %v21690_v18, %v20048_v63  ;;  %v21691_v51 = vld [vmem:[#allocation86_spill] sm:$0xff]  ;;  %v10813_v11 = vadd.f32 %v21693_v53, %v20042_v35  ;;  %v21696_v18 = vld [vmem:[#allocation87_spill] sm:$0xff] }
 0x6f2   : > { %10946 = vst [vmem:[%s20036_s5 + $0x3a0] sm:$0xff] %v10802_v16  ;;  %10947 = vst [vmem:[%s20036_s5 + $0x3a8] sm:$0xff] %v10803_v61  ;;  %v10811_v31 = vadd.f32 %v21691_v51, %v20050_v41  ;;  %v21694_v16 = vld [vmem:[#allocation110_spill] sm:$0xff]  ;;  %v10816_v51 = vadd.f32 %v21696_v18, %v20048_v63  ;;  %v21697_v1 = vld [vmem:[#allocation88_spill] sm:$0xff] }
 0x6f3   : > { %10948 = vst [vmem:[%s20036_s5 + $0x3b0] sm:$0xff] %v10804_v33  ;;  %10949 = vst [vmem:[%s20036_s5 + $0x3b8] sm:$0xff] %v10805_v28  ;;  %v10814_v61 = vadd.f32 %v20044_v20, %v21694_v16  ;;  %v21695_v33 = vld [vmem:[#allocation111_spill] sm:$0xff]  ;;  %v10817_v53 = vadd.f32 %v21697_v1, %v20050_v41  ;;  %v21700_v16 = vld [vmem:[#allocation112_spill] sm:$0xff] }
 0x6f4   : > { %10950 = vst [vmem:[%s20036_s5 + $0x3c0] sm:$0xff] %v10806_v5  ;;  %10951 = vst [vmem:[%s20036_s5 + $0x3c8] sm:$0xff] %v10807_v60  ;;  %v10815_v28 = vadd.f32 %v20046_v7, %v21695_v33  ;;  %v21698_v5 = vld [vmem:[#allocation56_spill] sm:$0xff]  ;;  %v10820_v33 = vadd.f32 %v20044_v20, %v21700_v16  ;;  %v21701_v18 = vld [vmem:[#allocation122_spill] sm:$0xff] }
 0x6f5   : > { %10952 = vst [vmem:[%s20036_s5 + $0x3d0] sm:$0xff] %v10808_v50  ;;  %10953 = vst [vmem:[%s20036_s5 + $0x3d8] sm:$0xff] %v10809_v46  ;;  %v10818_v60 = vadd.f32 %v21698_v5, %v20040_v23  ;;  %v21699_v50 = vld [vmem:[#allocation57_spill] sm:$0xff]  ;;  %v10821_v1 = vadd.f32 %v20046_v7, %v21701_v18  ;;  %v21704_v5 = vld [vmem:[#allocation58_spill] sm:$0xff] }
 0x6f6   : > { %10954 = vst [vmem:[%s20036_s5 + $0x3e0] sm:$0xff] %v10810_v40  ;;  %10955 = vst [vmem:[%s20036_s5 + $0x3e8] sm:$0xff] %v10811_v31  ;;  %v10819_v46 = vadd.f32 %v21699_v50, %v20042_v35  ;;  %v21702_v40 = vld [vmem:[#allocation89_spill] sm:$0xff]  ;;  %v10824_v50 = vadd.f32 %v21704_v5, %v20040_v23  ;;  %v21707_v16 = vld [vmem:[#allocation114_spill] sm:$0xff] }
 0x6f7   : > { %10956 = vst [vmem:[%s20036_s5 + $0x3f0] sm:$0xff] %v10812_v55  ;;  %10957 = vst [vmem:[%s20036_s5 + $0x3f8] sm:$0xff] %v10813_v11  ;;  %v10822_v31 = vadd.f32 %v21702_v40, %v20048_v63  ;;  %v21703_v55 = vld [vmem:[#allocation90_spill] sm:$0xff]  ;;  %v10827_v18 = vadd.f32 %v20046_v7, %v21707_v16  ;;  %v21708_v40 = vld [vmem:[#allocation91_spill] sm:$0xff] }
 0x6f8   : > { %10958 = vst [vmem:[%s20036_s5 + $0x400] sm:$0xff] %v10814_v61  ;;  %10959 = vst [vmem:[%s20036_s5 + $0x408] sm:$0xff] %v10815_v28  ;;  %v10823_v11 = vadd.f32 %v21703_v55, %v20050_v41  ;;  %v21705_v61 = vld [vmem:[#allocation59_spill] sm:$0xff]  ;;  %v10828_v55 = vadd.f32 %v21708_v40, %v20048_v63  ;;  %v21709_v23 = vld [vmem:[#allocation92_spill] sm:$0xff] }
 0x6f9   : > { %10960 = vst [vmem:[%s20036_s5 + $0x410] sm:$0xff] %v10816_v51  ;;  %10961 = vst [vmem:[%s20036_s5 + $0x418] sm:$0xff] %v10817_v53  ;;  %v10825_v28 = vadd.f32 %v21705_v61, %v20042_v35  ;;  %v21706_v51 = vld [vmem:[#allocation113_spill] sm:$0xff]  ;;  %v10829_v5 = vadd.f32 %v21709_v23, %v20050_v41 }
 0x6fa   : > { %10962 = vst [vmem:[%s20036_s5 + $0x420] sm:$0xff] %v10818_v60  ;;  %10963 = vst [vmem:[%s20036_s5 + $0x428] sm:$0xff] %v10819_v46  ;;  %v10826_v53 = vadd.f32 %v20044_v20, %v21706_v51 }
 0x6fb   : > { %10964 = vst [vmem:[%s20036_s5 + $0x430] sm:$0xff] %v10820_v33  ;;  %10965 = vst [vmem:[%s20036_s5 + $0x438] sm:$0xff] %v10821_v1 }
 0x6fc   : > { %10966 = vst [vmem:[%s20036_s5 + $0x440] sm:$0xff] %v10822_v31  ;;  %10967 = vst [vmem:[%s20036_s5 + $0x448] sm:$0xff] %v10823_v11 }
 0x6fd   : > { %10968 = vst [vmem:[%s20036_s5 + $0x450] sm:$0xff] %v10824_v50  ;;  %10969 = vst [vmem:[%s20036_s5 + $0x458] sm:$0xff] %v10825_v28 }
 0x6fe   : > { %10970 = vst [vmem:[%s20036_s5 + $0x460] sm:$0xff] %v10826_v53  ;;  %10971 = vst [vmem:[%s20036_s5 + $0x468] sm:$0xff] %v10827_v18 }
 0x6ff   : > { %10972 = vst [vmem:[%s20036_s5 + $0x470] sm:$0xff] %v10828_v55  ;;  %10973 = vst [vmem:[%s20036_s5 + $0x478] sm:$0xff] %v10829_v5 }
 0x700 PF: > { %p13584_p2 = scmp.le.s32.totalorder %s16808_s18, 0 }
 0x701   : > { %v10978_v41 = vld [vmem:[%s20036_s5] sm:$0xff] (!%p13584_p2)  ;;  %v10979_v7 = vld [vmem:[%s20036_s5 + $0x8] sm:$0xff] (!%p13584_p2)  ;;  %v10980_v35 = vld [vmem:[%s20036_s5 + $0x10] sm:$0xff] (!%p13584_p2) }
 0x702   : > { %10977 = sbr.rel (%p13584_p2) target bundleno = 1894 (0x766), region = 52  ;;  %v11122_v20 = vadd.f32 (!%p13584_p2), %v19502_v37, %v10978_v41  ;;  %v11123_v63 = vadd.f32 (!%p13584_p2), %v19505_v59, %v10979_v7  ;;  %v11124_v60 = vadd.f32 (!%p13584_p2), %v10980_v35, %v19722_v19  ;;  %v10981_v46 = vld [vmem:[%s20036_s5 + $0x18] sm:$0xff] (!%p13584_p2)  ;;  %v10982_v33 = vld [vmem:[%s20036_s5 + $0x20] sm:$0xff] (!%p13584_p2)  ;;  %v10983_v1 = vld [vmem:[%s20036_s5 + $0x28] sm:$0xff] (!%p13584_p2) }
 0x703   : > { %v11125_v31 = vadd.f32 (!%p13584_p2), %v10981_v46, %v19724_v49  ;;  %v11126_v11 = vadd.f32 (!%p13584_p2), %v19891_v56, %v10982_v33  ;;  %v21710_v50 = vld [vmem:[#allocation69_spill] sm:$0xff] (!%p13584_p2)  ;;  %v10984_v37 = vld [vmem:[%s20036_s5 + $0x30] sm:$0xff] (!%p13584_p2)  ;;  %v10985_v28 = vld [vmem:[%s20036_s5 + $0x38] sm:$0xff] (!%p13584_p2) }
 0x704   : > { %v11127_v61 = vadd.f32 (!%p13584_p2), %v21710_v50, %v10983_v1  ;;  %v10986_v59 = vld [vmem:[%s20036_s5 + $0x40] sm:$0xff] (!%p13584_p2)  ;;  %11266 = vst [vmem:[%s20036_s5] sm:$0xff] (!%p13584_p2), %v11122_v20  ;;  %11267 = vst [vmem:[%s20036_s5 + $0x8] sm:$0xff] (!%p13584_p2), %v11123_v63  ;;  %v10987_v16 = vld [vmem:[%s20036_s5 + $0x48] sm:$0xff] (!%p13584_p2) }
 0x705   : > { %11268 = vst [vmem:[%s20036_s5 + $0x10] sm:$0xff] (!%p13584_p2), %v11124_v60  ;;  %v21711_v19 = vld [vmem:[#allocation116_spill] sm:$0xff] (!%p13584_p2)  ;;  %v11130_v56 = vadd.f32 (!%p13584_p2), %v10986_v59, %v19726_v17  ;;  %v10988_v18 = vld [vmem:[%s20036_s5 + $0x50] sm:$0xff] (!%p13584_p2)  ;;  %v10989_v40 = vld [vmem:[%s20036_s5 + $0x58] sm:$0xff] (!%p13584_p2)  ;;  %v11131_v55 = vadd.f32 (!%p13584_p2), %v10987_v16, %v19728_v44 }
 0x706   : > { %v11128_v51 = vadd.f32 (!%p13584_p2), %v21711_v19, %v10984_v37  ;;  %v21712_v53 = vld [vmem:[#allocation24_spill] sm:$0xff] (!%p13584_p2)  ;;  %11269 = vst [vmem:[%s20036_s5 + $0x18] sm:$0xff] (!%p13584_p2), %v11125_v31  ;;  %11270 = vst [vmem:[%s20036_s5 + $0x20] sm:$0xff] (!%p13584_p2), %v11126_v11  ;;  %v11132_v23 = vadd.f32 (!%p13584_p2), %v19903_v21, %v10988_v18  ;;  %v11133_v5 = vadd.f32 (!%p13584_p2), %v19909_v32, %v10989_v40  ;;  %v10991_v17 = vld [vmem:[%s20036_s5 + $0x68] sm:$0xff] (!%p13584_p2) }
 0x707   : > { %v11129_v49 = vadd.f32 (!%p13584_p2), %v21712_v53, %v10985_v28  ;;  %11271 = vst [vmem:[%s20036_s5 + $0x28] sm:$0xff] (!%p13584_p2), %v11127_v61  ;;  %v10990_v41 = vld [vmem:[%s20036_s5 + $0x60] sm:$0xff] (!%p13584_p2)  ;;  %v10992_v7 = vld [vmem:[%s20036_s5 + $0x70] sm:$0xff] (!%p13584_p2)  ;;  %11274 = vst [vmem:[%s20036_s5 + $0x40] sm:$0xff] (!%p13584_p2), %v11130_v56  ;;  %v11135_v44 = vadd.f32 (!%p13584_p2), %v19525_v22, %v10991_v17 }
 0x708   : > { %11272 = vst [vmem:[%s20036_s5 + $0x30] sm:$0xff] (!%p13584_p2), %v11128_v51  ;;  %v11134_v35 = vadd.f32 (!%p13584_p2), %v19522_v48, %v10990_v41  ;;  %v11136_v21 = vadd.f32 (!%p13584_p2), %v10992_v7, %v19730_v29  ;;  %v10993_v20 = vld [vmem:[%s20036_s5 + $0x78] sm:$0xff] (!%p13584_p2)  ;;  %v10994_v32 = vld [vmem:[%s20036_s5 + $0x80] sm:$0xff] (!%p13584_p2)  ;;  %v10995_v63 = vld [vmem:[%s20036_s5 + $0x88] sm:$0xff] (!%p13584_p2) }
 0x709   : > { %11273 = vst [vmem:[%s20036_s5 + $0x38] sm:$0xff] %v11129_v49  ;;  %11275 = vst [vmem:[%s20036_s5 + $0x48] sm:$0xff] %v11131_v55  ;;  %v11137_v60 = vadd.f32 %v10993_v20, %v19732_v4  ;;  %v11138_v48 = vadd.f32 %v19915_v9, %v10994_v32  ;;  %v11139_v22 = vadd.f32 %v19921_v45, %v10995_v63  ;;  %v10996_v46 = vld [vmem:[%s20036_s5 + $0x90] sm:$0xff]  ;;  %v10997_v29 = vld [vmem:[%s20036_s5 + $0x98] sm:$0xff] }
 0x70a   : > { %11276 = vst [vmem:[%s20036_s5 + $0x50] sm:$0xff] %v11132_v23  ;;  %11277 = vst [vmem:[%s20036_s5 + $0x58] sm:$0xff] %v11133_v5  ;;  %v10998_v33 = vld [vmem:[%s20036_s5 + $0xa0] sm:$0xff]  ;;  %v11140_v1 = vadd.f32 %v19528_v2, %v10996_v46  ;;  %v11141_v4 = vadd.f32 %v19532_v14, %v10997_v29  ;;  %v10999_v31 = vld [vmem:[%s20036_s5 + $0xa8] sm:$0xff] }
 0x70b   : > { %11278 = vst [vmem:[%s20036_s5 + $0x60] sm:$0xff] %v11134_v35  ;;  %11279 = vst [vmem:[%s20036_s5 + $0x68] sm:$0xff] %v11135_v44  ;;  %v11142_v9 = vadd.f32 %v10998_v33, %v19734_v13  ;;  %v11000_v45 = vld [vmem:[%s20036_s5 + $0xb0] sm:$0xff]  ;;  %v11001_v11 = vld [vmem:[%s20036_s5 + $0xb8] sm:$0xff]  ;;  %v11143_v50 = vadd.f32 %v10999_v31, %v19736_v30 }
 0x70c   : > { %11280 = vst [vmem:[%s20036_s5 + $0x70] sm:$0xff] %v11136_v21  ;;  %11281 = vst [vmem:[%s20036_s5 + $0x78] sm:$0xff] %v11137_v60  ;;  %v11144_v2 = vadd.f32 %v19927_v42, %v11000_v45  ;;  %v11145_v14 = vadd.f32 %v19933_v58, %v11001_v11  ;;  %v11002_v61 = vld [vmem:[%s20036_s5 + $0xc0] sm:$0xff]  ;;  %v11003_v13 = vld [vmem:[%s20036_s5 + $0xc8] sm:$0xff] }
 0x70d   : > { %11282 = vst [vmem:[%s20036_s5 + $0x80] sm:$0xff] %v11138_v48  ;;  %11283 = vst [vmem:[%s20036_s5 + $0x88] sm:$0xff] %v11139_v22  ;;  %v11004_v37 = vld [vmem:[%s20036_s5 + $0xd0] sm:$0xff]  ;;  %v11146_v28 = vadd.f32 %v19542_v38, %v11002_v61  ;;  %v11147_v30 = vadd.f32 %v19545_v62, %v11003_v13  ;;  %v11005_v59 = vld [vmem:[%s20036_s5 + $0xd8] sm:$0xff] }
 0x70e   : > { %11284 = vst [vmem:[%s20036_s5 + $0x90] sm:$0xff] %v11140_v1  ;;  %11285 = vst [vmem:[%s20036_s5 + $0x98] sm:$0xff] %v11141_v4  ;;  %v11148_v42 = vadd.f32 %v11004_v37, %v19738_v6  ;;  %v11006_v58 = vld [vmem:[%s20036_s5 + $0xe0] sm:$0xff]  ;;  %v11007_v19 = vld [vmem:[%s20036_s5 + $0xe8] sm:$0xff]  ;;  %v11149_v51 = vadd.f32 %v11005_v59, %v19740_v36 }
 0x70f   : > { %11286 = vst [vmem:[%s20036_s5 + $0xa0] sm:$0xff] %v11142_v9  ;;  %11287 = vst [vmem:[%s20036_s5 + $0xa8] sm:$0xff] %v11143_v50  ;;  %v11150_v38 = vadd.f32 %v19939_v24, %v11006_v58  ;;  %v11151_v62 = vadd.f32 %v19945_v52, %v11007_v19  ;;  %v11008_v53 = vld [vmem:[%s20036_s5 + $0xf0] sm:$0xff]  ;;  %v11009_v6 = vld [vmem:[%s20036_s5 + $0xf8] sm:$0xff] }
 0x710   : > { %11288 = vst [vmem:[%s20036_s5 + $0xb0] sm:$0xff] %v11144_v2  ;;  %11289 = vst [vmem:[%s20036_s5 + $0xb8] sm:$0xff] %v11145_v14  ;;  %v11010_v49 = vld [vmem:[%s20036_s5 + $0x100] sm:$0xff]  ;;  %v11152_v56 = vadd.f32 %v19548_v25, %v11008_v53  ;;  %v11153_v36 = vadd.f32 %v19552_v57, %v11009_v6  ;;  %v11011_v16 = vld [vmem:[%s20036_s5 + $0x108] sm:$0xff] }
 0x711   : > { %11290 = vst [vmem:[%s20036_s5 + $0xc0] sm:$0xff] %v11146_v28  ;;  %11291 = vst [vmem:[%s20036_s5 + $0xc8] sm:$0xff] %v11147_v30  ;;  %v11154_v24 = vadd.f32 %v11010_v49, %v19742_v8  ;;  %v11012_v52 = vld [vmem:[%s20036_s5 + $0x110] sm:$0xff]  ;;  %v11013_v18 = vld [vmem:[%s20036_s5 + $0x118] sm:$0xff] }
 0x712   : > { %11292 = vst [vmem:[%s20036_s5 + $0xd0] sm:$0xff] %v11148_v42  ;;  %11293 = vst [vmem:[%s20036_s5 + $0xd8] sm:$0xff] %v11149_v51  ;;  %v21713_v40 = vld [vmem:[#allocation60_spill] sm:$0xff]  ;;  %v21714_v23 = vld [vmem:[#allocation79_spill] sm:$0xff] }
 0x713   : > { %11294 = vst [vmem:[%s20036_s5 + $0xe0] sm:$0xff] %v11150_v38  ;;  %11295 = vst [vmem:[%s20036_s5 + $0xe8] sm:$0xff] %v11151_v62  ;;  %v11155_v55 = vadd.f32 %v11011_v16, %v21713_v40  ;;  %v11156_v25 = vadd.f32 %v21714_v23, %v11012_v52  ;;  %v21715_v5 = vld [vmem:[#allocation80_spill] sm:$0xff]  ;;  %v11015_v8 = vld [vmem:[%s20036_s5 + $0x128] sm:$0xff] }
 0x714   : > { %v11157_v57 = vadd.f32 %v21715_v5, %v11013_v18  ;;  %v11014_v41 = vld [vmem:[%s20036_s5 + $0x120] sm:$0xff]  ;;  %v11016_v17 = vld [vmem:[%s20036_s5 + $0x130] sm:$0xff]  ;;  %11296 = vst [vmem:[%s20036_s5 + $0xf0] sm:$0xff] %v11152_v56  ;;  %11297 = vst [vmem:[%s20036_s5 + $0xf8] sm:$0xff] %v11153_v36 }
 0x715   : > { %11298 = vst [vmem:[%s20036_s5 + $0x100] sm:$0xff] %v11154_v24  ;;  %v11158_v7 = vadd.f32 %v19562_v47, %v11014_v41  ;;  %v21716_v35 = vld [vmem:[#allocation25_spill] sm:$0xff]  ;;  %v11017_v32 = vld [vmem:[%s20036_s5 + $0x138] sm:$0xff]  ;;  %v11018_v63 = vld [vmem:[%s20036_s5 + $0x140] sm:$0xff] }
 0x716   : > { %v11159_v44 = vadd.f32 %v21716_v35, %v11015_v8  ;;  %v21717_v21 = vld [vmem:[#allocation61_spill] sm:$0xff]  ;;  %11299 = vst [vmem:[%s20036_s5 + $0x108] sm:$0xff] %v11155_v55  ;;  %11300 = vst [vmem:[%s20036_s5 + $0x110] sm:$0xff] %v11156_v25  ;;  %v21718_v48 = vld [vmem:[#allocation62_spill] sm:$0xff]  ;;  %v11162_v47 = vadd.f32 %v19963_v15, %v11018_v63 }
 0x717   : > { %v11160_v20 = vadd.f32 %v11016_v17, %v21717_v21  ;;  %v11019_v60 = vld [vmem:[%s20036_s5 + $0x148] sm:$0xff]  ;;  %11301 = vst [vmem:[%s20036_s5 + $0x118] sm:$0xff] %v11157_v57  ;;  %v11161_v22 = vadd.f32 %v11017_v32, %v21718_v48  ;;  %v11020_v29 = vld [vmem:[%s20036_s5 + $0x150] sm:$0xff]  ;;  %v11021_v33 = vld [vmem:[%s20036_s5 + $0x158] sm:$0xff] }
 0x718   : > { %v11163_v46 = vadd.f32 %v19969_v54, %v11019_v60  ;;  %v11022_v1 = vld [vmem:[%s20036_s5 + $0x160] sm:$0xff]  ;;  %11302 = vst [vmem:[%s20036_s5 + $0x120] sm:$0xff] %v11158_v7  ;;  %11303 = vst [vmem:[%s20036_s5 + $0x128] sm:$0xff] %v11159_v44  ;;  %v21719_v4 = vld [vmem:[#allocation26_spill] sm:$0xff] }
 0x719   : > { %11304 = vst [vmem:[%s20036_s5 + $0x130] sm:$0xff] %v11160_v20  ;;  %v11164_v9 = vadd.f32 %v21719_v4, %v11020_v29  ;;  %v21720_v31 = vld [vmem:[#allocation27_spill] sm:$0xff]  ;;  %v11023_v50 = vld [vmem:[%s20036_s5 + $0x168] sm:$0xff]  ;;  %v11024_v54 = vld [vmem:[%s20036_s5 + $0x170] sm:$0xff] }
 0x71a   : > { %v11165_v45 = vadd.f32 %v21720_v31, %v11021_v33  ;;  %v21721_v11 = vld [vmem:[#allocation63_spill] sm:$0xff]  ;;  %11305 = vst [vmem:[%s20036_s5 + $0x138] sm:$0xff] %v11161_v22  ;;  %11306 = vst [vmem:[%s20036_s5 + $0x140] sm:$0xff] %v11162_v47  ;;  %v21722_v14 = vld [vmem:[#allocation64_spill] sm:$0xff]  ;;  %v11168_v13 = vadd.f32 %v19975_v3, %v11024_v54 }
 0x71b   : > { %v11166_v15 = vadd.f32 %v11022_v1, %v21721_v11  ;;  %v11025_v2 = vld [vmem:[%s20036_s5 + $0x178] sm:$0xff]  ;;  %11307 = vst [vmem:[%s20036_s5 + $0x148] sm:$0xff] %v11163_v46  ;;  %v11167_v61 = vadd.f32 %v11023_v50, %v21722_v14  ;;  %v21723_v37 = vld [vmem:[#allocation84_spill] sm:$0xff]  ;;  %v11027_v42 = vld [vmem:[%s20036_s5 + $0x188] sm:$0xff] }
 0x71c   : > { %v11169_v28 = vadd.f32 %v21723_v37, %v11025_v2  ;;  %v11026_v30 = vld [vmem:[%s20036_s5 + $0x180] sm:$0xff]  ;;  %v11028_v59 = vld [vmem:[%s20036_s5 + $0x190] sm:$0xff]  ;;  %11308 = vst [vmem:[%s20036_s5 + $0x150] sm:$0xff] %v11164_v9  ;;  %11309 = vst [vmem:[%s20036_s5 + $0x158] sm:$0xff] %v11165_v45 }
 0x71d   : > { %11310 = vst [vmem:[%s20036_s5 + $0x160] sm:$0xff] %v11166_v15  ;;  %v21724_v58 = vld [vmem:[#allocation28_spill] sm:$0xff]  ;;  %v21725_v51 = vld [vmem:[#allocation29_spill] sm:$0xff]  ;;  %v11029_v53 = vld [vmem:[%s20036_s5 + $0x198] sm:$0xff] }
 0x71e   : > { %v11170_v19 = vadd.f32 %v21724_v58, %v11026_v30  ;;  %v11171_v38 = vadd.f32 %v21725_v51, %v11027_v42  ;;  %v21726_v62 = vld [vmem:[#allocation65_spill] sm:$0xff]  ;;  %v11030_v6 = vld [vmem:[%s20036_s5 + $0x1a0] sm:$0xff]  ;;  %11311 = vst [vmem:[%s20036_s5 + $0x168] sm:$0xff] %v11167_v61  ;;  %11312 = vst [vmem:[%s20036_s5 + $0x170] sm:$0xff] %v11168_v13 }
 0x71f   : > { %v11172_v3 = vadd.f32 %v11028_v59, %v21726_v62  ;;  %v11031_v49 = vld [vmem:[%s20036_s5 + $0x1a8] sm:$0xff]  ;;  %11313 = vst [vmem:[%s20036_s5 + $0x178] sm:$0xff] %v11169_v28  ;;  %v21727_v56 = vld [vmem:[#allocation66_spill] sm:$0xff]  ;;  %v11174_v24 = vadd.f32 %v19987_v0, %v11030_v6  ;;  %v11033_v18 = vld [vmem:[%s20036_s5 + $0x1b8] sm:$0xff] }
 0x720   : > { %v11173_v36 = vadd.f32 %v11029_v53, %v21727_v56  ;;  %v11175_v16 = vadd.f32 %v19993_v34, %v11031_v49  ;;  %v11032_v52 = vld [vmem:[%s20036_s5 + $0x1b0] sm:$0xff]  ;;  %v11034_v40 = vld [vmem:[%s20036_s5 + $0x1c0] sm:$0xff]  ;;  %11314 = vst [vmem:[%s20036_s5 + $0x180] sm:$0xff] %v11170_v19  ;;  %11315 = vst [vmem:[%s20036_s5 + $0x188] sm:$0xff] %v11171_v38 }
 0x721   : > { %11316 = vst [vmem:[%s20036_s5 + $0x190] sm:$0xff] %v11172_v3  ;;  %v21728_v55 = vld [vmem:[#allocation30_spill] sm:$0xff]  ;;  %v21729_v25 = vld [vmem:[#allocation31_spill] sm:$0xff]  ;;  %v11035_v41 = vld [vmem:[%s20036_s5 + $0x1c8] sm:$0xff] }
 0x722   : > { %v11176_v23 = vadd.f32 %v21728_v55, %v11032_v52  ;;  %v11177_v5 = vadd.f32 %v21729_v25, %v11033_v18  ;;  %v21730_v57 = vld [vmem:[#allocation67_spill] sm:$0xff]  ;;  %v11036_v34 = vld [vmem:[%s20036_s5 + $0x1d0] sm:$0xff]  ;;  %11317 = vst [vmem:[%s20036_s5 + $0x198] sm:$0xff] %v11173_v36  ;;  %11318 = vst [vmem:[%s20036_s5 + $0x1a0] sm:$0xff] %v11174_v24 }
 0x723   : > { %v11178_v0 = vadd.f32 %v11034_v40, %v21730_v57  ;;  %v11037_v8 = vld [vmem:[%s20036_s5 + $0x1d8] sm:$0xff]  ;;  %11319 = vst [vmem:[%s20036_s5 + $0x1a8] sm:$0xff] %v11175_v16  ;;  %v21731_v17 = vld [vmem:[#allocation68_spill] sm:$0xff]  ;;  %v11180_v35 = vadd.f32 %v19999_v27, %v11036_v34  ;;  %v11039_v20 = vld [vmem:[%s20036_s5 + $0x1e8] sm:$0xff] }
 0x724   : > { %v11179_v7 = vadd.f32 %v11035_v41, %v21731_v17  ;;  %v11181_v44 = vadd.f32 %v20005_v26, %v11037_v8  ;;  %v11038_v21 = vld [vmem:[%s20036_s5 + $0x1e0] sm:$0xff]  ;;  %v11040_v32 = vld [vmem:[%s20036_s5 + $0x1f0] sm:$0xff]  ;;  %11320 = vst [vmem:[%s20036_s5 + $0x1b0] sm:$0xff] %v11176_v23  ;;  %11321 = vst [vmem:[%s20036_s5 + $0x1b8] sm:$0xff] %v11177_v5 }
 0x725   : > { %11322 = vst [vmem:[%s20036_s5 + $0x1c0] sm:$0xff] %v11178_v0  ;;  %v21732_v63 = vld [vmem:[#allocation32_spill] sm:$0xff]  ;;  %v21733_v48 = vld [vmem:[#allocation33_spill] sm:$0xff]  ;;  %v11041_v46 = vld [vmem:[%s20036_s5 + $0x1f8] sm:$0xff] }
 0x726   : > { %v11182_v60 = vadd.f32 %v21732_v63, %v11038_v21  ;;  %v11183_v22 = vadd.f32 %v21733_v48, %v11039_v20  ;;  %v21734_v47 = vld [vmem:[#allocation117_spill] sm:$0xff]  ;;  %v11042_v26 = vld [vmem:[%s20036_s5 + $0x200] sm:$0xff]  ;;  %11323 = vst [vmem:[%s20036_s5 + $0x1c8] sm:$0xff] %v11179_v7  ;;  %11324 = vst [vmem:[%s20036_s5 + $0x1d0] sm:$0xff] %v11180_v35 }
 0x727   : > { %v11184_v27 = vadd.f32 %v11040_v32, %v21734_v47  ;;  %v11043_v29 = vld [vmem:[%s20036_s5 + $0x208] sm:$0xff]  ;;  %11325 = vst [vmem:[%s20036_s5 + $0x1d8] sm:$0xff] %v11181_v44  ;;  %v21735_v33 = vld [vmem:[#allocation118_spill] sm:$0xff]  ;;  %v11186_v4 = vadd.f32 %v20011_v39, %v11042_v26  ;;  %v11045_v45 = vld [vmem:[%s20036_s5 + $0x218] sm:$0xff] }
 0x728   : > { %v11185_v1 = vadd.f32 %v11041_v46, %v21735_v33  ;;  %v11187_v9 = vadd.f32 %v20017_v10, %v11043_v29  ;;  %v11044_v31 = vld [vmem:[%s20036_s5 + $0x210] sm:$0xff]  ;;  %v11046_v11 = vld [vmem:[%s20036_s5 + $0x220] sm:$0xff]  ;;  %11326 = vst [vmem:[%s20036_s5 + $0x1e0] sm:$0xff] %v11182_v60  ;;  %11327 = vst [vmem:[%s20036_s5 + $0x1e8] sm:$0xff] %v11183_v22 }
 0x729   : > { %11328 = vst [vmem:[%s20036_s5 + $0x1f0] sm:$0xff] %v11184_v27  ;;  %v21736_v15 = vld [vmem:[#allocation34_spill] sm:$0xff]  ;;  %v21737_v54 = vld [vmem:[#allocation35_spill] sm:$0xff]  ;;  %v11047_v61 = vld [vmem:[%s20036_s5 + $0x228] sm:$0xff] }
 0x72a   : > { %v11188_v50 = vadd.f32 %v21736_v15, %v11044_v31  ;;  %v11189_v2 = vadd.f32 %v21737_v54, %v11045_v45  ;;  %v21738_v14 = vld [vmem:[#allocation119_spill] sm:$0xff]  ;;  %v11048_v10 = vld [vmem:[%s20036_s5 + $0x230] sm:$0xff]  ;;  %11329 = vst [vmem:[%s20036_s5 + $0x1f8] sm:$0xff] %v11185_v1  ;;  %11330 = vst [vmem:[%s20036_s5 + $0x200] sm:$0xff] %v11186_v4 }
 0x72b   : > { %v11190_v39 = vadd.f32 %v11046_v11, %v21738_v14  ;;  %v11049_v13 = vld [vmem:[%s20036_s5 + $0x238] sm:$0xff]  ;;  %11331 = vst [vmem:[%s20036_s5 + $0x208] sm:$0xff] %v11187_v9  ;;  %v21739_v37 = vld [vmem:[#allocation120_spill] sm:$0xff]  ;;  %v11192_v30 = vadd.f32 %v20023_v43, %v11048_v10  ;;  %v11051_v58 = vld [vmem:[%s20036_s5 + $0x248] sm:$0xff] }
 0x72c   : > { %v11191_v28 = vadd.f32 %v11047_v61, %v21739_v37  ;;  %v11193_v42 = vadd.f32 %v20029_v12, %v11049_v13  ;;  %v11050_v59 = vld [vmem:[%s20036_s5 + $0x240] sm:$0xff]  ;;  %v11052_v19 = vld [vmem:[%s20036_s5 + $0x250] sm:$0xff]  ;;  %11332 = vst [vmem:[%s20036_s5 + $0x210] sm:$0xff] %v11188_v50  ;;  %11333 = vst [vmem:[%s20036_s5 + $0x218] sm:$0xff] %v11189_v2 }
 0x72d   : > { %11334 = vst [vmem:[%s20036_s5 + $0x220] sm:$0xff] %v11190_v39  ;;  %v21740_v51 = vld [vmem:[#allocation36_spill] sm:$0xff]  ;;  %v21741_v62 = vld [vmem:[#allocation37_spill] sm:$0xff]  ;;  %v11053_v6 = vld [vmem:[%s20036_s5 + $0x258] sm:$0xff] }
 0x72e   : > { %v11194_v38 = vadd.f32 %v21740_v51, %v11050_v59  ;;  %v11195_v3 = vadd.f32 %v21741_v62, %v11051_v58  ;;  %v21742_v53 = vld [vmem:[#allocation121_spill] sm:$0xff]  ;;  %v11054_v12 = vld [vmem:[%s20036_s5 + $0x260] sm:$0xff]  ;;  %11335 = vst [vmem:[%s20036_s5 + $0x228] sm:$0xff] %v11191_v28  ;;  %11336 = vst [vmem:[%s20036_s5 + $0x230] sm:$0xff] %v11192_v30 }
 0x72f   : > { %v11196_v43 = vadd.f32 %v11052_v19, %v21742_v53  ;;  %v11055_v49 = vld [vmem:[%s20036_s5 + $0x268] sm:$0xff]  ;;  %11337 = vst [vmem:[%s20036_s5 + $0x238] sm:$0xff] %v11193_v42  ;;  %v21744_v24 = vld [vmem:[#allocation115_spill] sm:$0xff]  ;;  %v21745_v52 = vld [vmem:[#allocation70_spill] sm:$0xff] }
 0x730   : > { %v21743_v56 = vld [vmem:[#allocation93_spill] sm:$0xff]  ;;  %v11198_v16 = vadd.f32 %v21744_v24, %v11054_v12  ;;  %v11199_v18 = vadd.f32 %v21745_v52, %v11055_v49  ;;  %v11056_v40 = vld [vmem:[%s20036_s5 + $0x270] sm:$0xff]  ;;  %v11057_v55 = vld [vmem:[%s20036_s5 + $0x278] sm:$0xff]  ;;  %11338 = vst [vmem:[%s20036_s5 + $0x240] sm:$0xff] %v11194_v38 }
 0x731   : > { %v11197_v36 = vadd.f32 %v11053_v6, %v21743_v56  ;;  %v11058_v23 = vld [vmem:[%s20036_s5 + $0x280] sm:$0xff]  ;;  %11339 = vst [vmem:[%s20036_s5 + $0x248] sm:$0xff] %v11195_v3  ;;  %11340 = vst [vmem:[%s20036_s5 + $0x250] sm:$0xff] %v11196_v43  ;;  %v21746_v25 = vld [vmem:[#allocation38_spill] sm:$0xff] }
 0x732   : > { %v11200_v5 = vadd.f32 %v21746_v25, %v11056_v40  ;;  %v21747_v57 = vld [vmem:[#allocation39_spill] sm:$0xff]  ;;  %v21748_v41 = vld [vmem:[#allocation94_spill] sm:$0xff]  ;;  %v11059_v8 = vld [vmem:[%s20036_s5 + $0x288] sm:$0xff]  ;;  %11342 = vst [vmem:[%s20036_s5 + $0x260] sm:$0xff] %v11198_v16 }
 0x733   : > { %v11201_v0 = vadd.f32 %v21747_v57, %v11057_v55  ;;  %v11202_v34 = vadd.f32 %v11058_v23, %v21748_v41  ;;  %v11060_v17 = vld [vmem:[%s20036_s5 + $0x290] sm:$0xff]  ;;  %v11061_v7 = vld [vmem:[%s20036_s5 + $0x298] sm:$0xff]  ;;  %11341 = vst [vmem:[%s20036_s5 + $0x258] sm:$0xff] %v11197_v36  ;;  %11343 = vst [vmem:[%s20036_s5 + $0x268] sm:$0xff] %v11199_v18 }
 0x734   : > { %v21749_v35 = vld [vmem:[#allocation95_spill] sm:$0xff]  ;;  %v21751_v32 = vld [vmem:[#allocation72_spill] sm:$0xff]  ;;  %v11063_v48 = vld [vmem:[%s20036_s5 + $0x2a8] sm:$0xff]  ;;  %11344 = vst [vmem:[%s20036_s5 + $0x270] sm:$0xff] %v11200_v5 }
 0x735   : > { %v11203_v44 = vadd.f32 %v11059_v8, %v21749_v35  ;;  %v21750_v21 = vld [vmem:[#allocation71_spill] sm:$0xff]  ;;  %v11205_v63 = vadd.f32 %v21751_v32, %v11061_v7  ;;  %v11062_v60 = vld [vmem:[%s20036_s5 + $0x2a0] sm:$0xff]  ;;  %v11064_v22 = vld [vmem:[%s20036_s5 + $0x2b0] sm:$0xff]  ;;  %11345 = vst [vmem:[%s20036_s5 + $0x278] sm:$0xff] %v11201_v0 }
 0x736   : > { %v11204_v20 = vadd.f32 %v21750_v21, %v11060_v17  ;;  %11346 = vst [vmem:[%s20036_s5 + $0x280] sm:$0xff] %v11202_v34  ;;  %v21752_v47 = vld [vmem:[#allocation40_spill] sm:$0xff]  ;;  %v21753_v46 = vld [vmem:[#allocation41_spill] sm:$0xff]  ;;  %v11065_v1 = vld [vmem:[%s20036_s5 + $0x2b8] sm:$0xff] }
 0x737   : > { %v11206_v27 = vadd.f32 %v21752_v47, %v11062_v60  ;;  %v11207_v26 = vadd.f32 %v21753_v46, %v11063_v48  ;;  %v21754_v29 = vld [vmem:[#allocation96_spill] sm:$0xff]  ;;  %v11067_v9 = vld [vmem:[%s20036_s5 + $0x2c8] sm:$0xff]  ;;  %11347 = vst [vmem:[%s20036_s5 + $0x288] sm:$0xff] %v11203_v44  ;;  %11349 = vst [vmem:[%s20036_s5 + $0x298] sm:$0xff] %v11205_v63 }
 0x738   : > { %v11208_v33 = vadd.f32 %v11064_v22, %v21754_v29  ;;  %v11066_v4 = vld [vmem:[%s20036_s5 + $0x2c0] sm:$0xff]  ;;  %11348 = vst [vmem:[%s20036_s5 + $0x290] sm:$0xff] %v11204_v20  ;;  %v21755_v31 = vld [vmem:[#allocation97_spill] sm:$0xff]  ;;  %v21757_v50 = vld [vmem:[#allocation74_spill] sm:$0xff] }
 0x739   : > { %v11209_v45 = vadd.f32 %v11065_v1, %v21755_v31  ;;  %v21756_v11 = vld [vmem:[#allocation73_spill] sm:$0xff]  ;;  %v11211_v54 = vadd.f32 %v21757_v50, %v11067_v9  ;;  %v11068_v2 = vld [vmem:[%s20036_s5 + $0x2d0] sm:$0xff]  ;;  %v11069_v14 = vld [vmem:[%s20036_s5 + $0x2d8] sm:$0xff]  ;;  %11350 = vst [vmem:[%s20036_s5 + $0x2a0] sm:$0xff] %v11206_v27 }
 0x73a   : > { %v11210_v15 = vadd.f32 %v21756_v11, %v11066_v4  ;;  %v11070_v39 = vld [vmem:[%s20036_s5 + $0x2e0] sm:$0xff]  ;;  %11351 = vst [vmem:[%s20036_s5 + $0x2a8] sm:$0xff] %v11207_v26  ;;  %11352 = vst [vmem:[%s20036_s5 + $0x2b0] sm:$0xff] %v11208_v33  ;;  %v21758_v61 = vld [vmem:[#allocation42_spill] sm:$0xff] }
 0x73b   : > { %v11212_v10 = vadd.f32 %v21758_v61, %v11068_v2  ;;  %v21759_v13 = vld [vmem:[#allocation43_spill] sm:$0xff]  ;;  %v21760_v28 = vld [vmem:[#allocation98_spill] sm:$0xff]  ;;  %v11071_v42 = vld [vmem:[%s20036_s5 + $0x2e8] sm:$0xff]  ;;  %11353 = vst [vmem:[%s20036_s5 + $0x2b8] sm:$0xff] %v11209_v45 }
 0x73c   : > { %v11213_v37 = vadd.f32 %v21759_v13, %v11069_v14  ;;  %v11214_v30 = vadd.f32 %v11070_v39, %v21760_v28  ;;  %v11072_v59 = vld [vmem:[%s20036_s5 + $0x2f0] sm:$0xff]  ;;  %v11073_v58 = vld [vmem:[%s20036_s5 + $0x2f8] sm:$0xff]  ;;  %11354 = vst [vmem:[%s20036_s5 + $0x2c0] sm:$0xff] %v11210_v15  ;;  %11355 = vst [vmem:[%s20036_s5 + $0x2c8] sm:$0xff] %v11211_v54 }
 0x73d   : > { %v21761_v19 = vld [vmem:[#allocation99_spill] sm:$0xff]  ;;  %v21763_v3 = vld [vmem:[#allocation76_spill] sm:$0xff]  ;;  %v11075_v6 = vld [vmem:[%s20036_s5 + $0x308] sm:$0xff]  ;;  %11356 = vst [vmem:[%s20036_s5 + $0x2d0] sm:$0xff] %v11212_v10 }
 0x73e   : > { %v11215_v51 = vadd.f32 %v11071_v42, %v21761_v19  ;;  %v21762_v38 = vld [vmem:[#allocation75_spill] sm:$0xff]  ;;  %v11217_v53 = vadd.f32 %v21763_v3, %v11073_v58  ;;  %v11074_v43 = vld [vmem:[%s20036_s5 + $0x300] sm:$0xff]  ;;  %v11076_v12 = vld [vmem:[%s20036_s5 + $0x310] sm:$0xff]  ;;  %11357 = vst [vmem:[%s20036_s5 + $0x2d8] sm:$0xff] %v11213_v37 }
 0x73f   : > { %v11216_v62 = vadd.f32 %v21762_v38, %v11072_v59  ;;  %11358 = vst [vmem:[%s20036_s5 + $0x2e0] sm:$0xff] %v11214_v30  ;;  %v21764_v49 = vld [vmem:[#allocation44_spill] sm:$0xff]  ;;  %v21765_v36 = vld [vmem:[#allocation45_spill] sm:$0xff]  ;;  %v11077_v18 = vld [vmem:[%s20036_s5 + $0x318] sm:$0xff] }
 0x740   : > { %v11218_v56 = vadd.f32 %v21764_v49, %v11074_v43  ;;  %v11219_v24 = vadd.f32 %v21765_v36, %v11075_v6  ;;  %v21766_v16 = vld [vmem:[#allocation100_spill] sm:$0xff]  ;;  %v11079_v55 = vld [vmem:[%s20036_s5 + $0x328] sm:$0xff]  ;;  %11359 = vst [vmem:[%s20036_s5 + $0x2e8] sm:$0xff] %v11215_v51  ;;  %11361 = vst [vmem:[%s20036_s5 + $0x2f8] sm:$0xff] %v11217_v53 }
 0x741   : > { %v11220_v52 = vadd.f32 %v11076_v12, %v21766_v16  ;;  %v11078_v40 = vld [vmem:[%s20036_s5 + $0x320] sm:$0xff]  ;;  %11360 = vst [vmem:[%s20036_s5 + $0x2f0] sm:$0xff] %v11216_v62  ;;  %v21767_v23 = vld [vmem:[#allocation101_spill] sm:$0xff]  ;;  %v21769_v0 = vld [vmem:[#allocation78_spill] sm:$0xff] }
 0x742   : > { %v11221_v25 = vadd.f32 %v11077_v18, %v21767_v23  ;;  %v21768_v5 = vld [vmem:[#allocation77_spill] sm:$0xff]  ;;  %v11223_v41 = vadd.f32 %v21769_v0, %v11079_v55  ;;  %v11080_v34 = vld [vmem:[%s20036_s5 + $0x330] sm:$0xff]  ;;  %v11081_v8 = vld [vmem:[%s20036_s5 + $0x338] sm:$0xff]  ;;  %11362 = vst [vmem:[%s20036_s5 + $0x300] sm:$0xff] %v11218_v56 }
 0x743   : > { %v11222_v57 = vadd.f32 %v21768_v5, %v11078_v40  ;;  %v11082_v17 = vld [vmem:[%s20036_s5 + $0x340] sm:$0xff]  ;;  %11363 = vst [vmem:[%s20036_s5 + $0x308] sm:$0xff] %v11219_v24  ;;  %11364 = vst [vmem:[%s20036_s5 + $0x310] sm:$0xff] %v11220_v52  ;;  %v21770_v7 = vld [vmem:[#allocation46_spill] sm:$0xff] }
 0x744   : > { %v11224_v35 = vadd.f32 %v21770_v7, %v11080_v34  ;;  %v21771_v44 = vld [vmem:[#allocation47_spill] sm:$0xff]  ;;  %v21772_v20 = vld [vmem:[#allocation102_spill] sm:$0xff]  ;;  %v11083_v63 = vld [vmem:[%s20036_s5 + $0x348] sm:$0xff]  ;;  %11365 = vst [vmem:[%s20036_s5 + $0x318] sm:$0xff] %v11221_v25 }
 0x745   : > { %v11225_v21 = vadd.f32 %v21771_v44, %v11081_v8  ;;  %v11226_v32 = vadd.f32 %v11082_v17, %v21772_v20  ;;  %v11084_v60 = vld [vmem:[%s20036_s5 + $0x350] sm:$0xff]  ;;  %v11085_v48 = vld [vmem:[%s20036_s5 + $0x358] sm:$0xff]  ;;  %11366 = vst [vmem:[%s20036_s5 + $0x320] sm:$0xff] %v11222_v57  ;;  %11367 = vst [vmem:[%s20036_s5 + $0x328] sm:$0xff] %v11223_v41 }
 0x746   : > { %v21773_v22 = vld [vmem:[#allocation103_spill] sm:$0xff]  ;;  %v21775_v26 = vld [vmem:[#allocation124_spill] sm:$0xff]  ;;  %v11087_v1 = vld [vmem:[%s20036_s5 + $0x368] sm:$0xff]  ;;  %11368 = vst [vmem:[%s20036_s5 + $0x330] sm:$0xff] %v11224_v35 }
 0x747   : > { %v11227_v47 = vadd.f32 %v11083_v63, %v21773_v22  ;;  %v21774_v27 = vld [vmem:[#allocation123_spill] sm:$0xff]  ;;  %v11229_v29 = vadd.f32 %v21775_v26, %v11085_v48  ;;  %v11086_v33 = vld [vmem:[%s20036_s5 + $0x360] sm:$0xff]  ;;  %v11088_v4 = vld [vmem:[%s20036_s5 + $0x370] sm:$0xff]  ;;  %11369 = vst [vmem:[%s20036_s5 + $0x338] sm:$0xff] %v11225_v21 }
 0x748   : > { %v11228_v46 = vadd.f32 %v21774_v27, %v11084_v60  ;;  %11370 = vst [vmem:[%s20036_s5 + $0x340] sm:$0xff] %v11226_v32  ;;  %v21776_v9 = vld [vmem:[#allocation48_spill] sm:$0xff]  ;;  %v21777_v45 = vld [vmem:[#allocation49_spill] sm:$0xff]  ;;  %v11089_v54 = vld [vmem:[%s20036_s5 + $0x378] sm:$0xff] }
 0x749   : > { %v11230_v31 = vadd.f32 %v21776_v9, %v11086_v33  ;;  %v11231_v11 = vadd.f32 %v21777_v45, %v11087_v1  ;;  %v21778_v15 = vld [vmem:[#allocation104_spill] sm:$0xff]  ;;  %v11091_v14 = vld [vmem:[%s20036_s5 + $0x388] sm:$0xff]  ;;  %11371 = vst [vmem:[%s20036_s5 + $0x348] sm:$0xff] %v11227_v47  ;;  %11373 = vst [vmem:[%s20036_s5 + $0x358] sm:$0xff] %v11229_v29 }
 0x74a   : > { %v11232_v50 = vadd.f32 %v11088_v4, %v21778_v15  ;;  %v11090_v2 = vld [vmem:[%s20036_s5 + $0x380] sm:$0xff]  ;;  %11372 = vst [vmem:[%s20036_s5 + $0x350] sm:$0xff] %v11228_v46  ;;  %v21779_v39 = vld [vmem:[#allocation105_spill] sm:$0xff]  ;;  %v21781_v37 = vld [vmem:[#allocation82_spill] sm:$0xff] }
 0x74b   : > { %v11233_v61 = vadd.f32 %v11089_v54, %v21779_v39  ;;  %v21780_v10 = vld [vmem:[#allocation81_spill] sm:$0xff]  ;;  %v11235_v28 = vadd.f32 %v21781_v37, %v11091_v14  ;;  %v11092_v30 = vld [vmem:[%s20036_s5 + $0x390] sm:$0xff]  ;;  %v11093_v42 = vld [vmem:[%s20036_s5 + $0x398] sm:$0xff]  ;;  %11374 = vst [vmem:[%s20036_s5 + $0x360] sm:$0xff] %v11230_v31 }
 0x74c   : > { %v11234_v13 = vadd.f32 %v21780_v10, %v11090_v2  ;;  %v11094_v59 = vld [vmem:[%s20036_s5 + $0x3a0] sm:$0xff]  ;;  %11375 = vst [vmem:[%s20036_s5 + $0x368] sm:$0xff] %v11231_v11  ;;  %11376 = vst [vmem:[%s20036_s5 + $0x370] sm:$0xff] %v11232_v50  ;;  %v21782_v58 = vld [vmem:[#allocation50_spill] sm:$0xff] }
 0x74d   : > { %v11236_v19 = vadd.f32 %v21782_v58, %v11092_v30  ;;  %v21783_v51 = vld [vmem:[#allocation51_spill] sm:$0xff]  ;;  %v21784_v62 = vld [vmem:[#allocation106_spill] sm:$0xff]  ;;  %v11095_v53 = vld [vmem:[%s20036_s5 + $0x3a8] sm:$0xff]  ;;  %11377 = vst [vmem:[%s20036_s5 + $0x378] sm:$0xff] %v11233_v61 }
 0x74e   : > { %v11237_v38 = vadd.f32 %v21783_v51, %v11093_v42  ;;  %v11238_v3 = vadd.f32 %v11094_v59, %v21784_v62  ;;  %v11096_v43 = vld [vmem:[%s20036_s5 + $0x3b0] sm:$0xff]  ;;  %v11097_v6 = vld [vmem:[%s20036_s5 + $0x3b8] sm:$0xff]  ;;  %11378 = vst [vmem:[%s20036_s5 + $0x380] sm:$0xff] %v11234_v13  ;;  %11379 = vst [vmem:[%s20036_s5 + $0x388] sm:$0xff] %v11235_v28 }
 0x74f   : > { %v21785_v12 = vld [vmem:[#allocation107_spill] sm:$0xff]  ;;  %v21787_v24 = vld [vmem:[#allocation125_spill] sm:$0xff]  ;;  %v11098_v52 = vld [vmem:[%s20036_s5 + $0x3c0] sm:$0xff]  ;;  %11380 = vst [vmem:[%s20036_s5 + $0x390] sm:$0xff] %v11236_v19 }
 0x750   : > { %v11239_v49 = vadd.f32 %v11095_v53, %v21785_v12  ;;  %v21786_v56 = vld [vmem:[#allocation83_spill] sm:$0xff]  ;;  %v11241_v16 = vadd.f32 %v21787_v24, %v11097_v6  ;;  %v11099_v18 = vld [vmem:[%s20036_s5 + $0x3c8] sm:$0xff]  ;;  %v11100_v40 = vld [vmem:[%s20036_s5 + $0x3d0] sm:$0xff]  ;;  %11381 = vst [vmem:[%s20036_s5 + $0x398] sm:$0xff] %v11237_v38 }
 0x751   : > { %v11240_v36 = vadd.f32 %v21786_v56, %v11096_v43  ;;  %11382 = vst [vmem:[%s20036_s5 + $0x3a0] sm:$0xff] %v11238_v3  ;;  %v21788_v55 = vld [vmem:[#allocation52_spill] sm:$0xff]  ;;  %v21789_v25 = vld [vmem:[#allocation53_spill] sm:$0xff]  ;;  %v11101_v41 = vld [vmem:[%s20036_s5 + $0x3d8] sm:$0xff] }
 0x752   : > { %v11242_v23 = vadd.f32 %v21788_v55, %v11098_v52  ;;  %v11243_v5 = vadd.f32 %v21789_v25, %v11099_v18  ;;  %v21790_v57 = vld [vmem:[#allocation108_spill] sm:$0xff]  ;;  %v11103_v8 = vld [vmem:[%s20036_s5 + $0x3e8] sm:$0xff]  ;;  %11383 = vst [vmem:[%s20036_s5 + $0x3a8] sm:$0xff] %v11239_v49  ;;  %11385 = vst [vmem:[%s20036_s5 + $0x3b8] sm:$0xff] %v11241_v16 }
 0x753   : > { %v11244_v0 = vadd.f32 %v11100_v40, %v21790_v57  ;;  %v11102_v34 = vld [vmem:[%s20036_s5 + $0x3e0] sm:$0xff]  ;;  %11384 = vst [vmem:[%s20036_s5 + $0x3b0] sm:$0xff] %v11240_v36  ;;  %v21791_v17 = vld [vmem:[#allocation109_spill] sm:$0xff]  ;;  %v21793_v21 = vld [vmem:[#allocation86_spill] sm:$0xff] }
 0x754   : > { %v11245_v7 = vadd.f32 %v11101_v41, %v21791_v17  ;;  %v21792_v35 = vld [vmem:[#allocation85_spill] sm:$0xff]  ;;  %v11247_v20 = vadd.f32 %v21793_v21, %v11103_v8  ;;  %v11104_v32 = vld [vmem:[%s20036_s5 + $0x3f0] sm:$0xff]  ;;  %v11105_v63 = vld [vmem:[%s20036_s5 + $0x3f8] sm:$0xff]  ;;  %11386 = vst [vmem:[%s20036_s5 + $0x3c0] sm:$0xff] %v11242_v23 }
 0x755   : > { %v11246_v44 = vadd.f32 %v21792_v35, %v11102_v34  ;;  %v11106_v60 = vld [vmem:[%s20036_s5 + $0x400] sm:$0xff]  ;;  %11387 = vst [vmem:[%s20036_s5 + $0x3c8] sm:$0xff] %v11243_v5  ;;  %11388 = vst [vmem:[%s20036_s5 + $0x3d0] sm:$0xff] %v11244_v0  ;;  %v21794_v48 = vld [vmem:[#allocation54_spill] sm:$0xff] }
 0x756   : > { %v11248_v22 = vadd.f32 %v21794_v48, %v11104_v32  ;;  %v21795_v47 = vld [vmem:[#allocation55_spill] sm:$0xff]  ;;  %v21796_v46 = vld [vmem:[#allocation110_spill] sm:$0xff]  ;;  %v11107_v29 = vld [vmem:[%s20036_s5 + $0x408] sm:$0xff]  ;;  %11389 = vst [vmem:[%s20036_s5 + $0x3d8] sm:$0xff] %v11245_v7 }
 0x757   : > { %v11249_v27 = vadd.f32 %v21795_v47, %v11105_v63  ;;  %v11250_v26 = vadd.f32 %v11106_v60, %v21796_v46  ;;  %v11108_v33 = vld [vmem:[%s20036_s5 + $0x410] sm:$0xff]  ;;  %v11109_v1 = vld [vmem:[%s20036_s5 + $0x418] sm:$0xff]  ;;  %11390 = vst [vmem:[%s20036_s5 + $0x3e0] sm:$0xff] %v11246_v44  ;;  %11391 = vst [vmem:[%s20036_s5 + $0x3e8] sm:$0xff] %v11247_v20 }
 0x758   : > { %v21797_v4 = vld [vmem:[#allocation111_spill] sm:$0xff]  ;;  %v21799_v11 = vld [vmem:[#allocation88_spill] sm:$0xff]  ;;  %v11111_v54 = vld [vmem:[%s20036_s5 + $0x428] sm:$0xff]  ;;  %11392 = vst [vmem:[%s20036_s5 + $0x3f0] sm:$0xff] %v11248_v22 }
 0x759   : > { %v11251_v9 = vadd.f32 %v11107_v29, %v21797_v4  ;;  %v21798_v31 = vld [vmem:[#allocation87_spill] sm:$0xff]  ;;  %v11253_v15 = vadd.f32 %v21799_v11, %v11109_v1  ;;  %v11110_v50 = vld [vmem:[%s20036_s5 + $0x420] sm:$0xff]  ;;  %v11112_v2 = vld [vmem:[%s20036_s5 + $0x430] sm:$0xff]  ;;  %11393 = vst [vmem:[%s20036_s5 + $0x3f8] sm:$0xff] %v11249_v27 }
 0x75a   : > { %v11252_v45 = vadd.f32 %v21798_v31, %v11108_v33  ;;  %11394 = vst [vmem:[%s20036_s5 + $0x400] sm:$0xff] %v11250_v26  ;;  %v21800_v14 = vld [vmem:[#allocation56_spill] sm:$0xff]  ;;  %v21801_v61 = vld [vmem:[#allocation57_spill] sm:$0xff]  ;;  %v11113_v28 = vld [vmem:[%s20036_s5 + $0x438] sm:$0xff] }
 0x75b   : > { %v11254_v39 = vadd.f32 %v21800_v14, %v11110_v50  ;;  %v11255_v10 = vadd.f32 %v21801_v61, %v11111_v54  ;;  %v21802_v13 = vld [vmem:[#allocation112_spill] sm:$0xff]  ;;  %v11115_v42 = vld [vmem:[%s20036_s5 + $0x448] sm:$0xff]  ;;  %11395 = vst [vmem:[%s20036_s5 + $0x408] sm:$0xff] %v11251_v9  ;;  %11397 = vst [vmem:[%s20036_s5 + $0x418] sm:$0xff] %v11253_v15 }
 0x75c   : > { %v11256_v37 = vadd.f32 %v11112_v2, %v21802_v13  ;;  %v11114_v30 = vld [vmem:[%s20036_s5 + $0x440] sm:$0xff]  ;;  %11396 = vst [vmem:[%s20036_s5 + $0x410] sm:$0xff] %v11252_v45  ;;  %v21803_v59 = vld [vmem:[#allocation122_spill] sm:$0xff]  ;;  %v21804_v19 = vld [vmem:[#allocation89_spill] sm:$0xff] }
 0x75d   : > { %v11257_v58 = vadd.f32 %v11113_v28, %v21803_v59  ;;  %v11258_v51 = vadd.f32 %v21804_v19, %v11114_v30  ;;  %v21805_v38 = vld [vmem:[#allocation90_spill] sm:$0xff]  ;;  %v11117_v53 = vld [vmem:[%s20036_s5 + $0x458] sm:$0xff]  ;;  %v11118_v43 = vld [vmem:[%s20036_s5 + $0x460] sm:$0xff]  ;;  %11398 = vst [vmem:[%s20036_s5 + $0x420] sm:$0xff] %v11254_v39 }
 0x75e   : > { %v11259_v62 = vadd.f32 %v21805_v38, %v11115_v42  ;;  %v11116_v3 = vld [vmem:[%s20036_s5 + $0x450] sm:$0xff]  ;;  %11399 = vst [vmem:[%s20036_s5 + $0x428] sm:$0xff] %v11255_v10  ;;  %11400 = vst [vmem:[%s20036_s5 + $0x430] sm:$0xff] %v11256_v37  ;;  %v21807_v49 = vld [vmem:[#allocation59_spill] sm:$0xff] }
 0x75f   : > { %v21806_v6 = vld [vmem:[#allocation58_spill] sm:$0xff]  ;;  %v11261_v56 = vadd.f32 %v21807_v49, %v11117_v53  ;;  %v21808_v36 = vld [vmem:[#allocation113_spill] sm:$0xff]  ;;  %v11121_v18 = vld [vmem:[%s20036_s5 + $0x478] sm:$0xff]  ;;  %11401 = vst [vmem:[%s20036_s5 + $0x438] sm:$0xff] %v11257_v58 }
 0x760   : > { %v11260_v12 = vadd.f32 %v21806_v6, %v11116_v3  ;;  %v11262_v24 = vadd.f32 %v11118_v43, %v21808_v36  ;;  %v11119_v16 = vld [vmem:[%s20036_s5 + $0x468] sm:$0xff]  ;;  %v11120_v52 = vld [vmem:[%s20036_s5 + $0x470] sm:$0xff]  ;;  %11402 = vst [vmem:[%s20036_s5 + $0x440] sm:$0xff] %v11258_v51  ;;  %11403 = vst [vmem:[%s20036_s5 + $0x448] sm:$0xff] %v11259_v62 }
 0x761   : > { %v21809_v40 = vld [vmem:[#allocation114_spill] sm:$0xff]  ;;  %v21810_v23 = vld [vmem:[#allocation91_spill] sm:$0xff]  ;;  %v21811_v5 = vld [vmem:[#allocation92_spill] sm:$0xff]  ;;  %11405 = vst [vmem:[%s20036_s5 + $0x458] sm:$0xff] %v11261_v56 }
 0x762   : > { %v11263_v55 = vadd.f32 %v11119_v16, %v21809_v40  ;;  %v11264_v25 = vadd.f32 %v21810_v23, %v11120_v52  ;;  %v11265_v57 = vadd.f32 %v21811_v5, %v11121_v18  ;;  %11404 = vst [vmem:[%s20036_s5 + $0x450] sm:$0xff] %v11260_v12  ;;  %11406 = vst [vmem:[%s20036_s5 + $0x460] sm:$0xff] %v11262_v24 }
 0x764   : > { %11407 = vst [vmem:[%s20036_s5 + $0x468] sm:$0xff] %v11263_v55  ;;  %11408 = vst [vmem:[%s20036_s5 + $0x470] sm:$0xff] %v11264_v25 }
 0x765   : > { %11409 = vst [vmem:[%s20036_s5 + $0x478] sm:$0xff] %v11265_v57 }
 0x766 PF: > { %p13585_p6 = scmp.ne.s32.totalorder %s16808_s18, 5 }
 0x767   : > { %v11424_v29 = vld [vmem:[%s20036_s5 + $0x50] sm:$0xff] (!%p13585_p6)  ;;  %v11425_v33 = vld [vmem:[%s20036_s5 + $0x58] sm:$0xff] (!%p13585_p6)  ;;  %v11426_v31 = vld [vmem:[%s20036_s5 + $0x60] sm:$0xff] (!%p13585_p6) }
 0x768   : > { %11413 = sbr.rel (%p13585_p6) target bundleno = 1971 (0x7b3), region = 56  ;;  %v11414_v0 = vld [vmem:[%s20036_s5] sm:$0xff] (!%p13585_p6)  ;;  %v11415_v41 = vld [vmem:[%s20036_s5 + $0x8] sm:$0xff] (!%p13585_p6)  ;;  %v11568_v4 = vmax.f32 (!%p13585_p6), %v11424_v29, 0.0  ;;  %v11569_v9 = vmax.f32 (!%p13585_p6), %v11425_v33, 0.0  ;;  %v11428_v11 = vld [vmem:[%s20036_s5 + $0x70] sm:$0xff] (!%p13585_p6) }
 0x769   : > { %v11416_v34 = vld [vmem:[%s20036_s5 + $0x10] sm:$0xff] (!%p13585_p6)  ;;  %v11558_v8 = vmax.f32 (!%p13585_p6), %v11414_v0, 0.0  ;;  %v11559_v17 = vmax.f32 (!%p13585_p6), %v11415_v41, 0.0  ;;  %v11427_v45 = vld [vmem:[%s20036_s5 + $0x68] sm:$0xff] (!%p13585_p6)  ;;  %v11570_v15 = vmax.f32 (!%p13585_p6), %v11426_v31, 0.0  ;;  %v11572_v54 = vmax.f32 (!%p13585_p6), %v11428_v11, 0.0 }
 0x76a   : > { %v11560_v7 = vmax.f32 (!%p13585_p6), %v11416_v34, 0.0  ;;  %v11417_v35 = vld [vmem:[%s20036_s5 + $0x18] sm:$0xff] (!%p13585_p6)  ;;  %v11418_v44 = vld [vmem:[%s20036_s5 + $0x20] sm:$0xff] (!%p13585_p6)  ;;  %v11571_v50 = vmax.f32 (!%p13585_p6), %v11427_v45, 0.0  ;;  %v11431_v39 = vld [vmem:[%s20036_s5 + $0x88] sm:$0xff] (!%p13585_p6)  ;;  %11712 = vst [vmem:[%s20036_s5 + $0x50] sm:$0xff] (!%p13585_p6), %v11568_v4 }
 0x76b   : > { %v11419_v21 = vld [vmem:[%s20036_s5 + $0x28] sm:$0xff] (!%p13585_p6)  ;;  %v11561_v20 = vmax.f32 (!%p13585_p6), %v11417_v35, 0.0  ;;  %v11562_v32 = vmax.f32 (!%p13585_p6), %v11418_v44, 0.0  ;;  %v11422_v22 = vld [vmem:[%s20036_s5 + $0x40] sm:$0xff] (!%p13585_p6)  ;;  %11702 = vst [vmem:[%s20036_s5] sm:$0xff] (!%p13585_p6), %v11558_v8  ;;  %11703 = vst [vmem:[%s20036_s5 + $0x8] sm:$0xff] (!%p13585_p6), %v11559_v17  ;;  %v11575_v13 = vmax.f32 (!%p13585_p6), %v11431_v39, 0.0 }
 0x76c   : > { %v11563_v63 = vmax.f32 (!%p13585_p6), %v11419_v21, 0.0  ;;  %v11420_v60 = vld [vmem:[%s20036_s5 + $0x30] sm:$0xff] (!%p13585_p6)  ;;  %11704 = vst [vmem:[%s20036_s5 + $0x10] sm:$0xff] (!%p13585_p6), %v11560_v7  ;;  %v11566_v46 = vmax.f32 (!%p13585_p6), %v11422_v22, 0.0  ;;  %v11429_v2 = vld [vmem:[%s20036_s5 + $0x78] sm:$0xff] (!%p13585_p6)  ;;  %v11430_v14 = vld [vmem:[%s20036_s5 + $0x80] sm:$0xff] (!%p13585_p6) }
 0x76d   : > { %v11421_v48 = vld [vmem:[%s20036_s5 + $0x38] sm:$0xff] (!%p13585_p6)  ;;  %v11564_v47 = vmax.f32 (!%p13585_p6), %v11420_v60, 0.0  ;;  %v11423_v26 = vld [vmem:[%s20036_s5 + $0x48] sm:$0xff] (!%p13585_p6)  ;;  %11705 = vst [vmem:[%s20036_s5 + $0x18] sm:$0xff] (!%p13585_p6), %v11561_v20  ;;  %11706 = vst [vmem:[%s20036_s5 + $0x20] sm:$0xff] (!%p13585_p6), %v11562_v32  ;;  %v11573_v61 = vmax.f32 (!%p13585_p6), %v11429_v2, 0.0 }
 0x76e   : > { %v11565_v27 = vmax.f32 (!%p13585_p6), %v11421_v48, 0.0  ;;  %11707 = vst [vmem:[%s20036_s5 + $0x28] sm:$0xff] (!%p13585_p6), %v11563_v63  ;;  %v11567_v1 = vmax.f32 (!%p13585_p6), %v11423_v26, 0.0  ;;  %11710 = vst [vmem:[%s20036_s5 + $0x40] sm:$0xff] (!%p13585_p6), %v11566_v46  ;;  %v11574_v10 = vmax.f32 (!%p13585_p6), %v11430_v14, 0.0  ;;  %v11432_v37 = vld [vmem:[%s20036_s5 + $0x90] sm:$0xff] (!%p13585_p6) }
 0x76f   : > { %11708 = vst [vmem:[%s20036_s5 + $0x30] sm:$0xff] %v11564_v47  ;;  %11713 = vst [vmem:[%s20036_s5 + $0x58] sm:$0xff] %v11569_v9  ;;  %v11433_v28 = vld [vmem:[%s20036_s5 + $0x98] sm:$0xff]  ;;  %v11434_v30 = vld [vmem:[%s20036_s5 + $0xa0] sm:$0xff]  ;;  %v11576_v42 = vmax.f32 %v11432_v37, 0.0 }
 0x770   : > { %11709 = vst [vmem:[%s20036_s5 + $0x38] sm:$0xff] %v11565_v27  ;;  %11711 = vst [vmem:[%s20036_s5 + $0x48] sm:$0xff] %v11567_v1  ;;  %v11577_v59 = vmax.f32 %v11433_v28, 0.0  ;;  %v11578_v58 = vmax.f32 %v11434_v30, 0.0  ;;  %v11435_v19 = vld [vmem:[%s20036_s5 + $0xa8] sm:$0xff]  ;;  %v11436_v51 = vld [vmem:[%s20036_s5 + $0xb0] sm:$0xff] }
 0x771   : > { %11714 = vst [vmem:[%s20036_s5 + $0x60] sm:$0xff] %v11570_v15  ;;  %11715 = vst [vmem:[%s20036_s5 + $0x68] sm:$0xff] %v11571_v50  ;;  %v11437_v38 = vld [vmem:[%s20036_s5 + $0xb8] sm:$0xff]  ;;  %v11579_v62 = vmax.f32 %v11435_v19, 0.0  ;;  %v11580_v3 = vmax.f32 %v11436_v51, 0.0  ;;  %v11438_v43 = vld [vmem:[%s20036_s5 + $0xc0] sm:$0xff] }
 0x772   : > { %11716 = vst [vmem:[%s20036_s5 + $0x70] sm:$0xff] %v11572_v54  ;;  %11717 = vst [vmem:[%s20036_s5 + $0x78] sm:$0xff] %v11573_v61  ;;  %v11581_v53 = vmax.f32 %v11437_v38, 0.0  ;;  %v11439_v6 = vld [vmem:[%s20036_s5 + $0xc8] sm:$0xff]  ;;  %v11440_v12 = vld [vmem:[%s20036_s5 + $0xd0] sm:$0xff]  ;;  %v11582_v49 = vmax.f32 %v11438_v43, 0.0 }
 0x773   : > { %11718 = vst [vmem:[%s20036_s5 + $0x80] sm:$0xff] %v11574_v10  ;;  %11719 = vst [vmem:[%s20036_s5 + $0x88] sm:$0xff] %v11575_v13  ;;  %v11583_v56 = vmax.f32 %v11439_v6, 0.0  ;;  %v11584_v36 = vmax.f32 %v11440_v12, 0.0  ;;  %v11441_v24 = vld [vmem:[%s20036_s5 + $0xd8] sm:$0xff]  ;;  %v11442_v16 = vld [vmem:[%s20036_s5 + $0xe0] sm:$0xff] }
 0x774   : > { %11720 = vst [vmem:[%s20036_s5 + $0x90] sm:$0xff] %v11576_v42  ;;  %11721 = vst [vmem:[%s20036_s5 + $0x98] sm:$0xff] %v11577_v59  ;;  %v11443_v52 = vld [vmem:[%s20036_s5 + $0xe8] sm:$0xff]  ;;  %v11585_v18 = vmax.f32 %v11441_v24, 0.0  ;;  %v11586_v40 = vmax.f32 %v11442_v16, 0.0  ;;  %v11444_v23 = vld [vmem:[%s20036_s5 + $0xf0] sm:$0xff] }
 0x775   : > { %11722 = vst [vmem:[%s20036_s5 + $0xa0] sm:$0xff] %v11578_v58  ;;  %11723 = vst [vmem:[%s20036_s5 + $0xa8] sm:$0xff] %v11579_v62  ;;  %v11587_v55 = vmax.f32 %v11443_v52, 0.0  ;;  %v11445_v25 = vld [vmem:[%s20036_s5 + $0xf8] sm:$0xff]  ;;  %v11446_v5 = vld [vmem:[%s20036_s5 + $0x100] sm:$0xff]  ;;  %v11588_v57 = vmax.f32 %v11444_v23, 0.0 }
 0x776   : > { %11724 = vst [vmem:[%s20036_s5 + $0xb0] sm:$0xff] %v11580_v3  ;;  %11725 = vst [vmem:[%s20036_s5 + $0xb8] sm:$0xff] %v11581_v53  ;;  %v11589_v0 = vmax.f32 %v11445_v25, 0.0  ;;  %v11590_v41 = vmax.f32 %v11446_v5, 0.0  ;;  %v11447_v34 = vld [vmem:[%s20036_s5 + $0x108] sm:$0xff]  ;;  %v11448_v8 = vld [vmem:[%s20036_s5 + $0x110] sm:$0xff] }
 0x777   : > { %11726 = vst [vmem:[%s20036_s5 + $0xc0] sm:$0xff] %v11582_v49  ;;  %11727 = vst [vmem:[%s20036_s5 + $0xc8] sm:$0xff] %v11583_v56  ;;  %v11449_v17 = vld [vmem:[%s20036_s5 + $0x118] sm:$0xff]  ;;  %v11591_v7 = vmax.f32 %v11447_v34, 0.0  ;;  %v11592_v35 = vmax.f32 %v11448_v8, 0.0  ;;  %v11450_v21 = vld [vmem:[%s20036_s5 + $0x120] sm:$0xff] }
 0x778   : > { %11728 = vst [vmem:[%s20036_s5 + $0xd0] sm:$0xff] %v11584_v36  ;;  %11729 = vst [vmem:[%s20036_s5 + $0xd8] sm:$0xff] %v11585_v18  ;;  %v11593_v44 = vmax.f32 %v11449_v17, 0.0  ;;  %v11451_v20 = vld [vmem:[%s20036_s5 + $0x128] sm:$0xff]  ;;  %v11452_v32 = vld [vmem:[%s20036_s5 + $0x130] sm:$0xff]  ;;  %v11594_v63 = vmax.f32 %v11450_v21, 0.0 }
 0x779   : > { %11730 = vst [vmem:[%s20036_s5 + $0xe0] sm:$0xff] %v11586_v40  ;;  %11731 = vst [vmem:[%s20036_s5 + $0xe8] sm:$0xff] %v11587_v55  ;;  %v11595_v60 = vmax.f32 %v11451_v20, 0.0  ;;  %v11596_v48 = vmax.f32 %v11452_v32, 0.0  ;;  %v11453_v22 = vld [vmem:[%s20036_s5 + $0x138] sm:$0xff]  ;;  %v11454_v47 = vld [vmem:[%s20036_s5 + $0x140] sm:$0xff] }
 0x77a   : > { %11732 = vst [vmem:[%s20036_s5 + $0xf0] sm:$0xff] %v11588_v57  ;;  %11733 = vst [vmem:[%s20036_s5 + $0xf8] sm:$0xff] %v11589_v0  ;;  %v11455_v27 = vld [vmem:[%s20036_s5 + $0x148] sm:$0xff]  ;;  %v11597_v46 = vmax.f32 %v11453_v22, 0.0  ;;  %v11598_v26 = vmax.f32 %v11454_v47, 0.0  ;;  %v11456_v33 = vld [vmem:[%s20036_s5 + $0x150] sm:$0xff] }
 0x77b   : > { %11734 = vst [vmem:[%s20036_s5 + $0x100] sm:$0xff] %v11590_v41  ;;  %11735 = vst [vmem:[%s20036_s5 + $0x108] sm:$0xff] %v11591_v7  ;;  %v11599_v29 = vmax.f32 %v11455_v27, 0.0  ;;  %v11457_v1 = vld [vmem:[%s20036_s5 + $0x158] sm:$0xff]  ;;  %v11458_v4 = vld [vmem:[%s20036_s5 + $0x160] sm:$0xff]  ;;  %v11600_v9 = vmax.f32 %v11456_v33, 0.0 }
 0x77c   : > { %11736 = vst [vmem:[%s20036_s5 + $0x110] sm:$0xff] %v11592_v35  ;;  %11737 = vst [vmem:[%s20036_s5 + $0x118] sm:$0xff] %v11593_v44  ;;  %v11601_v31 = vmax.f32 %v11457_v1, 0.0  ;;  %v11602_v45 = vmax.f32 %v11458_v4, 0.0  ;;  %v11459_v11 = vld [vmem:[%s20036_s5 + $0x168] sm:$0xff]  ;;  %v11460_v15 = vld [vmem:[%s20036_s5 + $0x170] sm:$0xff] }
 0x77d   : > { %11738 = vst [vmem:[%s20036_s5 + $0x120] sm:$0xff] %v11594_v63  ;;  %11739 = vst [vmem:[%s20036_s5 + $0x128] sm:$0xff] %v11595_v60  ;;  %v11461_v50 = vld [vmem:[%s20036_s5 + $0x178] sm:$0xff]  ;;  %v11603_v54 = vmax.f32 %v11459_v11, 0.0  ;;  %v11604_v2 = vmax.f32 %v11460_v15, 0.0  ;;  %v11462_v39 = vld [vmem:[%s20036_s5 + $0x180] sm:$0xff] }
 0x77e   : > { %11740 = vst [vmem:[%s20036_s5 + $0x130] sm:$0xff] %v11596_v48  ;;  %11741 = vst [vmem:[%s20036_s5 + $0x138] sm:$0xff] %v11597_v46  ;;  %v11605_v14 = vmax.f32 %v11461_v50, 0.0  ;;  %v11463_v61 = vld [vmem:[%s20036_s5 + $0x188] sm:$0xff]  ;;  %v11464_v10 = vld [vmem:[%s20036_s5 + $0x190] sm:$0xff]  ;;  %v11606_v13 = vmax.f32 %v11462_v39, 0.0 }
 0x77f   : > { %11742 = vst [vmem:[%s20036_s5 + $0x140] sm:$0xff] %v11598_v26  ;;  %11743 = vst [vmem:[%s20036_s5 + $0x148] sm:$0xff] %v11599_v29  ;;  %v11607_v37 = vmax.f32 %v11463_v61, 0.0  ;;  %v11608_v28 = vmax.f32 %v11464_v10, 0.0  ;;  %v11465_v30 = vld [vmem:[%s20036_s5 + $0x198] sm:$0xff]  ;;  %v11466_v42 = vld [vmem:[%s20036_s5 + $0x1a0] sm:$0xff] }
 0x780   : > { %11744 = vst [vmem:[%s20036_s5 + $0x150] sm:$0xff] %v11600_v9  ;;  %11745 = vst [vmem:[%s20036_s5 + $0x158] sm:$0xff] %v11601_v31  ;;  %v11467_v59 = vld [vmem:[%s20036_s5 + $0x1a8] sm:$0xff]  ;;  %v11609_v58 = vmax.f32 %v11465_v30, 0.0  ;;  %v11610_v19 = vmax.f32 %v11466_v42, 0.0  ;;  %v11468_v38 = vld [vmem:[%s20036_s5 + $0x1b0] sm:$0xff] }
 0x781   : > { %11746 = vst [vmem:[%s20036_s5 + $0x160] sm:$0xff] %v11602_v45  ;;  %11747 = vst [vmem:[%s20036_s5 + $0x168] sm:$0xff] %v11603_v54  ;;  %v11611_v51 = vmax.f32 %v11467_v59, 0.0  ;;  %v11469_v62 = vld [vmem:[%s20036_s5 + $0x1b8] sm:$0xff]  ;;  %v11470_v3 = vld [vmem:[%s20036_s5 + $0x1c0] sm:$0xff]  ;;  %v11612_v53 = vmax.f32 %v11468_v38, 0.0 }
 0x782   : > { %11748 = vst [vmem:[%s20036_s5 + $0x170] sm:$0xff] %v11604_v2  ;;  %11749 = vst [vmem:[%s20036_s5 + $0x178] sm:$0xff] %v11605_v14  ;;  %v11613_v43 = vmax.f32 %v11469_v62, 0.0  ;;  %v11614_v6 = vmax.f32 %v11470_v3, 0.0  ;;  %v11471_v12 = vld [vmem:[%s20036_s5 + $0x1c8] sm:$0xff]  ;;  %v11472_v49 = vld [vmem:[%s20036_s5 + $0x1d0] sm:$0xff] }
 0x783   : > { %11750 = vst [vmem:[%s20036_s5 + $0x180] sm:$0xff] %v11606_v13  ;;  %11751 = vst [vmem:[%s20036_s5 + $0x188] sm:$0xff] %v11607_v37  ;;  %v11473_v56 = vld [vmem:[%s20036_s5 + $0x1d8] sm:$0xff]  ;;  %v11615_v36 = vmax.f32 %v11471_v12, 0.0  ;;  %v11616_v24 = vmax.f32 %v11472_v49, 0.0  ;;  %v11474_v52 = vld [vmem:[%s20036_s5 + $0x1e0] sm:$0xff] }
 0x784   : > { %11752 = vst [vmem:[%s20036_s5 + $0x190] sm:$0xff] %v11608_v28  ;;  %11753 = vst [vmem:[%s20036_s5 + $0x198] sm:$0xff] %v11609_v58  ;;  %v11617_v16 = vmax.f32 %v11473_v56, 0.0  ;;  %v11475_v18 = vld [vmem:[%s20036_s5 + $0x1e8] sm:$0xff]  ;;  %v11476_v40 = vld [vmem:[%s20036_s5 + $0x1f0] sm:$0xff]  ;;  %v11618_v55 = vmax.f32 %v11474_v52, 0.0 }
 0x785   : > { %11754 = vst [vmem:[%s20036_s5 + $0x1a0] sm:$0xff] %v11610_v19  ;;  %11755 = vst [vmem:[%s20036_s5 + $0x1a8] sm:$0xff] %v11611_v51  ;;  %v11619_v23 = vmax.f32 %v11475_v18, 0.0  ;;  %v11620_v25 = vmax.f32 %v11476_v40, 0.0  ;;  %v11477_v5 = vld [vmem:[%s20036_s5 + $0x1f8] sm:$0xff]  ;;  %v11478_v57 = vld [vmem:[%s20036_s5 + $0x200] sm:$0xff] }
 0x786   : > { %11756 = vst [vmem:[%s20036_s5 + $0x1b0] sm:$0xff] %v11612_v53  ;;  %11757 = vst [vmem:[%s20036_s5 + $0x1b8] sm:$0xff] %v11613_v43  ;;  %v11479_v0 = vld [vmem:[%s20036_s5 + $0x208] sm:$0xff]  ;;  %v11621_v41 = vmax.f32 %v11477_v5, 0.0  ;;  %v11622_v34 = vmax.f32 %v11478_v57, 0.0  ;;  %v11480_v17 = vld [vmem:[%s20036_s5 + $0x210] sm:$0xff] }
 0x787   : > { %11758 = vst [vmem:[%s20036_s5 + $0x1c0] sm:$0xff] %v11614_v6  ;;  %11759 = vst [vmem:[%s20036_s5 + $0x1c8] sm:$0xff] %v11615_v36  ;;  %v11623_v8 = vmax.f32 %v11479_v0, 0.0  ;;  %v11481_v7 = vld [vmem:[%s20036_s5 + $0x218] sm:$0xff]  ;;  %v11482_v35 = vld [vmem:[%s20036_s5 + $0x220] sm:$0xff]  ;;  %v11624_v44 = vmax.f32 %v11480_v17, 0.0 }
 0x788   : > { %11760 = vst [vmem:[%s20036_s5 + $0x1d0] sm:$0xff] %v11616_v24  ;;  %11761 = vst [vmem:[%s20036_s5 + $0x1d8] sm:$0xff] %v11617_v16  ;;  %v11625_v21 = vmax.f32 %v11481_v7, 0.0  ;;  %v11626_v20 = vmax.f32 %v11482_v35, 0.0  ;;  %v11483_v32 = vld [vmem:[%s20036_s5 + $0x228] sm:$0xff]  ;;  %v11484_v63 = vld [vmem:[%s20036_s5 + $0x230] sm:$0xff] }
 0x789   : > { %11762 = vst [vmem:[%s20036_s5 + $0x1e0] sm:$0xff] %v11618_v55  ;;  %11763 = vst [vmem:[%s20036_s5 + $0x1e8] sm:$0xff] %v11619_v23  ;;  %v11485_v60 = vld [vmem:[%s20036_s5 + $0x238] sm:$0xff]  ;;  %v11627_v48 = vmax.f32 %v11483_v32, 0.0  ;;  %v11628_v22 = vmax.f32 %v11484_v63, 0.0  ;;  %v11486_v27 = vld [vmem:[%s20036_s5 + $0x240] sm:$0xff] }
 0x78a   : > { %11764 = vst [vmem:[%s20036_s5 + $0x1f0] sm:$0xff] %v11620_v25  ;;  %11765 = vst [vmem:[%s20036_s5 + $0x1f8] sm:$0xff] %v11621_v41  ;;  %v11629_v47 = vmax.f32 %v11485_v60, 0.0  ;;  %v11487_v46 = vld [vmem:[%s20036_s5 + $0x248] sm:$0xff]  ;;  %v11488_v26 = vld [vmem:[%s20036_s5 + $0x250] sm:$0xff]  ;;  %v11630_v29 = vmax.f32 %v11486_v27, 0.0 }
 0x78b   : > { %11766 = vst [vmem:[%s20036_s5 + $0x200] sm:$0xff] %v11622_v34  ;;  %11767 = vst [vmem:[%s20036_s5 + $0x208] sm:$0xff] %v11623_v8  ;;  %v11631_v33 = vmax.f32 %v11487_v46, 0.0  ;;  %v11632_v1 = vmax.f32 %v11488_v26, 0.0  ;;  %v11489_v4 = vld [vmem:[%s20036_s5 + $0x258] sm:$0xff]  ;;  %v11490_v9 = vld [vmem:[%s20036_s5 + $0x260] sm:$0xff] }
 0x78c   : > { %11768 = vst [vmem:[%s20036_s5 + $0x210] sm:$0xff] %v11624_v44  ;;  %11769 = vst [vmem:[%s20036_s5 + $0x218] sm:$0xff] %v11625_v21  ;;  %v11491_v31 = vld [vmem:[%s20036_s5 + $0x268] sm:$0xff]  ;;  %v11633_v45 = vmax.f32 %v11489_v4, 0.0  ;;  %v11634_v11 = vmax.f32 %v11490_v9, 0.0  ;;  %v11492_v50 = vld [vmem:[%s20036_s5 + $0x270] sm:$0xff] }
 0x78d   : > { %11770 = vst [vmem:[%s20036_s5 + $0x220] sm:$0xff] %v11626_v20  ;;  %11771 = vst [vmem:[%s20036_s5 + $0x228] sm:$0xff] %v11627_v48  ;;  %v11635_v15 = vmax.f32 %v11491_v31, 0.0  ;;  %v11493_v54 = vld [vmem:[%s20036_s5 + $0x278] sm:$0xff]  ;;  %v11494_v2 = vld [vmem:[%s20036_s5 + $0x280] sm:$0xff]  ;;  %v11636_v14 = vmax.f32 %v11492_v50, 0.0 }
 0x78e   : > { %11772 = vst [vmem:[%s20036_s5 + $0x230] sm:$0xff] %v11628_v22  ;;  %11773 = vst [vmem:[%s20036_s5 + $0x238] sm:$0xff] %v11629_v47  ;;  %v11637_v39 = vmax.f32 %v11493_v54, 0.0  ;;  %v11638_v61 = vmax.f32 %v11494_v2, 0.0  ;;  %v11495_v10 = vld [vmem:[%s20036_s5 + $0x288] sm:$0xff]  ;;  %v11496_v13 = vld [vmem:[%s20036_s5 + $0x290] sm:$0xff] }
 0x78f   : > { %11774 = vst [vmem:[%s20036_s5 + $0x240] sm:$0xff] %v11630_v29  ;;  %11775 = vst [vmem:[%s20036_s5 + $0x248] sm:$0xff] %v11631_v33  ;;  %v11497_v37 = vld [vmem:[%s20036_s5 + $0x298] sm:$0xff]  ;;  %v11639_v28 = vmax.f32 %v11495_v10, 0.0  ;;  %v11640_v30 = vmax.f32 %v11496_v13, 0.0  ;;  %v11498_v59 = vld [vmem:[%s20036_s5 + $0x2a0] sm:$0xff] }
 0x790   : > { %11776 = vst [vmem:[%s20036_s5 + $0x250] sm:$0xff] %v11632_v1  ;;  %11777 = vst [vmem:[%s20036_s5 + $0x258] sm:$0xff] %v11633_v45  ;;  %v11641_v42 = vmax.f32 %v11497_v37, 0.0  ;;  %v11499_v58 = vld [vmem:[%s20036_s5 + $0x2a8] sm:$0xff]  ;;  %v11500_v19 = vld [vmem:[%s20036_s5 + $0x2b0] sm:$0xff]  ;;  %v11642_v51 = vmax.f32 %v11498_v59, 0.0 }
 0x791   : > { %11778 = vst [vmem:[%s20036_s5 + $0x260] sm:$0xff] %v11634_v11  ;;  %11779 = vst [vmem:[%s20036_s5 + $0x268] sm:$0xff] %v11635_v15  ;;  %v11643_v38 = vmax.f32 %v11499_v58, 0.0  ;;  %v11644_v62 = vmax.f32 %v11500_v19, 0.0  ;;  %v11501_v3 = vld [vmem:[%s20036_s5 + $0x2b8] sm:$0xff]  ;;  %v11502_v53 = vld [vmem:[%s20036_s5 + $0x2c0] sm:$0xff] }
 0x792   : > { %11780 = vst [vmem:[%s20036_s5 + $0x270] sm:$0xff] %v11636_v14  ;;  %11781 = vst [vmem:[%s20036_s5 + $0x278] sm:$0xff] %v11637_v39  ;;  %v11503_v43 = vld [vmem:[%s20036_s5 + $0x2c8] sm:$0xff]  ;;  %v11645_v6 = vmax.f32 %v11501_v3, 0.0  ;;  %v11646_v12 = vmax.f32 %v11502_v53, 0.0  ;;  %v11504_v56 = vld [vmem:[%s20036_s5 + $0x2d0] sm:$0xff] }
 0x793   : > { %11782 = vst [vmem:[%s20036_s5 + $0x280] sm:$0xff] %v11638_v61  ;;  %11783 = vst [vmem:[%s20036_s5 + $0x288] sm:$0xff] %v11639_v28  ;;  %v11647_v49 = vmax.f32 %v11503_v43, 0.0  ;;  %v11505_v36 = vld [vmem:[%s20036_s5 + $0x2d8] sm:$0xff]  ;;  %v11506_v24 = vld [vmem:[%s20036_s5 + $0x2e0] sm:$0xff]  ;;  %v11648_v16 = vmax.f32 %v11504_v56, 0.0 }
 0x794   : > { %11784 = vst [vmem:[%s20036_s5 + $0x290] sm:$0xff] %v11640_v30  ;;  %11785 = vst [vmem:[%s20036_s5 + $0x298] sm:$0xff] %v11641_v42  ;;  %v11649_v52 = vmax.f32 %v11505_v36, 0.0  ;;  %v11650_v18 = vmax.f32 %v11506_v24, 0.0  ;;  %v11507_v40 = vld [vmem:[%s20036_s5 + $0x2e8] sm:$0xff]  ;;  %v11508_v55 = vld [vmem:[%s20036_s5 + $0x2f0] sm:$0xff] }
 0x795   : > { %11786 = vst [vmem:[%s20036_s5 + $0x2a0] sm:$0xff] %v11642_v51  ;;  %11787 = vst [vmem:[%s20036_s5 + $0x2a8] sm:$0xff] %v11643_v38  ;;  %v11509_v23 = vld [vmem:[%s20036_s5 + $0x2f8] sm:$0xff]  ;;  %v11651_v25 = vmax.f32 %v11507_v40, 0.0  ;;  %v11652_v5 = vmax.f32 %v11508_v55, 0.0  ;;  %v11510_v0 = vld [vmem:[%s20036_s5 + $0x300] sm:$0xff] }
 0x796   : > { %11788 = vst [vmem:[%s20036_s5 + $0x2b0] sm:$0xff] %v11644_v62  ;;  %11789 = vst [vmem:[%s20036_s5 + $0x2b8] sm:$0xff] %v11645_v6  ;;  %v11653_v57 = vmax.f32 %v11509_v23, 0.0  ;;  %v11511_v41 = vld [vmem:[%s20036_s5 + $0x308] sm:$0xff]  ;;  %v11512_v34 = vld [vmem:[%s20036_s5 + $0x310] sm:$0xff]  ;;  %v11654_v8 = vmax.f32 %v11510_v0, 0.0 }
 0x797   : > { %11790 = vst [vmem:[%s20036_s5 + $0x2c0] sm:$0xff] %v11646_v12  ;;  %11791 = vst [vmem:[%s20036_s5 + $0x2c8] sm:$0xff] %v11647_v49  ;;  %v11655_v17 = vmax.f32 %v11511_v41, 0.0  ;;  %v11656_v7 = vmax.f32 %v11512_v34, 0.0  ;;  %v11513_v35 = vld [vmem:[%s20036_s5 + $0x318] sm:$0xff]  ;;  %v11514_v44 = vld [vmem:[%s20036_s5 + $0x320] sm:$0xff] }
 0x798   : > { %11792 = vst [vmem:[%s20036_s5 + $0x2d0] sm:$0xff] %v11648_v16  ;;  %11793 = vst [vmem:[%s20036_s5 + $0x2d8] sm:$0xff] %v11649_v52  ;;  %v11515_v21 = vld [vmem:[%s20036_s5 + $0x328] sm:$0xff]  ;;  %v11657_v20 = vmax.f32 %v11513_v35, 0.0  ;;  %v11658_v32 = vmax.f32 %v11514_v44, 0.0  ;;  %v11516_v60 = vld [vmem:[%s20036_s5 + $0x330] sm:$0xff] }
 0x799   : > { %11794 = vst [vmem:[%s20036_s5 + $0x2e0] sm:$0xff] %v11650_v18  ;;  %11795 = vst [vmem:[%s20036_s5 + $0x2e8] sm:$0xff] %v11651_v25  ;;  %v11659_v63 = vmax.f32 %v11515_v21, 0.0  ;;  %v11517_v48 = vld [vmem:[%s20036_s5 + $0x338] sm:$0xff]  ;;  %v11518_v22 = vld [vmem:[%s20036_s5 + $0x340] sm:$0xff]  ;;  %v11660_v47 = vmax.f32 %v11516_v60, 0.0 }
 0x79a   : > { %11796 = vst [vmem:[%s20036_s5 + $0x2f0] sm:$0xff] %v11652_v5  ;;  %11797 = vst [vmem:[%s20036_s5 + $0x2f8] sm:$0xff] %v11653_v57  ;;  %v11661_v27 = vmax.f32 %v11517_v48, 0.0  ;;  %v11662_v46 = vmax.f32 %v11518_v22, 0.0  ;;  %v11519_v26 = vld [vmem:[%s20036_s5 + $0x348] sm:$0xff]  ;;  %v11520_v29 = vld [vmem:[%s20036_s5 + $0x350] sm:$0xff] }
 0x79b   : > { %11798 = vst [vmem:[%s20036_s5 + $0x300] sm:$0xff] %v11654_v8  ;;  %11799 = vst [vmem:[%s20036_s5 + $0x308] sm:$0xff] %v11655_v17  ;;  %v11521_v33 = vld [vmem:[%s20036_s5 + $0x358] sm:$0xff]  ;;  %v11663_v1 = vmax.f32 %v11519_v26, 0.0  ;;  %v11664_v4 = vmax.f32 %v11520_v29, 0.0  ;;  %v11522_v31 = vld [vmem:[%s20036_s5 + $0x360] sm:$0xff] }
 0x79c   : > { %11800 = vst [vmem:[%s20036_s5 + $0x310] sm:$0xff] %v11656_v7  ;;  %11801 = vst [vmem:[%s20036_s5 + $0x318] sm:$0xff] %v11657_v20  ;;  %v11665_v9 = vmax.f32 %v11521_v33, 0.0  ;;  %v11523_v45 = vld [vmem:[%s20036_s5 + $0x368] sm:$0xff]  ;;  %v11524_v11 = vld [vmem:[%s20036_s5 + $0x370] sm:$0xff]  ;;  %v11666_v15 = vmax.f32 %v11522_v31, 0.0 }
 0x79d   : > { %11802 = vst [vmem:[%s20036_s5 + $0x320] sm:$0xff] %v11658_v32  ;;  %11803 = vst [vmem:[%s20036_s5 + $0x328] sm:$0xff] %v11659_v63  ;;  %v11667_v50 = vmax.f32 %v11523_v45, 0.0  ;;  %v11668_v54 = vmax.f32 %v11524_v11, 0.0  ;;  %v11525_v2 = vld [vmem:[%s20036_s5 + $0x378] sm:$0xff]  ;;  %v11526_v14 = vld [vmem:[%s20036_s5 + $0x380] sm:$0xff] }
 0x79e   : > { %11804 = vst [vmem:[%s20036_s5 + $0x330] sm:$0xff] %v11660_v47  ;;  %11805 = vst [vmem:[%s20036_s5 + $0x338] sm:$0xff] %v11661_v27  ;;  %v11527_v39 = vld [vmem:[%s20036_s5 + $0x388] sm:$0xff]  ;;  %v11669_v61 = vmax.f32 %v11525_v2, 0.0  ;;  %v11670_v10 = vmax.f32 %v11526_v14, 0.0  ;;  %v11528_v37 = vld [vmem:[%s20036_s5 + $0x390] sm:$0xff] }
 0x79f   : > { %11806 = vst [vmem:[%s20036_s5 + $0x340] sm:$0xff] %v11662_v46  ;;  %11807 = vst [vmem:[%s20036_s5 + $0x348] sm:$0xff] %v11663_v1  ;;  %v11671_v13 = vmax.f32 %v11527_v39, 0.0  ;;  %v11529_v28 = vld [vmem:[%s20036_s5 + $0x398] sm:$0xff]  ;;  %v11530_v30 = vld [vmem:[%s20036_s5 + $0x3a0] sm:$0xff]  ;;  %v11672_v42 = vmax.f32 %v11528_v37, 0.0 }
 0x7a0   : > { %11808 = vst [vmem:[%s20036_s5 + $0x350] sm:$0xff] %v11664_v4  ;;  %11809 = vst [vmem:[%s20036_s5 + $0x358] sm:$0xff] %v11665_v9  ;;  %v11673_v59 = vmax.f32 %v11529_v28, 0.0  ;;  %v11674_v58 = vmax.f32 %v11530_v30, 0.0  ;;  %v11531_v19 = vld [vmem:[%s20036_s5 + $0x3a8] sm:$0xff]  ;;  %v11532_v51 = vld [vmem:[%s20036_s5 + $0x3b0] sm:$0xff] }
 0x7a1   : > { %11810 = vst [vmem:[%s20036_s5 + $0x360] sm:$0xff] %v11666_v15  ;;  %11811 = vst [vmem:[%s20036_s5 + $0x368] sm:$0xff] %v11667_v50  ;;  %v11533_v38 = vld [vmem:[%s20036_s5 + $0x3b8] sm:$0xff]  ;;  %v11675_v62 = vmax.f32 %v11531_v19, 0.0  ;;  %v11676_v3 = vmax.f32 %v11532_v51, 0.0  ;;  %v11534_v43 = vld [vmem:[%s20036_s5 + $0x3c0] sm:$0xff] }
 0x7a2   : > { %11812 = vst [vmem:[%s20036_s5 + $0x370] sm:$0xff] %v11668_v54  ;;  %11813 = vst [vmem:[%s20036_s5 + $0x378] sm:$0xff] %v11669_v61  ;;  %v11677_v53 = vmax.f32 %v11533_v38, 0.0  ;;  %v11535_v6 = vld [vmem:[%s20036_s5 + $0x3c8] sm:$0xff]  ;;  %v11536_v12 = vld [vmem:[%s20036_s5 + $0x3d0] sm:$0xff]  ;;  %v11678_v49 = vmax.f32 %v11534_v43, 0.0 }
 0x7a3   : > { %11814 = vst [vmem:[%s20036_s5 + $0x380] sm:$0xff] %v11670_v10  ;;  %11815 = vst [vmem:[%s20036_s5 + $0x388] sm:$0xff] %v11671_v13  ;;  %v11679_v56 = vmax.f32 %v11535_v6, 0.0  ;;  %v11680_v36 = vmax.f32 %v11536_v12, 0.0  ;;  %v11537_v24 = vld [vmem:[%s20036_s5 + $0x3d8] sm:$0xff]  ;;  %v11538_v16 = vld [vmem:[%s20036_s5 + $0x3e0] sm:$0xff] }
 0x7a4   : > { %11816 = vst [vmem:[%s20036_s5 + $0x390] sm:$0xff] %v11672_v42  ;;  %11817 = vst [vmem:[%s20036_s5 + $0x398] sm:$0xff] %v11673_v59  ;;  %v11539_v52 = vld [vmem:[%s20036_s5 + $0x3e8] sm:$0xff]  ;;  %v11681_v18 = vmax.f32 %v11537_v24, 0.0  ;;  %v11682_v40 = vmax.f32 %v11538_v16, 0.0  ;;  %v11540_v23 = vld [vmem:[%s20036_s5 + $0x3f0] sm:$0xff] }
 0x7a5   : > { %11818 = vst [vmem:[%s20036_s5 + $0x3a0] sm:$0xff] %v11674_v58  ;;  %11819 = vst [vmem:[%s20036_s5 + $0x3a8] sm:$0xff] %v11675_v62  ;;  %v11683_v55 = vmax.f32 %v11539_v52, 0.0  ;;  %v11541_v25 = vld [vmem:[%s20036_s5 + $0x3f8] sm:$0xff]  ;;  %v11542_v5 = vld [vmem:[%s20036_s5 + $0x400] sm:$0xff]  ;;  %v11684_v57 = vmax.f32 %v11540_v23, 0.0 }
 0x7a6   : > { %11820 = vst [vmem:[%s20036_s5 + $0x3b0] sm:$0xff] %v11676_v3  ;;  %11821 = vst [vmem:[%s20036_s5 + $0x3b8] sm:$0xff] %v11677_v53  ;;  %v11685_v0 = vmax.f32 %v11541_v25, 0.0  ;;  %v11686_v41 = vmax.f32 %v11542_v5, 0.0  ;;  %v11543_v34 = vld [vmem:[%s20036_s5 + $0x408] sm:$0xff]  ;;  %v11544_v8 = vld [vmem:[%s20036_s5 + $0x410] sm:$0xff] }
 0x7a7   : > { %11822 = vst [vmem:[%s20036_s5 + $0x3c0] sm:$0xff] %v11678_v49  ;;  %11823 = vst [vmem:[%s20036_s5 + $0x3c8] sm:$0xff] %v11679_v56  ;;  %v11545_v17 = vld [vmem:[%s20036_s5 + $0x418] sm:$0xff]  ;;  %v11687_v7 = vmax.f32 %v11543_v34, 0.0  ;;  %v11688_v35 = vmax.f32 %v11544_v8, 0.0  ;;  %v11546_v21 = vld [vmem:[%s20036_s5 + $0x420] sm:$0xff] }
 0x7a8   : > { %11824 = vst [vmem:[%s20036_s5 + $0x3d0] sm:$0xff] %v11680_v36  ;;  %11825 = vst [vmem:[%s20036_s5 + $0x3d8] sm:$0xff] %v11681_v18  ;;  %v11689_v44 = vmax.f32 %v11545_v17, 0.0  ;;  %v11547_v20 = vld [vmem:[%s20036_s5 + $0x428] sm:$0xff]  ;;  %v11548_v32 = vld [vmem:[%s20036_s5 + $0x430] sm:$0xff]  ;;  %v11690_v63 = vmax.f32 %v11546_v21, 0.0 }
 0x7a9   : > { %11826 = vst [vmem:[%s20036_s5 + $0x3e0] sm:$0xff] %v11682_v40  ;;  %11827 = vst [vmem:[%s20036_s5 + $0x3e8] sm:$0xff] %v11683_v55  ;;  %v11691_v60 = vmax.f32 %v11547_v20, 0.0  ;;  %v11692_v48 = vmax.f32 %v11548_v32, 0.0  ;;  %v11549_v22 = vld [vmem:[%s20036_s5 + $0x438] sm:$0xff]  ;;  %v11550_v47 = vld [vmem:[%s20036_s5 + $0x440] sm:$0xff] }
 0x7aa   : > { %11828 = vst [vmem:[%s20036_s5 + $0x3f0] sm:$0xff] %v11684_v57  ;;  %11829 = vst [vmem:[%s20036_s5 + $0x3f8] sm:$0xff] %v11685_v0  ;;  %v11551_v27 = vld [vmem:[%s20036_s5 + $0x448] sm:$0xff]  ;;  %v11693_v46 = vmax.f32 %v11549_v22, 0.0  ;;  %v11694_v26 = vmax.f32 %v11550_v47, 0.0  ;;  %v11552_v33 = vld [vmem:[%s20036_s5 + $0x450] sm:$0xff] }
 0x7ab   : > { %11830 = vst [vmem:[%s20036_s5 + $0x400] sm:$0xff] %v11686_v41  ;;  %11831 = vst [vmem:[%s20036_s5 + $0x408] sm:$0xff] %v11687_v7  ;;  %v11695_v29 = vmax.f32 %v11551_v27, 0.0  ;;  %v11553_v1 = vld [vmem:[%s20036_s5 + $0x458] sm:$0xff]  ;;  %v11554_v4 = vld [vmem:[%s20036_s5 + $0x460] sm:$0xff]  ;;  %v11696_v9 = vmax.f32 %v11552_v33, 0.0 }
 0x7ac   : > { %11832 = vst [vmem:[%s20036_s5 + $0x410] sm:$0xff] %v11688_v35  ;;  %11833 = vst [vmem:[%s20036_s5 + $0x418] sm:$0xff] %v11689_v44  ;;  %v11697_v31 = vmax.f32 %v11553_v1, 0.0  ;;  %v11698_v45 = vmax.f32 %v11554_v4, 0.0  ;;  %v11555_v11 = vld [vmem:[%s20036_s5 + $0x468] sm:$0xff]  ;;  %v11556_v15 = vld [vmem:[%s20036_s5 + $0x470] sm:$0xff] }
 0x7ad   : > { %11834 = vst [vmem:[%s20036_s5 + $0x420] sm:$0xff] %v11690_v63  ;;  %11835 = vst [vmem:[%s20036_s5 + $0x428] sm:$0xff] %v11691_v60  ;;  %v11557_v50 = vld [vmem:[%s20036_s5 + $0x478] sm:$0xff]  ;;  %v11699_v54 = vmax.f32 %v11555_v11, 0.0  ;;  %v11700_v2 = vmax.f32 %v11556_v15, 0.0 }
 0x7ae   : > { %11836 = vst [vmem:[%s20036_s5 + $0x430] sm:$0xff] %v11692_v48  ;;  %11837 = vst [vmem:[%s20036_s5 + $0x438] sm:$0xff] %v11693_v46  ;;  %v11701_v14 = vmax.f32 %v11557_v50, 0.0 }
 0x7af   : > { %11838 = vst [vmem:[%s20036_s5 + $0x440] sm:$0xff] %v11694_v26  ;;  %11839 = vst [vmem:[%s20036_s5 + $0x448] sm:$0xff] %v11695_v29 }
 0x7b0   : > { %11840 = vst [vmem:[%s20036_s5 + $0x450] sm:$0xff] %v11696_v9  ;;  %11841 = vst [vmem:[%s20036_s5 + $0x458] sm:$0xff] %v11697_v31 }
 0x7b1   : > { %11842 = vst [vmem:[%s20036_s5 + $0x460] sm:$0xff] %v11698_v45  ;;  %11843 = vst [vmem:[%s20036_s5 + $0x468] sm:$0xff] %v11699_v54 }
 0x7b2   : > { %11844 = vst [vmem:[%s20036_s5 + $0x470] sm:$0xff] %v11700_v2  ;;  %11845 = vst [vmem:[%s20036_s5 + $0x478] sm:$0xff] %v11701_v14 }
 0x7b3 PF: > { %s13590_s18 = smul.u32 768, %s16812_s19  ;;  %s11860_s28 = sshll.u32 %s20036_s5, 4  ;;  %s21213_s28 = int_to_ptr.vmem [resolvable:$true] %s11860_s28 }
 0x7b4   : > { %s21812_s3 = sld [smem:[#allocation127_spill]]  ;;  %s11847_s25 = scalar_lea.sflag [#allocation4], %s17087_s27 }
 0x7b5   : > { %s16694_s9 = scalar_lea.vmem %s21213_s28, 18432  ;;  %p21813_p9 = scmp.ne.s32.totalorder %s21315_s11, 0 }
 0x7b6   : > { %p16695_p8 = scmp.ne.s32.totalorder %s21213_s28, %s16694_s9  ;;  %s16836_s8 = smov [#allocation8]  }
 0x7b7   : > { %s16698_s6 = sshll.u32 %s16836_s8, 4  ;;  %s16699_s6 = int_to_ptr.vmem [resolvable:$false] %s16698_s6 }
 0x7b8   : > { %p16696_p3 = pnand %p16695_p8, %p21813_p9  ;;  %s16700_s19 = scalar_lea.vmem %s16699_s6, 36864 }
 0x7b9   : > { %p16701_p13 = scmp.lt.s32.totalorder %s21213_s28, %s16699_s6  ;;  %p16702_p10 = scmp.lt.s32.totalorder %s16700_s19, %s16694_s9 }
 0x7ba   : > { %s21211_s20 = scalar_lea.hbm %s21812_s3, %s13590_s18  ;;  %p16697_p7 = pneg %p16696_p3 }
 0x7bb   : > { %p16703_p5 = por %p16702_p10, %p16701_p13 }
 0x7bd   : > { %p16704_p11 = pnand %p16703_p5, %p16697_p7 }
 0x7bf   : > { %16707 = shalt.err (!%p16704_p11)
}
 0x7c0   : > { %s16708_s26 = scalar_lea.hbm %s21211_s20, 18432  ;;  %s16712_s0 = scalar_lea.hbm %s21812_s3, 36864 }
 0x7c1   : > { %p16709_p0 = scmp.ne.s32.totalorder %s21211_s20, %s16708_s26  ;;  %p16713_p4 = scmp.lt.u32.totalorder %s21211_s20, %s21812_s3 }
 0x7c2   : > { %p16714_p2 = scmp.lt.u32.totalorder %s16712_s0, %s16708_s26  ;;  %p16716_p8 = scmp.lt.u32.totalorder %s16708_s26, %s21211_s20 }
 0x7c3   : > { %p16710_p12 = pnand %p16709_p0, %p21813_p9 }
 0x7c4   : > { %p16715_p6 = por %p16714_p2, %p16713_p4 }
 0x7c5   : > { %p16711_p1 = pneg %p16710_p12 }
 0x7c6   : > { %p16717_p3 = por %p16716_p8, %p16715_p6 }
 0x7c8   : > { %p16718_p7 = pnand %p16717_p3, %p16711_p1 }
 0x7ca   : > { %16721 = shalt.err (!%p16718_p7)
}
 0x7cb   : > { %s16837_s4 = smov 768   ;;  %s16838_s10 = smov 1536  }
 0x7cc   : > { %s16839_s15 = smov 48  }
 0x7cd   : > { %14797 = dma.vmem_to_hbm [thread:$0]  (%p21813_p9), %s21213_s28, 18432, %s21211_s20, %s11847_s25, %s16837_s4, %s16838_s10, %s16839_s15  }
 0x7ce PF: > { %s21814_s22 = sld [smem:[#allocation18_spill]]  ;;  %s21815_s5 = sld [smem:[#allocation16_spill]] }
 0x7cf   : > { %s21816_s18 = sld [smem:[#allocation23_spill]] }
 0x7d4   : > { %p14810_p13 = scmp.ge.s32.totalorder %s21814_s22, 2  ;;  %s11875_s24 = sand.u32 1, %s21815_s5  }
 0x7d5   : > { %p21817_p10 = scmp.ne.s32.totalorder %s21816_s18, 0  ;;  %s11876_s30 = scalar_lea.sflag [#allocation4], %s11875_s24 }
 0x7d7   : > { %p14804_p5 = pnand %p14810_p13, %p21817_p10 }
 0x7d9   : > { %16779 = dma.done.wait (!%p14804_p5), %s11876_s30, 18432  }
 0x7da   : > { %16781 = vsyncadd (!%p14804_p5), %s11876_s30, 4294948864  ;;  %s20_s22 = sadd.s32 1, %s21814_s22   ;;  %s21818_s9 = sld [smem:[#allocation21_spill]] }
 0x7db   : > { %p17_p11 = scmp.ge.s32.totalorder %s20_s22, 14   ;;  %s21819_s11 = sld [smem:[#allocation22_spill]] }
 0x7dc   : > { %s21820_s18 = sld [smem:[#allocation17_spill]]  ;;  %s21821_s20 = sld [smem:[#allocation19_spill]] }
 0x7dd   : > { %s21822_s27 = sld [smem:[#allocation20_spill]]  ;;  %s21823_s12 = smov %s16788_s13 }
 0x7de   : > { %s21824_s13 = smov %s16792_s14  ;;  %s21826_s15 = smov %s16800_s16 }
 0x7df   : > { %s21827_s16 = smov %s16804_s17  ;;  %s21829_s19 = smov %s16820_s21 }
 0x7e0   : > { %s21825_s14 = smov %s21818_s9  ;;  %19 = sbr.rel (!%p17_p11) target bundleno = 13 (0xd), region = 113 }
 0x7e1   : > { %s21828_s17 = smov %s21819_s11 }
 0x7e3   : > { %s21830_s21 = smov %s21822_s27 }
 0x7e7   :  { %11881 = vsyncpa [#allocation3], 1 }
 0x7e8   :  { %11883 = vsyncpa [#allocation3 + $0x1], 1 }
 0x7e9   :  { %11884 = vsyncpa [#allocation6], 1 }
 0x7ea   :  { %11886 = vsyncpa [#allocation6 + $0x1], 1 }
 0x7eb   :  { %11887 = vsyncpa [#allocation4], 1 }
 0x7ec   :  { %11889 = vsyncpa [#allocation4 + $0x1], 1 }

</bundles_post_ra>
